<compile_context>
chip_gen: v6e
topology: v6e:2x2x1
jax: 0.10.0
libtpu: 0.0.40
codegen_flags: <defaults>
</compile_context>

<pallas_src>
import numpy as np
import jax
import jax.numpy as jnp
from jax.experimental import pallas as pl
from jax.experimental.pallas import tpu as pltpu


# --------------------------------------------------------------------------------------
# Pallas kernel: whole forward in one invocation — four small 2D MXU matmuls + VPU ops.
# --------------------------------------------------------------------------------------
def lrssm_kernel(u_ref, e_ref, f_ref, tcols_ref, w1f_ref, b1_ref, w2t_ref, b2_ref, o_ref):
    """
    Shapes (B=batch, H=d_model, L=seq length, K=H*L, R=B*L):
      u_ref:     (B, K)  f32   input, flattened h-major/l-minor: u[b, h*L+s] = u[b,h,s]
      e_ref:     (R, B)  f32   0/1 batch-row replicator:  E[b*L+l, b'] = (b == b')
      f_ref:     (R, L)  f32   0/1 time-row replicator:   F[b*L+l, l'] = (l == l')
      tcols_ref: (L, K)  f32   Tcols[l, h*L+s] = K[h, l-s]*(l>=s) + D[h]*(l==s)
      w1f_ref:   (K, H)  f32   W1 expanded over s:        W1f[h*L+s, o] = W1[o, h]
      b1_ref:    (1, H)  f32
      w2t_ref:   (H, H)  f32   W2^T
      b2_ref:    (1, H)  f32
      o_ref:     (R, H)  f32   output rows (b,l), cols o: out[b*L+l, o] = y[b, o, l]
    """
    # Row replication via tiny MXU matmuls (avoids any in-kernel reshape / relayout).
    u_rep = jnp.dot(e_ref[...], u_ref[...], preferred_element_type=jnp.float32)      # (R, K)
    t_rep = jnp.dot(f_ref[...], tcols_ref[...], preferred_element_type=jnp.float32)  # (R, K)

    # Rank-1-expanded causal-conv operand: lhs[(b,l), (h,s)] = u[b,h,s] * T[h,l,s].
    lhs = u_rep * t_rep                                                               # VPU, f32

    # Fused (causal Toeplitz conv + D skip) contraction + first 1x1-conv channel mix.
    z = jnp.dot(lhs, w1f_ref[...], preferred_element_type=jnp.float32)               # (R, H)
    z = jnp.maximum(z + b1_ref[...], 0.0)                       # Conv1d(k=1) bias + ReLU

    # Second 1x1-conv channel mix + ReLU.
    z = jnp.dot(z, w2t_ref[...], preferred_element_type=jnp.float32)                 # (R, H)
    z = jnp.maximum(z + b2_ref[...], 0.0)

    o_ref[...] = z
    # dropout=0.0 -> nn.Identity(), nothing to do


def lrssm_forward(u, params):
    """Pallas-backed forward.  u: (B, H, L) float32.  Returns (y, None) like the module."""
    tcols, w1f, b1, w2t, b2 = params
    B, H, L = u.shape
    K = H * L
    R = B * L
    assert tcols.shape == (L, K) and w1f.shape == (K, H) and w2t.shape == (H, H)
    # TODO(synk): for production batch sizes (B*L rows >> VMEM budget), add a batch grid
    # with single-buffered (constant-index) weight BlockSpecs; at B=16 one step is optimal.

    u_flat = u.reshape(B, K).astype(jnp.float32)                                # host glue
    e_mat = jnp.asarray(np.repeat(np.eye(B, dtype=np.float32), L, axis=0))      # (R, B)
    f_mat = jnp.asarray(np.tile(np.eye(L, dtype=np.float32), (B, 1)))           # (R, L)

    flops = 2 * (R * B * K + R * L * K + R * K * H + R * H * H) + R * K + 4 * R * H
    nbytes = 4 * (B * K + R * B + R * L + L * K + K * H + H * H + 2 * H + R * H)

    vmem_spec = pl.BlockSpec(memory_space=pltpu.MemorySpace.VMEM)
    out_flat = pl.pallas_call(
        lrssm_kernel,
        out_shape=jax.ShapeDtypeStruct((R, H), jnp.float32),
        in_specs=[vmem_spec] * 8,
        out_specs=vmem_spec,
        compiler_params=pltpu.CompilerParams(vmem_limit_bytes=32 * 1024 * 1024),
        cost_estimate=pl.CostEstimate(flops=int(flops), transcendentals=0,
                                      bytes_accessed=int(nbytes)),
    )(u_flat, e_mat, f_mat, tcols, w1f, b1, w2t, b2)

    # rows are (b, l), cols are output channel o  ->  (B, H, L)
    y = jnp.transpose(out_flat.reshape(B, L, H), (0, 2, 1)).astype(u.dtype)
    return y, None


# --------------------------------------------------------------------------------------
# Host-side, one-time parameter preparation (glue) — mirrors the module's __init__.
# --------------------------------------------------------------------------------------
def init_params(d_model, d_state, L, mlp_layers=2, seed=0):
    """Deterministic synthetic parameters (frozen reservoir SSM kernel + MLP weights)."""
    rng = np.random.default_rng(seed)
    H, N = d_model, d_state

    # Frozen diagonal complex SSM (S4D-Lin style), continuous-time -> ZOH (discrete=False).
    A = -0.5 + 1j * np.pi * np.repeat(np.arange(N)[None, :], H, axis=0)         # (H, N)
    Bm = np.ones((H, N), dtype=np.complex128)
    C = (rng.standard_normal((H, N)) + 1j * rng.standard_normal((H, N))) / np.sqrt(2 * N)
    dt = np.exp(rng.uniform(np.log(1e-3), np.log(1e-1), size=(H, 1)))
    dA = np.exp(dt * A)
    dB = (dA - 1.0) / A * Bm
    # 'Vr' Vandermonde kernel: K[h, l] = 2 * Re( sum_n C[h,n] dB[h,n] dA[h,n]^l )
    vand = dA[:, :, None] ** np.arange(L)[None, None, :]                         # (H, N, L)
    K = (2.0 * np.real(np.einsum('hn,hnl->hl', C * dB, vand))).astype(np.float32)
    D = rng.standard_normal(H).astype(np.float32)

    # MLP (act='relu'): mlp_layers x [Conv1d(H, H, kernel_size=1), ReLU]
    Ws, bs = [], []
    for _ in range(mlp_layers):
        Ws.append((rng.standard_normal((H, H)) / np.sqrt(H)).astype(np.float32))
        bs.append((0.01 * rng.standard_normal(H)).astype(np.float32))
    return K, D, Ws, bs


def fuse_params(K, D, W1, b1, W2, b2):
    """Compress (causal conv + D skip) into Tcols and s-expand W1, all f32.
    Kernel-side parameter bytes ~= 4*(L*H*L + H*L*H + H*H) ~= 0.26 MiB (vs 4 MiB before)."""
    Kd = np.asarray(K, np.float64)
    Dd = np.asarray(D, np.float64)
    H, L = Kd.shape

    li = np.arange(L)[:, None]
    si = np.arange(L)[None, :]
    diff = li - si
    # T[h, l, s] = K[h, l-s] for l >= s else 0; D[h] on the diagonal (skip connection).
    T = np.where(diff[None] >= 0, Kd[:, np.clip(diff, 0, L - 1)], 0.0)           # (H, L, L)
    T[:, np.arange(L), np.arange(L)] += Dd[:, None]

    Tcols = np.ascontiguousarray(np.transpose(T, (1, 0, 2)).reshape(L, H * L))   # (L, H*L)
    W1f = np.repeat(np.asarray(W1, np.float64).T, L, axis=0)                     # (H*L, H)
    W2T = np.asarray(W2, np.float64).T                                           # (H, H)

    return (jnp.asarray(Tcols, jnp.float32),
            jnp.asarray(W1f, jnp.float32),
            jnp.asarray(np.asarray(b1, np.float32).reshape(1, H)),
            jnp.asarray(W2T, jnp.float32),
            jnp.asarray(np.asarray(b2, np.float32).reshape(1, H)))


# --------------------------------------------------------------------------------------
# Independent reference (float64, FFT convolution, unfused weights).
# --------------------------------------------------------------------------------------
def reference_forward(u, K, D, W1, b1, W2, b2):
    u = np.asarray(u, dtype=np.float64)
    B, H, L = u.shape
    Kf = np.fft.rfft(np.asarray(K, np.float64), n=2 * L, axis=-1)
    Uf = np.fft.rfft(u, n=2 * L, axis=-1)
    y = np.fft.irfft(Uf * Kf[None], n=2 * L, axis=-1)[..., :L]
    y = y + np.asarray(D, np.float64)[None, :, None] * u
    z = np.einsum('oh,bhl->bol', np.asarray(W1, np.float64), y) + np.asarray(b1)[None, :, None]
    z = np.maximum(z, 0.0)
    z = np.einsum('oh,bhl->bol', np.asarray(W2, np.float64), z) + np.asarray(b2)[None, :, None]
    z = np.maximum(z, 0.0)
    return z


if __name__ == "__main__":
    B, d_model, d_state, L = 16, 32, 16, 32

    K, D, Ws, bs = init_params(d_model, d_state, L, mlp_layers=2, seed=0)
    params = fuse_params(K, D, Ws[0], bs[0], Ws[1], bs[1])

    u = jax.random.normal(jax.random.PRNGKey(0), (B, d_model, L), dtype=jnp.float32)

    y, _ = lrssm_forward(u, params)
    y = jax.block_until_ready(y)

    # Sanity check against the float64 FFT-conv reference (validates both the parameter
    # compression and the kernel).  Everything is f32 with f32 accumulation.
    y_ref = reference_forward(np.asarray(u), K, D, Ws[0], bs[0], Ws[1], bs[1])
    y_np = np.asarray(y, dtype=np.float64)
    if not np.allclose(y_np, y_ref, atol=5e-2, rtol=5e-2):
        max_err = float(np.max(np.abs(y_np - y_ref)))
        raise AssertionError(f"Pallas output mismatch vs reference (max abs err {max_err})")

    # TODO(synk): FFTConvReservoir source was not provided; its FFT-domain convolution has
    # no Pallas FFT primitive and is realized exactly (same math) as the precomputed causal
    # Toeplitz operator Tcols contracted on the MXU inside the kernel.
    print("KERNEL_OK")
</pallas_src>

<mosaic_0001>
module attributes {stable_mosaic.version = 11 : i64} {
  func.func @lrssm_kernel(%arg0: memref<16x1024xf32, #tpu.memory_space<vmem>>, %arg1: memref<512x16xf32, #tpu.memory_space<vmem>>, %arg2: memref<512x32xf32, #tpu.memory_space<vmem>>, %arg3: memref<32x1024xf32, #tpu.memory_space<vmem>>, %arg4: memref<1024x32xf32, #tpu.memory_space<vmem>>, %arg5: memref<1x32xf32, #tpu.memory_space<vmem>>, %arg6: memref<32x32xf32, #tpu.memory_space<vmem>>, %arg7: memref<1x32xf32, #tpu.memory_space<vmem>>, %arg8: memref<512x32xf32, #tpu.memory_space<vmem>>) attributes {dimension_semantics = [], scalar_prefetch = 0 : i64, scratch_operands = 0 : i64, tpu.core_type = #tpu.core_type<tc>} {
    %c0 = arith.constant 0 : index
    %c0_0 = arith.constant 0 : index
    %0 = vector.load %arg1[%c0, %c0_0] : memref<512x16xf32, #tpu.memory_space<vmem>>, vector<512x16xf32>
    %c0_1 = arith.constant 0 : index
    %c0_2 = arith.constant 0 : index
    %1 = vector.load %arg0[%c0_1, %c0_2] : memref<16x1024xf32, #tpu.memory_space<vmem>>, vector<16x1024xf32>
    %cst = arith.constant dense<0.000000e+00> : vector<512x1024xf32>
    %2 = tpu.matmul %0, %1, %cst {dimension_numbers = #tpu.dot_dimension_numbers<[1], [0], [0], [1], [0, 0, 1, 1], [], []>} : vector<512x16xf32>, vector<16x1024xf32>, vector<512x1024xf32> -> vector<512x1024xf32>
    %c0_3 = arith.constant 0 : index
    %c0_4 = arith.constant 0 : index
    %3 = vector.load %arg2[%c0_3, %c0_4] : memref<512x32xf32, #tpu.memory_space<vmem>>, vector<512x32xf32>
    %c0_5 = arith.constant 0 : index
    %c0_6 = arith.constant 0 : index
    %4 = vector.load %arg3[%c0_5, %c0_6] : memref<32x1024xf32, #tpu.memory_space<vmem>>, vector<32x1024xf32>
    %cst_7 = arith.constant dense<0.000000e+00> : vector<512x1024xf32>
    %5 = tpu.matmul %3, %4, %cst_7 {dimension_numbers = #tpu.dot_dimension_numbers<[1], [0], [0], [1], [0, 0, 1, 1], [], []>} : vector<512x32xf32>, vector<32x1024xf32>, vector<512x1024xf32> -> vector<512x1024xf32>
    %6 = arith.mulf %2, %5 : vector<512x1024xf32>
    %c0_8 = arith.constant 0 : index
    %c0_9 = arith.constant 0 : index
    %7 = vector.load %arg4[%c0_8, %c0_9] : memref<1024x32xf32, #tpu.memory_space<vmem>>, vector<1024x32xf32>
    %cst_10 = arith.constant dense<0.000000e+00> : vector<512x32xf32>
    %8 = tpu.matmul %6, %7, %cst_10 {dimension_numbers = #tpu.dot_dimension_numbers<[1], [0], [0], [1], [0, 0, 1, 1], [], []>} : vector<512x1024xf32>, vector<1024x32xf32>, vector<512x32xf32> -> vector<512x32xf32>
    %c0_11 = arith.constant 0 : index
    %c0_12 = arith.constant 0 : index
    %9 = vector.load %arg5[%c0_11, %c0_12] : memref<1x32xf32, #tpu.memory_space<vmem>>, vector<1x32xf32>
    %10 = vector.broadcast %9 : vector<1x32xf32> to vector<512x32xf32>
    %11 = arith.addf %8, %10 : vector<512x32xf32>
    %cst_13 = arith.constant 0.000000e+00 : f32
    %12 = vector.broadcast %cst_13 : f32 to vector<512x32xf32>
    %13 = arith.maximumf %11, %12 : vector<512x32xf32>
    %c0_14 = arith.constant 0 : index
    %c0_15 = arith.constant 0 : index
    %14 = vector.load %arg6[%c0_14, %c0_15] : memref<32x32xf32, #tpu.memory_space<vmem>>, vector<32x32xf32>
    %cst_16 = arith.constant dense<0.000000e+00> : vector<512x32xf32>
    %15 = tpu.matmul %13, %14, %cst_16 {dimension_numbers = #tpu.dot_dimension_numbers<[1], [0], [0], [1], [0, 0, 1, 1], [], []>} : vector<512x32xf32>, vector<32x32xf32>, vector<512x32xf32> -> vector<512x32xf32>
    %c0_17 = arith.constant 0 : index
    %c0_18 = arith.constant 0 : index
    %16 = vector.load %arg7[%c0_17, %c0_18] : memref<1x32xf32, #tpu.memory_space<vmem>>, vector<1x32xf32>
    %17 = vector.broadcast %16 : vector<1x32xf32> to vector<512x32xf32>
    %18 = arith.addf %15, %17 : vector<512x32xf32>
    %cst_19 = arith.constant 0.000000e+00 : f32
    %19 = vector.broadcast %cst_19 : f32 to vector<512x32xf32>
    %20 = arith.maximumf %18, %19 : vector<512x32xf32>
    %c0_20 = arith.constant 0 : index
    %c0_21 = arith.constant 0 : index
    %21 = vector.load %arg8[%c0_20, %c0_21] : memref<512x32xf32, #tpu.memory_space<vmem>>, vector<512x32xf32>
    tpu.vector_store %arg8[%c0_20, %c0_21], %20 {strides = array<i32>} : memref<512x32xf32, #tpu.memory_space<vmem>>, vector<512x32xf32>,
    return
  }
}

</mosaic_0001>

<bundles_post_ra>
// kernel: tpu_custom_call.1
= control target key start
LH: loop header
LB: loop body
LE: loop exit
PB: predicated region body
PF: predicated region fallthrough
CT: control target
= control target key end

     0   :  { %v15549_v3 = vmov 0.0   ;;  %vm109_vm0 = vcmask 130048   ;;  %vm2194_vm1 = vcmask 261120   ;;  %s15535_s0 = inlined_call_operand.vmem [shape: f32[16,1024], index: 0, kind: input, shape index: {}]   ;;  %s15536_s1 = inlined_call_operand.vmem [shape: f32[512,16], index: 1, kind: input, shape index: {}]   ;;  %s15537_s3 = inlined_call_operand.vmem [shape: f32[32,1024], index: 3, kind: input, shape index: {}]   ;;  %s15538_s2 = inlined_call_operand.vmem [shape: f32[512,32], index: 2, kind: input, shape index: {}]   ;;  %s15539_s4 = inlined_call_operand.vmem [shape: f32[1024,32], index: 4, kind: input, shape index: {}]   ;;  %s15540_s5 = inlined_call_operand.vmem [shape: f32[1,32], index: 5, kind: input, shape index: {}]   ;;  %s15541_s6 = inlined_call_operand.vmem [shape: f32[32,32], index: 6, kind: input, shape index: {}]   ;;  %s15542_s7 = inlined_call_operand.vmem [shape: f32[1,32], index: 7, kind: input, shape index: {}]   ;;  %s15543_s8 = inlined_call_operand.vmem [shape: f32[512,32], index: 8, kind: output, shape index: {}]  }
   0x1   :  { %v102_v0 = vld [vmem:[%s15535_s0 + $0x48] sm:$0xff]  ;;  %v101_v1 = vld [vmem:[%s15535_s0 + $0x40] sm:$0xff]  ;;  %366 = vmatprep.mubr.f32.mxu0 %v15549_v3  ;;  %654 = vmatprep.mubr.f32.mxu1 %v15549_v3  ;;  %v104_v7 = vld [vmem:[%s15535_s0 + $0x58] sm:$0xff] }
   0x2   :  { %v94_v2 = vld [vmem:[%s15535_s0 + $0x8] sm:$0xff]  ;;  %330 = vmatprep.subr.mxu0 %v102_v0  ;;  %7904 = vmatprep.subr.mxu1 %v102_v0  ;;  %v93_v4 = vld [vmem:[%s15535_s0] sm:$0xff]  ;;  %v103_v8 = vld [vmem:[%s15535_s0 + $0x50] sm:$0xff] }
   0x3   :  { %331 = vmatpush1.msra.mxu0 %v101_v1  ;;  %7906 = vmatpush1.msra.mxu1 %v101_v1  ;;  %v8101_v5 = vld [vmem:[%s15536_s1] sm:$0xff]  ;;  %v8122_v9 = vld [vmem:[%s15536_s1 + $0x8] sm:$0xff]  ;;  %v96_v11 = vld [vmem:[%s15535_s0 + $0x18] sm:$0xff] }
   0x4   :  { %v8106_v6 = vld [vmem:[%s15536_s1 + $0x180] sm:$0xff]  ;;  %332 = vmatprep.subr.mxu0 %v94_v2  ;;  %7905 = vmatprep.subr.mxu1 %v94_v2  ;;  %v8127_v10 = vld [vmem:[%s15536_s1 + $0x188] sm:$0xff]  ;;  %v95_v12 = vld [vmem:[%s15535_s0 + $0x10] sm:$0xff] }
   0x5   :  { %333 = vmatpush1.msra.mxu0 %v93_v4  ;;  %7907 = vmatpush1.msra.mxu1 %v93_v4  ;;  %v8145_v13 = vld [vmem:[%s15536_s1 + $0x10] sm:$0xff]  ;;  %v108_v15 = vld [vmem:[%s15535_s0 + $0x78] sm:$0xff]  ;;  %v8180_v18 = vld [vmem:[%s15536_s1 + $0x20] sm:$0xff] }
   0x6   :  { %7154 = vmatmul.mubr.msk.f32.vlgmr.msra.gmra.mxu0 %vm109_vm0, %v8101_v5  ;;  %7202 = vmatmul.mubr.msk.f32.vlgmr.msra.gmra.mxu1 %vm109_vm0, %v8106_v6  ;;  %v8150_v14 = vld [vmem:[%s15536_s1 + $0x190] sm:$0xff]  ;;  %v8164_v16 = vld [vmem:[%s15536_s1 + $0x18] sm:$0xff]  ;;  %v8185_v19 = vld [vmem:[%s15536_s1 + $0x1a0] sm:$0xff] }
   0x7   :  { %779 = vmatprep.subr.mxu1 %v104_v7  ;;  %372 = vmatprep.mubr.f32.mxu0 %v15549_v3  ;;  %v8169_v17 = vld [vmem:[%s15536_s1 + $0x198] sm:$0xff]  ;;  %v106_v20 = vld [vmem:[%s15535_s0 + $0x68] sm:$0xff]  ;;  %v105_v21 = vld [vmem:[%s15535_s0 + $0x60] sm:$0xff] }
   0x8   :  { %780 = vmatpush1.msra.mxu1 %v103_v8  ;;  %660 = vmatprep.mubr.f32.mxu1 %v15549_v3  ;;  %v8202_v22 = vld [vmem:[%s15536_s1 + $0x28] sm:$0xff]  ;;  %v8218_v24 = vld [vmem:[%s15536_s1 + $0x30] sm:$0xff]  ;;  %v8234_v26 = vld [vmem:[%s15536_s1 + $0x38] sm:$0xff] }
   0x9   :  { %781 = vmatprep.subr.mxu1 %v96_v11  ;;  %1228 = vmatprep.subr.mxu0 %v106_v20  ;;  %v8207_v23 = vld [vmem:[%s15536_s1 + $0x1a8] sm:$0xff]  ;;  %v8223_v25 = vld [vmem:[%s15536_s1 + $0x1b0] sm:$0xff]  ;;  %v8239_v27 = vld [vmem:[%s15536_s1 + $0x1b8] sm:$0xff] }
   0xa   :  { %7155 = vmatmul.mubr.msk.f32.gmra.mxu0 %vm109_vm0, %v8122_v9  ;;  %7203 = vmatmul.mubr.msk.f32.gmra.mxu1 %vm109_vm0, %v8127_v10  ;;  %v8250_v28 = vld [vmem:[%s15536_s1 + $0x40] sm:$0xff]  ;;  %v8266_v30 = vld [vmem:[%s15536_s1 + $0x48] sm:$0xff]  ;;  %v8282_v32 = vld [vmem:[%s15536_s1 + $0x50] sm:$0xff] }
   0xb   :  { %378 = vmatprep.mubr.f32.mxu0 %v15549_v3  ;;  %666 = vmatprep.mubr.f32.mxu1 %v15549_v3  ;;  %v8255_v29 = vld [vmem:[%s15536_s1 + $0x1c0] sm:$0xff]  ;;  %v8271_v31 = vld [vmem:[%s15536_s1 + $0x1c8] sm:$0xff]  ;;  %v8287_v33 = vld [vmem:[%s15536_s1 + $0x1d0] sm:$0xff] }
   0xc   :  { %782 = vmatpush1.msra.mxu1 %v95_v12  ;;  %1229 = vmatpush1.msra.mxu0 %v105_v21  ;;  %v8298_v34 = vld [vmem:[%s15536_s1 + $0x58] sm:$0xff]  ;;  %v8314_v36 = vld [vmem:[%s15536_s1 + $0x60] sm:$0xff]  ;;  %v8330_v38 = vld [vmem:[%s15536_s1 + $0x68] sm:$0xff] }
   0xd   :  { %1677 = vmatprep.subr.mxu1 %v108_v15  ;;  %v8303_v35 = vld [vmem:[%s15536_s1 + $0x1d8] sm:$0xff]  ;;  %v8319_v37 = vld [vmem:[%s15536_s1 + $0x1e0] sm:$0xff]  ;;  %v8335_v39 = vld [vmem:[%s15536_s1 + $0x1e8] sm:$0xff] }
   0xe   :  { %7156 = vmatmul.mubr.msk.f32.gmra.mxu0 %vm109_vm0, %v8145_v13  ;;  %7204 = vmatmul.mubr.msk.f32.gmra.mxu1 %vm109_vm0, %v8150_v14  ;;  %15554 = vst [vmem:[#allocation2_spill] sm:$0xff] %v8335_v39  ;;  %v8346_v40 = vld [vmem:[%s15536_s1 + $0x70] sm:$0xff]  ;;  %v8362_v42 = vld [vmem:[%s15536_s1 + $0x78] sm:$0xff]  ;;  %v98_v44 = vld [vmem:[%s15535_s0 + $0x28] sm:$0xff] }
   0xf   :  { %384 = vmatprep.mubr.f32.mxu0 %v15549_v3  ;;  %672 = vmatprep.mubr.f32.mxu1 %v15549_v3  ;;  %v8351_v41 = vld [vmem:[%s15536_s1 + $0x1f0] sm:$0xff]  ;;  %v8367_v43 = vld [vmem:[%s15536_s1 + $0x1f8] sm:$0xff]  ;;  %v8381_v45 = vld [vmem:[%s15536_s1 + $0x80] sm:$0xff] }
  0x10   :  { %15555 = vst [vmem:[#allocation3_spill] sm:$0xff] %v8351_v41  ;;  %15556 = vst [vmem:[#allocation4_spill] sm:$0xff] %v8367_v43  ;;  %v97_v46 = vld [vmem:[%s15535_s0 + $0x20] sm:$0xff]  ;;  %v107_v47 = vld [vmem:[%s15535_s0 + $0x70] sm:$0xff]  ;;  %1230 = vmatprep.subr.mxu0 %v98_v44 }
  0x11   :  { %1231 = vmatpush1.msra.mxu0 %v97_v46  ;;  %v100_v48 = vld [vmem:[%s15535_s0 + $0x38] sm:$0xff]  ;;  %v99_v49 = vld [vmem:[%s15535_s0 + $0x30] sm:$0xff]  ;;  %v8403_v50 = vld [vmem:[%s15536_s1 + $0x88] sm:$0xff] }
  0x12   :  { %7157 = vmatmul.mubr.msk.f32.gmra.mxu0 %vm109_vm0, %v8164_v16  ;;  %7205 = vmatmul.mubr.msk.f32.gmra.mxu1 %vm109_vm0, %v8169_v17  ;;  %v8415_v51 = vld [vmem:[%s15536_s1 + $0x90] sm:$0xff]  ;;  %v8426_v52 = vld [vmem:[%s15536_s1 + $0x98] sm:$0xff]  ;;  %v8437_v53 = vld [vmem:[%s15536_s1 + $0xa0] sm:$0xff] }
  0x13   :  { %390 = vmatprep.mubr.f32.mxu0 %v15549_v3  ;;  %678 = vmatprep.mubr.f32.mxu1 %v15549_v3  ;;  %v8448_v54 = vld [vmem:[%s15536_s1 + $0xa8] sm:$0xff]  ;;  %v8459_v55 = vld [vmem:[%s15536_s1 + $0xb0] sm:$0xff]  ;;  %v8470_v56 = vld [vmem:[%s15536_s1 + $0xb8] sm:$0xff] }
  0x14   :  { %v8481_v57 = vld [vmem:[%s15536_s1 + $0xc0] sm:$0xff]  ;;  %v8492_v58 = vld [vmem:[%s15536_s1 + $0xc8] sm:$0xff]  ;;  %v8503_v59 = vld [vmem:[%s15536_s1 + $0xd0] sm:$0xff] }
  0x15   :  { %v8514_v60 = vld [vmem:[%s15536_s1 + $0xd8] sm:$0xff]  ;;  %v8525_v61 = vld [vmem:[%s15536_s1 + $0xe0] sm:$0xff]  ;;  %v8536_v62 = vld [vmem:[%s15536_s1 + $0xe8] sm:$0xff] }
  0x16   :  { %7158 = vmatmul.mubr.msk.f32.gmra.mxu0 %vm109_vm0, %v8180_v18  ;;  %7206 = vmatmul.mubr.msk.f32.gmra.mxu1 %vm109_vm0, %v8185_v19  ;;  %15557 = vst [vmem:[#allocation5_spill] sm:$0xff] %v8536_v62  ;;  %v8547_v63 = vld [vmem:[%s15536_s1 + $0xf0] sm:$0xff]  ;;  %v8558_v0 = vld [vmem:[%s15536_s1 + $0xf8] sm:$0xff]  ;;  %v8569_v1 = vld [vmem:[%s15536_s1 + $0x100] sm:$0xff] }
  0x17   :  { %396 = vmatprep.mubr.f32.mxu0 %v15549_v3  ;;  %684 = vmatprep.mubr.f32.mxu1 %v15549_v3  ;;  %15558 = vst [vmem:[#allocation6_spill] sm:$0xff] %v8547_v63  ;;  %15559 = vst [vmem:[#allocation7_spill] sm:$0xff] %v8558_v0  ;;  %v8580_v2 = vld [vmem:[%s15536_s1 + $0x108] sm:$0xff]  ;;  %v8591_v4 = vld [vmem:[%s15536_s1 + $0x110] sm:$0xff] }
  0x18   :  { %15560 = vst [vmem:[#allocation8_spill] sm:$0xff] %v8569_v1  ;;  %v8602_v7 = vld [vmem:[%s15536_s1 + $0x118] sm:$0xff]  ;;  %v8613_v8 = vld [vmem:[%s15536_s1 + $0x120] sm:$0xff]  ;;  %v8624_v11 = vld [vmem:[%s15536_s1 + $0x128] sm:$0xff] }
  0x19   :  { %v8635_v12 = vld [vmem:[%s15536_s1 + $0x130] sm:$0xff]  ;;  %v8646_v15 = vld [vmem:[%s15536_s1 + $0x138] sm:$0xff]  ;;  %v8657_v20 = vld [vmem:[%s15536_s1 + $0x140] sm:$0xff] }
  0x1a   :  { %7159 = vmatmul.mubr.msk.f32.gmra.mxu0 %vm109_vm0, %v8202_v22  ;;  %7207 = vmatmul.mubr.msk.f32.gmra.mxu1 %vm109_vm0, %v8207_v23  ;;  %v8668_v21 = vld [vmem:[%s15536_s1 + $0x148] sm:$0xff]  ;;  %v8679_v44 = vld [vmem:[%s15536_s1 + $0x150] sm:$0xff]  ;;  %v8690_v46 = vld [vmem:[%s15536_s1 + $0x158] sm:$0xff] }
  0x1b   :  { %402 = vmatprep.mubr.f32.mxu0 %v15549_v3  ;;  %690 = vmatprep.mubr.f32.mxu1 %v15549_v3 }
  0x1e   :  { %7160 = vmatmul.mubr.msk.f32.gmra.mxu0 %vm109_vm0, %v8218_v24  ;;  %7208 = vmatmul.mubr.msk.f32.gmra.mxu1 %vm109_vm0, %v8223_v25 }
  0x1f   :  { %408 = vmatprep.mubr.f32.mxu0 %v15549_v3  ;;  %696 = vmatprep.mubr.f32.mxu1 %v15549_v3 }
  0x22   :  { %7161 = vmatmul.mubr.msk.f32.gmra.mxu0 %vm109_vm0, %v8234_v26  ;;  %7209 = vmatmul.mubr.msk.f32.gmra.mxu1 %vm109_vm0, %v8239_v27 }
  0x23   :  { %414 = vmatprep.mubr.f32.mxu0 %v15549_v3  ;;  %702 = vmatprep.mubr.f32.mxu1 %v15549_v3 }
  0x26   :  { %7162 = vmatmul.mubr.msk.f32.gmra.mxu0 %vm109_vm0, %v8250_v28  ;;  %7210 = vmatmul.mubr.msk.f32.gmra.mxu1 %vm109_vm0, %v8255_v29 }
  0x27   :  { %420 = vmatprep.mubr.f32.mxu0 %v15549_v3  ;;  %708 = vmatprep.mubr.f32.mxu1 %v15549_v3 }
  0x2a   :  { %7163 = vmatmul.mubr.msk.f32.gmra.mxu0 %vm109_vm0, %v8266_v30  ;;  %7211 = vmatmul.mubr.msk.f32.gmra.mxu1 %vm109_vm0, %v8271_v31 }
  0x2b   :  { %426 = vmatprep.mubr.f32.mxu0 %v15549_v3  ;;  %714 = vmatprep.mubr.f32.mxu1 %v15549_v3 }
  0x2e   :  { %7164 = vmatmul.mubr.msk.f32.gmra.mxu0 %vm109_vm0, %v8282_v32  ;;  %7212 = vmatmul.mubr.msk.f32.gmra.mxu1 %vm109_vm0, %v8287_v33 }
  0x2f   :  { %432 = vmatprep.mubr.f32.mxu0 %v15549_v3  ;;  %720 = vmatprep.mubr.f32.mxu1 %v15549_v3 }
  0x32   :  { %7165 = vmatmul.mubr.msk.f32.gmra.mxu0 %vm109_vm0, %v8298_v34  ;;  %7213 = vmatmul.mubr.msk.f32.gmra.mxu1 %vm109_vm0, %v8303_v35 }
  0x33   :  { %438 = vmatprep.mubr.f32.mxu0 %v15549_v3  ;;  %726 = vmatprep.mubr.f32.mxu1 %v15549_v3 }
  0x36   :  { %7166 = vmatmul.mubr.msk.f32.gmra.mxu0 %vm109_vm0, %v8314_v36  ;;  %7214 = vmatmul.mubr.msk.f32.gmra.mxu1 %vm109_vm0, %v8319_v37 }
  0x37   :  { %444 = vmatprep.mubr.f32.mxu0 %v15549_v3  ;;  %732 = vmatprep.mubr.f32.mxu1 %v15549_v3 }
  0x3a   :  { %7167 = vmatmul.mubr.msk.f32.gmra.mxu0 %vm109_vm0, %v8330_v38  ;;  %7215 = vmatmul.mubr.msk.f32.gmra.mxu1 %vm109_vm0, %v8335_v39  ;;  %v15563_v39 = vmov 0.0  }
  0x3b   :  { %450 = vmatprep.mubr.f32.mxu0 %v15549_v3  ;;  %738 = vmatprep.mubr.f32.mxu1 %v15549_v3 }
  0x3e   :  { %7168 = vmatmul.mubr.msk.f32.gmra.mxu0 %vm109_vm0, %v8346_v40  ;;  %7216 = vmatmul.mubr.msk.f32.gmra.mxu1 %vm109_vm0, %v8351_v41 }
  0x3f   :  { %456 = vmatprep.mubr.f32.mxu0 %v15549_v3  ;;  %744 = vmatprep.mubr.f32.mxu1 %v15549_v3 }
  0x42   :  { %7169 = vmatmul.mubr.msk.f32.gmra.mxu0 %vm109_vm0, %v8362_v42  ;;  %7217 = vmatmul.mubr.msk.f32.gmra.mxu1 %vm109_vm0, %v8367_v43  ;;  %v8734_v43 = vld [vmem:[%s15536_s1 + $0x178] sm:$0xff] }
  0x43   :  { %462 = vmatprep.mubr.f32.mxu0 %v15549_v3  ;;  %815 = vmatprep.mubr.f32.mxu1 %v15549_v3 }
  0x46   :  { %7170 = vmatmul.mubr.msk.f32.gmra.mxu0 %vm109_vm0, %v8381_v45  ;;  %7218 = vmatmul.mubr.msk.f32.vlgmr.msra.gmra.mxu1 %vm109_vm0, %v8101_v5 }
  0x47   :  { %1678 = vmatpush1.msra.mxu1 %v107_v47  ;;  %468 = vmatprep.mubr.f32.mxu0 %v15549_v3  ;;  %v8701_v47 = vld [vmem:[%s15536_s1 + $0x160] sm:$0xff] }
  0x48   :  { %821 = vmatprep.mubr.f32.mxu1 %v15549_v3  ;;  %1679 = vmatprep.subr.mxu1 %v100_v48  ;;  %v8712_v48 = vld [vmem:[%s15536_s1 + $0x168] sm:$0xff] }
  0x49   :  { %1680 = vmatpush1.msra.mxu1 %v99_v49  ;;  %v8723_v49 = vld [vmem:[%s15536_s1 + $0x170] sm:$0xff] }
  0x4a   :  { %7171 = vmatmul.mubr.msk.f32.gmra.mxu0 %vm109_vm0, %v8403_v50  ;;  %7219 = vmatmul.mubr.msk.f32.gmra.mxu1 %vm109_vm0, %v8122_v9 }
  0x4b   :  { %474 = vmatprep.mubr.f32.mxu0 %v15549_v3  ;;  %827 = vmatprep.mubr.f32.mxu1 %v15549_v3 }
  0x4e   :  { %7172 = vmatmul.mubr.msk.f32.gmra.mxu0 %vm109_vm0, %v8415_v51  ;;  %7220 = vmatmul.mubr.msk.f32.gmra.mxu1 %vm109_vm0, %v8145_v13 }
  0x4f   :  { %480 = vmatprep.mubr.f32.mxu0 %v15549_v3  ;;  %833 = vmatprep.mubr.f32.mxu1 %v15549_v3 }
  0x52   :  { %7173 = vmatmul.mubr.msk.f32.gmra.mxu0 %vm109_vm0, %v8426_v52  ;;  %7221 = vmatmul.mubr.msk.f32.gmra.mxu1 %vm109_vm0, %v8164_v16 }
  0x53   :  { %486 = vmatprep.mubr.f32.mxu0 %v15549_v3  ;;  %839 = vmatprep.mubr.f32.mxu1 %v15549_v3 }
  0x56   :  { %7174 = vmatmul.mubr.msk.f32.gmra.mxu0 %vm109_vm0, %v8437_v53  ;;  %7222 = vmatmul.mubr.msk.f32.gmra.mxu1 %vm109_vm0, %v8180_v18 }
  0x57   :  { %492 = vmatprep.mubr.f32.mxu0 %v15549_v3  ;;  %845 = vmatprep.mubr.f32.mxu1 %v15549_v3 }
  0x5a   :  { %7175 = vmatmul.mubr.msk.f32.gmra.mxu0 %vm109_vm0, %v8448_v54  ;;  %7223 = vmatmul.mubr.msk.f32.gmra.mxu1 %vm109_vm0, %v8202_v22 }
  0x5b   :  { %498 = vmatprep.mubr.f32.mxu0 %v15549_v3  ;;  %851 = vmatprep.mubr.f32.mxu1 %v15549_v3 }
  0x5e   :  { %7176 = vmatmul.mubr.msk.f32.gmra.mxu0 %vm109_vm0, %v8459_v55  ;;  %7224 = vmatmul.mubr.msk.f32.gmra.mxu1 %vm109_vm0, %v8218_v24 }
  0x5f   :  { %504 = vmatprep.mubr.f32.mxu0 %v15549_v3  ;;  %857 = vmatprep.mubr.f32.mxu1 %v15549_v3 }
  0x62   :  { %7177 = vmatmul.mubr.msk.f32.gmra.mxu0 %vm109_vm0, %v8470_v56  ;;  %7225 = vmatmul.mubr.msk.f32.gmra.mxu1 %vm109_vm0, %v8234_v26 }
  0x63   :  { %510 = vmatprep.mubr.f32.mxu0 %v15549_v3  ;;  %863 = vmatprep.mubr.f32.mxu1 %v15549_v3 }
  0x66   :  { %7178 = vmatmul.mubr.msk.f32.gmra.mxu0 %vm109_vm0, %v8481_v57  ;;  %7226 = vmatmul.mubr.msk.f32.gmra.mxu1 %vm109_vm0, %v8250_v28 }
  0x67   :  { %516 = vmatprep.mubr.f32.mxu0 %v15549_v3  ;;  %869 = vmatprep.mubr.f32.mxu1 %v15549_v3 }
  0x6a   :  { %7179 = vmatmul.mubr.msk.f32.gmra.mxu0 %vm109_vm0, %v8492_v58  ;;  %7227 = vmatmul.mubr.msk.f32.gmra.mxu1 %vm109_vm0, %v8266_v30 }
  0x6b   :  { %522 = vmatprep.mubr.f32.mxu0 %v15549_v3  ;;  %875 = vmatprep.mubr.f32.mxu1 %v15549_v3 }
  0x6e   :  { %7180 = vmatmul.mubr.msk.f32.gmra.mxu0 %vm109_vm0, %v8503_v59  ;;  %7228 = vmatmul.mubr.msk.f32.gmra.mxu1 %vm109_vm0, %v8282_v32 }
  0x6f   :  { %528 = vmatprep.mubr.f32.mxu0 %v15549_v3  ;;  %881 = vmatprep.mubr.f32.mxu1 %v15549_v3 }
  0x72   :  { %7181 = vmatmul.mubr.msk.f32.gmra.mxu0 %vm109_vm0, %v8514_v60  ;;  %7229 = vmatmul.mubr.msk.f32.gmra.mxu1 %vm109_vm0, %v8298_v34 }
  0x73   :  { %534 = vmatprep.mubr.f32.mxu0 %v15549_v3  ;;  %887 = vmatprep.mubr.f32.mxu1 %v15549_v3 }
  0x76   :  { %7182 = vmatmul.mubr.msk.f32.gmra.mxu0 %vm109_vm0, %v8525_v61  ;;  %7230 = vmatmul.mubr.msk.f32.gmra.mxu1 %vm109_vm0, %v8314_v36 }
  0x77   :  { %540 = vmatprep.mubr.f32.mxu0 %v15549_v3  ;;  %893 = vmatprep.mubr.f32.mxu1 %v15549_v3 }
  0x7a   :  { %7183 = vmatmul.mubr.msk.f32.gmra.mxu0 %vm109_vm0, %v8536_v62  ;;  %7231 = vmatmul.mubr.msk.f32.gmra.mxu1 %vm109_vm0, %v8330_v38 }
  0x7b   :  { %546 = vmatprep.mubr.f32.mxu0 %v15549_v3  ;;  %899 = vmatprep.mubr.f32.mxu1 %v15549_v3 }
  0x7e   :  { %7184 = vmatmul.mubr.msk.f32.gmra.mxu0 %vm109_vm0, %v8547_v63  ;;  %7232 = vmatmul.mubr.msk.f32.gmra.mxu1 %vm109_vm0, %v8346_v40 }
  0x7f   :  { %552 = vmatprep.mubr.f32.mxu0 %v15549_v3  ;;  %905 = vmatprep.mubr.f32.mxu1 %v15549_v3 }
  0x82   :  { %7185 = vmatmul.mubr.msk.f32.gmra.mxu0 %vm109_vm0, %v8558_v0  ;;  %7233 = vmatmul.mubr.msk.f32.gmra.mxu1 %vm109_vm0, %v8362_v42 }
  0x83   :  { %558 = vmatprep.mubr.f32.mxu0 %v15549_v3  ;;  %911 = vmatprep.mubr.f32.mxu1 %v15549_v3 }
  0x86   :  { %7186 = vmatmul.mubr.msk.f32.gmra.mxu0 %vm109_vm0, %v8569_v1  ;;  %7234 = vmatmul.mubr.msk.f32.gmra.mxu1 %vm109_vm0, %v8381_v45 }
  0x87   :  { %564 = vmatprep.mubr.f32.mxu0 %v15549_v3  ;;  %917 = vmatprep.mubr.f32.mxu1 %v15549_v3 }
  0x8a   :  { %7187 = vmatmul.mubr.msk.f32.gmra.mxu0 %vm109_vm0, %v8580_v2  ;;  %7235 = vmatmul.mubr.msk.f32.gmra.mxu1 %vm109_vm0, %v8403_v50 }
  0x8b   :  { %570 = vmatprep.mubr.f32.mxu0 %v15549_v3  ;;  %923 = vmatprep.mubr.f32.mxu1 %v15549_v3 }
  0x8e   :  { %7188 = vmatmul.mubr.msk.f32.gmra.mxu0 %vm109_vm0, %v8591_v4  ;;  %7236 = vmatmul.mubr.msk.f32.gmra.mxu1 %vm109_vm0, %v8415_v51 }
  0x8f   :  { %576 = vmatprep.mubr.f32.mxu0 %v15549_v3  ;;  %929 = vmatprep.mubr.f32.mxu1 %v15549_v3 }
  0x92   :  { %7189 = vmatmul.mubr.msk.f32.gmra.mxu0 %vm109_vm0, %v8602_v7  ;;  %7237 = vmatmul.mubr.msk.f32.gmra.mxu1 %vm109_vm0, %v8426_v52 }
  0x93   :  { %582 = vmatprep.mubr.f32.mxu0 %v15549_v3  ;;  %935 = vmatprep.mubr.f32.mxu1 %v15549_v3 }
  0x96   :  { %7190 = vmatmul.mubr.msk.f32.gmra.mxu0 %vm109_vm0, %v8613_v8  ;;  %7238 = vmatmul.mubr.msk.f32.gmra.mxu1 %vm109_vm0, %v8437_v53 }
  0x97   :  { %588 = vmatprep.mubr.f32.mxu0 %v15549_v3  ;;  %941 = vmatprep.mubr.f32.mxu1 %v15549_v3 }
  0x9a   :  { %7191 = vmatmul.mubr.msk.f32.gmra.mxu0 %vm109_vm0, %v8624_v11  ;;  %7239 = vmatmul.mubr.msk.f32.gmra.mxu1 %vm109_vm0, %v8448_v54 }
  0x9b   :  { %594 = vmatprep.mubr.f32.mxu0 %v15549_v3  ;;  %947 = vmatprep.mubr.f32.mxu1 %v15549_v3 }
  0x9e   :  { %7192 = vmatmul.mubr.msk.f32.gmra.mxu0 %vm109_vm0, %v8635_v12  ;;  %7240 = vmatmul.mubr.msk.f32.gmra.mxu1 %vm109_vm0, %v8459_v55 }
  0x9f   :  { %600 = vmatprep.mubr.f32.mxu0 %v15549_v3  ;;  %953 = vmatprep.mubr.f32.mxu1 %v15549_v3 }
  0xa2   :  { %7193 = vmatmul.mubr.msk.f32.gmra.mxu0 %vm109_vm0, %v8646_v15  ;;  %7241 = vmatmul.mubr.msk.f32.gmra.mxu1 %vm109_vm0, %v8470_v56 }
  0xa3   :  { %606 = vmatprep.mubr.f32.mxu0 %v15549_v3  ;;  %959 = vmatprep.mubr.f32.mxu1 %v15549_v3 }
  0xa6   :  { %7194 = vmatmul.mubr.msk.f32.gmra.mxu0 %vm109_vm0, %v8657_v20  ;;  %7242 = vmatmul.mubr.msk.f32.gmra.mxu1 %vm109_vm0, %v8481_v57 }
  0xa7   :  { %612 = vmatprep.mubr.f32.mxu0 %v15549_v3  ;;  %965 = vmatprep.mubr.f32.mxu1 %v15549_v3 }
  0xaa   :  { %7195 = vmatmul.mubr.msk.f32.gmra.mxu0 %vm109_vm0, %v8668_v21  ;;  %7243 = vmatmul.mubr.msk.f32.gmra.mxu1 %vm109_vm0, %v8492_v58 }
  0xab   :  { %618 = vmatprep.mubr.f32.mxu0 %v15549_v3  ;;  %971 = vmatprep.mubr.f32.mxu1 %v15549_v3 }
  0xae   :  { %7196 = vmatmul.mubr.msk.f32.gmra.mxu0 %vm109_vm0, %v8679_v44  ;;  %7244 = vmatmul.mubr.msk.f32.gmra.mxu1 %vm109_vm0, %v8503_v59 }
  0xaf   :  { %624 = vmatprep.mubr.f32.mxu0 %v15549_v3  ;;  %977 = vmatprep.mubr.f32.mxu1 %v15549_v3 }
  0xb2   :  { %7197 = vmatmul.mubr.msk.f32.gmra.mxu0 %vm109_vm0, %v8690_v46  ;;  %7245 = vmatmul.mubr.msk.f32.gmra.mxu1 %vm109_vm0, %v8514_v60 }
  0xb3   :  { %630 = vmatprep.mubr.f32.mxu0 %v15549_v3  ;;  %983 = vmatprep.mubr.f32.mxu1 %v15549_v3 }
  0xb6   :  { %7198 = vmatmul.mubr.msk.f32.gmra.mxu0 %vm109_vm0, %v8701_v47  ;;  %7246 = vmatmul.mubr.msk.f32.gmra.mxu1 %vm109_vm0, %v8525_v61 }
  0xb7   :  { %636 = vmatprep.mubr.f32.mxu0 %v15549_v3  ;;  %989 = vmatprep.mubr.f32.mxu1 %v15549_v3 }
  0xba   :  { %7199 = vmatmul.mubr.msk.f32.gmra.mxu0 %vm109_vm0, %v8712_v48  ;;  %7247 = vmatmul.mubr.msk.f32.gmra.mxu1 %vm109_vm0, %v8536_v62 }
  0xbb   :  { %642 = vmatprep.mubr.f32.mxu0 %v15549_v3  ;;  %995 = vmatprep.mubr.f32.mxu1 %v15549_v3 }
  0xbe   :  { %7200 = vmatmul.mubr.msk.f32.gmra.mxu0 %vm109_vm0, %v8723_v49  ;;  %7248 = vmatmul.mubr.msk.f32.gmra.mxu1 %vm109_vm0, %v8547_v63  ;;  %v2187_v63 = vld [vmem:[%s15537_s3 + $0xc8] sm:$0xff] }
  0xbf   :  { %648 = vmatprep.mubr.f32.mxu0 %v15549_v3  ;;  %1001 = vmatprep.mubr.f32.mxu1 %v15549_v3 }
  0xc0   :  { %2411 = vmatprep.subr.mxu0 %v2187_v63 }
  0xc2   :  { %7201 = vmatmul.mubr.msk.f32.gmra.mxu0 %vm109_vm0, %v8734_v43  ;;  %7249 = vmatmul.mubr.msk.f32.gmra.mxu1 %vm109_vm0, %v8558_v0  ;;  %v2186_v0 = vld [vmem:[%s15537_s3 + $0xc0] sm:$0xff] }
  0xc3   :  { %1007 = vmatprep.mubr.f32.mxu1 %v15549_v3  ;;  %1264 = vmatprep.mubr.f32.mxu0 %v15549_v3  ;;  %v2189_v3 = vld [vmem:[%s15537_s3 + $0xd8] sm:$0xff] }
  0xc4   :  { %2860 = vmatprep.subr.mxu1 %v2189_v3 }
  0xc6   :  { %v8745_v41 = vpop.f32.mrf.mxu0  ;;  %v8747_v62 = vpop.f32.mrf.mxu1  ;;  %7250 = vmatmul.mubr.msk.f32.gmra.mxu1 %vm109_vm0, %v8569_v1  ;;  %7282 = vmatmul.mubr.msk.f32.vlgmr.msra.gmra.mxu0 %vm109_vm0, %v8101_v5 }
  0xc7   :  { %15561 = vst [vmem:[#allocation9_spill] sm:$0xff] %v8745_v41  ;;  %15562 = vst [vmem:[#allocation10_spill] sm:$0xff] %v8747_v62  ;;  %1013 = vmatprep.mubr.f32.mxu1 %v15563_v39  ;;  %1270 = vmatprep.mubr.f32.mxu0 %v15563_v39 }
  0xc8   :  { %v8761_v41 = vpop.f32.mrf.mxu0  ;;  %v8763_v62 = vpop.f32.mrf.mxu1  ;;  %2412 = vmatpush1.msra.mxu0 %v2186_v0 }
  0xc9   :  { %15564 = vst [vmem:[#allocation11_spill] sm:$0xff] %v8761_v41  ;;  %15565 = vst [vmem:[#allocation12_spill] sm:$0xff] %v8763_v62 }
  0xca   :  { %v8765_v5 = vpop.f32.mrf.mxu0  ;;  %v8767_v1 = vpop.f32.mrf.mxu1  ;;  %7251 = vmatmul.mubr.msk.f32.gmra.mxu1 %vm109_vm0, %v8580_v2  ;;  %7283 = vmatmul.mubr.msk.f32.gmra.mxu0 %vm109_vm0, %v8122_v9 }
  0xcb   :  { %15566 = vst [vmem:[#allocation13_spill] sm:$0xff] %v8767_v1  ;;  %1019 = vmatprep.mubr.f32.mxu1 %v15563_v39  ;;  %1276 = vmatprep.mubr.f32.mxu0 %v15563_v39 }
  0xcc   :  { %v8775_v41 = vpop.f32.mrf.mxu0  ;;  %v8777_v62 = vpop.f32.mrf.mxu1 }
  0xcd   :  { %15567 = vst [vmem:[#allocation14_spill] sm:$0xff] %v8777_v62 }
  0xce   :  { %v8779_v3 = vpop.f32.mrf.mxu0  ;;  %v8781_v63 = vpop.f32.mrf.mxu1  ;;  %7252 = vmatmul.mubr.msk.f32.gmra.mxu1 %vm109_vm0, %v8591_v4  ;;  %7284 = vmatmul.mubr.msk.f32.gmra.mxu0 %vm109_vm0, %v8145_v13 }
  0xcf   :  { %15568 = vst [vmem:[#allocation15_spill] sm:$0xff] %v8779_v3  ;;  %15569 = vst [vmem:[#allocation16_spill] sm:$0xff] %v8781_v63  ;;  %1025 = vmatprep.mubr.f32.mxu1 %v15563_v39  ;;  %1282 = vmatprep.mubr.f32.mxu0 %v15563_v39 }
  0xd0   :  { %v8789_v9 = vpop.f32.mrf.mxu0  ;;  %v8791_v0 = vpop.f32.mrf.mxu1 }
  0xd1   :  { %15570 = vst [vmem:[#allocation17_spill] sm:$0xff] %v8791_v0 }
  0xd2   :  { %v8793_v1 = vpop.f32.mrf.mxu0  ;;  %v8795_v62 = vpop.f32.mrf.mxu1  ;;  %7253 = vmatmul.mubr.msk.f32.gmra.mxu1 %vm109_vm0, %v8602_v7  ;;  %7285 = vmatmul.mubr.msk.f32.gmra.mxu0 %vm109_vm0, %v8164_v16 }
  0xd3   :  { %15571 = vst [vmem:[#allocation18_spill] sm:$0xff] %v8793_v1  ;;  %15572 = vst [vmem:[#allocation19_spill] sm:$0xff] %v8795_v62  ;;  %1031 = vmatprep.mubr.f32.mxu1 %v15563_v39  ;;  %1288 = vmatprep.mubr.f32.mxu0 %v15563_v39 }
  0xd4   :  { %v8803_v13 = vpop.f32.mrf.mxu0  ;;  %v8805_v63 = vpop.f32.mrf.mxu1 }
  0xd5   :  { %15573 = vst [vmem:[#allocation20_spill] sm:$0xff] %v8805_v63 }
  0xd6   :  { %v8807_v3 = vpop.f32.mrf.mxu0  ;;  %v8809_v0 = vpop.f32.mrf.mxu1  ;;  %7254 = vmatmul.mubr.msk.f32.gmra.mxu1 %vm109_vm0, %v8613_v8  ;;  %7286 = vmatmul.mubr.msk.f32.gmra.mxu0 %vm109_vm0, %v8180_v18 }
  0xd7   :  { %15574 = vst [vmem:[#allocation21_spill] sm:$0xff] %v8807_v3  ;;  %15575 = vst [vmem:[#allocation22_spill] sm:$0xff] %v8809_v0  ;;  %1037 = vmatprep.mubr.f32.mxu1 %v15563_v39  ;;  %1294 = vmatprep.mubr.f32.mxu0 %v15563_v39 }
  0xd8   :  { %v8817_v16 = vpop.f32.mrf.mxu0  ;;  %v8819_v62 = vpop.f32.mrf.mxu1 }
  0xd9   :  { %15576 = vst [vmem:[#allocation23_spill] sm:$0xff] %v8819_v62 }
  0xda   :  { %v8821_v1 = vpop.f32.mrf.mxu0  ;;  %v8823_v63 = vpop.f32.mrf.mxu1  ;;  %7255 = vmatmul.mubr.msk.f32.gmra.mxu1 %vm109_vm0, %v8624_v11  ;;  %7287 = vmatmul.mubr.msk.f32.gmra.mxu0 %vm109_vm0, %v8202_v22 }
  0xdb   :  { %15577 = vst [vmem:[#allocation24_spill] sm:$0xff] %v8821_v1  ;;  %15578 = vst [vmem:[#allocation25_spill] sm:$0xff] %v8823_v63  ;;  %1043 = vmatprep.mubr.f32.mxu1 %v15563_v39  ;;  %1300 = vmatprep.mubr.f32.mxu0 %v15563_v39 }
  0xdc   :  { %v8831_v18 = vpop.f32.mrf.mxu0  ;;  %v8833_v0 = vpop.f32.mrf.mxu1 }
  0xdd   :  { %15579 = vst [vmem:[#allocation26_spill] sm:$0xff] %v8833_v0 }
  0xde   :  { %v8835_v3 = vpop.f32.mrf.mxu0  ;;  %v8837_v62 = vpop.f32.mrf.mxu1  ;;  %7256 = vmatmul.mubr.msk.f32.gmra.mxu1 %vm109_vm0, %v8635_v12  ;;  %7288 = vmatmul.mubr.msk.f32.gmra.mxu0 %vm109_vm0, %v8218_v24 }
  0xdf   :  { %15580 = vst [vmem:[#allocation27_spill] sm:$0xff] %v8835_v3  ;;  %15581 = vst [vmem:[#allocation28_spill] sm:$0xff] %v8837_v62  ;;  %1049 = vmatprep.mubr.f32.mxu1 %v15563_v39  ;;  %1306 = vmatprep.mubr.f32.mxu0 %v15563_v39 }
  0xe0   :  { %v8845_v22 = vpop.f32.mrf.mxu0  ;;  %v8847_v63 = vpop.f32.mrf.mxu1 }
  0xe1   :  { %15582 = vst [vmem:[#allocation29_spill] sm:$0xff] %v8847_v63 }
  0xe2   :  { %v8849_v1 = vpop.f32.mrf.mxu0  ;;  %v8851_v0 = vpop.f32.mrf.mxu1  ;;  %7257 = vmatmul.mubr.msk.f32.gmra.mxu1 %vm109_vm0, %v8646_v15  ;;  %7289 = vmatmul.mubr.msk.f32.gmra.mxu0 %vm109_vm0, %v8234_v26 }
  0xe3   :  { %15583 = vst [vmem:[#allocation30_spill] sm:$0xff] %v8849_v1  ;;  %15584 = vst [vmem:[#allocation31_spill] sm:$0xff] %v8851_v0  ;;  %1055 = vmatprep.mubr.f32.mxu1 %v15563_v39  ;;  %1312 = vmatprep.mubr.f32.mxu0 %v15563_v39 }
  0xe4   :  { %v8859_v24 = vpop.f32.mrf.mxu0  ;;  %v8861_v62 = vpop.f32.mrf.mxu1 }
  0xe5   :  { %15585 = vst [vmem:[#allocation32_spill] sm:$0xff] %v8861_v62 }
  0xe6   :  { %v8863_v3 = vpop.f32.mrf.mxu0  ;;  %v8865_v63 = vpop.f32.mrf.mxu1  ;;  %7258 = vmatmul.mubr.msk.f32.gmra.mxu1 %vm109_vm0, %v8657_v20  ;;  %7290 = vmatmul.mubr.msk.f32.gmra.mxu0 %vm109_vm0, %v8250_v28 }
  0xe7   :  { %15586 = vst [vmem:[#allocation33_spill] sm:$0xff] %v8863_v3  ;;  %15587 = vst [vmem:[#allocation34_spill] sm:$0xff] %v8865_v63  ;;  %1061 = vmatprep.mubr.f32.mxu1 %v15563_v39  ;;  %1318 = vmatprep.mubr.f32.mxu0 %v15563_v39 }
  0xe8   :  { %v8873_v26 = vpop.f32.mrf.mxu0  ;;  %v8875_v0 = vpop.f32.mrf.mxu1 }
  0xe9   :  { %15588 = vst [vmem:[#allocation35_spill] sm:$0xff] %v8873_v26  ;;  %15589 = vst [vmem:[#allocation36_spill] sm:$0xff] %v8875_v0 }
  0xea   :  { %v8877_v1 = vpop.f32.mrf.mxu0  ;;  %v8879_v62 = vpop.f32.mrf.mxu1  ;;  %7259 = vmatmul.mubr.msk.f32.gmra.mxu1 %vm109_vm0, %v8668_v21  ;;  %7291 = vmatmul.mubr.msk.f32.gmra.mxu0 %vm109_vm0, %v8266_v30 }
  0xeb   :  { %15590 = vst [vmem:[#allocation37_spill] sm:$0xff] %v8877_v1  ;;  %15591 = vst [vmem:[#allocation38_spill] sm:$0xff] %v8879_v62  ;;  %1067 = vmatprep.mubr.f32.mxu1 %v15563_v39  ;;  %1324 = vmatprep.mubr.f32.mxu0 %v15563_v39 }
  0xec   :  { %v8887_v28 = vpop.f32.mrf.mxu0  ;;  %v8889_v63 = vpop.f32.mrf.mxu1 }
  0xed   :  { %15592 = vst [vmem:[#allocation39_spill] sm:$0xff] %v8887_v28  ;;  %15593 = vst [vmem:[#allocation40_spill] sm:$0xff] %v8889_v63 }
  0xee   :  { %v8891_v3 = vpop.f32.mrf.mxu0  ;;  %v8893_v0 = vpop.f32.mrf.mxu1  ;;  %7260 = vmatmul.mubr.msk.f32.gmra.mxu1 %vm109_vm0, %v8679_v44  ;;  %7292 = vmatmul.mubr.msk.f32.gmra.mxu0 %vm109_vm0, %v8282_v32 }
  0xef   :  { %15594 = vst [vmem:[#allocation41_spill] sm:$0xff] %v8891_v3  ;;  %15595 = vst [vmem:[#allocation42_spill] sm:$0xff] %v8893_v0  ;;  %1073 = vmatprep.mubr.f32.mxu1 %v15563_v39  ;;  %1330 = vmatprep.mubr.f32.mxu0 %v15563_v39 }
  0xf0   :  { %v8901_v30 = vpop.f32.mrf.mxu0  ;;  %v8903_v62 = vpop.f32.mrf.mxu1 }
  0xf1   :  { %15596 = vst [vmem:[#allocation43_spill] sm:$0xff] %v8901_v30  ;;  %15597 = vst [vmem:[#allocation44_spill] sm:$0xff] %v8903_v62 }
  0xf2   :  { %v8905_v1 = vpop.f32.mrf.mxu0  ;;  %v8907_v63 = vpop.f32.mrf.mxu1  ;;  %7261 = vmatmul.mubr.msk.f32.gmra.mxu1 %vm109_vm0, %v8690_v46  ;;  %7293 = vmatmul.mubr.msk.f32.gmra.mxu0 %vm109_vm0, %v8298_v34 }
  0xf3   :  { %15598 = vst [vmem:[#allocation45_spill] sm:$0xff] %v8905_v1  ;;  %15599 = vst [vmem:[#allocation46_spill] sm:$0xff] %v8907_v63  ;;  %1079 = vmatprep.mubr.f32.mxu1 %v15563_v39  ;;  %1336 = vmatprep.mubr.f32.mxu0 %v15563_v39 }
  0xf4   :  { %v8915_v32 = vpop.f32.mrf.mxu0  ;;  %v8917_v0 = vpop.f32.mrf.mxu1 }
  0xf5   :  { %15600 = vst [vmem:[#allocation47_spill] sm:$0xff] %v8915_v32  ;;  %15601 = vst [vmem:[#allocation48_spill] sm:$0xff] %v8917_v0 }
  0xf6   :  { %v8919_v3 = vpop.f32.mrf.mxu0  ;;  %v8921_v62 = vpop.f32.mrf.mxu1  ;;  %7262 = vmatmul.mubr.msk.f32.gmra.mxu1 %vm109_vm0, %v8701_v47  ;;  %7294 = vmatmul.mubr.msk.f32.gmra.mxu0 %vm109_vm0, %v8314_v36 }
  0xf7   :  { %15602 = vst [vmem:[#allocation49_spill] sm:$0xff] %v8919_v3  ;;  %15603 = vst [vmem:[#allocation50_spill] sm:$0xff] %v8921_v62  ;;  %1085 = vmatprep.mubr.f32.mxu1 %v15563_v39  ;;  %1342 = vmatprep.mubr.f32.mxu0 %v15563_v39 }
  0xf8   :  { %v8929_v34 = vpop.f32.mrf.mxu0  ;;  %v8931_v63 = vpop.f32.mrf.mxu1 }
  0xf9   :  { %15604 = vst [vmem:[#allocation51_spill] sm:$0xff] %v8929_v34  ;;  %15605 = vst [vmem:[#allocation52_spill] sm:$0xff] %v8931_v63 }
  0xfa   :  { %v8933_v1 = vpop.f32.mrf.mxu0  ;;  %v8935_v0 = vpop.f32.mrf.mxu1  ;;  %7263 = vmatmul.mubr.msk.f32.gmra.mxu1 %vm109_vm0, %v8712_v48  ;;  %7295 = vmatmul.mubr.msk.f32.gmra.mxu0 %vm109_vm0, %v8330_v38 }
  0xfb   :  { %15606 = vst [vmem:[#allocation53_spill] sm:$0xff] %v8933_v1  ;;  %15607 = vst [vmem:[#allocation54_spill] sm:$0xff] %v8935_v0  ;;  %1091 = vmatprep.mubr.f32.mxu1 %v15563_v39  ;;  %1348 = vmatprep.mubr.f32.mxu0 %v15563_v39 }
  0xfc   :  { %v8943_v36 = vpop.f32.mrf.mxu0  ;;  %v8945_v62 = vpop.f32.mrf.mxu1 }
  0xfd   :  { %15608 = vst [vmem:[#allocation55_spill] sm:$0xff] %v8943_v36  ;;  %15609 = vst [vmem:[#allocation56_spill] sm:$0xff] %v8945_v62 }
  0xfe   :  { %v8947_v3 = vpop.f32.mrf.mxu0  ;;  %v8949_v63 = vpop.f32.mrf.mxu1  ;;  %7264 = vmatmul.mubr.msk.f32.gmra.mxu1 %vm109_vm0, %v8723_v49  ;;  %7296 = vmatmul.mubr.msk.f32.gmra.mxu0 %vm109_vm0, %v8346_v40 }
  0xff   :  { %15610 = vst [vmem:[#allocation57_spill] sm:$0xff] %v8947_v3  ;;  %15611 = vst [vmem:[#allocation58_spill] sm:$0xff] %v8949_v63  ;;  %1097 = vmatprep.mubr.f32.mxu1 %v15563_v39  ;;  %1354 = vmatprep.mubr.f32.mxu0 %v15563_v39 }
 0x100   :  { %v8957_v38 = vpop.f32.mrf.mxu0  ;;  %v8959_v0 = vpop.f32.mrf.mxu1 }
 0x101   :  { %15612 = vst [vmem:[#allocation59_spill] sm:$0xff] %v8957_v38  ;;  %15613 = vst [vmem:[#allocation60_spill] sm:$0xff] %v8959_v0  ;;  %v2179_v0 = vld [vmem:[%s15537_s3 + $0x88] sm:$0xff] }
 0x102   :  { %v8961_v1 = vpop.f32.mrf.mxu0  ;;  %v8963_v62 = vpop.f32.mrf.mxu1  ;;  %7265 = vmatmul.mubr.msk.f32.gmra.mxu1 %vm109_vm0, %v8734_v43  ;;  %7297 = vmatmul.mubr.msk.f32.gmra.mxu0 %vm109_vm0, %v8362_v42 }
 0x103   :  { %15614 = vst [vmem:[#allocation61_spill] sm:$0xff] %v8961_v1  ;;  %15615 = vst [vmem:[#allocation62_spill] sm:$0xff] %v8963_v62  ;;  %1103 = vmatprep.mubr.f32.mxu1 %v15563_v39  ;;  %1360 = vmatprep.mubr.f32.mxu0 %v15563_v39  ;;  %v2178_v62 = vld [vmem:[%s15537_s3 + $0x80] sm:$0xff] }
 0x104   :  { %v8971_v40 = vpop.f32.mrf.mxu0  ;;  %v8973_v63 = vpop.f32.mrf.mxu1  ;;  %2413 = vmatprep.subr.mxu0 %v2179_v0 }
 0x105   :  { %15616 = vst [vmem:[#allocation63_spill] sm:$0xff] %v8971_v40  ;;  %15617 = vst [vmem:[#allocation64_spill] sm:$0xff] %v8973_v63  ;;  %2414 = vmatpush1.msra.mxu0 %v2178_v62 }
 0x106   :  { %v8981_v1 = vpop.f32.mrf.mxu0  ;;  %v8983_v42 = vpop.f32.mrf.mxu1  ;;  %7266 = vmatmul.mubr.msk.f32.gmra.mxu1 %vm109_vm0, %v8106_v6  ;;  %7298 = vmatmul.mubr.msk.f32.gmra.mxu0 %vm109_vm0, %v8381_v45 }
 0x107   :  { %15618 = vst [vmem:[#allocation65_spill] sm:$0xff] %v8981_v1  ;;  %15619 = vst [vmem:[#allocation66_spill] sm:$0xff] %v8983_v42  ;;  %1109 = vmatprep.mubr.f32.mxu1 %v15563_v39  ;;  %1366 = vmatprep.mubr.f32.mxu0 %v15563_v39 }
 0x108   :  { %v8991_v63 = vpop.f32.mrf.mxu0  ;;  %v8993_v0 = vpop.f32.mrf.mxu1 }
 0x109   :  { %15620 = vst [vmem:[#allocation67_spill] sm:$0xff] %v8991_v63  ;;  %15621 = vst [vmem:[#allocation68_spill] sm:$0xff] %v8993_v0  ;;  %v15672_v0 = vld [vmem:[#allocation2_spill] sm:$0xff] }
 0x10a   :  { %v8995_v40 = vpop.f32.mrf.mxu0  ;;  %v8997_v1 = vpop.f32.mrf.mxu1  ;;  %7267 = vmatmul.mubr.msk.f32.gmra.mxu1 %vm109_vm0, %v8127_v10  ;;  %7299 = vmatmul.mubr.msk.f32.gmra.mxu0 %vm109_vm0, %v8403_v50 }
 0x10b   :  { %15622 = vst [vmem:[#allocation69_spill] sm:$0xff] %v8995_v40  ;;  %15623 = vst [vmem:[#allocation70_spill] sm:$0xff] %v8997_v1  ;;  %1115 = vmatprep.mubr.f32.mxu1 %v15563_v39  ;;  %1372 = vmatprep.mubr.f32.mxu0 %v15563_v39 }
 0x10c   :  { %v9005_v6 = vpop.f32.mrf.mxu0  ;;  %v9007_v45 = vpop.f32.mrf.mxu1 }
 0x10d   :  { %15624 = vst [vmem:[#allocation71_spill] sm:$0xff] %v9005_v6  ;;  %15625 = vst [vmem:[#allocation72_spill] sm:$0xff] %v9007_v45 }
 0x10e   :  { %v9009_v42 = vpop.f32.mrf.mxu0  ;;  %v9011_v62 = vpop.f32.mrf.mxu1  ;;  %7268 = vmatmul.mubr.msk.f32.gmra.mxu1 %vm109_vm0, %v8150_v14  ;;  %7300 = vmatmul.mubr.msk.f32.gmra.mxu0 %vm109_vm0, %v8415_v51 }
 0x10f   :  { %15626 = vst [vmem:[#allocation73_spill] sm:$0xff] %v9009_v42  ;;  %15627 = vst [vmem:[#allocation74_spill] sm:$0xff] %v9011_v62  ;;  %1121 = vmatprep.mubr.f32.mxu1 %v15563_v39  ;;  %1378 = vmatprep.mubr.f32.mxu0 %v15563_v39 }
 0x110   :  { %v9019_v10 = vpop.f32.mrf.mxu0  ;;  %v9021_v50 = vpop.f32.mrf.mxu1 }
 0x111   :  { %15628 = vst [vmem:[#allocation75_spill] sm:$0xff] %v9019_v10  ;;  %15629 = vst [vmem:[#allocation76_spill] sm:$0xff] %v9021_v50 }
 0x112   :  { %v9023_v1 = vpop.f32.mrf.mxu0  ;;  %v9025_v45 = vpop.f32.mrf.mxu1  ;;  %7269 = vmatmul.mubr.msk.f32.gmra.mxu1 %vm109_vm0, %v8169_v17  ;;  %7301 = vmatmul.mubr.msk.f32.gmra.mxu0 %vm109_vm0, %v8426_v52 }
 0x113   :  { %15630 = vst [vmem:[#allocation77_spill] sm:$0xff] %v9023_v1  ;;  %15631 = vst [vmem:[#allocation78_spill] sm:$0xff] %v9025_v45  ;;  %1127 = vmatprep.mubr.f32.mxu1 %v15563_v39  ;;  %1384 = vmatprep.mubr.f32.mxu0 %v15563_v39 }
 0x114   :  { %v9033_v14 = vpop.f32.mrf.mxu0  ;;  %v9035_v51 = vpop.f32.mrf.mxu1 }
 0x115   :  { %15632 = vst [vmem:[#allocation79_spill] sm:$0xff] %v9033_v14  ;;  %15633 = vst [vmem:[#allocation80_spill] sm:$0xff] %v9035_v51 }
 0x116   :  { %v9037_v62 = vpop.f32.mrf.mxu0  ;;  %v9039_v50 = vpop.f32.mrf.mxu1  ;;  %7270 = vmatmul.mubr.msk.f32.gmra.mxu1 %vm109_vm0, %v8185_v19  ;;  %7302 = vmatmul.mubr.msk.f32.gmra.mxu0 %vm109_vm0, %v8437_v53 }
 0x117   :  { %15634 = vst [vmem:[#allocation81_spill] sm:$0xff] %v9037_v62  ;;  %15635 = vst [vmem:[#allocation82_spill] sm:$0xff] %v9039_v50  ;;  %1133 = vmatprep.mubr.f32.mxu1 %v15563_v39  ;;  %1390 = vmatprep.mubr.f32.mxu0 %v15563_v39 }
 0x118   :  { %v9047_v17 = vpop.f32.mrf.mxu0  ;;  %v9049_v52 = vpop.f32.mrf.mxu1 }
 0x119   :  { %15636 = vst [vmem:[#allocation83_spill] sm:$0xff] %v9047_v17  ;;  %15637 = vst [vmem:[#allocation84_spill] sm:$0xff] %v9049_v52 }
 0x11a   :  { %v9051_v45 = vpop.f32.mrf.mxu0  ;;  %v9053_v51 = vpop.f32.mrf.mxu1  ;;  %7271 = vmatmul.mubr.msk.f32.gmra.mxu1 %vm109_vm0, %v8207_v23  ;;  %7303 = vmatmul.mubr.msk.f32.gmra.mxu0 %vm109_vm0, %v8448_v54 }
 0x11b   :  { %15638 = vst [vmem:[#allocation85_spill] sm:$0xff] %v9051_v45  ;;  %15639 = vst [vmem:[#allocation86_spill] sm:$0xff] %v9053_v51  ;;  %1139 = vmatprep.mubr.f32.mxu1 %v15563_v39  ;;  %1396 = vmatprep.mubr.f32.mxu0 %v15563_v39 }
 0x11c   :  { %v9061_v19 = vpop.f32.mrf.mxu0  ;;  %v9063_v53 = vpop.f32.mrf.mxu1 }
 0x11d   :  { %15640 = vst [vmem:[#allocation87_spill] sm:$0xff] %v9061_v19  ;;  %15641 = vst [vmem:[#allocation88_spill] sm:$0xff] %v9063_v53 }
 0x11e   :  { %v9065_v50 = vpop.f32.mrf.mxu0  ;;  %v9067_v52 = vpop.f32.mrf.mxu1  ;;  %7272 = vmatmul.mubr.msk.f32.gmra.mxu1 %vm109_vm0, %v8223_v25  ;;  %7304 = vmatmul.mubr.msk.f32.gmra.mxu0 %vm109_vm0, %v8459_v55 }
 0x11f   :  { %15642 = vst [vmem:[#allocation89_spill] sm:$0xff] %v9065_v50  ;;  %15643 = vst [vmem:[#allocation90_spill] sm:$0xff] %v9067_v52  ;;  %1145 = vmatprep.mubr.f32.mxu1 %v15563_v39  ;;  %1402 = vmatprep.mubr.f32.mxu0 %v15563_v39 }
 0x120   :  { %v9075_v23 = vpop.f32.mrf.mxu0  ;;  %v9077_v54 = vpop.f32.mrf.mxu1 }
 0x121   :  { %15644 = vst [vmem:[#allocation91_spill] sm:$0xff] %v9075_v23  ;;  %15645 = vst [vmem:[#allocation92_spill] sm:$0xff] %v9077_v54 }
 0x122   :  { %v9079_v51 = vpop.f32.mrf.mxu0  ;;  %v9081_v53 = vpop.f32.mrf.mxu1  ;;  %7273 = vmatmul.mubr.msk.f32.gmra.mxu1 %vm109_vm0, %v8239_v27  ;;  %7305 = vmatmul.mubr.msk.f32.gmra.mxu0 %vm109_vm0, %v8470_v56 }
 0x123   :  { %15646 = vst [vmem:[#allocation93_spill] sm:$0xff] %v9079_v51  ;;  %15647 = vst [vmem:[#allocation94_spill] sm:$0xff] %v9081_v53  ;;  %1151 = vmatprep.mubr.f32.mxu1 %v15563_v39  ;;  %1408 = vmatprep.mubr.f32.mxu0 %v15563_v39 }
 0x124   :  { %v9089_v25 = vpop.f32.mrf.mxu0  ;;  %v9091_v55 = vpop.f32.mrf.mxu1 }
 0x125   :  { %15648 = vst [vmem:[#allocation95_spill] sm:$0xff] %v9089_v25  ;;  %15649 = vst [vmem:[#allocation96_spill] sm:$0xff] %v9091_v55 }
 0x126   :  { %v9093_v52 = vpop.f32.mrf.mxu0  ;;  %v9095_v54 = vpop.f32.mrf.mxu1  ;;  %7274 = vmatmul.mubr.msk.f32.gmra.mxu1 %vm109_vm0, %v8255_v29  ;;  %7306 = vmatmul.mubr.msk.f32.gmra.mxu0 %vm109_vm0, %v8481_v57 }
 0x127   :  { %15650 = vst [vmem:[#allocation97_spill] sm:$0xff] %v9093_v52  ;;  %15651 = vst [vmem:[#allocation98_spill] sm:$0xff] %v9095_v54  ;;  %1157 = vmatprep.mubr.f32.mxu1 %v15563_v39  ;;  %1414 = vmatprep.mubr.f32.mxu0 %v15563_v39 }
 0x128   :  { %v9103_v27 = vpop.f32.mrf.mxu0  ;;  %v9105_v56 = vpop.f32.mrf.mxu1 }
 0x129   :  { %15652 = vst [vmem:[#allocation99_spill] sm:$0xff] %v9103_v27  ;;  %15653 = vst [vmem:[#allocation100_spill] sm:$0xff] %v9105_v56 }
 0x12a   :  { %v9107_v53 = vpop.f32.mrf.mxu0  ;;  %v9109_v55 = vpop.f32.mrf.mxu1  ;;  %7275 = vmatmul.mubr.msk.f32.gmra.mxu1 %vm109_vm0, %v8271_v31  ;;  %7307 = vmatmul.mubr.msk.f32.gmra.mxu0 %vm109_vm0, %v8492_v58 }
 0x12b   :  { %15654 = vst [vmem:[#allocation101_spill] sm:$0xff] %v9107_v53  ;;  %15655 = vst [vmem:[#allocation102_spill] sm:$0xff] %v9109_v55  ;;  %1163 = vmatprep.mubr.f32.mxu1 %v15563_v39  ;;  %1420 = vmatprep.mubr.f32.mxu0 %v15563_v39 }
 0x12c   :  { %v9117_v29 = vpop.f32.mrf.mxu0  ;;  %v9119_v57 = vpop.f32.mrf.mxu1 }
 0x12d   :  { %15656 = vst [vmem:[#allocation103_spill] sm:$0xff] %v9117_v29  ;;  %15657 = vst [vmem:[#allocation104_spill] sm:$0xff] %v9119_v57 }
 0x12e   :  { %v9121_v54 = vpop.f32.mrf.mxu0  ;;  %v9123_v56 = vpop.f32.mrf.mxu1  ;;  %7276 = vmatmul.mubr.msk.f32.gmra.mxu1 %vm109_vm0, %v8287_v33  ;;  %7308 = vmatmul.mubr.msk.f32.gmra.mxu0 %vm109_vm0, %v8503_v59 }
 0x12f   :  { %15658 = vst [vmem:[#allocation105_spill] sm:$0xff] %v9121_v54  ;;  %15659 = vst [vmem:[#allocation106_spill] sm:$0xff] %v9123_v56  ;;  %1169 = vmatprep.mubr.f32.mxu1 %v15563_v39  ;;  %1426 = vmatprep.mubr.f32.mxu0 %v15563_v39 }
 0x130   :  { %v9131_v31 = vpop.f32.mrf.mxu0  ;;  %v9133_v58 = vpop.f32.mrf.mxu1 }
 0x131   :  { %15660 = vst [vmem:[#allocation107_spill] sm:$0xff] %v9131_v31  ;;  %15661 = vst [vmem:[#allocation108_spill] sm:$0xff] %v9133_v58 }
 0x132   :  { %v9135_v55 = vpop.f32.mrf.mxu0  ;;  %v9137_v57 = vpop.f32.mrf.mxu1  ;;  %7277 = vmatmul.mubr.msk.f32.gmra.mxu1 %vm109_vm0, %v8303_v35  ;;  %7309 = vmatmul.mubr.msk.f32.gmra.mxu0 %vm109_vm0, %v8514_v60 }
 0x133   :  { %15662 = vst [vmem:[#allocation109_spill] sm:$0xff] %v9135_v55  ;;  %15663 = vst [vmem:[#allocation110_spill] sm:$0xff] %v9137_v57  ;;  %1175 = vmatprep.mubr.f32.mxu1 %v15563_v39  ;;  %1432 = vmatprep.mubr.f32.mxu0 %v15563_v39  ;;  %v7958_v55 = vld [vmem:[%s15536_s1 + $0x108] sm:$0xff] }
 0x134   :  { %v9145_v33 = vpop.f32.mrf.mxu0  ;;  %v9147_v59 = vpop.f32.mrf.mxu1 }
 0x135   :  { %15664 = vst [vmem:[#allocation111_spill] sm:$0xff] %v9145_v33  ;;  %15665 = vst [vmem:[#allocation112_spill] sm:$0xff] %v9147_v59 }
 0x136   :  { %v9149_v56 = vpop.f32.mrf.mxu0  ;;  %v9151_v58 = vpop.f32.mrf.mxu1  ;;  %7278 = vmatmul.mubr.msk.f32.gmra.mxu1 %vm109_vm0, %v8319_v37  ;;  %7310 = vmatmul.mubr.msk.f32.gmra.mxu0 %vm109_vm0, %v8525_v61 }
 0x137   :  { %15666 = vst [vmem:[#allocation113_spill] sm:$0xff] %v9149_v56  ;;  %15667 = vst [vmem:[#allocation114_spill] sm:$0xff] %v9151_v58  ;;  %1181 = vmatprep.mubr.f32.mxu1 %v15563_v39  ;;  %1438 = vmatprep.mubr.f32.mxu0 %v15563_v39  ;;  %v15673_v58 = vld [vmem:[#allocation5_spill] sm:$0xff] }
 0x138   :  { %v9159_v35 = vpop.f32.mrf.mxu0  ;;  %v9161_v60 = vpop.f32.mrf.mxu1 }
 0x139   :  { %15668 = vst [vmem:[#allocation115_spill] sm:$0xff] %v9159_v35  ;;  %15669 = vst [vmem:[#allocation116_spill] sm:$0xff] %v9161_v60  ;;  %v15690_v35 = vld [vmem:[#allocation8_spill] sm:$0xff] }
 0x13a   :  { %v9163_v57 = vpop.f32.mrf.mxu0  ;;  %v9165_v59 = vpop.f32.mrf.mxu1  ;;  %7279 = vmatmul.mubr.msk.f32.gmra.mxu1 %vm109_vm0, %v15672_v0  ;;  %7311 = vmatmul.mubr.msk.f32.gmra.mxu0 %vm109_vm0, %v15673_v58 }
 0x13b   :  { %15670 = vst [vmem:[#allocation117_spill] sm:$0xff] %v9163_v57  ;;  %15671 = vst [vmem:[#allocation118_spill] sm:$0xff] %v9165_v59  ;;  %1187 = vmatprep.mubr.f32.mxu1 %v15563_v39  ;;  %1444 = vmatprep.mubr.f32.mxu0 %v15563_v39  ;;  %v15678_v57 = vld [vmem:[#allocation3_spill] sm:$0xff]  ;;  %v15679_v59 = vld [vmem:[#allocation6_spill] sm:$0xff] }
 0x13c   :  { %v9173_v37 = vpop.f32.mrf.mxu0  ;;  %v9175_v61 = vpop.f32.mrf.mxu1 }
 0x13d   :  { %15674 = vst [vmem:[#allocation2_spill] sm:$0xff] %v9173_v37  ;;  %15675 = vst [vmem:[#allocation5_spill] sm:$0xff] %v9175_v61  ;;  %v2171_v61 = vld [vmem:[%s15537_s3 + $0x48] sm:$0xff] }
 0x13e   :  { %v9177_v56 = vpop.f32.mrf.mxu0  ;;  %v9179_v60 = vpop.f32.mrf.mxu1  ;;  %7280 = vmatmul.mubr.msk.f32.gmra.mxu1 %vm109_vm0, %v15678_v57  ;;  %7312 = vmatmul.mubr.msk.f32.gmra.mxu0 %vm109_vm0, %v15679_v59  ;;  %v15684_v57 = vld [vmem:[#allocation4_spill] sm:$0xff]  ;;  %v15685_v59 = vld [vmem:[#allocation7_spill] sm:$0xff] }
 0x13f   :  { %15676 = vst [vmem:[#allocation119_spill] sm:$0xff] %v9177_v56  ;;  %15677 = vst [vmem:[#allocation120_spill] sm:$0xff] %v9179_v60  ;;  %1193 = vmatprep.mubr.f32.mxu1 %v15563_v39  ;;  %1450 = vmatprep.mubr.f32.mxu0 %v15563_v39 }
 0x140   :  { %v9187_v0 = vpop.f32.mrf.mxu0  ;;  %v9189_v58 = vpop.f32.mrf.mxu1  ;;  %2415 = vmatprep.subr.mxu0 %v2171_v61  ;;  %v2180_v61 = vld [vmem:[%s15537_s3 + $0x90] sm:$0xff] }
 0x141   :  { %15680 = vst [vmem:[#allocation3_spill] sm:$0xff] %v9187_v0  ;;  %15681 = vst [vmem:[#allocation6_spill] sm:$0xff] %v9189_v58  ;;  %v2170_v0 = vld [vmem:[%s15537_s3 + $0x40] sm:$0xff] }
 0x142   :  { %v9194_v56 = vpop.f32.mrf.mxu0  ;;  %v9196_v60 = vpop.f32.mrf.mxu1  ;;  %7281 = vmatmul.mubr.msk.f32.gmra.mxu1 %vm109_vm0, %v15684_v57  ;;  %7313 = vmatmul.mubr.msk.f32.gmra.mxu0 %vm109_vm0, %v15685_v59  ;;  %v2181_v57 = vld [vmem:[%s15537_s3 + $0x98] sm:$0xff] }
 0x143   :  { %15682 = vst [vmem:[#allocation121_spill] sm:$0xff] %v9194_v56  ;;  %15683 = vst [vmem:[#allocation122_spill] sm:$0xff] %v9196_v60  ;;  %1456 = vmatprep.mubr.f32.mxu0 %v15563_v39  ;;  %1713 = vmatprep.mubr.f32.mxu1 %v15563_v39  ;;  %v2188_v60 = vld [vmem:[%s15537_s3 + $0xd0] sm:$0xff] }
 0x144   :  { %v9207_v58 = vpop.f32.mrf.mxu0  ;;  %v9209_v37 = vpop.f32.mrf.mxu1  ;;  %2416 = vmatpush1.msra.mxu0 %v2170_v0  ;;  %v2163_v0 = vld [vmem:[%s15537_s3 + $0x8] sm:$0xff] }
 0x145   :  { %15686 = vst [vmem:[#allocation4_spill] sm:$0xff] %v9207_v58  ;;  %15687 = vst [vmem:[#allocation7_spill] sm:$0xff] %v9209_v37  ;;  %v7909_v37 = vld [vmem:[%s15536_s1] sm:$0xff]  ;;  %2417 = vmatprep.subr.mxu0 %v2163_v0 }
 0x146   :  { %v9217_v59 = vpop.f32.mrf.mxu0  ;;  %v9219_v56 = vpop.f32.mrf.mxu1  ;;  %7314 = vmatmul.mubr.msk.f32.gmra.mxu0 %vm109_vm0, %v15690_v35  ;;  %7346 = vmatmul.mubr.msk.f32.vlgmr.msra.gmra.mxu1 %vm109_vm0, %v7909_v37  ;;  %v2162_v37 = vld [vmem:[%s15537_s3] sm:$0xff] }
 0x147   :  { %15688 = vst [vmem:[#allocation123_spill] sm:$0xff] %v9217_v59  ;;  %15689 = vst [vmem:[#allocation124_spill] sm:$0xff] %v9219_v56  ;;  %2861 = vmatpush1.msra.mxu1 %v2188_v60  ;;  %1462 = vmatprep.mubr.f32.mxu0 %v15563_v39  ;;  %v2173_v59 = vld [vmem:[%s15537_s3 + $0x58] sm:$0xff] }
 0x148   :  { %v9234_v56 = vpop.f32.mrf.mxu0  ;;  %v9236_v35 = vpop.f32.mrf.mxu1  ;;  %1719 = vmatprep.mubr.f32.mxu1 %v15563_v39  ;;  %2862 = vmatprep.subr.mxu1 %v2181_v57  ;;  %v7910_v57 = vld [vmem:[%s15536_s1 + $0x8] sm:$0xff] }
 0x149   :  { %15691 = vst [vmem:[#allocation8_spill] sm:$0xff] %v9234_v56  ;;  %15692 = vst [vmem:[#allocation125_spill] sm:$0xff] %v9236_v35  ;;  %2863 = vmatpush1.msra.mxu1 %v2180_v61  ;;  %v2172_v61 = vld [vmem:[%s15537_s3 + $0x50] sm:$0xff]  ;;  %2418 = vmatpush1.msra.mxu0 %v2162_v37  ;;  %v7957_v56 = vld [vmem:[%s15536_s1 + $0x100] sm:$0xff] }
 0x14a   :  { %v9245_v60 = vpop.f32.mrf.mxu0  ;;  %v9247_v58 = vpop.f32.mrf.mxu1  ;;  %7315 = vmatmul.mubr.msk.f32.gmra.mxu0 %vm109_vm0, %v8580_v2  ;;  %7347 = vmatmul.mubr.msk.f32.gmra.mxu1 %vm109_vm0, %v7910_v57  ;;  %v7911_v57 = vld [vmem:[%s15536_s1 + $0x10] sm:$0xff] }
 0x14b   :  { %15693 = vst [vmem:[#allocation126_spill] sm:$0xff] %v9245_v60  ;;  %15694 = vst [vmem:[#allocation127_spill] sm:$0xff] %v9247_v58  ;;  %1468 = vmatprep.mubr.f32.mxu0 %v15563_v39  ;;  %1725 = vmatprep.mubr.f32.mxu1 %v15563_v39 }
 0x14c   :  { %v9260_v0 = vpop.f32.mrf.mxu0  ;;  %v9262_v58 = vpop.f32.mrf.mxu1  ;;  %2864 = vmatprep.subr.mxu1 %v2173_v59 }
 0x14d   :  { %15695 = vst [vmem:[#allocation128_spill] sm:$0xff] %v9260_v0  ;;  %15696 = vst [vmem:[#allocation129_spill] sm:$0xff] %v9262_v58  ;;  %2865 = vmatpush1.msra.mxu1 %v2172_v61 }
 0x14e   :  { %v9264_v2 = vpop.f32.mrf.mxu0  ;;  %v9266_v35 = vpop.f32.mrf.mxu1  ;;  %7316 = vmatmul.mubr.msk.f32.gmra.mxu0 %vm109_vm0, %v8591_v4  ;;  %7348 = vmatmul.mubr.msk.f32.gmra.mxu1 %vm109_vm0, %v7911_v57  ;;  %v7912_v4 = vld [vmem:[%s15536_s1 + $0x18] sm:$0xff] }
 0x14f   :  { %15697 = vst [vmem:[#allocation130_spill] sm:$0xff] %v9264_v2  ;;  %15698 = vst [vmem:[#allocation131_spill] sm:$0xff] %v9266_v35  ;;  %1474 = vmatprep.mubr.f32.mxu0 %v15563_v39  ;;  %1731 = vmatprep.mubr.f32.mxu1 %v15563_v39  ;;  %v9795_v2 = vld [vmem:[%s15536_s1 + $0x1f0] sm:$0xff] }
 0x150   :  { %v9276_v37 = vpop.f32.mrf.mxu0  ;;  %v9278_v59 = vpop.f32.mrf.mxu1 }
 0x151   :  { %15699 = vst [vmem:[#allocation132_spill] sm:$0xff] %v9276_v37  ;;  %15700 = vst [vmem:[#allocation133_spill] sm:$0xff] %v9278_v59  ;;  %v9816_v37 = vld [vmem:[%s15536_s1 + $0x1f8] sm:$0xff] }
 0x152   :  { %v9280_v61 = vpop.f32.mrf.mxu0  ;;  %v9282_v35 = vpop.f32.mrf.mxu1  ;;  %7317 = vmatmul.mubr.msk.f32.gmra.mxu0 %vm109_vm0, %v8602_v7  ;;  %7349 = vmatmul.mubr.msk.f32.gmra.mxu1 %vm109_vm0, %v7912_v4  ;;  %v7913_v7 = vld [vmem:[%s15536_s1 + $0x20] sm:$0xff] }
 0x153   :  { %15701 = vst [vmem:[#allocation134_spill] sm:$0xff] %v9280_v61  ;;  %15702 = vst [vmem:[#allocation135_spill] sm:$0xff] %v9282_v35  ;;  %1480 = vmatprep.mubr.f32.mxu0 %v15563_v39  ;;  %1737 = vmatprep.mubr.f32.mxu1 %v15563_v39  ;;  %v9753_v61 = vld [vmem:[%s15536_s1 + $0x1e0] sm:$0xff] }
 0x154   :  { %v9292_v57 = vpop.f32.mrf.mxu0  ;;  %v9294_v59 = vpop.f32.mrf.mxu1 }
 0x155   :  { %15703 = vst [vmem:[#allocation136_spill] sm:$0xff] %v9292_v57  ;;  %15704 = vst [vmem:[#allocation137_spill] sm:$0xff] %v9294_v59  ;;  %v9774_v57 = vld [vmem:[%s15536_s1 + $0x1e8] sm:$0xff] }
 0x156   :  { %v9296_v58 = vpop.f32.mrf.mxu0  ;;  %v9298_v35 = vpop.f32.mrf.mxu1  ;;  %7318 = vmatmul.mubr.msk.f32.gmra.mxu0 %vm109_vm0, %v8613_v8  ;;  %7350 = vmatmul.mubr.msk.f32.gmra.mxu1 %vm109_vm0, %v7913_v7  ;;  %v7914_v8 = vld [vmem:[%s15536_s1 + $0x28] sm:$0xff] }
 0x157   :  { %15705 = vst [vmem:[#allocation138_spill] sm:$0xff] %v9296_v58  ;;  %15706 = vst [vmem:[#allocation139_spill] sm:$0xff] %v9298_v35  ;;  %1486 = vmatprep.mubr.f32.mxu0 %v15563_v39  ;;  %1743 = vmatprep.mubr.f32.mxu1 %v15563_v39 }
 0x158   :  { %v9308_v4 = vpop.f32.mrf.mxu0  ;;  %v9310_v59 = vpop.f32.mrf.mxu1 }
 0x159   :  { %15707 = vst [vmem:[#allocation140_spill] sm:$0xff] %v9308_v4  ;;  %15708 = vst [vmem:[#allocation141_spill] sm:$0xff] %v9310_v59  ;;  %v9732_v4 = vld [vmem:[%s15536_s1 + $0x1d8] sm:$0xff] }
 0x15a   :  { %v9312_v58 = vpop.f32.mrf.mxu0  ;;  %v9314_v35 = vpop.f32.mrf.mxu1  ;;  %7319 = vmatmul.mubr.msk.f32.gmra.mxu0 %vm109_vm0, %v8624_v11  ;;  %7351 = vmatmul.mubr.msk.f32.gmra.mxu1 %vm109_vm0, %v7914_v8  ;;  %v7915_v11 = vld [vmem:[%s15536_s1 + $0x30] sm:$0xff] }
 0x15b   :  { %15709 = vst [vmem:[#allocation142_spill] sm:$0xff] %v9312_v58  ;;  %15710 = vst [vmem:[#allocation143_spill] sm:$0xff] %v9314_v35  ;;  %1492 = vmatprep.mubr.f32.mxu0 %v15563_v39  ;;  %1749 = vmatprep.mubr.f32.mxu1 %v15563_v39 }
 0x15c   :  { %v9324_v7 = vpop.f32.mrf.mxu0  ;;  %v9326_v59 = vpop.f32.mrf.mxu1 }
 0x15d   :  { %15711 = vst [vmem:[#allocation144_spill] sm:$0xff] %v9324_v7  ;;  %15712 = vst [vmem:[#allocation145_spill] sm:$0xff] %v9326_v59  ;;  %v9711_v7 = vld [vmem:[%s15536_s1 + $0x1d0] sm:$0xff] }
 0x15e   :  { %v9328_v58 = vpop.f32.mrf.mxu0  ;;  %v9330_v35 = vpop.f32.mrf.mxu1  ;;  %7320 = vmatmul.mubr.msk.f32.gmra.mxu0 %vm109_vm0, %v8635_v12  ;;  %7352 = vmatmul.mubr.msk.f32.gmra.mxu1 %vm109_vm0, %v7915_v11  ;;  %v7916_v12 = vld [vmem:[%s15536_s1 + $0x38] sm:$0xff] }
 0x15f   :  { %15713 = vst [vmem:[#allocation146_spill] sm:$0xff] %v9328_v58  ;;  %15714 = vst [vmem:[#allocation147_spill] sm:$0xff] %v9330_v35  ;;  %1498 = vmatprep.mubr.f32.mxu0 %v15563_v39  ;;  %1755 = vmatprep.mubr.f32.mxu1 %v15563_v39 }
 0x160   :  { %v9340_v8 = vpop.f32.mrf.mxu0  ;;  %v9342_v59 = vpop.f32.mrf.mxu1 }
 0x161   :  { %15715 = vst [vmem:[#allocation148_spill] sm:$0xff] %v9340_v8  ;;  %15716 = vst [vmem:[#allocation149_spill] sm:$0xff] %v9342_v59  ;;  %v9690_v8 = vld [vmem:[%s15536_s1 + $0x1c8] sm:$0xff] }
 0x162   :  { %v9344_v58 = vpop.f32.mrf.mxu0  ;;  %v9346_v35 = vpop.f32.mrf.mxu1  ;;  %7321 = vmatmul.mubr.msk.f32.gmra.mxu0 %vm109_vm0, %v8646_v15  ;;  %7353 = vmatmul.mubr.msk.f32.gmra.mxu1 %vm109_vm0, %v7916_v12  ;;  %v7917_v15 = vld [vmem:[%s15536_s1 + $0x40] sm:$0xff] }
 0x163   :  { %15717 = vst [vmem:[#allocation150_spill] sm:$0xff] %v9344_v58  ;;  %15718 = vst [vmem:[#allocation151_spill] sm:$0xff] %v9346_v35  ;;  %1504 = vmatprep.mubr.f32.mxu0 %v15563_v39  ;;  %1761 = vmatprep.mubr.f32.mxu1 %v15563_v39 }
 0x164   :  { %v9356_v11 = vpop.f32.mrf.mxu0  ;;  %v9358_v59 = vpop.f32.mrf.mxu1 }
 0x165   :  { %15719 = vst [vmem:[#allocation152_spill] sm:$0xff] %v9356_v11  ;;  %15720 = vst [vmem:[#allocation153_spill] sm:$0xff] %v9358_v59  ;;  %v9669_v11 = vld [vmem:[%s15536_s1 + $0x1c0] sm:$0xff] }
 0x166   :  { %v9360_v58 = vpop.f32.mrf.mxu0  ;;  %v9362_v35 = vpop.f32.mrf.mxu1  ;;  %7322 = vmatmul.mubr.msk.f32.gmra.mxu0 %vm109_vm0, %v8657_v20  ;;  %7354 = vmatmul.mubr.msk.f32.gmra.mxu1 %vm109_vm0, %v7917_v15  ;;  %v7918_v20 = vld [vmem:[%s15536_s1 + $0x48] sm:$0xff] }
 0x167   :  { %15721 = vst [vmem:[#allocation154_spill] sm:$0xff] %v9360_v58  ;;  %15722 = vst [vmem:[#allocation155_spill] sm:$0xff] %v9362_v35  ;;  %1510 = vmatprep.mubr.f32.mxu0 %v15563_v39  ;;  %1767 = vmatprep.mubr.f32.mxu1 %v15563_v39 }
 0x168   :  { %v9372_v12 = vpop.f32.mrf.mxu0  ;;  %v9374_v59 = vpop.f32.mrf.mxu1 }
 0x169   :  { %15723 = vst [vmem:[#allocation156_spill] sm:$0xff] %v9372_v12  ;;  %15724 = vst [vmem:[#allocation157_spill] sm:$0xff] %v9374_v59  ;;  %v9648_v12 = vld [vmem:[%s15536_s1 + $0x1b8] sm:$0xff] }
 0x16a   :  { %v9376_v58 = vpop.f32.mrf.mxu0  ;;  %v9378_v35 = vpop.f32.mrf.mxu1  ;;  %7323 = vmatmul.mubr.msk.f32.gmra.mxu0 %vm109_vm0, %v8668_v21  ;;  %7355 = vmatmul.mubr.msk.f32.gmra.mxu1 %vm109_vm0, %v7918_v20  ;;  %v7919_v21 = vld [vmem:[%s15536_s1 + $0x50] sm:$0xff] }
 0x16b   :  { %15725 = vst [vmem:[#allocation158_spill] sm:$0xff] %v9376_v58  ;;  %15726 = vst [vmem:[#allocation159_spill] sm:$0xff] %v9378_v35  ;;  %1516 = vmatprep.mubr.f32.mxu0 %v15563_v39  ;;  %1773 = vmatprep.mubr.f32.mxu1 %v15563_v39 }
 0x16c   :  { %v9388_v15 = vpop.f32.mrf.mxu0  ;;  %v9390_v59 = vpop.f32.mrf.mxu1 }
 0x16d   :  { %15727 = vst [vmem:[#allocation160_spill] sm:$0xff] %v9388_v15  ;;  %15728 = vst [vmem:[#allocation161_spill] sm:$0xff] %v9390_v59  ;;  %v9627_v15 = vld [vmem:[%s15536_s1 + $0x1b0] sm:$0xff] }
 0x16e   :  { %v9392_v58 = vpop.f32.mrf.mxu0  ;;  %v9394_v35 = vpop.f32.mrf.mxu1  ;;  %7324 = vmatmul.mubr.msk.f32.gmra.mxu0 %vm109_vm0, %v8679_v44  ;;  %7356 = vmatmul.mubr.msk.f32.gmra.mxu1 %vm109_vm0, %v7919_v21  ;;  %v7920_v44 = vld [vmem:[%s15536_s1 + $0x58] sm:$0xff] }
 0x16f   :  { %15729 = vst [vmem:[#allocation162_spill] sm:$0xff] %v9392_v58  ;;  %15730 = vst [vmem:[#allocation163_spill] sm:$0xff] %v9394_v35  ;;  %1522 = vmatprep.mubr.f32.mxu0 %v15563_v39  ;;  %1779 = vmatprep.mubr.f32.mxu1 %v15563_v39 }
 0x170   :  { %v9404_v20 = vpop.f32.mrf.mxu0  ;;  %v9406_v59 = vpop.f32.mrf.mxu1 }
 0x171   :  { %15731 = vst [vmem:[#allocation164_spill] sm:$0xff] %v9404_v20  ;;  %15732 = vst [vmem:[#allocation165_spill] sm:$0xff] %v9406_v59  ;;  %v9606_v20 = vld [vmem:[%s15536_s1 + $0x1a8] sm:$0xff] }
 0x172   :  { %v9408_v58 = vpop.f32.mrf.mxu0  ;;  %v9410_v35 = vpop.f32.mrf.mxu1  ;;  %7325 = vmatmul.mubr.msk.f32.gmra.mxu0 %vm109_vm0, %v8690_v46  ;;  %7357 = vmatmul.mubr.msk.f32.gmra.mxu1 %vm109_vm0, %v7920_v44  ;;  %v7921_v46 = vld [vmem:[%s15536_s1 + $0x60] sm:$0xff] }
 0x173   :  { %15733 = vst [vmem:[#allocation166_spill] sm:$0xff] %v9408_v58  ;;  %15734 = vst [vmem:[#allocation167_spill] sm:$0xff] %v9410_v35  ;;  %1528 = vmatprep.mubr.f32.mxu0 %v15563_v39  ;;  %1785 = vmatprep.mubr.f32.mxu1 %v15563_v39 }
 0x174   :  { %v9420_v21 = vpop.f32.mrf.mxu0  ;;  %v9422_v59 = vpop.f32.mrf.mxu1 }
 0x175   :  { %15735 = vst [vmem:[#allocation168_spill] sm:$0xff] %v9420_v21  ;;  %15736 = vst [vmem:[#allocation169_spill] sm:$0xff] %v9422_v59  ;;  %v9585_v21 = vld [vmem:[%s15536_s1 + $0x1a0] sm:$0xff] }
 0x176   :  { %v9424_v58 = vpop.f32.mrf.mxu0  ;;  %v9426_v35 = vpop.f32.mrf.mxu1  ;;  %7326 = vmatmul.mubr.msk.f32.gmra.mxu0 %vm109_vm0, %v8701_v47  ;;  %7358 = vmatmul.mubr.msk.f32.gmra.mxu1 %vm109_vm0, %v7921_v46  ;;  %v7922_v47 = vld [vmem:[%s15536_s1 + $0x68] sm:$0xff] }
 0x177   :  { %15737 = vst [vmem:[#allocation170_spill] sm:$0xff] %v9424_v58  ;;  %15738 = vst [vmem:[#allocation171_spill] sm:$0xff] %v9426_v35  ;;  %1534 = vmatprep.mubr.f32.mxu0 %v15563_v39  ;;  %1791 = vmatprep.mubr.f32.mxu1 %v15563_v39 }
 0x178   :  { %v9436_v44 = vpop.f32.mrf.mxu0  ;;  %v9438_v59 = vpop.f32.mrf.mxu1 }
 0x179   :  { %15739 = vst [vmem:[#allocation172_spill] sm:$0xff] %v9436_v44  ;;  %15740 = vst [vmem:[#allocation173_spill] sm:$0xff] %v9438_v59  ;;  %v9564_v44 = vld [vmem:[%s15536_s1 + $0x198] sm:$0xff] }
 0x17a   :  { %v9440_v58 = vpop.f32.mrf.mxu0  ;;  %v9442_v35 = vpop.f32.mrf.mxu1  ;;  %7327 = vmatmul.mubr.msk.f32.gmra.mxu0 %vm109_vm0, %v8712_v48  ;;  %7359 = vmatmul.mubr.msk.f32.gmra.mxu1 %vm109_vm0, %v7922_v47  ;;  %v7923_v48 = vld [vmem:[%s15536_s1 + $0x70] sm:$0xff] }
 0x17b   :  { %15741 = vst [vmem:[#allocation174_spill] sm:$0xff] %v9440_v58  ;;  %15742 = vst [vmem:[#allocation175_spill] sm:$0xff] %v9442_v35  ;;  %1540 = vmatprep.mubr.f32.mxu0 %v15563_v39  ;;  %1797 = vmatprep.mubr.f32.mxu1 %v15563_v39 }
 0x17c   :  { %v9452_v46 = vpop.f32.mrf.mxu0  ;;  %v9454_v59 = vpop.f32.mrf.mxu1 }
 0x17d   :  { %15743 = vst [vmem:[#allocation176_spill] sm:$0xff] %v9452_v46  ;;  %15744 = vst [vmem:[#allocation177_spill] sm:$0xff] %v9454_v59  ;;  %v9522_v46 = vld [vmem:[%s15536_s1 + $0x188] sm:$0xff] }
 0x17e   :  { %v9456_v58 = vpop.f32.mrf.mxu0  ;;  %v9458_v35 = vpop.f32.mrf.mxu1  ;;  %7328 = vmatmul.mubr.msk.f32.gmra.mxu0 %vm109_vm0, %v8723_v49  ;;  %7360 = vmatmul.mubr.msk.f32.gmra.mxu1 %vm109_vm0, %v7923_v48  ;;  %v7924_v49 = vld [vmem:[%s15536_s1 + $0x78] sm:$0xff] }
 0x17f   :  { %15745 = vst [vmem:[#allocation178_spill] sm:$0xff] %v9456_v58  ;;  %15746 = vst [vmem:[#allocation179_spill] sm:$0xff] %v9458_v35  ;;  %1546 = vmatprep.mubr.f32.mxu0 %v15563_v39  ;;  %1803 = vmatprep.mubr.f32.mxu1 %v15563_v39 }
 0x180   :  { %v9468_v47 = vpop.f32.mrf.mxu0  ;;  %v9470_v59 = vpop.f32.mrf.mxu1 }
 0x181   :  { %15747 = vst [vmem:[#allocation180_spill] sm:$0xff] %v9468_v47  ;;  %15748 = vst [vmem:[#allocation181_spill] sm:$0xff] %v9470_v59 }
 0x182   :  { %v9472_v58 = vpop.f32.mrf.mxu0  ;;  %v9474_v35 = vpop.f32.mrf.mxu1  ;;  %7329 = vmatmul.mubr.msk.f32.gmra.mxu0 %vm109_vm0, %v8734_v43  ;;  %7361 = vmatmul.mubr.msk.f32.gmra.mxu1 %vm109_vm0, %v7924_v49  ;;  %v9495_v43 = vld [vmem:[%s15536_s1 + $0x180] sm:$0xff] }
 0x183   :  { %15749 = vst [vmem:[#allocation182_spill] sm:$0xff] %v9472_v58  ;;  %15750 = vst [vmem:[#allocation183_spill] sm:$0xff] %v9474_v35  ;;  %1552 = vmatprep.mubr.f32.mxu0 %v15563_v39  ;;  %1809 = vmatprep.mubr.f32.mxu1 %v15563_v39  ;;  %v7926_v49 = vld [vmem:[%s15536_s1 + $0x80] sm:$0xff] }
 0x184   :  { %v9484_v48 = vpop.f32.mrf.mxu0  ;;  %v9486_v59 = vpop.f32.mrf.mxu1 }
 0x185   :  { %15751 = vst [vmem:[#allocation184_spill] sm:$0xff] %v9484_v48  ;;  %15752 = vst [vmem:[#allocation185_spill] sm:$0xff] %v9486_v59 }
 0x186   :  { %v9488_v58 = vpop.f32.mrf.mxu1  ;;  %v9490_v35 = vpop.f32.mrf.mxu0  ;;  %7330 = vmatmul.mubr.msk.f32.gmra.mxu0 %vm109_vm0, %v9495_v43  ;;  %7362 = vmatmul.mubr.msk.f32.gmra.mxu1 %vm109_vm0, %v7926_v49 }
 0x187   :  { %15753 = vst [vmem:[#allocation186_spill] sm:$0xff] %v9488_v58  ;;  %15754 = vst [vmem:[#allocation187_spill] sm:$0xff] %v9490_v35  ;;  %v2165_v58 = vld [vmem:[%s15537_s3 + $0x18] sm:$0xff]  ;;  %v2164_v35 = vld [vmem:[%s15537_s3 + $0x10] sm:$0xff]  ;;  %1558 = vmatprep.mubr.f32.mxu0 %v15563_v39  ;;  %1815 = vmatprep.mubr.f32.mxu1 %v15563_v39 }
 0x188   :  { %v9511_v59 = vpop.f32.mrf.mxu1  ;;  %v9513_v48 = vpop.f32.mrf.mxu0  ;;  %2866 = vmatprep.subr.mxu1 %v2165_v58 }
 0x189   :  { %15755 = vst [vmem:[#allocation188_spill] sm:$0xff] %v9511_v59  ;;  %15756 = vst [vmem:[#allocation189_spill] sm:$0xff] %v9513_v48  ;;  %2867 = vmatpush1.msra.mxu1 %v2164_v35  ;;  %v7928_v59 = vld [vmem:[%s15536_s1 + $0x88] sm:$0xff]  ;;  %v9543_v48 = vld [vmem:[%s15536_s1 + $0x190] sm:$0xff] }
 0x18a   :  { %v9515_v47 = vpop.f32.mrf.mxu1  ;;  %v9517_v49 = vpop.f32.mrf.mxu0  ;;  %7331 = vmatmul.mubr.msk.f32.gmra.mxu0 %vm109_vm0, %v9522_v46  ;;  %7363 = vmatmul.mubr.msk.f32.gmra.mxu1 %vm109_vm0, %v7928_v59  ;;  %v7930_v59 = vld [vmem:[%s15536_s1 + $0x90] sm:$0xff] }
 0x18b   :  { %15757 = vst [vmem:[#allocation190_spill] sm:$0xff] %v9515_v47  ;;  %15758 = vst [vmem:[#allocation191_spill] sm:$0xff] %v9517_v49  ;;  %1564 = vmatprep.mubr.f32.mxu0 %v15563_v39  ;;  %1821 = vmatprep.mubr.f32.mxu1 %v15563_v39 }
 0x18c   :  { %v9532_v58 = vpop.f32.mrf.mxu1  ;;  %v9534_v35 = vpop.f32.mrf.mxu0 }
 0x18d   :  { %15759 = vst [vmem:[#allocation192_spill] sm:$0xff] %v9532_v58  ;;  %15760 = vst [vmem:[#allocation193_spill] sm:$0xff] %v9534_v35 }
 0x18e   :  { %v9536_v49 = vpop.f32.mrf.mxu1  ;;  %v9538_v47 = vpop.f32.mrf.mxu0  ;;  %7332 = vmatmul.mubr.msk.f32.gmra.mxu0 %vm109_vm0, %v9543_v48  ;;  %7364 = vmatmul.mubr.msk.f32.gmra.mxu1 %vm109_vm0, %v7930_v59  ;;  %v7932_v59 = vld [vmem:[%s15536_s1 + $0x98] sm:$0xff] }
 0x18f   :  { %15761 = vst [vmem:[#allocation194_spill] sm:$0xff] %v9536_v49  ;;  %15762 = vst [vmem:[#allocation195_spill] sm:$0xff] %v9538_v47  ;;  %1570 = vmatprep.mubr.f32.mxu0 %v15563_v39  ;;  %1827 = vmatprep.mubr.f32.mxu1 %v15563_v39 }
 0x190   :  { %v9553_v49 = vpop.f32.mrf.mxu1  ;;  %v9555_v47 = vpop.f32.mrf.mxu0 }
 0x191   :  { %15763 = vst [vmem:[#allocation196_spill] sm:$0xff] %v9553_v49  ;;  %15764 = vst [vmem:[#allocation197_spill] sm:$0xff] %v9555_v47 }
 0x192   :  { %v9557_v35 = vpop.f32.mrf.mxu1  ;;  %v9559_v58 = vpop.f32.mrf.mxu0  ;;  %7333 = vmatmul.mubr.msk.f32.gmra.mxu0 %vm109_vm0, %v9564_v44  ;;  %7365 = vmatmul.mubr.msk.f32.gmra.mxu1 %vm109_vm0, %v7932_v59  ;;  %v7934_v59 = vld [vmem:[%s15536_s1 + $0xa0] sm:$0xff] }
 0x193   :  { %15765 = vst [vmem:[#allocation198_spill] sm:$0xff] %v9557_v35  ;;  %15766 = vst [vmem:[#allocation199_spill] sm:$0xff] %v9559_v58  ;;  %1576 = vmatprep.mubr.f32.mxu0 %v15563_v39  ;;  %1833 = vmatprep.mubr.f32.mxu1 %v15563_v39 }
 0x194   :  { %v9574_v35 = vpop.f32.mrf.mxu1  ;;  %v9576_v58 = vpop.f32.mrf.mxu0 }
 0x195   :  { %15767 = vst [vmem:[#allocation200_spill] sm:$0xff] %v9574_v35  ;;  %15768 = vst [vmem:[#allocation201_spill] sm:$0xff] %v9576_v58 }
 0x196   :  { %v9578_v47 = vpop.f32.mrf.mxu1  ;;  %v9580_v49 = vpop.f32.mrf.mxu0  ;;  %7334 = vmatmul.mubr.msk.f32.gmra.mxu0 %vm109_vm0, %v9585_v21  ;;  %7366 = vmatmul.mubr.msk.f32.gmra.mxu1 %vm109_vm0, %v7934_v59  ;;  %v7936_v59 = vld [vmem:[%s15536_s1 + $0xa8] sm:$0xff] }
 0x197   :  { %15769 = vst [vmem:[#allocation202_spill] sm:$0xff] %v9578_v47  ;;  %15770 = vst [vmem:[#allocation203_spill] sm:$0xff] %v9580_v49  ;;  %1582 = vmatprep.mubr.f32.mxu0 %v15563_v39  ;;  %1839 = vmatprep.mubr.f32.mxu1 %v15563_v39 }
 0x198   :  { %v9595_v47 = vpop.f32.mrf.mxu1  ;;  %v9597_v49 = vpop.f32.mrf.mxu0 }
 0x199   :  { %15771 = vst [vmem:[#allocation204_spill] sm:$0xff] %v9595_v47  ;;  %15772 = vst [vmem:[#allocation205_spill] sm:$0xff] %v9597_v49 }
 0x19a   :  { %v9599_v58 = vpop.f32.mrf.mxu1  ;;  %v9601_v35 = vpop.f32.mrf.mxu0  ;;  %7335 = vmatmul.mubr.msk.f32.gmra.mxu0 %vm109_vm0, %v9606_v20  ;;  %7367 = vmatmul.mubr.msk.f32.gmra.mxu1 %vm109_vm0, %v7936_v59  ;;  %v7938_v59 = vld [vmem:[%s15536_s1 + $0xb0] sm:$0xff] }
 0x19b   :  { %15773 = vst [vmem:[#allocation206_spill] sm:$0xff] %v9599_v58  ;;  %15774 = vst [vmem:[#allocation207_spill] sm:$0xff] %v9601_v35  ;;  %1588 = vmatprep.mubr.f32.mxu0 %v15563_v39  ;;  %1845 = vmatprep.mubr.f32.mxu1 %v15563_v39 }
 0x19c   :  { %v9616_v58 = vpop.f32.mrf.mxu1  ;;  %v9618_v35 = vpop.f32.mrf.mxu0 }
 0x19d   :  { %15775 = vst [vmem:[#allocation208_spill] sm:$0xff] %v9616_v58  ;;  %15776 = vst [vmem:[#allocation209_spill] sm:$0xff] %v9618_v35 }
 0x19e   :  { %v9620_v49 = vpop.f32.mrf.mxu1  ;;  %v9622_v47 = vpop.f32.mrf.mxu0  ;;  %7336 = vmatmul.mubr.msk.f32.gmra.mxu0 %vm109_vm0, %v9627_v15  ;;  %7368 = vmatmul.mubr.msk.f32.gmra.mxu1 %vm109_vm0, %v7938_v59  ;;  %v7940_v59 = vld [vmem:[%s15536_s1 + $0xb8] sm:$0xff] }
 0x19f   :  { %15777 = vst [vmem:[#allocation210_spill] sm:$0xff] %v9620_v49  ;;  %15778 = vst [vmem:[#allocation211_spill] sm:$0xff] %v9622_v47  ;;  %1594 = vmatprep.mubr.f32.mxu0 %v15563_v39  ;;  %1851 = vmatprep.mubr.f32.mxu1 %v15563_v39 }
 0x1a0   :  { %v9637_v49 = vpop.f32.mrf.mxu1  ;;  %v9639_v47 = vpop.f32.mrf.mxu0 }
 0x1a1   :  { %15779 = vst [vmem:[#allocation212_spill] sm:$0xff] %v9637_v49  ;;  %15780 = vst [vmem:[#allocation213_spill] sm:$0xff] %v9639_v47 }
 0x1a2   :  { %v9641_v35 = vpop.f32.mrf.mxu1  ;;  %v9643_v58 = vpop.f32.mrf.mxu0  ;;  %7337 = vmatmul.mubr.msk.f32.gmra.mxu0 %vm109_vm0, %v9648_v12  ;;  %7369 = vmatmul.mubr.msk.f32.gmra.mxu1 %vm109_vm0, %v7940_v59  ;;  %v7942_v59 = vld [vmem:[%s15536_s1 + $0xc0] sm:$0xff] }
 0x1a3   :  { %15781 = vst [vmem:[#allocation214_spill] sm:$0xff] %v9641_v35  ;;  %15782 = vst [vmem:[#allocation215_spill] sm:$0xff] %v9643_v58  ;;  %1600 = vmatprep.mubr.f32.mxu0 %v15563_v39  ;;  %1857 = vmatprep.mubr.f32.mxu1 %v15563_v39 }
 0x1a4   :  { %v9658_v35 = vpop.f32.mrf.mxu1  ;;  %v9660_v58 = vpop.f32.mrf.mxu0 }
 0x1a5   :  { %15783 = vst [vmem:[#allocation216_spill] sm:$0xff] %v9658_v35  ;;  %15784 = vst [vmem:[#allocation217_spill] sm:$0xff] %v9660_v58 }
 0x1a6   :  { %v9662_v47 = vpop.f32.mrf.mxu1  ;;  %v9664_v49 = vpop.f32.mrf.mxu0  ;;  %7338 = vmatmul.mubr.msk.f32.gmra.mxu0 %vm109_vm0, %v9669_v11  ;;  %7370 = vmatmul.mubr.msk.f32.gmra.mxu1 %vm109_vm0, %v7942_v59  ;;  %v7944_v59 = vld [vmem:[%s15536_s1 + $0xc8] sm:$0xff] }
 0x1a7   :  { %15785 = vst [vmem:[#allocation218_spill] sm:$0xff] %v9662_v47  ;;  %15786 = vst [vmem:[#allocation219_spill] sm:$0xff] %v9664_v49  ;;  %1606 = vmatprep.mubr.f32.mxu0 %v15563_v39  ;;  %1863 = vmatprep.mubr.f32.mxu1 %v15563_v39 }
 0x1a8   :  { %v9679_v47 = vpop.f32.mrf.mxu1  ;;  %v9681_v49 = vpop.f32.mrf.mxu0 }
 0x1a9   :  { %15787 = vst [vmem:[#allocation220_spill] sm:$0xff] %v9679_v47  ;;  %15788 = vst [vmem:[#allocation221_spill] sm:$0xff] %v9681_v49 }
 0x1aa   :  { %v9683_v58 = vpop.f32.mrf.mxu1  ;;  %v9685_v35 = vpop.f32.mrf.mxu0  ;;  %7339 = vmatmul.mubr.msk.f32.gmra.mxu0 %vm109_vm0, %v9690_v8  ;;  %7371 = vmatmul.mubr.msk.f32.gmra.mxu1 %vm109_vm0, %v7944_v59  ;;  %v7946_v59 = vld [vmem:[%s15536_s1 + $0xd0] sm:$0xff] }
 0x1ab   :  { %15789 = vst [vmem:[#allocation222_spill] sm:$0xff] %v9683_v58  ;;  %15790 = vst [vmem:[#allocation223_spill] sm:$0xff] %v9685_v35  ;;  %1612 = vmatprep.mubr.f32.mxu0 %v15563_v39  ;;  %1869 = vmatprep.mubr.f32.mxu1 %v15563_v39 }
 0x1ac   :  { %v9700_v58 = vpop.f32.mrf.mxu1  ;;  %v9702_v35 = vpop.f32.mrf.mxu0 }
 0x1ad   :  { %15791 = vst [vmem:[#allocation224_spill] sm:$0xff] %v9700_v58  ;;  %15792 = vst [vmem:[#allocation225_spill] sm:$0xff] %v9702_v35 }
 0x1ae   :  { %v9704_v49 = vpop.f32.mrf.mxu1  ;;  %v9706_v47 = vpop.f32.mrf.mxu0  ;;  %7340 = vmatmul.mubr.msk.f32.gmra.mxu0 %vm109_vm0, %v9711_v7  ;;  %7372 = vmatmul.mubr.msk.f32.gmra.mxu1 %vm109_vm0, %v7946_v59  ;;  %v7948_v59 = vld [vmem:[%s15536_s1 + $0xd8] sm:$0xff] }
 0x1af   :  { %15793 = vst [vmem:[#allocation226_spill] sm:$0xff] %v9704_v49  ;;  %15794 = vst [vmem:[#allocation227_spill] sm:$0xff] %v9706_v47  ;;  %1618 = vmatprep.mubr.f32.mxu0 %v15563_v39  ;;  %1875 = vmatprep.mubr.f32.mxu1 %v15563_v39 }
 0x1b0   :  { %v9721_v49 = vpop.f32.mrf.mxu1  ;;  %v9723_v47 = vpop.f32.mrf.mxu0 }
 0x1b1   :  { %15795 = vst [vmem:[#allocation228_spill] sm:$0xff] %v9721_v49  ;;  %15796 = vst [vmem:[#allocation229_spill] sm:$0xff] %v9723_v47 }
 0x1b2   :  { %v9725_v35 = vpop.f32.mrf.mxu1  ;;  %v9727_v58 = vpop.f32.mrf.mxu0  ;;  %7341 = vmatmul.mubr.msk.f32.gmra.mxu0 %vm109_vm0, %v9732_v4  ;;  %7373 = vmatmul.mubr.msk.f32.gmra.mxu1 %vm109_vm0, %v7948_v59  ;;  %v7950_v59 = vld [vmem:[%s15536_s1 + $0xe0] sm:$0xff] }
 0x1b3   :  { %15797 = vst [vmem:[#allocation230_spill] sm:$0xff] %v9725_v35  ;;  %15798 = vst [vmem:[#allocation231_spill] sm:$0xff] %v9727_v58  ;;  %1624 = vmatprep.mubr.f32.mxu0 %v15563_v39  ;;  %1881 = vmatprep.mubr.f32.mxu1 %v15563_v39 }
 0x1b4   :  { %v9742_v35 = vpop.f32.mrf.mxu1  ;;  %v9744_v58 = vpop.f32.mrf.mxu0 }
 0x1b5   :  { %15799 = vst [vmem:[#allocation232_spill] sm:$0xff] %v9742_v35  ;;  %15800 = vst [vmem:[#allocation233_spill] sm:$0xff] %v9744_v58 }
 0x1b6   :  { %v9746_v47 = vpop.f32.mrf.mxu1  ;;  %v9748_v49 = vpop.f32.mrf.mxu0  ;;  %7342 = vmatmul.mubr.msk.f32.gmra.mxu0 %vm109_vm0, %v9753_v61  ;;  %7374 = vmatmul.mubr.msk.f32.gmra.mxu1 %vm109_vm0, %v7950_v59  ;;  %v7952_v59 = vld [vmem:[%s15536_s1 + $0xe8] sm:$0xff] }
 0x1b7   :  { %15801 = vst [vmem:[#allocation234_spill] sm:$0xff] %v9746_v47  ;;  %15802 = vst [vmem:[#allocation235_spill] sm:$0xff] %v9748_v49  ;;  %1630 = vmatprep.mubr.f32.mxu0 %v15563_v39  ;;  %1887 = vmatprep.mubr.f32.mxu1 %v15563_v39 }
 0x1b8   :  { %v9763_v47 = vpop.f32.mrf.mxu1  ;;  %v9765_v49 = vpop.f32.mrf.mxu0 }
 0x1b9   :  { %15803 = vst [vmem:[#allocation236_spill] sm:$0xff] %v9763_v47  ;;  %15804 = vst [vmem:[#allocation237_spill] sm:$0xff] %v9765_v49 }
 0x1ba   :  { %v9767_v58 = vpop.f32.mrf.mxu1  ;;  %v9769_v35 = vpop.f32.mrf.mxu0  ;;  %7343 = vmatmul.mubr.msk.f32.gmra.mxu0 %vm109_vm0, %v9774_v57  ;;  %7375 = vmatmul.mubr.msk.f32.gmra.mxu1 %vm109_vm0, %v7952_v59  ;;  %v7954_v59 = vld [vmem:[%s15536_s1 + $0xf0] sm:$0xff] }
 0x1bb   :  { %15805 = vst [vmem:[#allocation238_spill] sm:$0xff] %v9767_v58  ;;  %15806 = vst [vmem:[#allocation239_spill] sm:$0xff] %v9769_v35  ;;  %1636 = vmatprep.mubr.f32.mxu0 %v15563_v39  ;;  %1893 = vmatprep.mubr.f32.mxu1 %v15563_v39 }
 0x1bc   :  { %v9784_v58 = vpop.f32.mrf.mxu1  ;;  %v9786_v35 = vpop.f32.mrf.mxu0 }
 0x1bd   :  { %15807 = vst [vmem:[#allocation240_spill] sm:$0xff] %v9784_v58  ;;  %15808 = vst [vmem:[#allocation241_spill] sm:$0xff] %v9786_v35 }
 0x1be   :  { %v9788_v49 = vpop.f32.mrf.mxu1  ;;  %v9790_v47 = vpop.f32.mrf.mxu0  ;;  %7344 = vmatmul.mubr.msk.f32.gmra.mxu0 %vm109_vm0, %v9795_v2  ;;  %7376 = vmatmul.mubr.msk.f32.gmra.mxu1 %vm109_vm0, %v7954_v59  ;;  %v7956_v59 = vld [vmem:[%s15536_s1 + $0xf8] sm:$0xff] }
 0x1bf   :  { %15809 = vst [vmem:[#allocation242_spill] sm:$0xff] %v9788_v49  ;;  %15810 = vst [vmem:[#allocation243_spill] sm:$0xff] %v9790_v47  ;;  %1642 = vmatprep.mubr.f32.mxu0 %v15563_v39  ;;  %1899 = vmatprep.mubr.f32.mxu1 %v15563_v39 }
 0x1c0   :  { %v9805_v49 = vpop.f32.mrf.mxu1  ;;  %v9807_v47 = vpop.f32.mrf.mxu0 }
 0x1c1   :  { %15811 = vst [vmem:[#allocation244_spill] sm:$0xff] %v9805_v49  ;;  %15812 = vst [vmem:[#allocation245_spill] sm:$0xff] %v9807_v47  ;;  %v2191_v49 = vld [vmem:[%s15537_s3 + $0xe8] sm:$0xff] }
 0x1c2   :  { %v9809_v35 = vpop.f32.mrf.mxu1  ;;  %v9811_v58 = vpop.f32.mrf.mxu0  ;;  %7345 = vmatmul.mubr.msk.f32.gmra.mxu0 %vm109_vm0, %v9816_v37  ;;  %7377 = vmatmul.mubr.msk.f32.gmra.mxu1 %vm109_vm0, %v7956_v59  ;;  %v2190_v59 = vld [vmem:[%s15537_s3 + $0xe0] sm:$0xff] }
 0x1c3   :  { %15813 = vst [vmem:[#allocation246_spill] sm:$0xff] %v9809_v35  ;;  %15814 = vst [vmem:[#allocation247_spill] sm:$0xff] %v9811_v58  ;;  %1905 = vmatprep.mubr.f32.mxu1 %v15563_v39  ;;  %2451 = vmatprep.mubr.f32.mxu0 %v15563_v39  ;;  %v9829_v58 = vld [vmem:[%s15538_s2] sm:$0xff] }
 0x1c4   :  { %v9831_v35 = vpop.f32.mrf.mxu1  ;;  %v9833_v47 = vpop.f32.mrf.mxu0  ;;  %3309 = vmatprep.subr.mxu0 %v2191_v49  ;;  %v2193_v49 = vld [vmem:[%s15537_s3 + $0xf8] sm:$0xff] }
 0x1c5   :  { %15815 = vst [vmem:[#allocation248_spill] sm:$0xff] %v9831_v35  ;;  %15816 = vst [vmem:[#allocation249_spill] sm:$0xff] %v9833_v47  ;;  %3758 = vmatprep.subr.mxu1 %v2193_v49 }
 0x1c6   :  { %v9841_v60 = vpop.f32.mrf.mxu1  ;;  %v9843_v0 = vpop.f32.mrf.mxu0  ;;  %7378 = vmatmul.mubr.msk.f32.gmra.mxu1 %vm109_vm0, %v7957_v56  ;;  %7410 = vmatmul.mubr.msk.f32.vlgmr.msra.gmra.mxu0 %vm2194_vm1, %v9829_v58 }
 0x1c7   :  { %15817 = vst [vmem:[#allocation250_spill] sm:$0xff] %v9841_v60  ;;  %15818 = vst [vmem:[#allocation251_spill] sm:$0xff] %v9843_v0  ;;  %1911 = vmatprep.mubr.f32.mxu1 %v15563_v39  ;;  %2457 = vmatprep.mubr.f32.mxu0 %v15563_v39  ;;  %v9859_v0 = vld [vmem:[%s15538_s2 + $0x8] sm:$0xff] }
 0x1c8   :  { %v9861_v60 = vpop.f32.mrf.mxu1  ;;  %v9863_v47 = vpop.f32.mrf.mxu0  ;;  %3310 = vmatpush1.msra.mxu0 %v2190_v59  ;;  %v9880_v59 = vld [vmem:[%s15538_s2 + $0x10] sm:$0xff] }
 0x1c9   :  { %15819 = vst [vmem:[#allocation252_spill] sm:$0xff] %v9861_v60  ;;  %15820 = vst [vmem:[#allocation253_spill] sm:$0xff] %v9863_v47 }
 0x1ca   :  { %v9865_v56 = vpop.f32.mrf.mxu1  ;;  %v9867_v35 = vpop.f32.mrf.mxu0  ;;  %7379 = vmatmul.mubr.msk.f32.gmra.mxu1 %vm109_vm0, %v7958_v55  ;;  %7411 = vmatmul.mubr.msk.f32.gmra.mxu0 %vm2194_vm1, %v9859_v0  ;;  %v7959_v55 = vld [vmem:[%s15536_s1 + $0x110] sm:$0xff] }
 0x1cb   :  { %15821 = vst [vmem:[#allocation254_spill] sm:$0xff] %v9865_v56  ;;  %15822 = vst [vmem:[#allocation255_spill] sm:$0xff] %v9867_v35  ;;  %1917 = vmatprep.mubr.f32.mxu1 %v15563_v39  ;;  %2463 = vmatprep.mubr.f32.mxu0 %v15563_v39 }
 0x1cc   :  { %v9882_v49 = vpop.f32.mrf.mxu1  ;;  %v9884_v35 = vpop.f32.mrf.mxu0 }
 0x1cd   :  { %15823 = vst [vmem:[#allocation256_spill] sm:$0xff] %v9882_v49  ;;  %15824 = vst [vmem:[#allocation257_spill] sm:$0xff] %v9884_v35  ;;  %v9901_v35 = vld [vmem:[%s15538_s2 + $0x18] sm:$0xff] }
 0x1ce   :  { %v9886_v56 = vpop.f32.mrf.mxu1  ;;  %v9888_v47 = vpop.f32.mrf.mxu0  ;;  %7380 = vmatmul.mubr.msk.f32.gmra.mxu1 %vm109_vm0, %v7959_v55  ;;  %7412 = vmatmul.mubr.msk.f32.gmra.mxu0 %vm2194_vm1, %v9880_v59  ;;  %v7960_v55 = vld [vmem:[%s15536_s1 + $0x118] sm:$0xff] }
 0x1cf   :  { %15825 = vst [vmem:[#allocation258_spill] sm:$0xff] %v9886_v56  ;;  %15826 = vst [vmem:[#allocation259_spill] sm:$0xff] %v9888_v47  ;;  %1923 = vmatprep.mubr.f32.mxu1 %v15563_v39  ;;  %2469 = vmatprep.mubr.f32.mxu0 %v15563_v39 }
 0x1d0   :  { %v9903_v56 = vpop.f32.mrf.mxu1  ;;  %v9905_v47 = vpop.f32.mrf.mxu0 }
 0x1d1   :  { %15827 = vst [vmem:[#allocation260_spill] sm:$0xff] %v9903_v56  ;;  %15828 = vst [vmem:[#allocation261_spill] sm:$0xff] %v9905_v47  ;;  %v9922_v47 = vld [vmem:[%s15538_s2 + $0x20] sm:$0xff] }
 0x1d2   :  { %v9907_v49 = vpop.f32.mrf.mxu1  ;;  %v9909_v60 = vpop.f32.mrf.mxu0  ;;  %7381 = vmatmul.mubr.msk.f32.gmra.mxu1 %vm109_vm0, %v7960_v55  ;;  %7413 = vmatmul.mubr.msk.f32.gmra.mxu0 %vm2194_vm1, %v9901_v35  ;;  %v7961_v55 = vld [vmem:[%s15536_s1 + $0x120] sm:$0xff] }
 0x1d3   :  { %15829 = vst [vmem:[#allocation262_spill] sm:$0xff] %v9907_v49  ;;  %15830 = vst [vmem:[#allocation263_spill] sm:$0xff] %v9909_v60  ;;  %1929 = vmatprep.mubr.f32.mxu1 %v15563_v39  ;;  %2475 = vmatprep.mubr.f32.mxu0 %v15563_v39 }
 0x1d4   :  { %v9924_v49 = vpop.f32.mrf.mxu1  ;;  %v9926_v60 = vpop.f32.mrf.mxu0 }
 0x1d5   :  { %15831 = vst [vmem:[#allocation264_spill] sm:$0xff] %v9924_v49  ;;  %15832 = vst [vmem:[#allocation265_spill] sm:$0xff] %v9926_v60  ;;  %v9943_v60 = vld [vmem:[%s15538_s2 + $0x28] sm:$0xff] }
 0x1d6   :  { %v9928_v56 = vpop.f32.mrf.mxu1  ;;  %v9930_v33 = vpop.f32.mrf.mxu0  ;;  %7382 = vmatmul.mubr.msk.f32.gmra.mxu1 %vm109_vm0, %v7961_v55  ;;  %7414 = vmatmul.mubr.msk.f32.gmra.mxu0 %vm2194_vm1, %v9922_v47  ;;  %v7962_v55 = vld [vmem:[%s15536_s1 + $0x128] sm:$0xff] }
 0x1d7   :  { %15833 = vst [vmem:[#allocation266_spill] sm:$0xff] %v9928_v56  ;;  %15834 = vst [vmem:[#allocation267_spill] sm:$0xff] %v9930_v33  ;;  %1935 = vmatprep.mubr.f32.mxu1 %v15563_v39  ;;  %2481 = vmatprep.mubr.f32.mxu0 %v15563_v39 }
 0x1d8   :  { %v9945_v56 = vpop.f32.mrf.mxu1  ;;  %v9947_v33 = vpop.f32.mrf.mxu0 }
 0x1d9   :  { %15835 = vst [vmem:[#allocation268_spill] sm:$0xff] %v9945_v56  ;;  %15836 = vst [vmem:[#allocation269_spill] sm:$0xff] %v9947_v33  ;;  %v9964_v33 = vld [vmem:[%s15538_s2 + $0x30] sm:$0xff] }
 0x1da   :  { %v9949_v49 = vpop.f32.mrf.mxu1  ;;  %v9951_v54 = vpop.f32.mrf.mxu0  ;;  %7383 = vmatmul.mubr.msk.f32.gmra.mxu1 %vm109_vm0, %v7962_v55  ;;  %7415 = vmatmul.mubr.msk.f32.gmra.mxu0 %vm2194_vm1, %v9943_v60  ;;  %v7963_v55 = vld [vmem:[%s15536_s1 + $0x130] sm:$0xff] }
 0x1db   :  { %15837 = vst [vmem:[#allocation270_spill] sm:$0xff] %v9949_v49  ;;  %15838 = vst [vmem:[#allocation271_spill] sm:$0xff] %v9951_v54  ;;  %1941 = vmatprep.mubr.f32.mxu1 %v15563_v39  ;;  %2487 = vmatprep.mubr.f32.mxu0 %v15563_v39 }
 0x1dc   :  { %v9966_v49 = vpop.f32.mrf.mxu1  ;;  %v9968_v54 = vpop.f32.mrf.mxu0 }
 0x1dd   :  { %15839 = vst [vmem:[#allocation272_spill] sm:$0xff] %v9966_v49  ;;  %15840 = vst [vmem:[#allocation273_spill] sm:$0xff] %v9968_v54  ;;  %v9985_v54 = vld [vmem:[%s15538_s2 + $0x38] sm:$0xff] }
 0x1de   :  { %v9970_v56 = vpop.f32.mrf.mxu1  ;;  %v9972_v31 = vpop.f32.mrf.mxu0  ;;  %7384 = vmatmul.mubr.msk.f32.gmra.mxu1 %vm109_vm0, %v7963_v55  ;;  %7416 = vmatmul.mubr.msk.f32.gmra.mxu0 %vm2194_vm1, %v9964_v33  ;;  %v7964_v55 = vld [vmem:[%s15536_s1 + $0x138] sm:$0xff] }
 0x1df   :  { %15841 = vst [vmem:[#allocation274_spill] sm:$0xff] %v9970_v56  ;;  %15842 = vst [vmem:[#allocation275_spill] sm:$0xff] %v9972_v31  ;;  %1947 = vmatprep.mubr.f32.mxu1 %v15563_v39  ;;  %2493 = vmatprep.mubr.f32.mxu0 %v15563_v39 }
 0x1e0   :  { %v9987_v56 = vpop.f32.mrf.mxu1  ;;  %v9989_v31 = vpop.f32.mrf.mxu0 }
 0x1e1   :  { %15843 = vst [vmem:[#allocation276_spill] sm:$0xff] %v9987_v56  ;;  %15844 = vst [vmem:[#allocation277_spill] sm:$0xff] %v9989_v31  ;;  %v10006_v31 = vld [vmem:[%s15538_s2 + $0x40] sm:$0xff] }
 0x1e2   :  { %v9991_v49 = vpop.f32.mrf.mxu1  ;;  %v9993_v53 = vpop.f32.mrf.mxu0  ;;  %7385 = vmatmul.mubr.msk.f32.gmra.mxu1 %vm109_vm0, %v7964_v55  ;;  %7417 = vmatmul.mubr.msk.f32.gmra.mxu0 %vm2194_vm1, %v9985_v54  ;;  %v7965_v55 = vld [vmem:[%s15536_s1 + $0x140] sm:$0xff] }
 0x1e3   :  { %15845 = vst [vmem:[#allocation278_spill] sm:$0xff] %v9991_v49  ;;  %15846 = vst [vmem:[#allocation279_spill] sm:$0xff] %v9993_v53  ;;  %1953 = vmatprep.mubr.f32.mxu1 %v15563_v39  ;;  %2499 = vmatprep.mubr.f32.mxu0 %v15563_v39 }
 0x1e4   :  { %v10008_v49 = vpop.f32.mrf.mxu1  ;;  %v10010_v53 = vpop.f32.mrf.mxu0 }
 0x1e5   :  { %15847 = vst [vmem:[#allocation280_spill] sm:$0xff] %v10008_v49  ;;  %15848 = vst [vmem:[#allocation281_spill] sm:$0xff] %v10010_v53  ;;  %v10027_v53 = vld [vmem:[%s15538_s2 + $0x48] sm:$0xff] }
 0x1e6   :  { %v10012_v56 = vpop.f32.mrf.mxu1  ;;  %v10014_v29 = vpop.f32.mrf.mxu0  ;;  %7386 = vmatmul.mubr.msk.f32.gmra.mxu1 %vm109_vm0, %v7965_v55  ;;  %7418 = vmatmul.mubr.msk.f32.gmra.mxu0 %vm2194_vm1, %v10006_v31  ;;  %v7966_v55 = vld [vmem:[%s15536_s1 + $0x148] sm:$0xff] }
 0x1e7   :  { %15849 = vst [vmem:[#allocation282_spill] sm:$0xff] %v10012_v56  ;;  %15850 = vst [vmem:[#allocation283_spill] sm:$0xff] %v10014_v29  ;;  %1959 = vmatprep.mubr.f32.mxu1 %v15563_v39  ;;  %2505 = vmatprep.mubr.f32.mxu0 %v15563_v39 }
 0x1e8   :  { %v10029_v56 = vpop.f32.mrf.mxu1  ;;  %v10031_v29 = vpop.f32.mrf.mxu0 }
 0x1e9   :  { %15851 = vst [vmem:[#allocation284_spill] sm:$0xff] %v10029_v56  ;;  %15852 = vst [vmem:[#allocation285_spill] sm:$0xff] %v10031_v29  ;;  %v10048_v29 = vld [vmem:[%s15538_s2 + $0x50] sm:$0xff] }
 0x1ea   :  { %v10033_v49 = vpop.f32.mrf.mxu1  ;;  %v10035_v52 = vpop.f32.mrf.mxu0  ;;  %7387 = vmatmul.mubr.msk.f32.gmra.mxu1 %vm109_vm0, %v7966_v55  ;;  %7419 = vmatmul.mubr.msk.f32.gmra.mxu0 %vm2194_vm1, %v10027_v53  ;;  %v7967_v55 = vld [vmem:[%s15536_s1 + $0x150] sm:$0xff] }
 0x1eb   :  { %15853 = vst [vmem:[#allocation286_spill] sm:$0xff] %v10033_v49  ;;  %15854 = vst [vmem:[#allocation287_spill] sm:$0xff] %v10035_v52  ;;  %1965 = vmatprep.mubr.f32.mxu1 %v15563_v39  ;;  %2511 = vmatprep.mubr.f32.mxu0 %v15563_v39 }
 0x1ec   :  { %v10050_v49 = vpop.f32.mrf.mxu1  ;;  %v10052_v52 = vpop.f32.mrf.mxu0 }
 0x1ed   :  { %15855 = vst [vmem:[#allocation288_spill] sm:$0xff] %v10050_v49  ;;  %15856 = vst [vmem:[#allocation289_spill] sm:$0xff] %v10052_v52  ;;  %v10069_v52 = vld [vmem:[%s15538_s2 + $0x58] sm:$0xff] }
 0x1ee   :  { %v10054_v56 = vpop.f32.mrf.mxu1  ;;  %v10056_v27 = vpop.f32.mrf.mxu0  ;;  %7388 = vmatmul.mubr.msk.f32.gmra.mxu1 %vm109_vm0, %v7967_v55  ;;  %7420 = vmatmul.mubr.msk.f32.gmra.mxu0 %vm2194_vm1, %v10048_v29  ;;  %v7968_v55 = vld [vmem:[%s15536_s1 + $0x158] sm:$0xff] }
 0x1ef   :  { %15857 = vst [vmem:[#allocation290_spill] sm:$0xff] %v10054_v56  ;;  %15858 = vst [vmem:[#allocation291_spill] sm:$0xff] %v10056_v27  ;;  %1971 = vmatprep.mubr.f32.mxu1 %v15563_v39  ;;  %2517 = vmatprep.mubr.f32.mxu0 %v15563_v39 }
 0x1f0   :  { %v10071_v56 = vpop.f32.mrf.mxu1  ;;  %v10073_v27 = vpop.f32.mrf.mxu0 }
 0x1f1   :  { %15859 = vst [vmem:[#allocation292_spill] sm:$0xff] %v10071_v56  ;;  %15860 = vst [vmem:[#allocation293_spill] sm:$0xff] %v10073_v27  ;;  %v10090_v27 = vld [vmem:[%s15538_s2 + $0x60] sm:$0xff] }
 0x1f2   :  { %v10075_v49 = vpop.f32.mrf.mxu1  ;;  %v10077_v51 = vpop.f32.mrf.mxu0  ;;  %7389 = vmatmul.mubr.msk.f32.gmra.mxu1 %vm109_vm0, %v7968_v55  ;;  %7421 = vmatmul.mubr.msk.f32.gmra.mxu0 %vm2194_vm1, %v10069_v52  ;;  %v7969_v55 = vld [vmem:[%s15536_s1 + $0x160] sm:$0xff] }
 0x1f3   :  { %15861 = vst [vmem:[#allocation294_spill] sm:$0xff] %v10075_v49  ;;  %15862 = vst [vmem:[#allocation295_spill] sm:$0xff] %v10077_v51  ;;  %1977 = vmatprep.mubr.f32.mxu1 %v15563_v39  ;;  %2523 = vmatprep.mubr.f32.mxu0 %v15563_v39 }
 0x1f4   :  { %v10092_v49 = vpop.f32.mrf.mxu1  ;;  %v10094_v51 = vpop.f32.mrf.mxu0 }
 0x1f5   :  { %15863 = vst [vmem:[#allocation296_spill] sm:$0xff] %v10092_v49  ;;  %15864 = vst [vmem:[#allocation297_spill] sm:$0xff] %v10094_v51  ;;  %v10111_v51 = vld [vmem:[%s15538_s2 + $0x68] sm:$0xff] }
 0x1f6   :  { %v10096_v56 = vpop.f32.mrf.mxu1  ;;  %v10098_v25 = vpop.f32.mrf.mxu0  ;;  %7390 = vmatmul.mubr.msk.f32.gmra.mxu1 %vm109_vm0, %v7969_v55  ;;  %7422 = vmatmul.mubr.msk.f32.gmra.mxu0 %vm2194_vm1, %v10090_v27  ;;  %v7970_v55 = vld [vmem:[%s15536_s1 + $0x168] sm:$0xff] }
 0x1f7   :  { %15865 = vst [vmem:[#allocation298_spill] sm:$0xff] %v10096_v56  ;;  %15866 = vst [vmem:[#allocation299_spill] sm:$0xff] %v10098_v25  ;;  %1983 = vmatprep.mubr.f32.mxu1 %v15563_v39  ;;  %2529 = vmatprep.mubr.f32.mxu0 %v15563_v39 }
 0x1f8   :  { %v10113_v56 = vpop.f32.mrf.mxu1  ;;  %v10115_v25 = vpop.f32.mrf.mxu0 }
 0x1f9   :  { %15867 = vst [vmem:[#allocation300_spill] sm:$0xff] %v10113_v56  ;;  %15868 = vst [vmem:[#allocation301_spill] sm:$0xff] %v10115_v25  ;;  %v10132_v25 = vld [vmem:[%s15538_s2 + $0x70] sm:$0xff] }
 0x1fa   :  { %v10117_v49 = vpop.f32.mrf.mxu1  ;;  %v10119_v50 = vpop.f32.mrf.mxu0  ;;  %7391 = vmatmul.mubr.msk.f32.gmra.mxu1 %vm109_vm0, %v7970_v55  ;;  %7423 = vmatmul.mubr.msk.f32.gmra.mxu0 %vm2194_vm1, %v10111_v51  ;;  %v7971_v55 = vld [vmem:[%s15536_s1 + $0x170] sm:$0xff] }
 0x1fb   :  { %15869 = vst [vmem:[#allocation302_spill] sm:$0xff] %v10117_v49  ;;  %15870 = vst [vmem:[#allocation303_spill] sm:$0xff] %v10119_v50  ;;  %1989 = vmatprep.mubr.f32.mxu1 %v15563_v39  ;;  %2535 = vmatprep.mubr.f32.mxu0 %v15563_v39 }
 0x1fc   :  { %v10134_v49 = vpop.f32.mrf.mxu1  ;;  %v10136_v50 = vpop.f32.mrf.mxu0 }
 0x1fd   :  { %15871 = vst [vmem:[#allocation304_spill] sm:$0xff] %v10134_v49  ;;  %15872 = vst [vmem:[#allocation305_spill] sm:$0xff] %v10136_v50  ;;  %v10153_v50 = vld [vmem:[%s15538_s2 + $0x78] sm:$0xff] }
 0x1fe   :  { %v10138_v56 = vpop.f32.mrf.mxu1  ;;  %v10140_v23 = vpop.f32.mrf.mxu0  ;;  %7392 = vmatmul.mubr.msk.f32.gmra.mxu1 %vm109_vm0, %v7971_v55  ;;  %7424 = vmatmul.mubr.msk.f32.gmra.mxu0 %vm2194_vm1, %v10132_v25  ;;  %v7972_v55 = vld [vmem:[%s15536_s1 + $0x178] sm:$0xff] }
 0x1ff   :  { %15873 = vst [vmem:[#allocation306_spill] sm:$0xff] %v10138_v56  ;;  %15874 = vst [vmem:[#allocation307_spill] sm:$0xff] %v10140_v23  ;;  %1995 = vmatprep.mubr.f32.mxu1 %v15563_v39  ;;  %2541 = vmatprep.mubr.f32.mxu0 %v15563_v39 }
 0x200   :  { %v10155_v56 = vpop.f32.mrf.mxu1  ;;  %v10157_v23 = vpop.f32.mrf.mxu0 }
 0x201   :  { %15875 = vst [vmem:[#allocation308_spill] sm:$0xff] %v10155_v56  ;;  %15876 = vst [vmem:[#allocation309_spill] sm:$0xff] %v10157_v23  ;;  %v10174_v23 = vld [vmem:[%s15538_s2 + $0x80] sm:$0xff] }
 0x202   :  { %v10159_v49 = vpop.f32.mrf.mxu1  ;;  %v10161_v45 = vpop.f32.mrf.mxu0  ;;  %7393 = vmatmul.mubr.msk.f32.gmra.mxu1 %vm109_vm0, %v7972_v55  ;;  %7425 = vmatmul.mubr.msk.f32.gmra.mxu0 %vm2194_vm1, %v10153_v50  ;;  %v2183_v55 = vld [vmem:[%s15537_s3 + $0xa8] sm:$0xff]  ;;  %v2182_v56 = vld [vmem:[%s15537_s3 + $0xa0] sm:$0xff] }
 0x203   :  { %15877 = vst [vmem:[#allocation310_spill] sm:$0xff] %v10159_v49  ;;  %15878 = vst [vmem:[#allocation311_spill] sm:$0xff] %v10161_v45  ;;  %2001 = vmatprep.mubr.f32.mxu1 %v15563_v39  ;;  %2547 = vmatprep.mubr.f32.mxu0 %v15563_v39 }
 0x204   :  { %v10176_v49 = vpop.f32.mrf.mxu1  ;;  %v10178_v45 = vpop.f32.mrf.mxu0  ;;  %3311 = vmatprep.subr.mxu0 %v2183_v55  ;;  %v10199_v55 = vld [vmem:[%s15538_s2 + $0x88] sm:$0xff] }
 0x205   :  { %15879 = vst [vmem:[#allocation312_spill] sm:$0xff] %v10176_v49  ;;  %15880 = vst [vmem:[#allocation313_spill] sm:$0xff] %v10178_v45  ;;  %3312 = vmatpush1.msra.mxu0 %v2182_v56  ;;  %v2185_v49 = vld [vmem:[%s15537_s3 + $0xb8] sm:$0xff] }
 0x206   :  { %v10186_v19 = vpop.f32.mrf.mxu0  ;;  %v10188_v62 = vpop.f32.mrf.mxu1  ;;  %7394 = vmatmul.mubr.msk.f32.gmra.mxu1 %vm109_vm0, %v9495_v43  ;;  %7426 = vmatmul.mubr.msk.f32.gmra.mxu0 %vm2194_vm1, %v10174_v23 }
 0x207   :  { %15881 = vst [vmem:[#allocation314_spill] sm:$0xff] %v10186_v19  ;;  %15882 = vst [vmem:[#allocation315_spill] sm:$0xff] %v10188_v62  ;;  %2007 = vmatprep.mubr.f32.mxu1 %v15563_v39  ;;  %2553 = vmatprep.mubr.f32.mxu0 %v15563_v39 }
 0x208   :  { %v10201_v45 = vpop.f32.mrf.mxu0  ;;  %v10203_v19 = vpop.f32.mrf.mxu1 }
 0x209   :  { %15883 = vst [vmem:[#allocation316_spill] sm:$0xff] %v10201_v45  ;;  %15884 = vst [vmem:[#allocation317_spill] sm:$0xff] %v10203_v19  ;;  %v10218_v45 = vld [vmem:[%s15538_s2 + $0x90] sm:$0xff] }
 0x20a   :  { %v10205_v62 = vpop.f32.mrf.mxu0  ;;  %v10207_v43 = vpop.f32.mrf.mxu1  ;;  %7395 = vmatmul.mubr.msk.f32.gmra.mxu1 %vm109_vm0, %v9522_v46  ;;  %7427 = vmatmul.mubr.msk.f32.gmra.mxu0 %vm2194_vm1, %v10199_v55  ;;  %v10237_v46 = vld [vmem:[%s15538_s2 + $0x98] sm:$0xff] }
 0x20b   :  { %15885 = vst [vmem:[#allocation318_spill] sm:$0xff] %v10205_v62  ;;  %15886 = vst [vmem:[#allocation319_spill] sm:$0xff] %v10207_v43  ;;  %2013 = vmatprep.mubr.f32.mxu1 %v15563_v39  ;;  %2559 = vmatprep.mubr.f32.mxu0 %v15563_v39 }
 0x20c   :  { %v10220_v56 = vpop.f32.mrf.mxu0  ;;  %v10222_v62 = vpop.f32.mrf.mxu1 }
 0x20d   :  { %15887 = vst [vmem:[#allocation320_spill] sm:$0xff] %v10220_v56  ;;  %15888 = vst [vmem:[#allocation321_spill] sm:$0xff] %v10222_v62 }
 0x20e   :  { %v10224_v43 = vpop.f32.mrf.mxu0  ;;  %v10226_v19 = vpop.f32.mrf.mxu1  ;;  %7396 = vmatmul.mubr.msk.f32.gmra.mxu1 %vm109_vm0, %v9543_v48  ;;  %7428 = vmatmul.mubr.msk.f32.gmra.mxu0 %vm2194_vm1, %v10218_v45  ;;  %v10256_v48 = vld [vmem:[%s15538_s2 + $0xa0] sm:$0xff] }
 0x20f   :  { %15889 = vst [vmem:[#allocation322_spill] sm:$0xff] %v10224_v43  ;;  %15890 = vst [vmem:[#allocation323_spill] sm:$0xff] %v10226_v19  ;;  %2019 = vmatprep.mubr.f32.mxu1 %v15563_v39  ;;  %2565 = vmatprep.mubr.f32.mxu0 %v15563_v39 }
 0x210   :  { %v10239_v62 = vpop.f32.mrf.mxu0  ;;  %v10241_v43 = vpop.f32.mrf.mxu1 }
 0x211   :  { %15891 = vst [vmem:[#allocation324_spill] sm:$0xff] %v10239_v62  ;;  %15892 = vst [vmem:[#allocation325_spill] sm:$0xff] %v10241_v43 }
 0x212   :  { %v10243_v19 = vpop.f32.mrf.mxu0  ;;  %v10245_v56 = vpop.f32.mrf.mxu1  ;;  %7397 = vmatmul.mubr.msk.f32.gmra.mxu1 %vm109_vm0, %v9564_v44  ;;  %7429 = vmatmul.mubr.msk.f32.gmra.mxu0 %vm2194_vm1, %v10237_v46  ;;  %v10275_v44 = vld [vmem:[%s15538_s2 + $0xa8] sm:$0xff] }
 0x213   :  { %15893 = vst [vmem:[#allocation326_spill] sm:$0xff] %v10243_v19  ;;  %15894 = vst [vmem:[#allocation327_spill] sm:$0xff] %v10245_v56  ;;  %2025 = vmatprep.mubr.f32.mxu1 %v15563_v39  ;;  %2571 = vmatprep.mubr.f32.mxu0 %v15563_v39 }
 0x214   :  { %v10258_v43 = vpop.f32.mrf.mxu0  ;;  %v10260_v19 = vpop.f32.mrf.mxu1 }
 0x215   :  { %15895 = vst [vmem:[#allocation328_spill] sm:$0xff] %v10258_v43  ;;  %15896 = vst [vmem:[#allocation329_spill] sm:$0xff] %v10260_v19 }
 0x216   :  { %v10262_v56 = vpop.f32.mrf.mxu0  ;;  %v10264_v62 = vpop.f32.mrf.mxu1  ;;  %7398 = vmatmul.mubr.msk.f32.gmra.mxu1 %vm109_vm0, %v9585_v21  ;;  %7430 = vmatmul.mubr.msk.f32.gmra.mxu0 %vm2194_vm1, %v10256_v48  ;;  %v10294_v21 = vld [vmem:[%s15538_s2 + $0xb0] sm:$0xff] }
 0x217   :  { %15897 = vst [vmem:[#allocation330_spill] sm:$0xff] %v10262_v56  ;;  %15898 = vst [vmem:[#allocation331_spill] sm:$0xff] %v10264_v62  ;;  %2031 = vmatprep.mubr.f32.mxu1 %v15563_v39  ;;  %2577 = vmatprep.mubr.f32.mxu0 %v15563_v39 }
 0x218   :  { %v10277_v19 = vpop.f32.mrf.mxu0  ;;  %v10279_v56 = vpop.f32.mrf.mxu1 }
 0x219   :  { %15899 = vst [vmem:[#allocation332_spill] sm:$0xff] %v10277_v19  ;;  %15900 = vst [vmem:[#allocation333_spill] sm:$0xff] %v10279_v56 }
 0x21a   :  { %v10281_v62 = vpop.f32.mrf.mxu0  ;;  %v10283_v43 = vpop.f32.mrf.mxu1  ;;  %7399 = vmatmul.mubr.msk.f32.gmra.mxu1 %vm109_vm0, %v9606_v20  ;;  %7431 = vmatmul.mubr.msk.f32.gmra.mxu0 %vm2194_vm1, %v10275_v44  ;;  %v10313_v20 = vld [vmem:[%s15538_s2 + $0xb8] sm:$0xff] }
 0x21b   :  { %15901 = vst [vmem:[#allocation334_spill] sm:$0xff] %v10281_v62  ;;  %15902 = vst [vmem:[#allocation335_spill] sm:$0xff] %v10283_v43  ;;  %2037 = vmatprep.mubr.f32.mxu1 %v15563_v39  ;;  %2583 = vmatprep.mubr.f32.mxu0 %v15563_v39 }
 0x21c   :  { %v10296_v56 = vpop.f32.mrf.mxu0  ;;  %v10298_v62 = vpop.f32.mrf.mxu1 }
 0x21d   :  { %15903 = vst [vmem:[#allocation336_spill] sm:$0xff] %v10296_v56  ;;  %15904 = vst [vmem:[#allocation337_spill] sm:$0xff] %v10298_v62 }
 0x21e   :  { %v10300_v43 = vpop.f32.mrf.mxu0  ;;  %v10302_v19 = vpop.f32.mrf.mxu1  ;;  %7400 = vmatmul.mubr.msk.f32.gmra.mxu1 %vm109_vm0, %v9627_v15  ;;  %7432 = vmatmul.mubr.msk.f32.gmra.mxu0 %vm2194_vm1, %v10294_v21  ;;  %v10332_v15 = vld [vmem:[%s15538_s2 + $0xc0] sm:$0xff] }
 0x21f   :  { %15905 = vst [vmem:[#allocation338_spill] sm:$0xff] %v10300_v43  ;;  %15906 = vst [vmem:[#allocation339_spill] sm:$0xff] %v10302_v19  ;;  %2043 = vmatprep.mubr.f32.mxu1 %v15563_v39  ;;  %2589 = vmatprep.mubr.f32.mxu0 %v15563_v39 }
 0x220   :  { %v10315_v62 = vpop.f32.mrf.mxu0  ;;  %v10317_v43 = vpop.f32.mrf.mxu1 }
 0x221   :  { %15907 = vst [vmem:[#allocation340_spill] sm:$0xff] %v10315_v62  ;;  %15908 = vst [vmem:[#allocation341_spill] sm:$0xff] %v10317_v43 }
 0x222   :  { %v10319_v19 = vpop.f32.mrf.mxu0  ;;  %v10321_v56 = vpop.f32.mrf.mxu1  ;;  %7401 = vmatmul.mubr.msk.f32.gmra.mxu1 %vm109_vm0, %v9648_v12  ;;  %7433 = vmatmul.mubr.msk.f32.gmra.mxu0 %vm2194_vm1, %v10313_v20  ;;  %v10351_v12 = vld [vmem:[%s15538_s2 + $0xc8] sm:$0xff] }
 0x223   :  { %15909 = vst [vmem:[#allocation342_spill] sm:$0xff] %v10319_v19  ;;  %15910 = vst [vmem:[#allocation343_spill] sm:$0xff] %v10321_v56  ;;  %2049 = vmatprep.mubr.f32.mxu1 %v15563_v39  ;;  %2595 = vmatprep.mubr.f32.mxu0 %v15563_v39 }
 0x224   :  { %v10334_v43 = vpop.f32.mrf.mxu0  ;;  %v10336_v19 = vpop.f32.mrf.mxu1 }
 0x225   :  { %15911 = vst [vmem:[#allocation344_spill] sm:$0xff] %v10334_v43  ;;  %15912 = vst [vmem:[#allocation345_spill] sm:$0xff] %v10336_v19 }
 0x226   :  { %v10338_v56 = vpop.f32.mrf.mxu0  ;;  %v10340_v62 = vpop.f32.mrf.mxu1  ;;  %7402 = vmatmul.mubr.msk.f32.gmra.mxu1 %vm109_vm0, %v9669_v11  ;;  %7434 = vmatmul.mubr.msk.f32.gmra.mxu0 %vm2194_vm1, %v10332_v15  ;;  %v10370_v11 = vld [vmem:[%s15538_s2 + $0xd0] sm:$0xff] }
 0x227   :  { %15913 = vst [vmem:[#allocation346_spill] sm:$0xff] %v10338_v56  ;;  %15914 = vst [vmem:[#allocation347_spill] sm:$0xff] %v10340_v62  ;;  %2055 = vmatprep.mubr.f32.mxu1 %v15563_v39  ;;  %2601 = vmatprep.mubr.f32.mxu0 %v15563_v39 }
 0x228   :  { %v10353_v19 = vpop.f32.mrf.mxu0  ;;  %v10355_v56 = vpop.f32.mrf.mxu1 }
 0x229   :  { %15915 = vst [vmem:[#allocation348_spill] sm:$0xff] %v10353_v19  ;;  %15916 = vst [vmem:[#allocation349_spill] sm:$0xff] %v10355_v56 }
 0x22a   :  { %v10357_v62 = vpop.f32.mrf.mxu0  ;;  %v10359_v43 = vpop.f32.mrf.mxu1  ;;  %7403 = vmatmul.mubr.msk.f32.gmra.mxu1 %vm109_vm0, %v9690_v8  ;;  %7435 = vmatmul.mubr.msk.f32.gmra.mxu0 %vm2194_vm1, %v10351_v12  ;;  %v10389_v8 = vld [vmem:[%s15538_s2 + $0xd8] sm:$0xff] }
 0x22b   :  { %15917 = vst [vmem:[#allocation350_spill] sm:$0xff] %v10357_v62  ;;  %15918 = vst [vmem:[#allocation351_spill] sm:$0xff] %v10359_v43  ;;  %2061 = vmatprep.mubr.f32.mxu1 %v15563_v39  ;;  %2607 = vmatprep.mubr.f32.mxu0 %v15563_v39 }
 0x22c   :  { %v10372_v56 = vpop.f32.mrf.mxu0  ;;  %v10374_v62 = vpop.f32.mrf.mxu1 }
 0x22d   :  { %15919 = vst [vmem:[#allocation352_spill] sm:$0xff] %v10372_v56  ;;  %15920 = vst [vmem:[#allocation353_spill] sm:$0xff] %v10374_v62 }
 0x22e   :  { %v10376_v43 = vpop.f32.mrf.mxu0  ;;  %v10378_v19 = vpop.f32.mrf.mxu1  ;;  %7404 = vmatmul.mubr.msk.f32.gmra.mxu1 %vm109_vm0, %v9711_v7  ;;  %7436 = vmatmul.mubr.msk.f32.gmra.mxu0 %vm2194_vm1, %v10370_v11  ;;  %v10408_v7 = vld [vmem:[%s15538_s2 + $0xe0] sm:$0xff] }
 0x22f   :  { %15921 = vst [vmem:[#allocation354_spill] sm:$0xff] %v10376_v43  ;;  %15922 = vst [vmem:[#allocation355_spill] sm:$0xff] %v10378_v19  ;;  %2067 = vmatprep.mubr.f32.mxu1 %v15563_v39  ;;  %2613 = vmatprep.mubr.f32.mxu0 %v15563_v39 }
 0x230   :  { %v10391_v62 = vpop.f32.mrf.mxu0  ;;  %v10393_v43 = vpop.f32.mrf.mxu1 }
 0x231   :  { %15923 = vst [vmem:[#allocation356_spill] sm:$0xff] %v10391_v62  ;;  %15924 = vst [vmem:[#allocation357_spill] sm:$0xff] %v10393_v43 }
 0x232   :  { %v10395_v19 = vpop.f32.mrf.mxu0  ;;  %v10397_v56 = vpop.f32.mrf.mxu1  ;;  %7405 = vmatmul.mubr.msk.f32.gmra.mxu1 %vm109_vm0, %v9732_v4  ;;  %7437 = vmatmul.mubr.msk.f32.gmra.mxu0 %vm2194_vm1, %v10389_v8  ;;  %v10427_v4 = vld [vmem:[%s15538_s2 + $0xe8] sm:$0xff] }
 0x233   :  { %15925 = vst [vmem:[#allocation358_spill] sm:$0xff] %v10395_v19  ;;  %15926 = vst [vmem:[#allocation359_spill] sm:$0xff] %v10397_v56  ;;  %2073 = vmatprep.mubr.f32.mxu1 %v15563_v39  ;;  %2619 = vmatprep.mubr.f32.mxu0 %v15563_v39 }
 0x234   :  { %v10410_v43 = vpop.f32.mrf.mxu0  ;;  %v10412_v19 = vpop.f32.mrf.mxu1 }
 0x235   :  { %15927 = vst [vmem:[#allocation360_spill] sm:$0xff] %v10410_v43  ;;  %15928 = vst [vmem:[#allocation361_spill] sm:$0xff] %v10412_v19 }
 0x236   :  { %v10414_v56 = vpop.f32.mrf.mxu0  ;;  %v10416_v62 = vpop.f32.mrf.mxu1  ;;  %7406 = vmatmul.mubr.msk.f32.gmra.mxu1 %vm109_vm0, %v9753_v61  ;;  %7438 = vmatmul.mubr.msk.f32.gmra.mxu0 %vm2194_vm1, %v10408_v7  ;;  %v10446_v61 = vld [vmem:[%s15538_s2 + $0xf0] sm:$0xff] }
 0x237   :  { %15929 = vst [vmem:[#allocation362_spill] sm:$0xff] %v10414_v56  ;;  %15930 = vst [vmem:[#allocation363_spill] sm:$0xff] %v10416_v62  ;;  %2079 = vmatprep.mubr.f32.mxu1 %v15563_v39  ;;  %2625 = vmatprep.mubr.f32.mxu0 %v15563_v39 }
 0x238   :  { %v10429_v19 = vpop.f32.mrf.mxu0  ;;  %v10431_v56 = vpop.f32.mrf.mxu1 }
 0x239   :  { %15931 = vst [vmem:[#allocation364_spill] sm:$0xff] %v10429_v19  ;;  %15932 = vst [vmem:[#allocation365_spill] sm:$0xff] %v10431_v56 }
 0x23a   :  { %v10433_v62 = vpop.f32.mrf.mxu0  ;;  %v10435_v43 = vpop.f32.mrf.mxu1  ;;  %7407 = vmatmul.mubr.msk.f32.gmra.mxu1 %vm109_vm0, %v9774_v57  ;;  %7439 = vmatmul.mubr.msk.f32.gmra.mxu0 %vm2194_vm1, %v10427_v4  ;;  %v10465_v57 = vld [vmem:[%s15538_s2 + $0xf8] sm:$0xff] }
 0x23b   :  { %15933 = vst [vmem:[#allocation366_spill] sm:$0xff] %v10433_v62  ;;  %15934 = vst [vmem:[#allocation367_spill] sm:$0xff] %v10435_v43  ;;  %2085 = vmatprep.mubr.f32.mxu1 %v15563_v39  ;;  %2631 = vmatprep.mubr.f32.mxu0 %v15563_v39 }
 0x23c   :  { %v10448_v56 = vpop.f32.mrf.mxu0  ;;  %v10450_v62 = vpop.f32.mrf.mxu1 }
 0x23d   :  { %15935 = vst [vmem:[#allocation368_spill] sm:$0xff] %v10448_v56  ;;  %15936 = vst [vmem:[#allocation369_spill] sm:$0xff] %v10450_v62 }
 0x23e   :  { %v10452_v43 = vpop.f32.mrf.mxu0  ;;  %v10454_v19 = vpop.f32.mrf.mxu1  ;;  %7408 = vmatmul.mubr.msk.f32.gmra.mxu1 %vm109_vm0, %v9795_v2  ;;  %7440 = vmatmul.mubr.msk.f32.gmra.mxu0 %vm2194_vm1, %v10446_v61  ;;  %v2175_v2 = vld [vmem:[%s15537_s3 + $0x68] sm:$0xff] }
 0x23f   :  { %15937 = vst [vmem:[#allocation370_spill] sm:$0xff] %v10452_v43  ;;  %15938 = vst [vmem:[#allocation371_spill] sm:$0xff] %v10454_v19  ;;  %2091 = vmatprep.mubr.f32.mxu1 %v15563_v39  ;;  %2637 = vmatprep.mubr.f32.mxu0 %v15563_v39 }
 0x240   :  { %v10467_v62 = vpop.f32.mrf.mxu0  ;;  %v10469_v43 = vpop.f32.mrf.mxu1  ;;  %3313 = vmatprep.subr.mxu0 %v2175_v2  ;;  %v2167_v2 = vld [vmem:[%s15537_s3 + $0x28] sm:$0xff] }
 0x241   :  { %15939 = vst [vmem:[#allocation372_spill] sm:$0xff] %v10467_v62  ;;  %15940 = vst [vmem:[#allocation373_spill] sm:$0xff] %v10469_v43  ;;  %v2174_v62 = vld [vmem:[%s15537_s3 + $0x60] sm:$0xff] }
 0x242   :  { %v10474_v19 = vpop.f32.mrf.mxu0  ;;  %v10476_v56 = vpop.f32.mrf.mxu1  ;;  %7409 = vmatmul.mubr.msk.f32.gmra.mxu1 %vm109_vm0, %v9816_v37  ;;  %7441 = vmatmul.mubr.msk.f32.gmra.mxu0 %vm2194_vm1, %v10465_v57  ;;  %v2192_v37 = vld [vmem:[%s15537_s3 + $0xf0] sm:$0xff] }
 0x243   :  { %15941 = vst [vmem:[#allocation374_spill] sm:$0xff] %v10474_v19  ;;  %15942 = vst [vmem:[#allocation375_spill] sm:$0xff] %v10476_v56  ;;  %2643 = vmatprep.mubr.f32.mxu0 %v15563_v39  ;;  %2900 = vmatprep.mubr.f32.mxu1 %v15563_v39  ;;  %v10490_v19 = vld [vmem:[%s15538_s2 + $0x100] sm:$0xff] }
 0x244   :  { %v10492_v56 = vpop.f32.mrf.mxu0  ;;  %v10494_v43 = vpop.f32.mrf.mxu1  ;;  %3314 = vmatpush1.msra.mxu0 %v2174_v62  ;;  %v10520_v62 = vld [vmem:[%s15538_s2 + $0x108] sm:$0xff] }
 0x245   :  { %15943 = vst [vmem:[#allocation376_spill] sm:$0xff] %v10492_v56  ;;  %15944 = vst [vmem:[#allocation377_spill] sm:$0xff] %v10494_v43  ;;  %v2184_v43 = vld [vmem:[%s15537_s3 + $0xb0] sm:$0xff]  ;;  %3315 = vmatprep.subr.mxu0 %v2167_v2 }
 0x246   :  { %v10502_v17 = vpop.f32.mrf.mxu0  ;;  %v10504_v1 = vpop.f32.mrf.mxu1  ;;  %7442 = vmatmul.mubr.msk.f32.gmra.mxu0 %vm2194_vm1, %v10490_v19  ;;  %7474 = vmatmul.mubr.msk.f32.vlgmr.msra.gmra.mxu1 %vm2194_vm1, %v9829_v58  ;;  %v2166_v58 = vld [vmem:[%s15537_s3 + $0x20] sm:$0xff] }
 0x247   :  { %15945 = vst [vmem:[#allocation378_spill] sm:$0xff] %v10502_v17  ;;  %15946 = vst [vmem:[#allocation379_spill] sm:$0xff] %v10504_v1  ;;  %3759 = vmatpush1.msra.mxu1 %v2192_v37  ;;  %2649 = vmatprep.mubr.f32.mxu0 %v15563_v39  ;;  %v2177_v37 = vld [vmem:[%s15537_s3 + $0x78] sm:$0xff] }
 0x248   :  { %v10522_v1 = vpop.f32.mrf.mxu0  ;;  %v10524_v17 = vpop.f32.mrf.mxu1  ;;  %2906 = vmatprep.mubr.f32.mxu1 %v15563_v39  ;;  %3760 = vmatprep.subr.mxu1 %v2185_v49  ;;  %v2176_v49 = vld [vmem:[%s15537_s3 + $0x70] sm:$0xff] }
 0x249   :  { %15947 = vst [vmem:[#allocation380_spill] sm:$0xff] %v10522_v1  ;;  %15948 = vst [vmem:[#allocation381_spill] sm:$0xff] %v10524_v17  ;;  %3761 = vmatpush1.msra.mxu1 %v2184_v43  ;;  %v10549_v43 = vld [vmem:[%s15538_s2 + $0x110] sm:$0xff]  ;;  %3316 = vmatpush1.msra.mxu0 %v2166_v58  ;;  %v10569_v58 = vld [vmem:[%s15538_s2 + $0x118] sm:$0xff] }
 0x24a   :  { %v10533_v56 = vpop.f32.mrf.mxu0  ;;  %v10535_v14 = vpop.f32.mrf.mxu1  ;;  %7443 = vmatmul.mubr.msk.f32.gmra.mxu0 %vm2194_vm1, %v10520_v62  ;;  %7475 = vmatmul.mubr.msk.f32.gmra.mxu1 %vm2194_vm1, %v9859_v0 }
 0x24b   :  { %15949 = vst [vmem:[#allocation382_spill] sm:$0xff] %v10533_v56  ;;  %15950 = vst [vmem:[#allocation383_spill] sm:$0xff] %v10535_v14  ;;  %2655 = vmatprep.mubr.f32.mxu0 %v15563_v39  ;;  %2912 = vmatprep.mubr.f32.mxu1 %v15563_v39 }
 0x24c   :  { %v10551_v2 = vpop.f32.mrf.mxu0  ;;  %v10553_v14 = vpop.f32.mrf.mxu1  ;;  %3762 = vmatprep.subr.mxu1 %v2177_v37  ;;  %4830 = vmatprep.subr.mxu0 %v15563_v39 }
 0x24d   :  { %15951 = vst [vmem:[#allocation384_spill] sm:$0xff] %v10551_v2  ;;  %15952 = vst [vmem:[#allocation385_spill] sm:$0xff] %v10553_v14  ;;  %3763 = vmatpush1.msra.mxu1 %v2176_v49 }
 0x24e   :  { %v10556_v0 = vpop.f32.mrf.mxu0  ;;  %v10558_v56 = vpop.f32.mrf.mxu1  ;;  %7444 = vmatmul.mubr.msk.f32.gmra.mxu0 %vm2194_vm1, %v10549_v43  ;;  %7476 = vmatmul.mubr.msk.f32.gmra.mxu1 %vm2194_vm1, %v9880_v59  ;;  %v10588_v59 = vld [vmem:[%s15538_s2 + $0x120] sm:$0xff] }
 0x24f   :  { %15953 = vst [vmem:[#allocation386_spill] sm:$0xff] %v10556_v0  ;;  %15954 = vst [vmem:[#allocation387_spill] sm:$0xff] %v10558_v56  ;;  %2661 = vmatprep.mubr.f32.mxu0 %v15563_v39  ;;  %2918 = vmatprep.mubr.f32.mxu1 %v15563_v39 }
 0x250   :  { %v10571_v37 = vpop.f32.mrf.mxu0  ;;  %v10573_v49 = vpop.f32.mrf.mxu1 }
 0x251   :  { %15955 = vst [vmem:[#allocation388_spill] sm:$0xff] %v10571_v37  ;;  %15956 = vst [vmem:[#allocation389_spill] sm:$0xff] %v10573_v49 }
 0x252   :  { %v10575_v56 = vpop.f32.mrf.mxu0  ;;  %v10577_v0 = vpop.f32.mrf.mxu1  ;;  %7445 = vmatmul.mubr.msk.f32.gmra.mxu0 %vm2194_vm1, %v10569_v58  ;;  %7477 = vmatmul.mubr.msk.f32.gmra.mxu1 %vm2194_vm1, %v9901_v35  ;;  %v10607_v35 = vld [vmem:[%s15538_s2 + $0x128] sm:$0xff] }
 0x253   :  { %15957 = vst [vmem:[#allocation390_spill] sm:$0xff] %v10575_v56  ;;  %15958 = vst [vmem:[#allocation391_spill] sm:$0xff] %v10577_v0  ;;  %2667 = vmatprep.mubr.f32.mxu0 %v15563_v39  ;;  %2924 = vmatprep.mubr.f32.mxu1 %v15563_v39 }
 0x254   :  { %v10590_v49 = vpop.f32.mrf.mxu0  ;;  %v10592_v56 = vpop.f32.mrf.mxu1 }
 0x255   :  { %15959 = vst [vmem:[#allocation392_spill] sm:$0xff] %v10590_v49  ;;  %15960 = vst [vmem:[#allocation393_spill] sm:$0xff] %v10592_v56 }
 0x256   :  { %v10594_v0 = vpop.f32.mrf.mxu0  ;;  %v10596_v37 = vpop.f32.mrf.mxu1  ;;  %7446 = vmatmul.mubr.msk.f32.gmra.mxu0 %vm2194_vm1, %v10588_v59  ;;  %7478 = vmatmul.mubr.msk.f32.gmra.mxu1 %vm2194_vm1, %v9922_v47  ;;  %v10626_v47 = vld [vmem:[%s15538_s2 + $0x130] sm:$0xff] }
 0x257   :  { %15961 = vst [vmem:[#allocation394_spill] sm:$0xff] %v10594_v0  ;;  %15962 = vst [vmem:[#allocation395_spill] sm:$0xff] %v10596_v37  ;;  %2673 = vmatprep.mubr.f32.mxu0 %v15563_v39  ;;  %2930 = vmatprep.mubr.f32.mxu1 %v15563_v39 }
 0x258   :  { %v10609_v56 = vpop.f32.mrf.mxu0  ;;  %v10611_v0 = vpop.f32.mrf.mxu1 }
 0x259   :  { %15963 = vst [vmem:[#allocation396_spill] sm:$0xff] %v10609_v56  ;;  %15964 = vst [vmem:[#allocation397_spill] sm:$0xff] %v10611_v0 }
 0x25a   :  { %v10613_v37 = vpop.f32.mrf.mxu0  ;;  %v10615_v49 = vpop.f32.mrf.mxu1  ;;  %7447 = vmatmul.mubr.msk.f32.gmra.mxu0 %vm2194_vm1, %v10607_v35  ;;  %7479 = vmatmul.mubr.msk.f32.gmra.mxu1 %vm2194_vm1, %v9943_v60  ;;  %v10645_v60 = vld [vmem:[%s15538_s2 + $0x138] sm:$0xff] }
 0x25b   :  { %15965 = vst [vmem:[#allocation398_spill] sm:$0xff] %v10613_v37  ;;  %15966 = vst [vmem:[#allocation399_spill] sm:$0xff] %v10615_v49  ;;  %2679 = vmatprep.mubr.f32.mxu0 %v15563_v39  ;;  %2936 = vmatprep.mubr.f32.mxu1 %v15563_v39 }
 0x25c   :  { %v10628_v0 = vpop.f32.mrf.mxu0  ;;  %v10630_v37 = vpop.f32.mrf.mxu1 }
 0x25d   :  { %15967 = vst [vmem:[#allocation400_spill] sm:$0xff] %v10628_v0  ;;  %15968 = vst [vmem:[#allocation401_spill] sm:$0xff] %v10630_v37 }
 0x25e   :  { %v10632_v49 = vpop.f32.mrf.mxu0  ;;  %v10634_v56 = vpop.f32.mrf.mxu1  ;;  %7448 = vmatmul.mubr.msk.f32.gmra.mxu0 %vm2194_vm1, %v10626_v47  ;;  %7480 = vmatmul.mubr.msk.f32.gmra.mxu1 %vm2194_vm1, %v9964_v33  ;;  %v10664_v33 = vld [vmem:[%s15538_s2 + $0x140] sm:$0xff] }
 0x25f   :  { %15969 = vst [vmem:[#allocation402_spill] sm:$0xff] %v10632_v49  ;;  %15970 = vst [vmem:[#allocation403_spill] sm:$0xff] %v10634_v56  ;;  %2685 = vmatprep.mubr.f32.mxu0 %v15563_v39  ;;  %2942 = vmatprep.mubr.f32.mxu1 %v15563_v39 }
 0x260   :  { %v10647_v37 = vpop.f32.mrf.mxu0  ;;  %v10649_v49 = vpop.f32.mrf.mxu1 }
 0x261   :  { %15971 = vst [vmem:[#allocation404_spill] sm:$0xff] %v10647_v37  ;;  %15972 = vst [vmem:[#allocation405_spill] sm:$0xff] %v10649_v49 }
 0x262   :  { %v10651_v56 = vpop.f32.mrf.mxu0  ;;  %v10653_v0 = vpop.f32.mrf.mxu1  ;;  %7449 = vmatmul.mubr.msk.f32.gmra.mxu0 %vm2194_vm1, %v10645_v60  ;;  %7481 = vmatmul.mubr.msk.f32.gmra.mxu1 %vm2194_vm1, %v9985_v54  ;;  %v10683_v54 = vld [vmem:[%s15538_s2 + $0x148] sm:$0xff] }
 0x263   :  { %15973 = vst [vmem:[#allocation406_spill] sm:$0xff] %v10651_v56  ;;  %15974 = vst [vmem:[#allocation407_spill] sm:$0xff] %v10653_v0  ;;  %2691 = vmatprep.mubr.f32.mxu0 %v15563_v39  ;;  %2948 = vmatprep.mubr.f32.mxu1 %v15563_v39 }
 0x264   :  { %v10666_v49 = vpop.f32.mrf.mxu0  ;;  %v10668_v56 = vpop.f32.mrf.mxu1 }
 0x265   :  { %15975 = vst [vmem:[#allocation408_spill] sm:$0xff] %v10666_v49  ;;  %15976 = vst [vmem:[#allocation409_spill] sm:$0xff] %v10668_v56 }
 0x266   :  { %v10670_v0 = vpop.f32.mrf.mxu0  ;;  %v10672_v37 = vpop.f32.mrf.mxu1  ;;  %7450 = vmatmul.mubr.msk.f32.gmra.mxu0 %vm2194_vm1, %v10664_v33  ;;  %7482 = vmatmul.mubr.msk.f32.gmra.mxu1 %vm2194_vm1, %v10006_v31  ;;  %v10702_v31 = vld [vmem:[%s15538_s2 + $0x150] sm:$0xff] }
 0x267   :  { %15977 = vst [vmem:[#allocation410_spill] sm:$0xff] %v10670_v0  ;;  %15978 = vst [vmem:[#allocation411_spill] sm:$0xff] %v10672_v37  ;;  %2697 = vmatprep.mubr.f32.mxu0 %v15563_v39  ;;  %2954 = vmatprep.mubr.f32.mxu1 %v15563_v39 }
 0x268   :  { %v10685_v56 = vpop.f32.mrf.mxu0  ;;  %v10687_v0 = vpop.f32.mrf.mxu1 }
 0x269   :  { %15979 = vst [vmem:[#allocation412_spill] sm:$0xff] %v10685_v56  ;;  %15980 = vst [vmem:[#allocation413_spill] sm:$0xff] %v10687_v0 }
 0x26a   :  { %v10689_v37 = vpop.f32.mrf.mxu0  ;;  %v10691_v49 = vpop.f32.mrf.mxu1  ;;  %7451 = vmatmul.mubr.msk.f32.gmra.mxu0 %vm2194_vm1, %v10683_v54  ;;  %7483 = vmatmul.mubr.msk.f32.gmra.mxu1 %vm2194_vm1, %v10027_v53  ;;  %v10721_v53 = vld [vmem:[%s15538_s2 + $0x158] sm:$0xff] }
 0x26b   :  { %15981 = vst [vmem:[#allocation414_spill] sm:$0xff] %v10689_v37  ;;  %15982 = vst [vmem:[#allocation415_spill] sm:$0xff] %v10691_v49  ;;  %2703 = vmatprep.mubr.f32.mxu0 %v15563_v39  ;;  %2960 = vmatprep.mubr.f32.mxu1 %v15563_v39 }
 0x26c   :  { %v10704_v0 = vpop.f32.mrf.mxu0  ;;  %v10706_v37 = vpop.f32.mrf.mxu1 }
 0x26d   :  { %15983 = vst [vmem:[#allocation416_spill] sm:$0xff] %v10704_v0  ;;  %15984 = vst [vmem:[#allocation417_spill] sm:$0xff] %v10706_v37 }
 0x26e   :  { %v10708_v49 = vpop.f32.mrf.mxu0  ;;  %v10710_v56 = vpop.f32.mrf.mxu1  ;;  %7452 = vmatmul.mubr.msk.f32.gmra.mxu0 %vm2194_vm1, %v10702_v31  ;;  %7484 = vmatmul.mubr.msk.f32.gmra.mxu1 %vm2194_vm1, %v10048_v29  ;;  %v10740_v29 = vld [vmem:[%s15538_s2 + $0x160] sm:$0xff] }
 0x26f   :  { %15985 = vst [vmem:[#allocation418_spill] sm:$0xff] %v10708_v49  ;;  %15986 = vst [vmem:[#allocation419_spill] sm:$0xff] %v10710_v56  ;;  %2709 = vmatprep.mubr.f32.mxu0 %v15563_v39  ;;  %2966 = vmatprep.mubr.f32.mxu1 %v15563_v39 }
 0x270   :  { %v10723_v37 = vpop.f32.mrf.mxu0  ;;  %v10725_v49 = vpop.f32.mrf.mxu1 }
 0x271   :  { %15987 = vst [vmem:[#allocation420_spill] sm:$0xff] %v10723_v37  ;;  %15988 = vst [vmem:[#allocation421_spill] sm:$0xff] %v10725_v49 }
 0x272   :  { %v10727_v56 = vpop.f32.mrf.mxu0  ;;  %v10729_v0 = vpop.f32.mrf.mxu1  ;;  %7453 = vmatmul.mubr.msk.f32.gmra.mxu0 %vm2194_vm1, %v10721_v53  ;;  %7485 = vmatmul.mubr.msk.f32.gmra.mxu1 %vm2194_vm1, %v10069_v52  ;;  %v10759_v52 = vld [vmem:[%s15538_s2 + $0x168] sm:$0xff] }
 0x273   :  { %15989 = vst [vmem:[#allocation422_spill] sm:$0xff] %v10727_v56  ;;  %15990 = vst [vmem:[#allocation423_spill] sm:$0xff] %v10729_v0  ;;  %2715 = vmatprep.mubr.f32.mxu0 %v15563_v39  ;;  %2972 = vmatprep.mubr.f32.mxu1 %v15563_v39 }
 0x274   :  { %v10742_v49 = vpop.f32.mrf.mxu0  ;;  %v10744_v56 = vpop.f32.mrf.mxu1 }
 0x275   :  { %15991 = vst [vmem:[#allocation424_spill] sm:$0xff] %v10742_v49  ;;  %15992 = vst [vmem:[#allocation425_spill] sm:$0xff] %v10744_v56 }
 0x276   :  { %v10746_v0 = vpop.f32.mrf.mxu0  ;;  %v10748_v37 = vpop.f32.mrf.mxu1  ;;  %7454 = vmatmul.mubr.msk.f32.gmra.mxu0 %vm2194_vm1, %v10740_v29  ;;  %7486 = vmatmul.mubr.msk.f32.gmra.mxu1 %vm2194_vm1, %v10090_v27  ;;  %v10778_v27 = vld [vmem:[%s15538_s2 + $0x170] sm:$0xff] }
 0x277   :  { %15993 = vst [vmem:[#allocation426_spill] sm:$0xff] %v10746_v0  ;;  %15994 = vst [vmem:[#allocation427_spill] sm:$0xff] %v10748_v37  ;;  %2721 = vmatprep.mubr.f32.mxu0 %v15563_v39  ;;  %2978 = vmatprep.mubr.f32.mxu1 %v15563_v39 }
 0x278   :  { %v10761_v56 = vpop.f32.mrf.mxu0  ;;  %v10763_v0 = vpop.f32.mrf.mxu1 }
 0x279   :  { %15995 = vst [vmem:[#allocation428_spill] sm:$0xff] %v10761_v56  ;;  %15996 = vst [vmem:[#allocation429_spill] sm:$0xff] %v10763_v0 }
 0x27a   :  { %v10765_v37 = vpop.f32.mrf.mxu0  ;;  %v10767_v49 = vpop.f32.mrf.mxu1  ;;  %7455 = vmatmul.mubr.msk.f32.gmra.mxu0 %vm2194_vm1, %v10759_v52  ;;  %7487 = vmatmul.mubr.msk.f32.gmra.mxu1 %vm2194_vm1, %v10111_v51  ;;  %v10797_v51 = vld [vmem:[%s15538_s2 + $0x178] sm:$0xff] }
 0x27b   :  { %15997 = vst [vmem:[#allocation430_spill] sm:$0xff] %v10765_v37  ;;  %15998 = vst [vmem:[#allocation431_spill] sm:$0xff] %v10767_v49  ;;  %2727 = vmatprep.mubr.f32.mxu0 %v15563_v39  ;;  %2984 = vmatprep.mubr.f32.mxu1 %v15563_v39 }
 0x27c   :  { %v10780_v0 = vpop.f32.mrf.mxu0  ;;  %v10782_v37 = vpop.f32.mrf.mxu1 }
 0x27d   :  { %15999 = vst [vmem:[#allocation432_spill] sm:$0xff] %v10780_v0  ;;  %16000 = vst [vmem:[#allocation433_spill] sm:$0xff] %v10782_v37 }
 0x27e   :  { %v10784_v49 = vpop.f32.mrf.mxu0  ;;  %v10786_v56 = vpop.f32.mrf.mxu1  ;;  %7456 = vmatmul.mubr.msk.f32.gmra.mxu0 %vm2194_vm1, %v10778_v27  ;;  %7488 = vmatmul.mubr.msk.f32.gmra.mxu1 %vm2194_vm1, %v10132_v25  ;;  %v10816_v25 = vld [vmem:[%s15538_s2 + $0x180] sm:$0xff] }
 0x27f   :  { %16001 = vst [vmem:[#allocation434_spill] sm:$0xff] %v10784_v49  ;;  %16002 = vst [vmem:[#allocation435_spill] sm:$0xff] %v10786_v56  ;;  %2733 = vmatprep.mubr.f32.mxu0 %v15563_v39  ;;  %2990 = vmatprep.mubr.f32.mxu1 %v15563_v39 }
 0x280   :  { %v10799_v37 = vpop.f32.mrf.mxu0  ;;  %v10801_v49 = vpop.f32.mrf.mxu1 }
 0x281   :  { %16003 = vst [vmem:[#allocation436_spill] sm:$0xff] %v10799_v37  ;;  %16004 = vst [vmem:[#allocation437_spill] sm:$0xff] %v10801_v49 }
 0x282   :  { %v10803_v56 = vpop.f32.mrf.mxu0  ;;  %v10805_v0 = vpop.f32.mrf.mxu1  ;;  %7457 = vmatmul.mubr.msk.f32.gmra.mxu0 %vm2194_vm1, %v10797_v51  ;;  %7489 = vmatmul.mubr.msk.f32.gmra.mxu1 %vm2194_vm1, %v10153_v50  ;;  %v10835_v50 = vld [vmem:[%s15538_s2 + $0x188] sm:$0xff] }
 0x283   :  { %16005 = vst [vmem:[#allocation438_spill] sm:$0xff] %v10803_v56  ;;  %16006 = vst [vmem:[#allocation439_spill] sm:$0xff] %v10805_v0  ;;  %2739 = vmatprep.mubr.f32.mxu0 %v15563_v39  ;;  %2996 = vmatprep.mubr.f32.mxu1 %v15563_v39 }
 0x284   :  { %v10818_v49 = vpop.f32.mrf.mxu0  ;;  %v10820_v56 = vpop.f32.mrf.mxu1 }
 0x285   :  { %16007 = vst [vmem:[#allocation440_spill] sm:$0xff] %v10818_v49  ;;  %16008 = vst [vmem:[#allocation441_spill] sm:$0xff] %v10820_v56  ;;  %v2168_v56 = vld [vmem:[%s15537_s3 + $0x30] sm:$0xff] }
 0x286   :  { %v10822_v0 = vpop.f32.mrf.mxu1  ;;  %v10824_v37 = vpop.f32.mrf.mxu0  ;;  %7458 = vmatmul.mubr.msk.f32.gmra.mxu0 %vm2194_vm1, %v10816_v25  ;;  %7490 = vmatmul.mubr.msk.f32.gmra.mxu1 %vm2194_vm1, %v10174_v23 }
 0x287   :  { %16009 = vst [vmem:[#allocation442_spill] sm:$0xff] %v10822_v0  ;;  %2745 = vmatprep.mubr.f32.mxu0 %v15563_v39  ;;  %3002 = vmatprep.mubr.f32.mxu1 %v15563_v39  ;;  %v2169_v0 = vld [vmem:[%s15537_s3 + $0x38] sm:$0xff] }
 0x288   :  { %v10843_v49 = vpop.f32.mrf.mxu1  ;;  %v10845_v23 = vpop.f32.mrf.mxu0  ;;  %3764 = vmatprep.subr.mxu1 %v2169_v0 }
 0x289   :  { %16010 = vst [vmem:[#allocation443_spill] sm:$0xff] %v10843_v49  ;;  %3765 = vmatpush1.msra.mxu1 %v2168_v56  ;;  %v10860_v49 = vld [vmem:[%s15538_s2 + $0x190] sm:$0xff] }
 0x28a   :  { %v10847_v14 = vpop.f32.mrf.mxu1  ;;  %v10849_v2 = vpop.f32.mrf.mxu0  ;;  %7459 = vmatmul.mubr.msk.f32.gmra.mxu0 %vm2194_vm1, %v10835_v50  ;;  %7491 = vmatmul.mubr.msk.f32.gmra.mxu1 %vm2194_vm1, %v10199_v55  ;;  %v10880_v55 = vld [vmem:[%s15538_s2 + $0x198] sm:$0xff] }
 0x28b   :  { %16011 = vst [vmem:[#allocation444_spill] sm:$0xff] %v10847_v14  ;;  %2751 = vmatprep.mubr.f32.mxu0 %v15563_v39  ;;  %3008 = vmatprep.mubr.f32.mxu1 %v15563_v39 }
 0x28c   :  { %v10862_v56 = vpop.f32.mrf.mxu1  ;;  %v10864_v0 = vpop.f32.mrf.mxu0  ;;  %5215 = vmatprep.subr.mxu1 %v15563_v39 }
 0x28d   :  { %16012 = vst [vmem:[#allocation445_spill] sm:$0xff] %v10862_v56 }
 0x28e   :  { %v10867_v14 = vpop.f32.mrf.mxu1  ;;  %v10869_v17 = vpop.f32.mrf.mxu0  ;;  %7460 = vmatmul.mubr.msk.f32.gmra.mxu0 %vm2194_vm1, %v10860_v49  ;;  %7492 = vmatmul.mubr.msk.f32.gmra.mxu1 %vm2194_vm1, %v10218_v45  ;;  %v10899_v45 = vld [vmem:[%s15538_s2 + $0x1a0] sm:$0xff] }
 0x28f   :  { %16013 = vst [vmem:[#allocation446_spill] sm:$0xff] %v10867_v14  ;;  %2757 = vmatprep.mubr.f32.mxu0 %v15563_v39  ;;  %3014 = vmatprep.mubr.f32.mxu1 %v15563_v39 }
 0x290   :  { %v10882_v56 = vpop.f32.mrf.mxu1  ;;  %v10884_v14 = vpop.f32.mrf.mxu0 }
 0x291   :  { %16014 = vst [vmem:[#allocation447_spill] sm:$0xff] %v10882_v56 }
 0x292   :  { %v10886_v1 = vpop.f32.mrf.mxu1  ;;  %v10888_v42 = vpop.f32.mrf.mxu0  ;;  %7461 = vmatmul.mubr.msk.f32.gmra.mxu0 %vm2194_vm1, %v10880_v55  ;;  %7493 = vmatmul.mubr.msk.f32.gmra.mxu1 %vm2194_vm1, %v10237_v46  ;;  %v10918_v46 = vld [vmem:[%s15538_s2 + $0x1a8] sm:$0xff] }
 0x293   :  { %16015 = vst [vmem:[#allocation448_spill] sm:$0xff] %v10886_v1  ;;  %2763 = vmatprep.mubr.f32.mxu0 %v15563_v39  ;;  %3020 = vmatprep.mubr.f32.mxu1 %v15563_v39 }
 0x294   :  { %v10901_v56 = vpop.f32.mrf.mxu1  ;;  %v10903_v1 = vpop.f32.mrf.mxu0 }
 0x295   :  { %16016 = vst [vmem:[#allocation449_spill] sm:$0xff] %v10901_v56 }
 0x296   :  { %v10905_v10 = vpop.f32.mrf.mxu1  ;;  %v10907_v40 = vpop.f32.mrf.mxu0  ;;  %7462 = vmatmul.mubr.msk.f32.gmra.mxu0 %vm2194_vm1, %v10899_v45  ;;  %7494 = vmatmul.mubr.msk.f32.gmra.mxu1 %vm2194_vm1, %v10256_v48  ;;  %v10937_v48 = vld [vmem:[%s15538_s2 + $0x1b0] sm:$0xff] }
 0x297   :  { %16017 = vst [vmem:[#allocation450_spill] sm:$0xff] %v10905_v10  ;;  %2769 = vmatprep.mubr.f32.mxu0 %v15563_v39  ;;  %3026 = vmatprep.mubr.f32.mxu1 %v15563_v39 }
 0x298   :  { %v10920_v56 = vpop.f32.mrf.mxu1  ;;  %v10922_v10 = vpop.f32.mrf.mxu0 }
 0x299   :  { %16018 = vst [vmem:[#allocation451_spill] sm:$0xff] %v10920_v56 }
 0x29a   :  { %v10924_v6 = vpop.f32.mrf.mxu1  ;;  %v10926_v63 = vpop.f32.mrf.mxu0  ;;  %7463 = vmatmul.mubr.msk.f32.gmra.mxu0 %vm2194_vm1, %v10918_v46  ;;  %7495 = vmatmul.mubr.msk.f32.gmra.mxu1 %vm2194_vm1, %v10275_v44  ;;  %v10956_v44 = vld [vmem:[%s15538_s2 + $0x1b8] sm:$0xff] }
 0x29b   :  { %16019 = vst [vmem:[#allocation452_spill] sm:$0xff] %v10924_v6  ;;  %2775 = vmatprep.mubr.f32.mxu0 %v15563_v39  ;;  %3032 = vmatprep.mubr.f32.mxu1 %v15563_v39 }
 0x29c   :  { %v10939_v56 = vpop.f32.mrf.mxu1  ;;  %v10941_v6 = vpop.f32.mrf.mxu0 }
 0x29d   :  { %16020 = vst [vmem:[#allocation453_spill] sm:$0xff] %v10939_v56 }
 0x29e   :  { %v10943_v3 = vpop.f32.mrf.mxu1  ;;  %v10945_v38 = vpop.f32.mrf.mxu0  ;;  %7464 = vmatmul.mubr.msk.f32.gmra.mxu0 %vm2194_vm1, %v10937_v48  ;;  %7496 = vmatmul.mubr.msk.f32.gmra.mxu1 %vm2194_vm1, %v10294_v21  ;;  %v10975_v21 = vld [vmem:[%s15538_s2 + $0x1c0] sm:$0xff] }
 0x29f   :  { %16021 = vst [vmem:[#allocation454_spill] sm:$0xff] %v10943_v3  ;;  %2781 = vmatprep.mubr.f32.mxu0 %v15563_v39  ;;  %3038 = vmatprep.mubr.f32.mxu1 %v15563_v39 }
 0x2a0   :  { %v10958_v56 = vpop.f32.mrf.mxu1  ;;  %v10960_v3 = vpop.f32.mrf.mxu0 }
 0x2a1   :  { %16022 = vst [vmem:[#allocation455_spill] sm:$0xff] %v10958_v56 }
 0x2a2   :  { %v10962_v36 = vpop.f32.mrf.mxu1  ;;  %v10964_v34 = vpop.f32.mrf.mxu0  ;;  %7465 = vmatmul.mubr.msk.f32.gmra.mxu0 %vm2194_vm1, %v10956_v44  ;;  %7497 = vmatmul.mubr.msk.f32.gmra.mxu1 %vm2194_vm1, %v10313_v20  ;;  %v10994_v20 = vld [vmem:[%s15538_s2 + $0x1c8] sm:$0xff] }
 0x2a3   :  { %16023 = vst [vmem:[#allocation456_spill] sm:$0xff] %v10962_v36  ;;  %2787 = vmatprep.mubr.f32.mxu0 %v15563_v39  ;;  %3044 = vmatprep.mubr.f32.mxu1 %v15563_v39 }
 0x2a4   :  { %v10977_v56 = vpop.f32.mrf.mxu1  ;;  %v10979_v36 = vpop.f32.mrf.mxu0 }
 0x2a5   :  { %16024 = vst [vmem:[#allocation457_spill] sm:$0xff] %v10977_v56 }
 0x2a6   :  { %v10981_v32 = vpop.f32.mrf.mxu1  ;;  %v10983_v30 = vpop.f32.mrf.mxu0  ;;  %7466 = vmatmul.mubr.msk.f32.gmra.mxu0 %vm2194_vm1, %v10975_v21  ;;  %7498 = vmatmul.mubr.msk.f32.gmra.mxu1 %vm2194_vm1, %v10332_v15  ;;  %v11013_v15 = vld [vmem:[%s15538_s2 + $0x1d0] sm:$0xff] }
 0x2a7   :  { %16025 = vst [vmem:[#allocation458_spill] sm:$0xff] %v10981_v32  ;;  %16026 = vst [vmem:[#allocation459_spill] sm:$0xff] %v10983_v30  ;;  %2793 = vmatprep.mubr.f32.mxu0 %v15563_v39  ;;  %3050 = vmatprep.mubr.f32.mxu1 %v15563_v39 }
 0x2a8   :  { %v10996_v56 = vpop.f32.mrf.mxu1  ;;  %v10998_v32 = vpop.f32.mrf.mxu0 }
 0x2a9   :  { %16027 = vst [vmem:[#allocation460_spill] sm:$0xff] %v10996_v56  ;;  %16028 = vst [vmem:[#allocation461_spill] sm:$0xff] %v10998_v32 }
 0x2aa   :  { %v11000_v28 = vpop.f32.mrf.mxu1  ;;  %v11002_v30 = vpop.f32.mrf.mxu0  ;;  %7467 = vmatmul.mubr.msk.f32.gmra.mxu0 %vm2194_vm1, %v10994_v20  ;;  %7499 = vmatmul.mubr.msk.f32.gmra.mxu1 %vm2194_vm1, %v10351_v12  ;;  %v11032_v12 = vld [vmem:[%s15538_s2 + $0x1d8] sm:$0xff] }
 0x2ab   :  { %16029 = vst [vmem:[#allocation462_spill] sm:$0xff] %v11000_v28  ;;  %16030 = vst [vmem:[#allocation463_spill] sm:$0xff] %v11002_v30  ;;  %2799 = vmatprep.mubr.f32.mxu0 %v15563_v39  ;;  %3056 = vmatprep.mubr.f32.mxu1 %v15563_v39 }
 0x2ac   :  { %v11015_v56 = vpop.f32.mrf.mxu1  ;;  %v11017_v28 = vpop.f32.mrf.mxu0 }
 0x2ad   :  { %16031 = vst [vmem:[#allocation464_spill] sm:$0xff] %v11015_v56  ;;  %16032 = vst [vmem:[#allocation465_spill] sm:$0xff] %v11017_v28 }
 0x2ae   :  { %v11019_v30 = vpop.f32.mrf.mxu1  ;;  %v11021_v32 = vpop.f32.mrf.mxu0  ;;  %7468 = vmatmul.mubr.msk.f32.gmra.mxu0 %vm2194_vm1, %v11013_v15  ;;  %7500 = vmatmul.mubr.msk.f32.gmra.mxu1 %vm2194_vm1, %v10370_v11  ;;  %v11051_v11 = vld [vmem:[%s15538_s2 + $0x1e0] sm:$0xff] }
 0x2af   :  { %16033 = vst [vmem:[#allocation466_spill] sm:$0xff] %v11019_v30  ;;  %16034 = vst [vmem:[#allocation467_spill] sm:$0xff] %v11021_v32  ;;  %2805 = vmatprep.mubr.f32.mxu0 %v15563_v39  ;;  %3062 = vmatprep.mubr.f32.mxu1 %v15563_v39 }
 0x2b0   :  { %v11034_v56 = vpop.f32.mrf.mxu1  ;;  %v11036_v30 = vpop.f32.mrf.mxu0 }
 0x2b1   :  { %16035 = vst [vmem:[#allocation468_spill] sm:$0xff] %v11034_v56  ;;  %16036 = vst [vmem:[#allocation469_spill] sm:$0xff] %v11036_v30 }
 0x2b2   :  { %v11038_v32 = vpop.f32.mrf.mxu1  ;;  %v11040_v28 = vpop.f32.mrf.mxu0  ;;  %7469 = vmatmul.mubr.msk.f32.gmra.mxu0 %vm2194_vm1, %v11032_v12  ;;  %7501 = vmatmul.mubr.msk.f32.gmra.mxu1 %vm2194_vm1, %v10389_v8  ;;  %v11070_v8 = vld [vmem:[%s15538_s2 + $0x1e8] sm:$0xff] }
 0x2b3   :  { %16037 = vst [vmem:[#allocation470_spill] sm:$0xff] %v11038_v32  ;;  %16038 = vst [vmem:[#allocation471_spill] sm:$0xff] %v11040_v28  ;;  %2811 = vmatprep.mubr.f32.mxu0 %v15563_v39  ;;  %3068 = vmatprep.mubr.f32.mxu1 %v15563_v39 }
 0x2b4   :  { %v11053_v56 = vpop.f32.mrf.mxu1  ;;  %v11055_v32 = vpop.f32.mrf.mxu0 }
 0x2b5   :  { %16039 = vst [vmem:[#allocation472_spill] sm:$0xff] %v11053_v56  ;;  %16040 = vst [vmem:[#allocation473_spill] sm:$0xff] %v11055_v32 }
 0x2b6   :  { %v11057_v28 = vpop.f32.mrf.mxu1  ;;  %v11059_v30 = vpop.f32.mrf.mxu0  ;;  %7470 = vmatmul.mubr.msk.f32.gmra.mxu0 %vm2194_vm1, %v11051_v11  ;;  %7502 = vmatmul.mubr.msk.f32.gmra.mxu1 %vm2194_vm1, %v10408_v7  ;;  %v11089_v7 = vld [vmem:[%s15538_s2 + $0x1f0] sm:$0xff] }
 0x2b7   :  { %16041 = vst [vmem:[#allocation474_spill] sm:$0xff] %v11057_v28  ;;  %16042 = vst [vmem:[#allocation475_spill] sm:$0xff] %v11059_v30  ;;  %2817 = vmatprep.mubr.f32.mxu0 %v15563_v39  ;;  %3074 = vmatprep.mubr.f32.mxu1 %v15563_v39 }
 0x2b8   :  { %v11072_v56 = vpop.f32.mrf.mxu1  ;;  %v11074_v28 = vpop.f32.mrf.mxu0 }
 0x2b9   :  { %16043 = vst [vmem:[#allocation476_spill] sm:$0xff] %v11072_v56  ;;  %16044 = vst [vmem:[#allocation477_spill] sm:$0xff] %v11074_v28 }
 0x2ba   :  { %v11076_v30 = vpop.f32.mrf.mxu1  ;;  %v11078_v32 = vpop.f32.mrf.mxu0  ;;  %7471 = vmatmul.mubr.msk.f32.gmra.mxu0 %vm2194_vm1, %v11070_v8  ;;  %7503 = vmatmul.mubr.msk.f32.gmra.mxu1 %vm2194_vm1, %v10427_v4  ;;  %v11108_v4 = vld [vmem:[%s15538_s2 + $0x1f8] sm:$0xff] }
 0x2bb   :  { %16045 = vst [vmem:[#allocation478_spill] sm:$0xff] %v11076_v30  ;;  %16046 = vst [vmem:[#allocation479_spill] sm:$0xff] %v11078_v32  ;;  %2823 = vmatprep.mubr.f32.mxu0 %v15563_v39  ;;  %3080 = vmatprep.mubr.f32.mxu1 %v15563_v39 }
 0x2bc   :  { %v11091_v56 = vpop.f32.mrf.mxu1  ;;  %v11093_v30 = vpop.f32.mrf.mxu0 }
 0x2bd   :  { %16047 = vst [vmem:[#allocation480_spill] sm:$0xff] %v11091_v56  ;;  %16048 = vst [vmem:[#allocation481_spill] sm:$0xff] %v11093_v30 }
 0x2be   :  { %v11095_v32 = vpop.f32.mrf.mxu1  ;;  %v11097_v28 = vpop.f32.mrf.mxu0  ;;  %7472 = vmatmul.mubr.msk.f32.gmra.mxu0 %vm2194_vm1, %v11089_v7  ;;  %7504 = vmatmul.mubr.msk.f32.gmra.mxu1 %vm2194_vm1, %v10446_v61 }
 0x2bf   :  { %16049 = vst [vmem:[#allocation482_spill] sm:$0xff] %v11095_v32  ;;  %16050 = vst [vmem:[#allocation483_spill] sm:$0xff] %v11097_v28  ;;  %2829 = vmatprep.mubr.f32.mxu0 %v15563_v39  ;;  %3086 = vmatprep.mubr.f32.mxu1 %v15563_v39 }
 0x2c0   :  { %v11110_v56 = vpop.f32.mrf.mxu1  ;;  %v11112_v32 = vpop.f32.mrf.mxu0 }
 0x2c1   :  { %16051 = vst [vmem:[#allocation484_spill] sm:$0xff] %v11110_v56  ;;  %16052 = vst [vmem:[#allocation485_spill] sm:$0xff] %v11112_v32 }
 0x2c2   :  { %v11114_v28 = vpop.f32.mrf.mxu1  ;;  %v11116_v30 = vpop.f32.mrf.mxu0  ;;  %7473 = vmatmul.mubr.msk.f32.gmra.mxu0 %vm2194_vm1, %v11108_v4  ;;  %7505 = vmatmul.mubr.msk.f32.gmra.mxu1 %vm2194_vm1, %v10465_v57  ;;  %v4710_v57 = vld [vmem:[%s15539_s4 + $0x78] sm:$0xff] }
 0x2c3   :  { %16053 = vst [vmem:[#allocation486_spill] sm:$0xff] %v11114_v28  ;;  %16054 = vst [vmem:[#allocation487_spill] sm:$0xff] %v11116_v30  ;;  %3092 = vmatprep.mubr.f32.mxu1 %v15563_v39  ;;  %3349 = vmatprep.mubr.f32.mxu0 %v15563_v39  ;;  %v11137_v28 = vld [vmem:[%s15538_s2] sm:$0xff]  ;;  %v11160_v30 = vld [vmem:[%s15538_s2 + $0x8] sm:$0xff] }
 0x2c4   :  { %v11124_v61 = vpop.f32.mrf.mxu1  ;;  %v11126_v26 = vpop.f32.mrf.mxu0 }
 0x2c5   :  { %16055 = vst [vmem:[#allocation488_spill] sm:$0xff] %v11124_v61  ;;  %16056 = vst [vmem:[#allocation489_spill] sm:$0xff] %v11126_v26  ;;  %v11833_v26 = vld [vmem:[%s15538_s2 + $0x100] sm:$0xff] }
 0x2c6   :  { %v11128_v56 = vpop.f32.mrf.mxu1  ;;  %v11130_v32 = vpop.f32.mrf.mxu0  ;;  %7506 = vmatmul.mubr.msk.f32.gmra.mxu1 %vm2194_vm1, %v10490_v19  ;;  %7538 = vmatmul.mubr.msk.f32.vlgmr.msra.gmra.mxu0 %vm2194_vm1, %v11137_v28 }
 0x2c7   :  { %16057 = vst [vmem:[#allocation490_spill] sm:$0xff] %v11128_v56  ;;  %16058 = vst [vmem:[#allocation491_spill] sm:$0xff] %v11130_v32  ;;  %3098 = vmatprep.mubr.f32.mxu1 %v15563_v39  ;;  %3355 = vmatprep.mubr.f32.mxu0 %v15563_v39 }
 0x2c8   :  { %v11146_v56 = vpop.f32.mrf.mxu1  ;;  %v11148_v61 = vpop.f32.mrf.mxu0  ;;  %4831 = vmatpush1.msra.mxu0 %v4710_v57 }
 0x2c9   :  { %16059 = vst [vmem:[#allocation492_spill] sm:$0xff] %v11146_v56  ;;  %16060 = vst [vmem:[#allocation493_spill] sm:$0xff] %v11148_v61  ;;  %4832 = vmatprep.subr.mxu0 %v15563_v39  ;;  %v11182_v61 = vld [vmem:[%s15538_s2 + $0x10] sm:$0xff] }
 0x2ca   :  { %v11151_v19 = vpop.f32.mrf.mxu1  ;;  %v11153_v32 = vpop.f32.mrf.mxu0  ;;  %7507 = vmatmul.mubr.msk.f32.gmra.mxu1 %vm2194_vm1, %v10520_v62  ;;  %7539 = vmatmul.mubr.msk.f32.gmra.mxu0 %vm2194_vm1, %v11160_v30  ;;  %v4709_v62 = vld [vmem:[%s15539_s4 + $0x70] sm:$0xff] }
 0x2cb   :  { %16061 = vst [vmem:[#allocation494_spill] sm:$0xff] %v11151_v19  ;;  %16062 = vst [vmem:[#allocation495_spill] sm:$0xff] %v11153_v32  ;;  %3104 = vmatprep.mubr.f32.mxu1 %v15563_v39  ;;  %3361 = vmatprep.mubr.f32.mxu0 %v15563_v39 }
 0x2cc   :  { %v11166_v57 = vpop.f32.mrf.mxu1  ;;  %v11168_v19 = vpop.f32.mrf.mxu0  ;;  %4833 = vmatpush1.msra.mxu0 %v4709_v62 }
 0x2cd   :  { %16063 = vst [vmem:[#allocation496_spill] sm:$0xff] %v11166_v57  ;;  %16064 = vst [vmem:[#allocation497_spill] sm:$0xff] %v11168_v19  ;;  %4834 = vmatprep.subr.mxu0 %v15563_v39  ;;  %v11202_v19 = vld [vmem:[%s15538_s2 + $0x18] sm:$0xff] }
 0x2ce   :  { %v11173_v56 = vpop.f32.mrf.mxu1  ;;  %v11175_v32 = vpop.f32.mrf.mxu0  ;;  %7508 = vmatmul.mubr.msk.f32.gmra.mxu1 %vm2194_vm1, %v10549_v43  ;;  %7540 = vmatmul.mubr.msk.f32.gmra.mxu0 %vm2194_vm1, %v11182_v61 }
 0x2cf   :  { %16065 = vst [vmem:[#allocation498_spill] sm:$0xff] %v11173_v56  ;;  %16066 = vst [vmem:[#allocation499_spill] sm:$0xff] %v11175_v32  ;;  %3110 = vmatprep.mubr.f32.mxu1 %v15563_v39  ;;  %3367 = vmatprep.mubr.f32.mxu0 %v15563_v39 }
 0x2d0   :  { %v11188_v57 = vpop.f32.mrf.mxu1  ;;  %v11190_v56 = vpop.f32.mrf.mxu0 }
 0x2d1   :  { %16067 = vst [vmem:[#allocation500_spill] sm:$0xff] %v11188_v57  ;;  %16068 = vst [vmem:[#allocation501_spill] sm:$0xff] %v11190_v56  ;;  %v11224_v56 = vld [vmem:[%s15538_s2 + $0x20] sm:$0xff] }
 0x2d2   :  { %v11193_v43 = vpop.f32.mrf.mxu1  ;;  %v11195_v32 = vpop.f32.mrf.mxu0  ;;  %7509 = vmatmul.mubr.msk.f32.gmra.mxu1 %vm2194_vm1, %v10569_v58  ;;  %7541 = vmatmul.mubr.msk.f32.gmra.mxu0 %vm2194_vm1, %v11202_v19  ;;  %v4708_v58 = vld [vmem:[%s15539_s4 + $0x68] sm:$0xff] }
 0x2d3   :  { %16069 = vst [vmem:[#allocation502_spill] sm:$0xff] %v11193_v43  ;;  %16070 = vst [vmem:[#allocation503_spill] sm:$0xff] %v11195_v32  ;;  %3116 = vmatprep.mubr.f32.mxu1 %v15563_v39  ;;  %3373 = vmatprep.mubr.f32.mxu0 %v15563_v39 }
 0x2d4   :  { %v11208_v62 = vpop.f32.mrf.mxu1  ;;  %v11210_v43 = vpop.f32.mrf.mxu0  ;;  %4835 = vmatpush1.msra.mxu0 %v4708_v58 }
 0x2d5   :  { %16071 = vst [vmem:[#allocation504_spill] sm:$0xff] %v11208_v62  ;;  %16072 = vst [vmem:[#allocation505_spill] sm:$0xff] %v11210_v43  ;;  %4836 = vmatprep.subr.mxu0 %v15563_v39  ;;  %v11244_v43 = vld [vmem:[%s15538_s2 + $0x28] sm:$0xff] }
 0x2d6   :  { %v11215_v57 = vpop.f32.mrf.mxu1  ;;  %v11217_v32 = vpop.f32.mrf.mxu0  ;;  %7510 = vmatmul.mubr.msk.f32.gmra.mxu1 %vm2194_vm1, %v10588_v59  ;;  %7542 = vmatmul.mubr.msk.f32.gmra.mxu0 %vm2194_vm1, %v11224_v56 }
 0x2d7   :  { %16073 = vst [vmem:[#allocation506_spill] sm:$0xff] %v11215_v57  ;;  %16074 = vst [vmem:[#allocation507_spill] sm:$0xff] %v11217_v32  ;;  %3122 = vmatprep.mubr.f32.mxu1 %v15563_v39  ;;  %3379 = vmatprep.mubr.f32.mxu0 %v15563_v39 }
 0x2d8   :  { %v11230_v62 = vpop.f32.mrf.mxu1  ;;  %v11232_v57 = vpop.f32.mrf.mxu0 }
 0x2d9   :  { %16075 = vst [vmem:[#allocation508_spill] sm:$0xff] %v11230_v62  ;;  %16076 = vst [vmem:[#allocation509_spill] sm:$0xff] %v11232_v57  ;;  %v11266_v57 = vld [vmem:[%s15538_s2 + $0x30] sm:$0xff] }
 0x2da   :  { %v11235_v59 = vpop.f32.mrf.mxu1  ;;  %v11237_v32 = vpop.f32.mrf.mxu0  ;;  %7511 = vmatmul.mubr.msk.f32.gmra.mxu1 %vm2194_vm1, %v10607_v35  ;;  %7543 = vmatmul.mubr.msk.f32.gmra.mxu0 %vm2194_vm1, %v11244_v43  ;;  %v4707_v35 = vld [vmem:[%s15539_s4 + $0x60] sm:$0xff] }
 0x2db   :  { %16077 = vst [vmem:[#allocation510_spill] sm:$0xff] %v11235_v59  ;;  %16078 = vst [vmem:[#allocation511_spill] sm:$0xff] %v11237_v32  ;;  %3128 = vmatprep.mubr.f32.mxu1 %v15563_v39  ;;  %3385 = vmatprep.mubr.f32.mxu0 %v15563_v39 }
 0x2dc   :  { %v11250_v58 = vpop.f32.mrf.mxu1  ;;  %v11252_v59 = vpop.f32.mrf.mxu0  ;;  %4837 = vmatpush1.msra.mxu0 %v4707_v35 }
 0x2dd   :  { %16079 = vst [vmem:[#allocation512_spill] sm:$0xff] %v11250_v58  ;;  %16080 = vst [vmem:[#allocation513_spill] sm:$0xff] %v11252_v59  ;;  %4838 = vmatprep.subr.mxu0 %v15563_v39  ;;  %v11286_v59 = vld [vmem:[%s15538_s2 + $0x38] sm:$0xff] }
 0x2de   :  { %v11257_v62 = vpop.f32.mrf.mxu1  ;;  %v11259_v32 = vpop.f32.mrf.mxu0  ;;  %7512 = vmatmul.mubr.msk.f32.gmra.mxu1 %vm2194_vm1, %v10626_v47  ;;  %7544 = vmatmul.mubr.msk.f32.gmra.mxu0 %vm2194_vm1, %v11266_v57 }
 0x2df   :  { %16081 = vst [vmem:[#allocation514_spill] sm:$0xff] %v11257_v62  ;;  %16082 = vst [vmem:[#allocation515_spill] sm:$0xff] %v11259_v32  ;;  %3134 = vmatprep.mubr.f32.mxu1 %v15563_v39  ;;  %3391 = vmatprep.mubr.f32.mxu0 %v15563_v39 }
 0x2e0   :  { %v11272_v58 = vpop.f32.mrf.mxu1  ;;  %v11274_v62 = vpop.f32.mrf.mxu0 }
 0x2e1   :  { %16083 = vst [vmem:[#allocation516_spill] sm:$0xff] %v11272_v58  ;;  %16084 = vst [vmem:[#allocation517_spill] sm:$0xff] %v11274_v62  ;;  %v11308_v62 = vld [vmem:[%s15538_s2 + $0x40] sm:$0xff] }
 0x2e2   :  { %v11277_v47 = vpop.f32.mrf.mxu1  ;;  %v11279_v32 = vpop.f32.mrf.mxu0  ;;  %7513 = vmatmul.mubr.msk.f32.gmra.mxu1 %vm2194_vm1, %v10645_v60  ;;  %7545 = vmatmul.mubr.msk.f32.gmra.mxu0 %vm2194_vm1, %v11286_v59  ;;  %v4706_v60 = vld [vmem:[%s15539_s4 + $0x58] sm:$0xff] }
 0x2e3   :  { %16085 = vst [vmem:[#allocation518_spill] sm:$0xff] %v11277_v47  ;;  %16086 = vst [vmem:[#allocation519_spill] sm:$0xff] %v11279_v32  ;;  %3140 = vmatprep.mubr.f32.mxu1 %v15563_v39  ;;  %3397 = vmatprep.mubr.f32.mxu0 %v15563_v39 }
 0x2e4   :  { %v11292_v35 = vpop.f32.mrf.mxu1  ;;  %v11294_v47 = vpop.f32.mrf.mxu0  ;;  %4839 = vmatpush1.msra.mxu0 %v4706_v60 }
 0x2e5   :  { %16087 = vst [vmem:[#allocation520_spill] sm:$0xff] %v11292_v35  ;;  %16088 = vst [vmem:[#allocation521_spill] sm:$0xff] %v11294_v47  ;;  %4840 = vmatprep.subr.mxu0 %v15563_v39  ;;  %v11328_v47 = vld [vmem:[%s15538_s2 + $0x48] sm:$0xff] }
 0x2e6   :  { %v11299_v58 = vpop.f32.mrf.mxu1  ;;  %v11301_v32 = vpop.f32.mrf.mxu0  ;;  %7514 = vmatmul.mubr.msk.f32.gmra.mxu1 %vm2194_vm1, %v10664_v33  ;;  %7546 = vmatmul.mubr.msk.f32.gmra.mxu0 %vm2194_vm1, %v11308_v62 }
 0x2e7   :  { %16089 = vst [vmem:[#allocation522_spill] sm:$0xff] %v11299_v58  ;;  %16090 = vst [vmem:[#allocation523_spill] sm:$0xff] %v11301_v32  ;;  %3146 = vmatprep.mubr.f32.mxu1 %v15563_v39  ;;  %3403 = vmatprep.mubr.f32.mxu0 %v15563_v39 }
 0x2e8   :  { %v11314_v35 = vpop.f32.mrf.mxu1  ;;  %v11316_v58 = vpop.f32.mrf.mxu0 }
 0x2e9   :  { %16091 = vst [vmem:[#allocation524_spill] sm:$0xff] %v11314_v35  ;;  %16092 = vst [vmem:[#allocation525_spill] sm:$0xff] %v11316_v58  ;;  %v11350_v58 = vld [vmem:[%s15538_s2 + $0x50] sm:$0xff] }
 0x2ea   :  { %v11319_v33 = vpop.f32.mrf.mxu1  ;;  %v11321_v32 = vpop.f32.mrf.mxu0  ;;  %7515 = vmatmul.mubr.msk.f32.gmra.mxu1 %vm2194_vm1, %v10683_v54  ;;  %7547 = vmatmul.mubr.msk.f32.gmra.mxu0 %vm2194_vm1, %v11328_v47  ;;  %v4705_v54 = vld [vmem:[%s15539_s4 + $0x50] sm:$0xff] }
 0x2eb   :  { %16093 = vst [vmem:[#allocation526_spill] sm:$0xff] %v11319_v33  ;;  %16094 = vst [vmem:[#allocation527_spill] sm:$0xff] %v11321_v32  ;;  %3152 = vmatprep.mubr.f32.mxu1 %v15563_v39  ;;  %3409 = vmatprep.mubr.f32.mxu0 %v15563_v39 }
 0x2ec   :  { %v11334_v60 = vpop.f32.mrf.mxu1  ;;  %v11336_v33 = vpop.f32.mrf.mxu0  ;;  %4841 = vmatpush1.msra.mxu0 %v4705_v54 }
 0x2ed   :  { %16095 = vst [vmem:[#allocation528_spill] sm:$0xff] %v11334_v60  ;;  %16096 = vst [vmem:[#allocation529_spill] sm:$0xff] %v11336_v33  ;;  %4842 = vmatprep.subr.mxu0 %v15563_v39  ;;  %v11370_v33 = vld [vmem:[%s15538_s2 + $0x58] sm:$0xff] }
 0x2ee   :  { %v11341_v35 = vpop.f32.mrf.mxu1  ;;  %v11343_v32 = vpop.f32.mrf.mxu0  ;;  %7516 = vmatmul.mubr.msk.f32.gmra.mxu1 %vm2194_vm1, %v10702_v31  ;;  %7548 = vmatmul.mubr.msk.f32.gmra.mxu0 %vm2194_vm1, %v11350_v58 }
 0x2ef   :  { %16097 = vst [vmem:[#allocation530_spill] sm:$0xff] %v11341_v35  ;;  %16098 = vst [vmem:[#allocation531_spill] sm:$0xff] %v11343_v32  ;;  %3158 = vmatprep.mubr.f32.mxu1 %v15563_v39  ;;  %3415 = vmatprep.mubr.f32.mxu0 %v15563_v39 }
 0x2f0   :  { %v11356_v60 = vpop.f32.mrf.mxu1  ;;  %v11358_v35 = vpop.f32.mrf.mxu0 }
 0x2f1   :  { %16099 = vst [vmem:[#allocation532_spill] sm:$0xff] %v11356_v60  ;;  %16100 = vst [vmem:[#allocation533_spill] sm:$0xff] %v11358_v35  ;;  %v11392_v35 = vld [vmem:[%s15538_s2 + $0x60] sm:$0xff] }
 0x2f2   :  { %v11361_v31 = vpop.f32.mrf.mxu1  ;;  %v11363_v32 = vpop.f32.mrf.mxu0  ;;  %7517 = vmatmul.mubr.msk.f32.gmra.mxu1 %vm2194_vm1, %v10721_v53  ;;  %7549 = vmatmul.mubr.msk.f32.gmra.mxu0 %vm2194_vm1, %v11370_v33  ;;  %v4704_v53 = vld [vmem:[%s15539_s4 + $0x48] sm:$0xff] }
 0x2f3   :  { %16101 = vst [vmem:[#allocation534_spill] sm:$0xff] %v11361_v31  ;;  %16102 = vst [vmem:[#allocation535_spill] sm:$0xff] %v11363_v32  ;;  %3164 = vmatprep.mubr.f32.mxu1 %v15563_v39  ;;  %3421 = vmatprep.mubr.f32.mxu0 %v15563_v39 }
 0x2f4   :  { %v11376_v54 = vpop.f32.mrf.mxu1  ;;  %v11378_v31 = vpop.f32.mrf.mxu0  ;;  %4843 = vmatpush1.msra.mxu0 %v4704_v53 }
 0x2f5   :  { %16103 = vst [vmem:[#allocation536_spill] sm:$0xff] %v11376_v54  ;;  %16104 = vst [vmem:[#allocation537_spill] sm:$0xff] %v11378_v31  ;;  %4844 = vmatprep.subr.mxu0 %v15563_v39  ;;  %v11412_v31 = vld [vmem:[%s15538_s2 + $0x68] sm:$0xff] }
 0x2f6   :  { %v11383_v60 = vpop.f32.mrf.mxu1  ;;  %v11385_v32 = vpop.f32.mrf.mxu0  ;;  %7518 = vmatmul.mubr.msk.f32.gmra.mxu1 %vm2194_vm1, %v10740_v29  ;;  %7550 = vmatmul.mubr.msk.f32.gmra.mxu0 %vm2194_vm1, %v11392_v35 }
 0x2f7   :  { %16105 = vst [vmem:[#allocation538_spill] sm:$0xff] %v11383_v60  ;;  %16106 = vst [vmem:[#allocation539_spill] sm:$0xff] %v11385_v32  ;;  %3170 = vmatprep.mubr.f32.mxu1 %v15563_v39  ;;  %3427 = vmatprep.mubr.f32.mxu0 %v15563_v39 }
 0x2f8   :  { %v11398_v54 = vpop.f32.mrf.mxu1  ;;  %v11400_v60 = vpop.f32.mrf.mxu0 }
 0x2f9   :  { %16107 = vst [vmem:[#allocation540_spill] sm:$0xff] %v11398_v54  ;;  %16108 = vst [vmem:[#allocation541_spill] sm:$0xff] %v11400_v60  ;;  %v11434_v60 = vld [vmem:[%s15538_s2 + $0x70] sm:$0xff] }
 0x2fa   :  { %v11403_v29 = vpop.f32.mrf.mxu1  ;;  %v11405_v32 = vpop.f32.mrf.mxu0  ;;  %7519 = vmatmul.mubr.msk.f32.gmra.mxu1 %vm2194_vm1, %v10759_v52  ;;  %7551 = vmatmul.mubr.msk.f32.gmra.mxu0 %vm2194_vm1, %v11412_v31  ;;  %v4703_v52 = vld [vmem:[%s15539_s4 + $0x40] sm:$0xff] }
 0x2fb   :  { %16109 = vst [vmem:[#allocation542_spill] sm:$0xff] %v11403_v29  ;;  %16110 = vst [vmem:[#allocation543_spill] sm:$0xff] %v11405_v32  ;;  %3176 = vmatprep.mubr.f32.mxu1 %v15563_v39  ;;  %3433 = vmatprep.mubr.f32.mxu0 %v15563_v39 }
 0x2fc   :  { %v11418_v53 = vpop.f32.mrf.mxu1  ;;  %v11420_v29 = vpop.f32.mrf.mxu0  ;;  %4845 = vmatpush1.msra.mxu0 %v4703_v52 }
 0x2fd   :  { %16111 = vst [vmem:[#allocation544_spill] sm:$0xff] %v11418_v53  ;;  %16112 = vst [vmem:[#allocation545_spill] sm:$0xff] %v11420_v29  ;;  %4846 = vmatprep.subr.mxu0 %v15563_v39  ;;  %v11454_v29 = vld [vmem:[%s15538_s2 + $0x78] sm:$0xff] }
 0x2fe   :  { %v11425_v54 = vpop.f32.mrf.mxu1  ;;  %v11427_v32 = vpop.f32.mrf.mxu0  ;;  %7520 = vmatmul.mubr.msk.f32.gmra.mxu1 %vm2194_vm1, %v10778_v27  ;;  %7552 = vmatmul.mubr.msk.f32.gmra.mxu0 %vm2194_vm1, %v11434_v60 }
 0x2ff   :  { %16113 = vst [vmem:[#allocation546_spill] sm:$0xff] %v11425_v54  ;;  %16114 = vst [vmem:[#allocation547_spill] sm:$0xff] %v11427_v32  ;;  %3182 = vmatprep.mubr.f32.mxu1 %v15563_v39  ;;  %3439 = vmatprep.mubr.f32.mxu0 %v15563_v39 }
 0x300   :  { %v11440_v53 = vpop.f32.mrf.mxu1  ;;  %v11442_v54 = vpop.f32.mrf.mxu0 }
 0x301   :  { %16115 = vst [vmem:[#allocation548_spill] sm:$0xff] %v11440_v53  ;;  %16116 = vst [vmem:[#allocation549_spill] sm:$0xff] %v11442_v54  ;;  %v11476_v54 = vld [vmem:[%s15538_s2 + $0x80] sm:$0xff] }
 0x302   :  { %v11445_v27 = vpop.f32.mrf.mxu1  ;;  %v11447_v32 = vpop.f32.mrf.mxu0  ;;  %7521 = vmatmul.mubr.msk.f32.gmra.mxu1 %vm2194_vm1, %v10797_v51  ;;  %7553 = vmatmul.mubr.msk.f32.gmra.mxu0 %vm2194_vm1, %v11454_v29  ;;  %v4702_v51 = vld [vmem:[%s15539_s4 + $0x38] sm:$0xff] }
 0x303   :  { %16117 = vst [vmem:[#allocation550_spill] sm:$0xff] %v11445_v27  ;;  %16118 = vst [vmem:[#allocation551_spill] sm:$0xff] %v11447_v32  ;;  %3188 = vmatprep.mubr.f32.mxu1 %v15563_v39  ;;  %3445 = vmatprep.mubr.f32.mxu0 %v15563_v39 }
 0x304   :  { %v11460_v52 = vpop.f32.mrf.mxu1  ;;  %v11462_v27 = vpop.f32.mrf.mxu0  ;;  %4847 = vmatpush1.msra.mxu0 %v4702_v51 }
 0x305   :  { %16119 = vst [vmem:[#allocation552_spill] sm:$0xff] %v11460_v52  ;;  %16120 = vst [vmem:[#allocation553_spill] sm:$0xff] %v11462_v27  ;;  %4848 = vmatprep.subr.mxu0 %v15563_v39  ;;  %v11496_v27 = vld [vmem:[%s15538_s2 + $0x88] sm:$0xff] }
 0x306   :  { %v11467_v53 = vpop.f32.mrf.mxu0  ;;  %v11469_v32 = vpop.f32.mrf.mxu1  ;;  %7522 = vmatmul.mubr.msk.f32.gmra.mxu1 %vm2194_vm1, %v10816_v25  ;;  %7554 = vmatmul.mubr.msk.f32.gmra.mxu0 %vm2194_vm1, %v11476_v54 }
 0x307   :  { %16121 = vst [vmem:[#allocation554_spill] sm:$0xff] %v11467_v53  ;;  %16122 = vst [vmem:[#allocation555_spill] sm:$0xff] %v11469_v32  ;;  %3194 = vmatprep.mubr.f32.mxu1 %v15563_v39  ;;  %3451 = vmatprep.mubr.f32.mxu0 %v15563_v39 }
 0x308   :  { %v11482_v52 = vpop.f32.mrf.mxu0  ;;  %v11484_v53 = vpop.f32.mrf.mxu1 }
 0x309   :  { %16123 = vst [vmem:[#allocation556_spill] sm:$0xff] %v11482_v52  ;;  %16124 = vst [vmem:[#allocation557_spill] sm:$0xff] %v11484_v53  ;;  %v11518_v52 = vld [vmem:[%s15538_s2 + $0x90] sm:$0xff] }
 0x30a   :  { %v11487_v25 = vpop.f32.mrf.mxu0  ;;  %v11489_v32 = vpop.f32.mrf.mxu1  ;;  %7523 = vmatmul.mubr.msk.f32.gmra.mxu1 %vm2194_vm1, %v10835_v50  ;;  %7555 = vmatmul.mubr.msk.f32.gmra.mxu0 %vm2194_vm1, %v11496_v27  ;;  %v4701_v50 = vld [vmem:[%s15539_s4 + $0x30] sm:$0xff] }
 0x30b   :  { %16125 = vst [vmem:[#allocation558_spill] sm:$0xff] %v11487_v25  ;;  %16126 = vst [vmem:[#allocation559_spill] sm:$0xff] %v11489_v32  ;;  %3200 = vmatprep.mubr.f32.mxu1 %v15563_v39  ;;  %3457 = vmatprep.mubr.f32.mxu0 %v15563_v39 }
 0x30c   :  { %v11502_v51 = vpop.f32.mrf.mxu0  ;;  %v11504_v25 = vpop.f32.mrf.mxu1  ;;  %4849 = vmatpush1.msra.mxu0 %v4701_v50 }
 0x30d   :  { %16127 = vst [vmem:[#allocation560_spill] sm:$0xff] %v11502_v51  ;;  %16128 = vst [vmem:[#allocation561_spill] sm:$0xff] %v11504_v25  ;;  %4850 = vmatprep.subr.mxu0 %v15563_v39  ;;  %v11538_v51 = vld [vmem:[%s15538_s2 + $0x98] sm:$0xff] }
 0x30e   :  { %v11509_v32 = vpop.f32.mrf.mxu0  ;;  %v11511_v53 = vpop.f32.mrf.mxu1  ;;  %7524 = vmatmul.mubr.msk.f32.gmra.mxu1 %vm2194_vm1, %v10860_v49  ;;  %7556 = vmatmul.mubr.msk.f32.gmra.mxu0 %vm2194_vm1, %v11518_v52 }
 0x30f   :  { %16129 = vst [vmem:[#allocation562_spill] sm:$0xff] %v11509_v32  ;;  %16130 = vst [vmem:[#allocation563_spill] sm:$0xff] %v11511_v53  ;;  %3206 = vmatprep.mubr.f32.mxu1 %v15563_v39  ;;  %3463 = vmatprep.mubr.f32.mxu0 %v15563_v39 }
 0x310   :  { %v11524_v25 = vpop.f32.mrf.mxu0  ;;  %v11526_v32 = vpop.f32.mrf.mxu1 }
 0x311   :  { %16131 = vst [vmem:[#allocation564_spill] sm:$0xff] %v11524_v25  ;;  %16132 = vst [vmem:[#allocation565_spill] sm:$0xff] %v11526_v32  ;;  %v11560_v25 = vld [vmem:[%s15538_s2 + $0xa0] sm:$0xff] }
 0x312   :  { %v11529_v49 = vpop.f32.mrf.mxu0  ;;  %v11531_v53 = vpop.f32.mrf.mxu1  ;;  %7525 = vmatmul.mubr.msk.f32.gmra.mxu1 %vm2194_vm1, %v10880_v55  ;;  %7557 = vmatmul.mubr.msk.f32.gmra.mxu0 %vm2194_vm1, %v11538_v51  ;;  %v4700_v55 = vld [vmem:[%s15539_s4 + $0x28] sm:$0xff] }
 0x313   :  { %16133 = vst [vmem:[#allocation566_spill] sm:$0xff] %v11529_v49  ;;  %16134 = vst [vmem:[#allocation567_spill] sm:$0xff] %v11531_v53  ;;  %3212 = vmatprep.mubr.f32.mxu1 %v15563_v39  ;;  %3469 = vmatprep.mubr.f32.mxu0 %v15563_v39 }
 0x314   :  { %v11544_v50 = vpop.f32.mrf.mxu0  ;;  %v11546_v49 = vpop.f32.mrf.mxu1  ;;  %4851 = vmatpush1.msra.mxu0 %v4700_v55 }
 0x315   :  { %16135 = vst [vmem:[#allocation568_spill] sm:$0xff] %v11544_v50  ;;  %16136 = vst [vmem:[#allocation569_spill] sm:$0xff] %v11546_v49  ;;  %4852 = vmatprep.subr.mxu0 %v15563_v39  ;;  %v11580_v50 = vld [vmem:[%s15538_s2 + $0xa8] sm:$0xff] }
 0x316   :  { %v11551_v53 = vpop.f32.mrf.mxu0  ;;  %v11553_v32 = vpop.f32.mrf.mxu1  ;;  %7526 = vmatmul.mubr.msk.f32.gmra.mxu1 %vm2194_vm1, %v10899_v45  ;;  %7558 = vmatmul.mubr.msk.f32.gmra.mxu0 %vm2194_vm1, %v11560_v25 }
 0x317   :  { %16137 = vst [vmem:[#allocation570_spill] sm:$0xff] %v11551_v53  ;;  %16138 = vst [vmem:[#allocation571_spill] sm:$0xff] %v11553_v32  ;;  %3218 = vmatprep.mubr.f32.mxu1 %v15563_v39  ;;  %3475 = vmatprep.mubr.f32.mxu0 %v15563_v39 }
 0x318   :  { %v11566_v49 = vpop.f32.mrf.mxu0  ;;  %v11568_v53 = vpop.f32.mrf.mxu1 }
 0x319   :  { %16139 = vst [vmem:[#allocation572_spill] sm:$0xff] %v11566_v49  ;;  %16140 = vst [vmem:[#allocation573_spill] sm:$0xff] %v11568_v53  ;;  %v11602_v49 = vld [vmem:[%s15538_s2 + $0xb0] sm:$0xff] }
 0x31a   :  { %v11571_v45 = vpop.f32.mrf.mxu0  ;;  %v11573_v32 = vpop.f32.mrf.mxu1  ;;  %7527 = vmatmul.mubr.msk.f32.gmra.mxu1 %vm2194_vm1, %v10918_v46  ;;  %7559 = vmatmul.mubr.msk.f32.gmra.mxu0 %vm2194_vm1, %v11580_v50  ;;  %v4699_v46 = vld [vmem:[%s15539_s4 + $0x20] sm:$0xff] }
 0x31b   :  { %16141 = vst [vmem:[#allocation574_spill] sm:$0xff] %v11571_v45  ;;  %16142 = vst [vmem:[#allocation575_spill] sm:$0xff] %v11573_v32  ;;  %3224 = vmatprep.mubr.f32.mxu1 %v15563_v39  ;;  %3481 = vmatprep.mubr.f32.mxu0 %v15563_v39 }
 0x31c   :  { %v11586_v55 = vpop.f32.mrf.mxu0  ;;  %v11588_v45 = vpop.f32.mrf.mxu1  ;;  %4853 = vmatpush1.msra.mxu0 %v4699_v46 }
 0x31d   :  { %16143 = vst [vmem:[#allocation576_spill] sm:$0xff] %v11586_v55  ;;  %16144 = vst [vmem:[#allocation577_spill] sm:$0xff] %v11588_v45  ;;  %v4698_v45 = vld [vmem:[%s15539_s4 + $0x18] sm:$0xff]  ;;  %4854 = vmatprep.subr.mxu0 %v15563_v39 }
 0x31e   :  { %v11593_v32 = vpop.f32.mrf.mxu0  ;;  %v11595_v53 = vpop.f32.mrf.mxu1  ;;  %7528 = vmatmul.mubr.msk.f32.gmra.mxu1 %vm2194_vm1, %v10937_v48  ;;  %7560 = vmatmul.mubr.msk.f32.gmra.mxu0 %vm2194_vm1, %v11602_v49  ;;  %v11625_v55 = vld [vmem:[%s15538_s2 + $0xb8] sm:$0xff] }
 0x31f   :  { %16145 = vst [vmem:[#allocation578_spill] sm:$0xff] %v11593_v32  ;;  %16146 = vst [vmem:[#allocation579_spill] sm:$0xff] %v11595_v53  ;;  %3230 = vmatprep.mubr.f32.mxu1 %v15563_v39  ;;  %3487 = vmatprep.mubr.f32.mxu0 %v15563_v39 }
 0x320   :  { %v11611_v46 = vpop.f32.mrf.mxu0  ;;  %v11613_v53 = vpop.f32.mrf.mxu1  ;;  %4855 = vmatpush1.msra.mxu0 %v4698_v45 }
 0x321   :  { %16147 = vst [vmem:[#allocation580_spill] sm:$0xff] %v11611_v46  ;;  %16148 = vst [vmem:[#allocation581_spill] sm:$0xff] %v11613_v53  ;;  %v4697_v53 = vld [vmem:[%s15539_s4 + $0x10] sm:$0xff]  ;;  %4856 = vmatprep.subr.mxu0 %v15563_v39  ;;  %v11648_v46 = vld [vmem:[%s15538_s2 + $0xc0] sm:$0xff] }
 0x322   :  { %v11616_v48 = vpop.f32.mrf.mxu0  ;;  %v11618_v32 = vpop.f32.mrf.mxu1  ;;  %7529 = vmatmul.mubr.msk.f32.gmra.mxu1 %vm2194_vm1, %v10956_v44  ;;  %7561 = vmatmul.mubr.msk.f32.gmra.mxu0 %vm2194_vm1, %v11625_v55 }
 0x323   :  { %16149 = vst [vmem:[#allocation582_spill] sm:$0xff] %v11616_v48  ;;  %16150 = vst [vmem:[#allocation583_spill] sm:$0xff] %v11618_v32  ;;  %3236 = vmatprep.mubr.f32.mxu1 %v15563_v39  ;;  %3493 = vmatprep.mubr.f32.mxu0 %v15563_v39 }
 0x324   :  { %v11634_v45 = vpop.f32.mrf.mxu0  ;;  %v11636_v32 = vpop.f32.mrf.mxu1  ;;  %4857 = vmatpush1.msra.mxu0 %v4697_v53 }
 0x325   :  { %16151 = vst [vmem:[#allocation584_spill] sm:$0xff] %v11634_v45  ;;  %16152 = vst [vmem:[#allocation585_spill] sm:$0xff] %v11636_v32  ;;  %v4696_v32 = vld [vmem:[%s15539_s4 + $0x8] sm:$0xff]  ;;  %4858 = vmatprep.subr.mxu0 %v15563_v39 }
 0x326   :  { %v11639_v44 = vpop.f32.mrf.mxu0  ;;  %v11641_v48 = vpop.f32.mrf.mxu1  ;;  %7530 = vmatmul.mubr.msk.f32.gmra.mxu1 %vm2194_vm1, %v10975_v21  ;;  %7562 = vmatmul.mubr.msk.f32.gmra.mxu0 %vm2194_vm1, %v11648_v46  ;;  %v11671_v45 = vld [vmem:[%s15538_s2 + $0xc8] sm:$0xff] }
 0x327   :  { %16153 = vst [vmem:[#allocation586_spill] sm:$0xff] %v11639_v44  ;;  %16154 = vst [vmem:[#allocation587_spill] sm:$0xff] %v11641_v48  ;;  %3242 = vmatprep.mubr.f32.mxu1 %v15563_v39  ;;  %3499 = vmatprep.mubr.f32.mxu0 %v15563_v39 }
 0x328   :  { %v11657_v53 = vpop.f32.mrf.mxu0  ;;  %v11659_v48 = vpop.f32.mrf.mxu1  ;;  %4859 = vmatpush1.msra.mxu0 %v4696_v32 }
 0x329   :  { %16155 = vst [vmem:[#allocation588_spill] sm:$0xff] %v11657_v53  ;;  %16156 = vst [vmem:[#allocation589_spill] sm:$0xff] %v11659_v48  ;;  %v4695_v48 = vld [vmem:[%s15539_s4] sm:$0xff]  ;;  %4860 = vmatprep.subr.mxu0 %v15563_v39  ;;  %v11694_v53 = vld [vmem:[%s15538_s2 + $0xd0] sm:$0xff] }
 0x32a   :  { %v11662_v21 = vpop.f32.mrf.mxu0  ;;  %v11664_v44 = vpop.f32.mrf.mxu1  ;;  %7531 = vmatmul.mubr.msk.f32.gmra.mxu1 %vm2194_vm1, %v10994_v20  ;;  %7563 = vmatmul.mubr.msk.f32.gmra.mxu0 %vm2194_vm1, %v11671_v45 }
 0x32b   :  { %16157 = vst [vmem:[#allocation590_spill] sm:$0xff] %v11662_v21  ;;  %16158 = vst [vmem:[#allocation591_spill] sm:$0xff] %v11664_v44  ;;  %3248 = vmatprep.mubr.f32.mxu1 %v15563_v39  ;;  %3505 = vmatprep.mubr.f32.mxu0 %v15563_v39 }
 0x32c   :  { %v11680_v32 = vpop.f32.mrf.mxu0  ;;  %v11682_v44 = vpop.f32.mrf.mxu1  ;;  %4861 = vmatpush1.msra.mxu0 %v4695_v48 }
 0x32d   :  { %16159 = vst [vmem:[#allocation592_spill] sm:$0xff] %v11680_v32  ;;  %16160 = vst [vmem:[#allocation593_spill] sm:$0xff] %v11682_v44  ;;  %v4726_v44 = vld [vmem:[%s15539_s4 + $0xf8] sm:$0xff]  ;;  %4862 = vmatprep.subr.mxu0 %v15563_v39 }
 0x32e   :  { %v11685_v20 = vpop.f32.mrf.mxu0  ;;  %v11687_v21 = vpop.f32.mrf.mxu1  ;;  %7532 = vmatmul.mubr.msk.f32.gmra.mxu1 %vm2194_vm1, %v11013_v15  ;;  %7564 = vmatmul.mubr.msk.f32.gmra.mxu0 %vm2194_vm1, %v11694_v53  ;;  %v11717_v32 = vld [vmem:[%s15538_s2 + $0xd8] sm:$0xff] }
 0x32f   :  { %16161 = vst [vmem:[#allocation594_spill] sm:$0xff] %v11685_v20  ;;  %16162 = vst [vmem:[#allocation595_spill] sm:$0xff] %v11687_v21  ;;  %3254 = vmatprep.mubr.f32.mxu1 %v15563_v39  ;;  %3511 = vmatprep.mubr.f32.mxu0 %v15563_v39 }
 0x330   :  { %v11703_v48 = vpop.f32.mrf.mxu0  ;;  %v11705_v21 = vpop.f32.mrf.mxu1  ;;  %4863 = vmatpush2.msra.mxu0 %v4726_v44 }
 0x331   :  { %16163 = vst [vmem:[#allocation596_spill] sm:$0xff] %v11703_v48  ;;  %16164 = vst [vmem:[#allocation597_spill] sm:$0xff] %v11705_v21  ;;  %v4725_v21 = vld [vmem:[%s15539_s4 + $0xf0] sm:$0xff]  ;;  %4864 = vmatprep.subr.mxu0 %v15563_v39  ;;  %v11740_v48 = vld [vmem:[%s15538_s2 + $0xe0] sm:$0xff] }
 0x332   :  { %v11708_v15 = vpop.f32.mrf.mxu0  ;;  %v11710_v20 = vpop.f32.mrf.mxu1  ;;  %7533 = vmatmul.mubr.msk.f32.gmra.mxu1 %vm2194_vm1, %v11032_v12  ;;  %7565 = vmatmul.mubr.msk.f32.gmra.mxu0 %vm2194_vm1, %v11717_v32 }
 0x333   :  { %16165 = vst [vmem:[#allocation598_spill] sm:$0xff] %v11708_v15  ;;  %16166 = vst [vmem:[#allocation599_spill] sm:$0xff] %v11710_v20  ;;  %3260 = vmatprep.mubr.f32.mxu1 %v15563_v39  ;;  %3517 = vmatprep.mubr.f32.mxu0 %v15563_v39 }
 0x334   :  { %v11726_v44 = vpop.f32.mrf.mxu0  ;;  %v11728_v20 = vpop.f32.mrf.mxu1  ;;  %4865 = vmatpush2.msra.mxu0 %v4725_v21 }
 0x335   :  { %16167 = vst [vmem:[#allocation600_spill] sm:$0xff] %v11726_v44  ;;  %16168 = vst [vmem:[#allocation601_spill] sm:$0xff] %v11728_v20  ;;  %v4724_v20 = vld [vmem:[%s15539_s4 + $0xe8] sm:$0xff]  ;;  %4866 = vmatprep.subr.mxu0 %v15563_v39 }
 0x336   :  { %v11731_v12 = vpop.f32.mrf.mxu0  ;;  %v11733_v15 = vpop.f32.mrf.mxu1  ;;  %7534 = vmatmul.mubr.msk.f32.gmra.mxu1 %vm2194_vm1, %v11051_v11  ;;  %7566 = vmatmul.mubr.msk.f32.gmra.mxu0 %vm2194_vm1, %v11740_v48  ;;  %v11763_v44 = vld [vmem:[%s15538_s2 + $0xe8] sm:$0xff] }
 0x337   :  { %16169 = vst [vmem:[#allocation602_spill] sm:$0xff] %v11731_v12  ;;  %16170 = vst [vmem:[#allocation603_spill] sm:$0xff] %v11733_v15  ;;  %3266 = vmatprep.mubr.f32.mxu1 %v15563_v39  ;;  %3523 = vmatprep.mubr.f32.mxu0 %v15563_v39 }
 0x338   :  { %v11749_v21 = vpop.f32.mrf.mxu0  ;;  %v11751_v15 = vpop.f32.mrf.mxu1  ;;  %4867 = vmatpush2.msra.mxu0 %v4724_v20 }
 0x339   :  { %16171 = vst [vmem:[#allocation604_spill] sm:$0xff] %v11749_v21  ;;  %16172 = vst [vmem:[#allocation605_spill] sm:$0xff] %v11751_v15  ;;  %v4723_v15 = vld [vmem:[%s15539_s4 + $0xe0] sm:$0xff]  ;;  %4868 = vmatprep.subr.mxu0 %v15563_v39  ;;  %v11786_v21 = vld [vmem:[%s15538_s2 + $0xf0] sm:$0xff] }
 0x33a   :  { %v11754_v11 = vpop.f32.mrf.mxu0  ;;  %v11756_v12 = vpop.f32.mrf.mxu1  ;;  %7535 = vmatmul.mubr.msk.f32.gmra.mxu1 %vm2194_vm1, %v11070_v8  ;;  %7567 = vmatmul.mubr.msk.f32.gmra.mxu0 %vm2194_vm1, %v11763_v44 }
 0x33b   :  { %16173 = vst [vmem:[#allocation606_spill] sm:$0xff] %v11754_v11  ;;  %16174 = vst [vmem:[#allocation607_spill] sm:$0xff] %v11756_v12  ;;  %3272 = vmatprep.mubr.f32.mxu1 %v15563_v39  ;;  %3529 = vmatprep.mubr.f32.mxu0 %v15563_v39 }
 0x33c   :  { %v11772_v20 = vpop.f32.mrf.mxu0  ;;  %v11774_v12 = vpop.f32.mrf.mxu1  ;;  %4869 = vmatpush2.msra.mxu0 %v4723_v15 }
 0x33d   :  { %16175 = vst [vmem:[#allocation608_spill] sm:$0xff] %v11772_v20  ;;  %16176 = vst [vmem:[#allocation609_spill] sm:$0xff] %v11774_v12  ;;  %v4722_v12 = vld [vmem:[%s15539_s4 + $0xd8] sm:$0xff]  ;;  %4870 = vmatprep.subr.mxu0 %v15563_v39 }
 0x33e   :  { %v11777_v8 = vpop.f32.mrf.mxu0  ;;  %v11779_v11 = vpop.f32.mrf.mxu1  ;;  %7536 = vmatmul.mubr.msk.f32.gmra.mxu1 %vm2194_vm1, %v11089_v7  ;;  %7568 = vmatmul.mubr.msk.f32.gmra.mxu0 %vm2194_vm1, %v11786_v21  ;;  %v11809_v20 = vld [vmem:[%s15538_s2 + $0xf8] sm:$0xff] }
 0x33f   :  { %16177 = vst [vmem:[#allocation610_spill] sm:$0xff] %v11777_v8  ;;  %16178 = vst [vmem:[#allocation611_spill] sm:$0xff] %v11779_v11  ;;  %3278 = vmatprep.mubr.f32.mxu1 %v15563_v39  ;;  %3535 = vmatprep.mubr.f32.mxu0 %v15563_v39 }
 0x340   :  { %v11795_v15 = vpop.f32.mrf.mxu0  ;;  %v11797_v11 = vpop.f32.mrf.mxu1  ;;  %4871 = vmatpush2.msra.mxu0 %v4722_v12 }
 0x341   :  { %16179 = vst [vmem:[#allocation612_spill] sm:$0xff] %v11795_v15  ;;  %16180 = vst [vmem:[#allocation613_spill] sm:$0xff] %v11797_v11  ;;  %v4721_v11 = vld [vmem:[%s15539_s4 + $0xd0] sm:$0xff]  ;;  %4872 = vmatprep.subr.mxu0 %v15563_v39 }
 0x342   :  { %v11800_v7 = vpop.f32.mrf.mxu0  ;;  %v11802_v8 = vpop.f32.mrf.mxu1  ;;  %7537 = vmatmul.mubr.msk.f32.gmra.mxu1 %vm2194_vm1, %v11108_v4  ;;  %7569 = vmatmul.mubr.msk.f32.gmra.mxu0 %vm2194_vm1, %v11809_v20  ;;  %v4742_v4 = vld [vmem:[%s15539_s4 + $0x178] sm:$0xff] }
 0x343   :  { %16181 = vst [vmem:[#allocation614_spill] sm:$0xff] %v11800_v7  ;;  %16182 = vst [vmem:[#allocation615_spill] sm:$0xff] %v11802_v8  ;;  %3541 = vmatprep.mubr.f32.mxu0 %v15563_v39  ;;  %3798 = vmatprep.mubr.f32.mxu1 %v15563_v39 }
 0x344   :  { %v11818_v12 = vpop.f32.mrf.mxu0  ;;  %v11820_v8 = vpop.f32.mrf.mxu1  ;;  %4873 = vmatpush2.msra.mxu0 %v4721_v11 }
 0x345   :  { %16183 = vst [vmem:[#allocation616_spill] sm:$0xff] %v11818_v12  ;;  %16184 = vst [vmem:[#allocation617_spill] sm:$0xff] %v11820_v8  ;;  %v4741_v8 = vld [vmem:[%s15539_s4 + $0x170] sm:$0xff]  ;;  %4874 = vmatprep.subr.mxu0 %v15563_v39 }
 0x346   :  { %v11826_v7 = vpop.f32.mrf.mxu0  ;;  %v11828_v15 = vpop.f32.mrf.mxu1  ;;  %7570 = vmatmul.mubr.msk.f32.gmra.mxu0 %vm2194_vm1, %v11833_v26  ;;  %7602 = vmatmul.mubr.msk.f32.vlgmr.msra.gmra.mxu1 %vm2194_vm1, %v11137_v28  ;;  %v4720_v28 = vld [vmem:[%s15539_s4 + $0xc8] sm:$0xff] }
 0x347   :  { %16185 = vst [vmem:[#allocation618_spill] sm:$0xff] %v11826_v7  ;;  %16186 = vst [vmem:[#allocation619_spill] sm:$0xff] %v11828_v15  ;;  %5216 = vmatpush1.msra.mxu1 %v4742_v4  ;;  %3547 = vmatprep.mubr.f32.mxu0 %v15563_v39 }
 0x348   :  { %v11843_v11 = vpop.f32.mrf.mxu0  ;;  %v11845_v15 = vpop.f32.mrf.mxu1  ;;  %3804 = vmatprep.mubr.f32.mxu1 %v15563_v39  ;;  %5217 = vmatprep.subr.mxu1 %v15563_v39 }
 0x349   :  { %16187 = vst [vmem:[#allocation620_spill] sm:$0xff] %v11843_v11  ;;  %16188 = vst [vmem:[#allocation621_spill] sm:$0xff] %v11845_v15  ;;  %5218 = vmatpush1.msra.mxu1 %v4741_v8  ;;  %v11860_v11 = vld [vmem:[%s15538_s2 + $0x108] sm:$0xff]  ;;  %4875 = vmatpush2.msra.mxu0 %v4720_v28  ;;  %v4739_v28 = vld [vmem:[%s15539_s4 + $0x160] sm:$0xff] }
 0x34a   :  { %v11853_v7 = vpop.f32.mrf.mxu0  ;;  %v11855_v4 = vpop.f32.mrf.mxu1  ;;  %7571 = vmatmul.mubr.msk.f32.gmra.mxu0 %vm2194_vm1, %v11860_v11  ;;  %7603 = vmatmul.mubr.msk.f32.gmra.mxu1 %vm2194_vm1, %v11160_v30  ;;  %v4740_v8 = vld [vmem:[%s15539_s4 + $0x168] sm:$0xff]  ;;  %v4719_v30 = vld [vmem:[%s15539_s4 + $0xc0] sm:$0xff] }
 0x34b   :  { %16189 = vst [vmem:[#allocation622_spill] sm:$0xff] %v11853_v7  ;;  %16190 = vst [vmem:[#allocation623_spill] sm:$0xff] %v11855_v4  ;;  %3553 = vmatprep.mubr.f32.mxu0 %v15563_v39  ;;  %3810 = vmatprep.mubr.f32.mxu1 %v15563_v39 }
 0x34c   :  { %v11871_v4 = vpop.f32.mrf.mxu0  ;;  %v11873_v7 = vpop.f32.mrf.mxu1  ;;  %5219 = vmatprep.subr.mxu1 %v15563_v39  ;;  %4876 = vmatprep.subr.mxu0 %v15563_v39 }
 0x34d   :  { %16191 = vst [vmem:[#allocation624_spill] sm:$0xff] %v11871_v4  ;;  %16192 = vst [vmem:[#allocation625_spill] sm:$0xff] %v11873_v7  ;;  %5220 = vmatpush1.msra.mxu1 %v4740_v8  ;;  %v11887_v4 = vld [vmem:[%s15538_s2 + $0x110] sm:$0xff]  ;;  %4877 = vmatpush2.msra.mxu0 %v4719_v30  ;;  %v4738_v30 = vld [vmem:[%s15539_s4 + $0x158] sm:$0xff] }
 0x34e   :  { %v11880_v15 = vpop.f32.mrf.mxu0  ;;  %v11882_v12 = vpop.f32.mrf.mxu1  ;;  %7572 = vmatmul.mubr.msk.f32.gmra.mxu0 %vm2194_vm1, %v11887_v4  ;;  %7604 = vmatmul.mubr.msk.f32.gmra.mxu1 %vm2194_vm1, %v11182_v61  ;;  %v4718_v61 = vld [vmem:[%s15539_s4 + $0xb8] sm:$0xff] }
 0x34f   :  { %16193 = vst [vmem:[#allocation626_spill] sm:$0xff] %v11880_v15  ;;  %16194 = vst [vmem:[#allocation627_spill] sm:$0xff] %v11882_v12  ;;  %3559 = vmatprep.mubr.f32.mxu0 %v15563_v39  ;;  %3816 = vmatprep.mubr.f32.mxu1 %v15563_v39 }
 0x350   :  { %v11898_v8 = vpop.f32.mrf.mxu0  ;;  %v11900_v12 = vpop.f32.mrf.mxu1  ;;  %5221 = vmatprep.subr.mxu1 %v15563_v39  ;;  %4878 = vmatprep.subr.mxu0 %v15563_v39 }
 0x351   :  { %16195 = vst [vmem:[#allocation628_spill] sm:$0xff] %v11898_v8  ;;  %16196 = vst [vmem:[#allocation629_spill] sm:$0xff] %v11900_v12  ;;  %5222 = vmatpush1.msra.mxu1 %v4739_v28  ;;  %v11914_v8 = vld [vmem:[%s15538_s2 + $0x118] sm:$0xff]  ;;  %4879 = vmatpush2.msra.mxu0 %v4718_v61  ;;  %v4737_v61 = vld [vmem:[%s15539_s4 + $0x150] sm:$0xff] }
 0x352   :  { %v11907_v15 = vpop.f32.mrf.mxu0  ;;  %v11909_v7 = vpop.f32.mrf.mxu1  ;;  %7573 = vmatmul.mubr.msk.f32.gmra.mxu0 %vm2194_vm1, %v11914_v8  ;;  %7605 = vmatmul.mubr.msk.f32.gmra.mxu1 %vm2194_vm1, %v11202_v19  ;;  %v4717_v19 = vld [vmem:[%s15539_s4 + $0xb0] sm:$0xff] }
 0x353   :  { %16197 = vst [vmem:[#allocation630_spill] sm:$0xff] %v11907_v15  ;;  %16198 = vst [vmem:[#allocation631_spill] sm:$0xff] %v11909_v7  ;;  %3565 = vmatprep.mubr.f32.mxu0 %v15563_v39  ;;  %3822 = vmatprep.mubr.f32.mxu1 %v15563_v39 }
 0x354   :  { %v11925_v28 = vpop.f32.mrf.mxu0  ;;  %v11927_v7 = vpop.f32.mrf.mxu1  ;;  %5223 = vmatprep.subr.mxu1 %v15563_v39  ;;  %4880 = vmatprep.subr.mxu0 %v15563_v39 }
 0x355   :  { %16199 = vst [vmem:[#allocation632_spill] sm:$0xff] %v11925_v28  ;;  %16200 = vst [vmem:[#allocation633_spill] sm:$0xff] %v11927_v7  ;;  %5224 = vmatpush1.msra.mxu1 %v4738_v30  ;;  %v11941_v28 = vld [vmem:[%s15538_s2 + $0x120] sm:$0xff]  ;;  %4881 = vmatpush2.msra.mxu0 %v4717_v19  ;;  %v4736_v19 = vld [vmem:[%s15539_s4 + $0x148] sm:$0xff] }
 0x356   :  { %v11934_v15 = vpop.f32.mrf.mxu0  ;;  %v11936_v12 = vpop.f32.mrf.mxu1  ;;  %7574 = vmatmul.mubr.msk.f32.gmra.mxu0 %vm2194_vm1, %v11941_v28  ;;  %7606 = vmatmul.mubr.msk.f32.gmra.mxu1 %vm2194_vm1, %v11224_v56  ;;  %v4716_v56 = vld [vmem:[%s15539_s4 + $0xa8] sm:$0xff] }
 0x357   :  { %16201 = vst [vmem:[#allocation634_spill] sm:$0xff] %v11934_v15  ;;  %16202 = vst [vmem:[#allocation635_spill] sm:$0xff] %v11936_v12  ;;  %3571 = vmatprep.mubr.f32.mxu0 %v15563_v39  ;;  %3828 = vmatprep.mubr.f32.mxu1 %v15563_v39 }
 0x358   :  { %v11952_v30 = vpop.f32.mrf.mxu0  ;;  %v11954_v12 = vpop.f32.mrf.mxu1  ;;  %5225 = vmatprep.subr.mxu1 %v15563_v39  ;;  %4882 = vmatprep.subr.mxu0 %v15563_v39 }
 0x359   :  { %16203 = vst [vmem:[#allocation636_spill] sm:$0xff] %v11952_v30  ;;  %16204 = vst [vmem:[#allocation637_spill] sm:$0xff] %v11954_v12  ;;  %5226 = vmatpush1.msra.mxu1 %v4737_v61  ;;  %v11968_v30 = vld [vmem:[%s15538_s2 + $0x128] sm:$0xff]  ;;  %4883 = vmatpush2.msra.mxu0 %v4716_v56  ;;  %v4735_v56 = vld [vmem:[%s15539_s4 + $0x140] sm:$0xff] }
 0x35a   :  { %v11961_v15 = vpop.f32.mrf.mxu0  ;;  %v11963_v7 = vpop.f32.mrf.mxu1  ;;  %7575 = vmatmul.mubr.msk.f32.gmra.mxu0 %vm2194_vm1, %v11968_v30  ;;  %7607 = vmatmul.mubr.msk.f32.gmra.mxu1 %vm2194_vm1, %v11244_v43  ;;  %v4715_v43 = vld [vmem:[%s15539_s4 + $0xa0] sm:$0xff] }
 0x35b   :  { %16205 = vst [vmem:[#allocation638_spill] sm:$0xff] %v11961_v15  ;;  %16206 = vst [vmem:[#allocation639_spill] sm:$0xff] %v11963_v7  ;;  %3577 = vmatprep.mubr.f32.mxu0 %v15563_v39  ;;  %3834 = vmatprep.mubr.f32.mxu1 %v15563_v39 }
 0x35c   :  { %v11979_v61 = vpop.f32.mrf.mxu0  ;;  %v11981_v7 = vpop.f32.mrf.mxu1  ;;  %5227 = vmatprep.subr.mxu1 %v15563_v39  ;;  %4884 = vmatprep.subr.mxu0 %v15563_v39 }
 0x35d   :  { %16207 = vst [vmem:[#allocation640_spill] sm:$0xff] %v11979_v61  ;;  %16208 = vst [vmem:[#allocation641_spill] sm:$0xff] %v11981_v7  ;;  %5228 = vmatpush1.msra.mxu1 %v4736_v19  ;;  %v11995_v61 = vld [vmem:[%s15538_s2 + $0x130] sm:$0xff]  ;;  %4885 = vmatpush2.msra.mxu0 %v4715_v43  ;;  %v4734_v43 = vld [vmem:[%s15539_s4 + $0x138] sm:$0xff] }
 0x35e   :  { %v11988_v15 = vpop.f32.mrf.mxu0  ;;  %v11990_v12 = vpop.f32.mrf.mxu1  ;;  %7576 = vmatmul.mubr.msk.f32.gmra.mxu0 %vm2194_vm1, %v11995_v61  ;;  %7608 = vmatmul.mubr.msk.f32.gmra.mxu1 %vm2194_vm1, %v11266_v57  ;;  %v4714_v57 = vld [vmem:[%s15539_s4 + $0x98] sm:$0xff] }
 0x35f   :  { %16209 = vst [vmem:[#allocation642_spill] sm:$0xff] %v11988_v15  ;;  %16210 = vst [vmem:[#allocation643_spill] sm:$0xff] %v11990_v12  ;;  %3583 = vmatprep.mubr.f32.mxu0 %v15563_v39  ;;  %3840 = vmatprep.mubr.f32.mxu1 %v15563_v39 }
 0x360   :  { %v12006_v19 = vpop.f32.mrf.mxu0  ;;  %v12008_v12 = vpop.f32.mrf.mxu1  ;;  %5229 = vmatprep.subr.mxu1 %v15563_v39  ;;  %4886 = vmatprep.subr.mxu0 %v15563_v39 }
 0x361   :  { %16211 = vst [vmem:[#allocation644_spill] sm:$0xff] %v12006_v19  ;;  %16212 = vst [vmem:[#allocation645_spill] sm:$0xff] %v12008_v12  ;;  %5230 = vmatpush1.msra.mxu1 %v4735_v56  ;;  %v12022_v19 = vld [vmem:[%s15538_s2 + $0x138] sm:$0xff]  ;;  %4887 = vmatpush2.msra.mxu0 %v4714_v57  ;;  %v4733_v57 = vld [vmem:[%s15539_s4 + $0x130] sm:$0xff] }
 0x362   :  { %v12015_v15 = vpop.f32.mrf.mxu0  ;;  %v12017_v7 = vpop.f32.mrf.mxu1  ;;  %7577 = vmatmul.mubr.msk.f32.gmra.mxu0 %vm2194_vm1, %v12022_v19  ;;  %7609 = vmatmul.mubr.msk.f32.gmra.mxu1 %vm2194_vm1, %v11286_v59  ;;  %v4713_v59 = vld [vmem:[%s15539_s4 + $0x90] sm:$0xff] }
 0x363   :  { %16213 = vst [vmem:[#allocation646_spill] sm:$0xff] %v12015_v15  ;;  %16214 = vst [vmem:[#allocation647_spill] sm:$0xff] %v12017_v7  ;;  %3589 = vmatprep.mubr.f32.mxu0 %v15563_v39  ;;  %3846 = vmatprep.mubr.f32.mxu1 %v15563_v39 }
 0x364   :  { %v12033_v56 = vpop.f32.mrf.mxu0  ;;  %v12035_v7 = vpop.f32.mrf.mxu1  ;;  %5231 = vmatprep.subr.mxu1 %v15563_v39  ;;  %4888 = vmatprep.subr.mxu0 %v15563_v39 }
 0x365   :  { %16215 = vst [vmem:[#allocation648_spill] sm:$0xff] %v12033_v56  ;;  %16216 = vst [vmem:[#allocation649_spill] sm:$0xff] %v12035_v7  ;;  %5232 = vmatpush1.msra.mxu1 %v4734_v43  ;;  %v12049_v56 = vld [vmem:[%s15538_s2 + $0x140] sm:$0xff]  ;;  %4889 = vmatpush2.msra.mxu0 %v4713_v59  ;;  %v4732_v59 = vld [vmem:[%s15539_s4 + $0x128] sm:$0xff] }
 0x366   :  { %v12042_v15 = vpop.f32.mrf.mxu0  ;;  %v12044_v12 = vpop.f32.mrf.mxu1  ;;  %7578 = vmatmul.mubr.msk.f32.gmra.mxu0 %vm2194_vm1, %v12049_v56  ;;  %7610 = vmatmul.mubr.msk.f32.gmra.mxu1 %vm2194_vm1, %v11308_v62  ;;  %v4712_v62 = vld [vmem:[%s15539_s4 + $0x88] sm:$0xff] }
 0x367   :  { %16217 = vst [vmem:[#allocation650_spill] sm:$0xff] %v12042_v15  ;;  %16218 = vst [vmem:[#allocation651_spill] sm:$0xff] %v12044_v12  ;;  %3595 = vmatprep.mubr.f32.mxu0 %v15563_v39  ;;  %3852 = vmatprep.mubr.f32.mxu1 %v15563_v39 }
 0x368   :  { %v12060_v43 = vpop.f32.mrf.mxu0  ;;  %v12062_v12 = vpop.f32.mrf.mxu1  ;;  %5233 = vmatprep.subr.mxu1 %v15563_v39  ;;  %4890 = vmatprep.subr.mxu0 %v15563_v39 }
 0x369   :  { %16219 = vst [vmem:[#allocation652_spill] sm:$0xff] %v12060_v43  ;;  %16220 = vst [vmem:[#allocation653_spill] sm:$0xff] %v12062_v12  ;;  %5234 = vmatpush1.msra.mxu1 %v4733_v57  ;;  %v12076_v43 = vld [vmem:[%s15538_s2 + $0x148] sm:$0xff]  ;;  %4891 = vmatpush2.msra.mxu0 %v4712_v62  ;;  %v4731_v62 = vld [vmem:[%s15539_s4 + $0x120] sm:$0xff] }
 0x36a   :  { %v12069_v15 = vpop.f32.mrf.mxu0  ;;  %v12071_v7 = vpop.f32.mrf.mxu1  ;;  %7579 = vmatmul.mubr.msk.f32.gmra.mxu0 %vm2194_vm1, %v12076_v43  ;;  %7611 = vmatmul.mubr.msk.f32.gmra.mxu1 %vm2194_vm1, %v11328_v47  ;;  %v4711_v47 = vld [vmem:[%s15539_s4 + $0x80] sm:$0xff] }
 0x36b   :  { %16221 = vst [vmem:[#allocation654_spill] sm:$0xff] %v12069_v15  ;;  %16222 = vst [vmem:[#allocation655_spill] sm:$0xff] %v12071_v7  ;;  %3601 = vmatprep.mubr.f32.mxu0 %v15563_v39  ;;  %3858 = vmatprep.mubr.f32.mxu1 %v15563_v39 }
 0x36c   :  { %v12087_v57 = vpop.f32.mrf.mxu0  ;;  %v12089_v7 = vpop.f32.mrf.mxu1  ;;  %5235 = vmatprep.subr.mxu1 %v15563_v39  ;;  %4892 = vmatprep.subr.mxu0 %v15563_v39 }
 0x36d   :  { %16223 = vst [vmem:[#allocation656_spill] sm:$0xff] %v12087_v57  ;;  %16224 = vst [vmem:[#allocation657_spill] sm:$0xff] %v12089_v7  ;;  %5236 = vmatpush1.msra.mxu1 %v4732_v59  ;;  %v12103_v57 = vld [vmem:[%s15538_s2 + $0x150] sm:$0xff]  ;;  %4893 = vmatpush2.msra.mxu0 %v4711_v47  ;;  %v12127_v7 = vld [vmem:[%s15538_s2 + $0x158] sm:$0xff] }
 0x36e   :  { %v12096_v15 = vpop.f32.mrf.mxu0  ;;  %v12098_v12 = vpop.f32.mrf.mxu1  ;;  %7580 = vmatmul.mubr.msk.f32.gmra.mxu0 %vm2194_vm1, %v12103_v57  ;;  %7612 = vmatmul.mubr.msk.f32.gmra.mxu1 %vm2194_vm1, %v11350_v58  ;;  %v4730_v47 = vld [vmem:[%s15539_s4 + $0x118] sm:$0xff] }
 0x36f   :  { %16225 = vst [vmem:[#allocation658_spill] sm:$0xff] %v12096_v15  ;;  %16226 = vst [vmem:[#allocation659_spill] sm:$0xff] %v12098_v12  ;;  %3607 = vmatprep.mubr.f32.mxu0 %v15563_v39  ;;  %3864 = vmatprep.mubr.f32.mxu1 %v15563_v39 }
 0x370   :  { %v12114_v59 = vpop.f32.mrf.mxu0  ;;  %v12116_v12 = vpop.f32.mrf.mxu1  ;;  %5237 = vmatprep.subr.mxu1 %v15563_v39  ;;  %5600 = vmatprep.subr.mxu0 %v15563_v39 }
 0x371   :  { %16227 = vst [vmem:[#allocation660_spill] sm:$0xff] %v12114_v59  ;;  %16228 = vst [vmem:[#allocation661_spill] sm:$0xff] %v12116_v12  ;;  %5238 = vmatpush1.msra.mxu1 %v4731_v62 }
 0x372   :  { %v12120_v15 = vpop.f32.mrf.mxu0  ;;  %v12122_v58 = vpop.f32.mrf.mxu1  ;;  %7581 = vmatmul.mubr.msk.f32.gmra.mxu0 %vm2194_vm1, %v12127_v7  ;;  %7613 = vmatmul.mubr.msk.f32.gmra.mxu1 %vm2194_vm1, %v11370_v33  ;;  %v12150_v33 = vld [vmem:[%s15538_s2 + $0x160] sm:$0xff] }
 0x373   :  { %16229 = vst [vmem:[#allocation662_spill] sm:$0xff] %v12120_v15  ;;  %16230 = vst [vmem:[#allocation663_spill] sm:$0xff] %v12122_v58  ;;  %3613 = vmatprep.mubr.f32.mxu0 %v15563_v39  ;;  %3870 = vmatprep.mubr.f32.mxu1 %v15563_v39 }
 0x374   :  { %v12138_v62 = vpop.f32.mrf.mxu0  ;;  %v12140_v58 = vpop.f32.mrf.mxu1  ;;  %5239 = vmatprep.subr.mxu1 %v15563_v39 }
 0x375   :  { %16231 = vst [vmem:[#allocation664_spill] sm:$0xff] %v12138_v62  ;;  %16232 = vst [vmem:[#allocation665_spill] sm:$0xff] %v12140_v58  ;;  %5240 = vmatpush1.msra.mxu1 %v4730_v47  ;;  %v4729_v58 = vld [vmem:[%s15539_s4 + $0x110] sm:$0xff] }
 0x376   :  { %v12143_v15 = vpop.f32.mrf.mxu0  ;;  %v12145_v12 = vpop.f32.mrf.mxu1  ;;  %7582 = vmatmul.mubr.msk.f32.gmra.mxu0 %vm2194_vm1, %v12150_v33  ;;  %7614 = vmatmul.mubr.msk.f32.gmra.mxu1 %vm2194_vm1, %v11392_v35  ;;  %v12173_v35 = vld [vmem:[%s15538_s2 + $0x168] sm:$0xff] }
 0x377   :  { %16233 = vst [vmem:[#allocation666_spill] sm:$0xff] %v12143_v15  ;;  %16234 = vst [vmem:[#allocation667_spill] sm:$0xff] %v12145_v12  ;;  %3619 = vmatprep.mubr.f32.mxu0 %v15563_v39  ;;  %3876 = vmatprep.mubr.f32.mxu1 %v15563_v39 }
 0x378   :  { %v12161_v47 = vpop.f32.mrf.mxu0  ;;  %v12163_v12 = vpop.f32.mrf.mxu1  ;;  %5241 = vmatprep.subr.mxu1 %v15563_v39 }
 0x379   :  { %16235 = vst [vmem:[#allocation668_spill] sm:$0xff] %v12161_v47  ;;  %16236 = vst [vmem:[#allocation669_spill] sm:$0xff] %v12163_v12  ;;  %5242 = vmatpush1.msra.mxu1 %v4729_v58  ;;  %v4728_v12 = vld [vmem:[%s15539_s4 + $0x108] sm:$0xff] }
 0x37a   :  { %v12166_v15 = vpop.f32.mrf.mxu0  ;;  %v12168_v62 = vpop.f32.mrf.mxu1  ;;  %7583 = vmatmul.mubr.msk.f32.gmra.mxu0 %vm2194_vm1, %v12173_v35  ;;  %7615 = vmatmul.mubr.msk.f32.gmra.mxu1 %vm2194_vm1, %v11412_v31  ;;  %v12196_v31 = vld [vmem:[%s15538_s2 + $0x170] sm:$0xff] }
 0x37b   :  { %16237 = vst [vmem:[#allocation670_spill] sm:$0xff] %v12166_v15  ;;  %16238 = vst [vmem:[#allocation671_spill] sm:$0xff] %v12168_v62  ;;  %3625 = vmatprep.mubr.f32.mxu0 %v15563_v39  ;;  %3882 = vmatprep.mubr.f32.mxu1 %v15563_v39 }
 0x37c   :  { %v12184_v58 = vpop.f32.mrf.mxu0  ;;  %v12186_v62 = vpop.f32.mrf.mxu1  ;;  %5243 = vmatprep.subr.mxu1 %v15563_v39 }
 0x37d   :  { %16239 = vst [vmem:[#allocation672_spill] sm:$0xff] %v12184_v58  ;;  %16240 = vst [vmem:[#allocation673_spill] sm:$0xff] %v12186_v62  ;;  %5244 = vmatpush1.msra.mxu1 %v4728_v12  ;;  %v4727_v62 = vld [vmem:[%s15539_s4 + $0x100] sm:$0xff] }
 0x37e   :  { %v12189_v15 = vpop.f32.mrf.mxu0  ;;  %v12191_v47 = vpop.f32.mrf.mxu1  ;;  %7584 = vmatmul.mubr.msk.f32.gmra.mxu0 %vm2194_vm1, %v12196_v31  ;;  %7616 = vmatmul.mubr.msk.f32.gmra.mxu1 %vm2194_vm1, %v11434_v60  ;;  %v12219_v60 = vld [vmem:[%s15538_s2 + $0x178] sm:$0xff] }
 0x37f   :  { %16241 = vst [vmem:[#allocation674_spill] sm:$0xff] %v12189_v15  ;;  %16242 = vst [vmem:[#allocation675_spill] sm:$0xff] %v12191_v47  ;;  %3631 = vmatprep.mubr.f32.mxu0 %v15563_v39  ;;  %3888 = vmatprep.mubr.f32.mxu1 %v15563_v39 }
 0x380   :  { %v12207_v12 = vpop.f32.mrf.mxu0  ;;  %v12209_v47 = vpop.f32.mrf.mxu1  ;;  %5245 = vmatprep.subr.mxu1 %v15563_v39 }
 0x381   :  { %16243 = vst [vmem:[#allocation676_spill] sm:$0xff] %v12207_v12  ;;  %16244 = vst [vmem:[#allocation677_spill] sm:$0xff] %v12209_v47  ;;  %5246 = vmatpush1.msra.mxu1 %v4727_v62  ;;  %v4758_v47 = vld [vmem:[%s15539_s4 + $0x1f8] sm:$0xff] }
 0x382   :  { %v12212_v15 = vpop.f32.mrf.mxu0  ;;  %v12214_v58 = vpop.f32.mrf.mxu1  ;;  %7585 = vmatmul.mubr.msk.f32.gmra.mxu0 %vm2194_vm1, %v12219_v60  ;;  %7617 = vmatmul.mubr.msk.f32.gmra.mxu1 %vm2194_vm1, %v11454_v29  ;;  %v12242_v29 = vld [vmem:[%s15538_s2 + $0x180] sm:$0xff] }
 0x383   :  { %16245 = vst [vmem:[#allocation678_spill] sm:$0xff] %v12212_v15  ;;  %16246 = vst [vmem:[#allocation679_spill] sm:$0xff] %v12214_v58  ;;  %3637 = vmatprep.mubr.f32.mxu0 %v15563_v39  ;;  %3894 = vmatprep.mubr.f32.mxu1 %v15563_v39 }
 0x384   :  { %v12230_v62 = vpop.f32.mrf.mxu0  ;;  %v12232_v58 = vpop.f32.mrf.mxu1  ;;  %5247 = vmatprep.subr.mxu1 %v15563_v39 }
 0x385   :  { %16247 = vst [vmem:[#allocation680_spill] sm:$0xff] %v12230_v62  ;;  %16248 = vst [vmem:[#allocation681_spill] sm:$0xff] %v12232_v58  ;;  %5248 = vmatpush2.msra.mxu1 %v4758_v47  ;;  %v4757_v58 = vld [vmem:[%s15539_s4 + $0x1f0] sm:$0xff] }
 0x386   :  { %v12235_v15 = vpop.f32.mrf.mxu1  ;;  %v12237_v12 = vpop.f32.mrf.mxu0  ;;  %7586 = vmatmul.mubr.msk.f32.gmra.mxu0 %vm2194_vm1, %v12242_v29  ;;  %7618 = vmatmul.mubr.msk.f32.gmra.mxu1 %vm2194_vm1, %v11476_v54  ;;  %v12265_v54 = vld [vmem:[%s15538_s2 + $0x188] sm:$0xff] }
 0x387   :  { %16249 = vst [vmem:[#allocation682_spill] sm:$0xff] %v12235_v15  ;;  %16250 = vst [vmem:[#allocation683_spill] sm:$0xff] %v12237_v12  ;;  %3643 = vmatprep.mubr.f32.mxu0 %v15563_v39  ;;  %3900 = vmatprep.mubr.f32.mxu1 %v15563_v39 }
 0x388   :  { %v12253_v47 = vpop.f32.mrf.mxu1  ;;  %v12255_v12 = vpop.f32.mrf.mxu0  ;;  %5249 = vmatprep.subr.mxu1 %v15563_v39 }
 0x389   :  { %16251 = vst [vmem:[#allocation684_spill] sm:$0xff] %v12253_v47  ;;  %16252 = vst [vmem:[#allocation685_spill] sm:$0xff] %v12255_v12  ;;  %5250 = vmatpush2.msra.mxu1 %v4757_v58  ;;  %v4756_v12 = vld [vmem:[%s15539_s4 + $0x1e8] sm:$0xff] }
 0x38a   :  { %v12258_v15 = vpop.f32.mrf.mxu1  ;;  %v12260_v62 = vpop.f32.mrf.mxu0  ;;  %7587 = vmatmul.mubr.msk.f32.gmra.mxu0 %vm2194_vm1, %v12265_v54  ;;  %7619 = vmatmul.mubr.msk.f32.gmra.mxu1 %vm2194_vm1, %v11496_v27  ;;  %v12288_v27 = vld [vmem:[%s15538_s2 + $0x190] sm:$0xff] }
 0x38b   :  { %16253 = vst [vmem:[#allocation686_spill] sm:$0xff] %v12258_v15  ;;  %16254 = vst [vmem:[#allocation687_spill] sm:$0xff] %v12260_v62  ;;  %3649 = vmatprep.mubr.f32.mxu0 %v15563_v39  ;;  %3906 = vmatprep.mubr.f32.mxu1 %v15563_v39 }
 0x38c   :  { %v12276_v58 = vpop.f32.mrf.mxu1  ;;  %v12278_v62 = vpop.f32.mrf.mxu0  ;;  %5251 = vmatprep.subr.mxu1 %v15563_v39 }
 0x38d   :  { %16255 = vst [vmem:[#allocation688_spill] sm:$0xff] %v12276_v58  ;;  %16256 = vst [vmem:[#allocation689_spill] sm:$0xff] %v12278_v62  ;;  %5252 = vmatpush2.msra.mxu1 %v4756_v12  ;;  %v4755_v62 = vld [vmem:[%s15539_s4 + $0x1e0] sm:$0xff] }
 0x38e   :  { %v12281_v15 = vpop.f32.mrf.mxu1  ;;  %v12283_v47 = vpop.f32.mrf.mxu0  ;;  %7588 = vmatmul.mubr.msk.f32.gmra.mxu0 %vm2194_vm1, %v12288_v27  ;;  %7620 = vmatmul.mubr.msk.f32.gmra.mxu1 %vm2194_vm1, %v11518_v52  ;;  %v12311_v52 = vld [vmem:[%s15538_s2 + $0x198] sm:$0xff] }
 0x38f   :  { %16257 = vst [vmem:[#allocation690_spill] sm:$0xff] %v12281_v15  ;;  %16258 = vst [vmem:[#allocation691_spill] sm:$0xff] %v12283_v47  ;;  %3655 = vmatprep.mubr.f32.mxu0 %v15563_v39  ;;  %3912 = vmatprep.mubr.f32.mxu1 %v15563_v39 }
 0x390   :  { %v12299_v12 = vpop.f32.mrf.mxu1  ;;  %v12301_v47 = vpop.f32.mrf.mxu0  ;;  %5253 = vmatprep.subr.mxu1 %v15563_v39 }
 0x391   :  { %16259 = vst [vmem:[#allocation692_spill] sm:$0xff] %v12299_v12  ;;  %16260 = vst [vmem:[#allocation693_spill] sm:$0xff] %v12301_v47  ;;  %5254 = vmatpush2.msra.mxu1 %v4755_v62  ;;  %v4754_v47 = vld [vmem:[%s15539_s4 + $0x1d8] sm:$0xff] }
 0x392   :  { %v12304_v15 = vpop.f32.mrf.mxu1  ;;  %v12306_v58 = vpop.f32.mrf.mxu0  ;;  %7589 = vmatmul.mubr.msk.f32.gmra.mxu0 %vm2194_vm1, %v12311_v52  ;;  %7621 = vmatmul.mubr.msk.f32.gmra.mxu1 %vm2194_vm1, %v11538_v51  ;;  %v12334_v51 = vld [vmem:[%s15538_s2 + $0x1a0] sm:$0xff] }
 0x393   :  { %16261 = vst [vmem:[#allocation694_spill] sm:$0xff] %v12304_v15  ;;  %16262 = vst [vmem:[#allocation695_spill] sm:$0xff] %v12306_v58  ;;  %3661 = vmatprep.mubr.f32.mxu0 %v15563_v39  ;;  %3918 = vmatprep.mubr.f32.mxu1 %v15563_v39 }
 0x394   :  { %v12322_v62 = vpop.f32.mrf.mxu1  ;;  %v12324_v58 = vpop.f32.mrf.mxu0  ;;  %5255 = vmatprep.subr.mxu1 %v15563_v39 }
 0x395   :  { %16263 = vst [vmem:[#allocation696_spill] sm:$0xff] %v12322_v62  ;;  %16264 = vst [vmem:[#allocation697_spill] sm:$0xff] %v12324_v58  ;;  %5256 = vmatpush2.msra.mxu1 %v4754_v47  ;;  %v4753_v58 = vld [vmem:[%s15539_s4 + $0x1d0] sm:$0xff] }
 0x396   :  { %v12327_v15 = vpop.f32.mrf.mxu1  ;;  %v12329_v12 = vpop.f32.mrf.mxu0  ;;  %7590 = vmatmul.mubr.msk.f32.gmra.mxu0 %vm2194_vm1, %v12334_v51  ;;  %7622 = vmatmul.mubr.msk.f32.gmra.mxu1 %vm2194_vm1, %v11560_v25  ;;  %v12357_v25 = vld [vmem:[%s15538_s2 + $0x1a8] sm:$0xff] }
 0x397   :  { %16265 = vst [vmem:[#allocation698_spill] sm:$0xff] %v12327_v15  ;;  %16266 = vst [vmem:[#allocation699_spill] sm:$0xff] %v12329_v12  ;;  %3667 = vmatprep.mubr.f32.mxu0 %v15563_v39  ;;  %3924 = vmatprep.mubr.f32.mxu1 %v15563_v39 }
 0x398   :  { %v12345_v47 = vpop.f32.mrf.mxu1  ;;  %v12347_v12 = vpop.f32.mrf.mxu0  ;;  %5257 = vmatprep.subr.mxu1 %v15563_v39 }
 0x399   :  { %16267 = vst [vmem:[#allocation700_spill] sm:$0xff] %v12345_v47  ;;  %16268 = vst [vmem:[#allocation701_spill] sm:$0xff] %v12347_v12  ;;  %5258 = vmatpush2.msra.mxu1 %v4753_v58  ;;  %v4752_v12 = vld [vmem:[%s15539_s4 + $0x1c8] sm:$0xff] }
 0x39a   :  { %v12350_v15 = vpop.f32.mrf.mxu1  ;;  %v12352_v62 = vpop.f32.mrf.mxu0  ;;  %7591 = vmatmul.mubr.msk.f32.gmra.mxu0 %vm2194_vm1, %v12357_v25  ;;  %7623 = vmatmul.mubr.msk.f32.gmra.mxu1 %vm2194_vm1, %v11580_v50  ;;  %v12380_v50 = vld [vmem:[%s15538_s2 + $0x1b0] sm:$0xff] }
 0x39b   :  { %16269 = vst [vmem:[#allocation702_spill] sm:$0xff] %v12350_v15  ;;  %16270 = vst [vmem:[#allocation703_spill] sm:$0xff] %v12352_v62  ;;  %3673 = vmatprep.mubr.f32.mxu0 %v15563_v39  ;;  %3930 = vmatprep.mubr.f32.mxu1 %v15563_v39 }
 0x39c   :  { %v12368_v58 = vpop.f32.mrf.mxu1  ;;  %v12370_v62 = vpop.f32.mrf.mxu0  ;;  %5259 = vmatprep.subr.mxu1 %v15563_v39 }
 0x39d   :  { %16271 = vst [vmem:[#allocation704_spill] sm:$0xff] %v12368_v58  ;;  %16272 = vst [vmem:[#allocation705_spill] sm:$0xff] %v12370_v62  ;;  %5260 = vmatpush2.msra.mxu1 %v4752_v12  ;;  %v4751_v62 = vld [vmem:[%s15539_s4 + $0x1c0] sm:$0xff] }
 0x39e   :  { %v12373_v15 = vpop.f32.mrf.mxu1  ;;  %v12375_v47 = vpop.f32.mrf.mxu0  ;;  %7592 = vmatmul.mubr.msk.f32.gmra.mxu0 %vm2194_vm1, %v12380_v50  ;;  %7624 = vmatmul.mubr.msk.f32.gmra.mxu1 %vm2194_vm1, %v11602_v49  ;;  %v12403_v49 = vld [vmem:[%s15538_s2 + $0x1b8] sm:$0xff] }
 0x39f   :  { %16273 = vst [vmem:[#allocation706_spill] sm:$0xff] %v12373_v15  ;;  %16274 = vst [vmem:[#allocation707_spill] sm:$0xff] %v12375_v47  ;;  %3679 = vmatprep.mubr.f32.mxu0 %v15563_v39  ;;  %3936 = vmatprep.mubr.f32.mxu1 %v15563_v39 }
 0x3a0   :  { %v12391_v12 = vpop.f32.mrf.mxu1  ;;  %v12393_v47 = vpop.f32.mrf.mxu0  ;;  %5261 = vmatprep.subr.mxu1 %v15563_v39 }
 0x3a1   :  { %16275 = vst [vmem:[#allocation708_spill] sm:$0xff] %v12391_v12  ;;  %16276 = vst [vmem:[#allocation709_spill] sm:$0xff] %v12393_v47  ;;  %5262 = vmatpush2.msra.mxu1 %v4751_v62  ;;  %v4750_v47 = vld [vmem:[%s15539_s4 + $0x1b8] sm:$0xff] }
 0x3a2   :  { %v12396_v15 = vpop.f32.mrf.mxu1  ;;  %v12398_v58 = vpop.f32.mrf.mxu0  ;;  %7593 = vmatmul.mubr.msk.f32.gmra.mxu0 %vm2194_vm1, %v12403_v49  ;;  %7625 = vmatmul.mubr.msk.f32.gmra.mxu1 %vm2194_vm1, %v11625_v55  ;;  %v12426_v55 = vld [vmem:[%s15538_s2 + $0x1c0] sm:$0xff] }
 0x3a3   :  { %16277 = vst [vmem:[#allocation710_spill] sm:$0xff] %v12396_v15  ;;  %16278 = vst [vmem:[#allocation711_spill] sm:$0xff] %v12398_v58  ;;  %3685 = vmatprep.mubr.f32.mxu0 %v15563_v39  ;;  %3942 = vmatprep.mubr.f32.mxu1 %v15563_v39 }
 0x3a4   :  { %v12414_v62 = vpop.f32.mrf.mxu1  ;;  %v12416_v58 = vpop.f32.mrf.mxu0  ;;  %5263 = vmatprep.subr.mxu1 %v15563_v39 }
 0x3a5   :  { %16279 = vst [vmem:[#allocation712_spill] sm:$0xff] %v12414_v62  ;;  %16280 = vst [vmem:[#allocation713_spill] sm:$0xff] %v12416_v58  ;;  %5264 = vmatpush2.msra.mxu1 %v4750_v47  ;;  %v4749_v58 = vld [vmem:[%s15539_s4 + $0x1b0] sm:$0xff] }
 0x3a6   :  { %v12419_v15 = vpop.f32.mrf.mxu1  ;;  %v12421_v12 = vpop.f32.mrf.mxu0  ;;  %7594 = vmatmul.mubr.msk.f32.gmra.mxu0 %vm2194_vm1, %v12426_v55  ;;  %7626 = vmatmul.mubr.msk.f32.gmra.mxu1 %vm2194_vm1, %v11648_v46  ;;  %v12449_v46 = vld [vmem:[%s15538_s2 + $0x1c8] sm:$0xff] }
 0x3a7   :  { %16281 = vst [vmem:[#allocation714_spill] sm:$0xff] %v12419_v15  ;;  %16282 = vst [vmem:[#allocation715_spill] sm:$0xff] %v12421_v12  ;;  %3691 = vmatprep.mubr.f32.mxu0 %v15563_v39  ;;  %3948 = vmatprep.mubr.f32.mxu1 %v15563_v39 }
 0x3a8   :  { %v12437_v47 = vpop.f32.mrf.mxu1  ;;  %v12439_v12 = vpop.f32.mrf.mxu0  ;;  %5265 = vmatprep.subr.mxu1 %v15563_v39 }
 0x3a9   :  { %16283 = vst [vmem:[#allocation716_spill] sm:$0xff] %v12437_v47  ;;  %16284 = vst [vmem:[#allocation717_spill] sm:$0xff] %v12439_v12  ;;  %5266 = vmatpush2.msra.mxu1 %v4749_v58  ;;  %v4748_v12 = vld [vmem:[%s15539_s4 + $0x1a8] sm:$0xff] }
 0x3aa   :  { %v12442_v15 = vpop.f32.mrf.mxu1  ;;  %v12444_v62 = vpop.f32.mrf.mxu0  ;;  %7595 = vmatmul.mubr.msk.f32.gmra.mxu0 %vm2194_vm1, %v12449_v46  ;;  %7627 = vmatmul.mubr.msk.f32.gmra.mxu1 %vm2194_vm1, %v11671_v45  ;;  %v12472_v45 = vld [vmem:[%s15538_s2 + $0x1d0] sm:$0xff] }
 0x3ab   :  { %16285 = vst [vmem:[#allocation718_spill] sm:$0xff] %v12442_v15  ;;  %16286 = vst [vmem:[#allocation719_spill] sm:$0xff] %v12444_v62  ;;  %3697 = vmatprep.mubr.f32.mxu0 %v15563_v39  ;;  %3954 = vmatprep.mubr.f32.mxu1 %v15563_v39 }
 0x3ac   :  { %v12460_v58 = vpop.f32.mrf.mxu1  ;;  %v12462_v62 = vpop.f32.mrf.mxu0  ;;  %5267 = vmatprep.subr.mxu1 %v15563_v39 }
 0x3ad   :  { %16287 = vst [vmem:[#allocation720_spill] sm:$0xff] %v12460_v58  ;;  %16288 = vst [vmem:[#allocation721_spill] sm:$0xff] %v12462_v62  ;;  %5268 = vmatpush2.msra.mxu1 %v4748_v12  ;;  %v4747_v62 = vld [vmem:[%s15539_s4 + $0x1a0] sm:$0xff] }
 0x3ae   :  { %v12465_v15 = vpop.f32.mrf.mxu1  ;;  %v12467_v47 = vpop.f32.mrf.mxu0  ;;  %7596 = vmatmul.mubr.msk.f32.gmra.mxu0 %vm2194_vm1, %v12472_v45  ;;  %7628 = vmatmul.mubr.msk.f32.gmra.mxu1 %vm2194_vm1, %v11694_v53  ;;  %v12495_v53 = vld [vmem:[%s15538_s2 + $0x1d8] sm:$0xff] }
 0x3af   :  { %16289 = vst [vmem:[#allocation722_spill] sm:$0xff] %v12465_v15  ;;  %16290 = vst [vmem:[#allocation723_spill] sm:$0xff] %v12467_v47  ;;  %3703 = vmatprep.mubr.f32.mxu0 %v15563_v39  ;;  %3960 = vmatprep.mubr.f32.mxu1 %v15563_v39 }
 0x3b0   :  { %v12483_v12 = vpop.f32.mrf.mxu1  ;;  %v12485_v47 = vpop.f32.mrf.mxu0  ;;  %5269 = vmatprep.subr.mxu1 %v15563_v39 }
 0x3b1   :  { %16291 = vst [vmem:[#allocation724_spill] sm:$0xff] %v12483_v12  ;;  %16292 = vst [vmem:[#allocation725_spill] sm:$0xff] %v12485_v47  ;;  %5270 = vmatpush2.msra.mxu1 %v4747_v62  ;;  %v4746_v47 = vld [vmem:[%s15539_s4 + $0x198] sm:$0xff] }
 0x3b2   :  { %v12488_v15 = vpop.f32.mrf.mxu1  ;;  %v12490_v58 = vpop.f32.mrf.mxu0  ;;  %7597 = vmatmul.mubr.msk.f32.gmra.mxu0 %vm2194_vm1, %v12495_v53  ;;  %7629 = vmatmul.mubr.msk.f32.gmra.mxu1 %vm2194_vm1, %v11717_v32  ;;  %v12518_v32 = vld [vmem:[%s15538_s2 + $0x1e0] sm:$0xff] }
 0x3b3   :  { %16293 = vst [vmem:[#allocation726_spill] sm:$0xff] %v12488_v15  ;;  %16294 = vst [vmem:[#allocation727_spill] sm:$0xff] %v12490_v58  ;;  %3709 = vmatprep.mubr.f32.mxu0 %v15563_v39  ;;  %3966 = vmatprep.mubr.f32.mxu1 %v15563_v39 }
 0x3b4   :  { %v12506_v62 = vpop.f32.mrf.mxu1  ;;  %v12508_v58 = vpop.f32.mrf.mxu0  ;;  %5271 = vmatprep.subr.mxu1 %v15563_v39 }
 0x3b5   :  { %16295 = vst [vmem:[#allocation728_spill] sm:$0xff] %v12506_v62  ;;  %16296 = vst [vmem:[#allocation729_spill] sm:$0xff] %v12508_v58  ;;  %5272 = vmatpush2.msra.mxu1 %v4746_v47  ;;  %v4745_v58 = vld [vmem:[%s15539_s4 + $0x190] sm:$0xff] }
 0x3b6   :  { %v12511_v15 = vpop.f32.mrf.mxu1  ;;  %v12513_v12 = vpop.f32.mrf.mxu0  ;;  %7598 = vmatmul.mubr.msk.f32.gmra.mxu0 %vm2194_vm1, %v12518_v32  ;;  %7630 = vmatmul.mubr.msk.f32.gmra.mxu1 %vm2194_vm1, %v11740_v48  ;;  %v12541_v48 = vld [vmem:[%s15538_s2 + $0x1e8] sm:$0xff] }
 0x3b7   :  { %16297 = vst [vmem:[#allocation730_spill] sm:$0xff] %v12511_v15  ;;  %16298 = vst [vmem:[#allocation731_spill] sm:$0xff] %v12513_v12  ;;  %3715 = vmatprep.mubr.f32.mxu0 %v15563_v39  ;;  %3972 = vmatprep.mubr.f32.mxu1 %v15563_v39 }
 0x3b8   :  { %v12529_v47 = vpop.f32.mrf.mxu1  ;;  %v12531_v12 = vpop.f32.mrf.mxu0  ;;  %5273 = vmatprep.subr.mxu1 %v15563_v39 }
 0x3b9   :  { %16299 = vst [vmem:[#allocation732_spill] sm:$0xff] %v12529_v47  ;;  %16300 = vst [vmem:[#allocation733_spill] sm:$0xff] %v12531_v12  ;;  %5274 = vmatpush2.msra.mxu1 %v4745_v58  ;;  %v4744_v12 = vld [vmem:[%s15539_s4 + $0x188] sm:$0xff] }
 0x3ba   :  { %v12534_v15 = vpop.f32.mrf.mxu1  ;;  %v12536_v62 = vpop.f32.mrf.mxu0  ;;  %7599 = vmatmul.mubr.msk.f32.gmra.mxu0 %vm2194_vm1, %v12541_v48  ;;  %7631 = vmatmul.mubr.msk.f32.gmra.mxu1 %vm2194_vm1, %v11763_v44  ;;  %v12564_v44 = vld [vmem:[%s15538_s2 + $0x1f0] sm:$0xff] }
 0x3bb   :  { %16301 = vst [vmem:[#allocation734_spill] sm:$0xff] %v12534_v15  ;;  %16302 = vst [vmem:[#allocation735_spill] sm:$0xff] %v12536_v62  ;;  %3721 = vmatprep.mubr.f32.mxu0 %v15563_v39  ;;  %3978 = vmatprep.mubr.f32.mxu1 %v15563_v39 }
 0x3bc   :  { %v12552_v58 = vpop.f32.mrf.mxu1  ;;  %v12554_v62 = vpop.f32.mrf.mxu0  ;;  %5275 = vmatprep.subr.mxu1 %v15563_v39  ;;  %16307 = vst [vmem:[#allocation740_spill] sm:$0xff] %v12564_v44 }
 0x3bd   :  { %16303 = vst [vmem:[#allocation736_spill] sm:$0xff] %v12552_v58  ;;  %16304 = vst [vmem:[#allocation737_spill] sm:$0xff] %v12554_v62  ;;  %5276 = vmatpush2.msra.mxu1 %v4744_v12  ;;  %v4743_v12 = vld [vmem:[%s15539_s4 + $0x180] sm:$0xff]  ;;  %v16309_v62 = vld [vmem:[#allocation11_spill] sm:$0xff] }
 0x3be   :  { %v12557_v15 = vpop.f32.mrf.mxu1  ;;  %v12559_v47 = vpop.f32.mrf.mxu0  ;;  %7600 = vmatmul.mubr.msk.f32.gmra.mxu0 %vm2194_vm1, %v12564_v44  ;;  %7632 = vmatmul.mubr.msk.f32.gmra.mxu1 %vm2194_vm1, %v11786_v21  ;;  %v4184_v58 = vmul.f32 %v10845_v23, %v16309_v62  ;;  %v12589_v44 = vld [vmem:[%s15538_s2 + $0x1f8] sm:$0xff] }
 0x3bf   :  { %16305 = vst [vmem:[#allocation738_spill] sm:$0xff] %v12557_v15  ;;  %16306 = vst [vmem:[#allocation739_spill] sm:$0xff] %v12559_v47  ;;  %3727 = vmatprep.mubr.f32.mxu0 %v15563_v39  ;;  %3984 = vmatprep.mubr.f32.mxu1 %v15563_v39  ;;  %v16312_v23 = vld [vmem:[#allocation9_spill] sm:$0xff] }
 0x3c0   :  { %v12575_v47 = vpop.f32.mrf.mxu1  ;;  %v12577_v15 = vpop.f32.mrf.mxu0  ;;  %5277 = vmatprep.subr.mxu1 %v15563_v39  ;;  %v4183_v62 = vmul.f32 %v10824_v37, %v16312_v23  ;;  %v4191_v37 = vmul.f32 %v10849_v2, %v8765_v5  ;;  %v16314_v5 = vld [vmem:[#allocation15_spill] sm:$0xff] }
 0x3c1   :  { %16308 = vst [vmem:[#allocation741_spill] sm:$0xff] %v12577_v15  ;;  %5278 = vmatpush2.msra.mxu1 %v4743_v12  ;;  %v4774_v15 = vld [vmem:[%s15539_s4 + $0x278] sm:$0xff]  ;;  %v4199_v2 = vmul.f32 %v10869_v17, %v16314_v5  ;;  %v16315_v17 = vld [vmem:[#allocation18_spill] sm:$0xff] }
 0x3c2   :  { %v12582_v59 = vpop.f32.mrf.mxu1  ;;  %v12584_v21 = vpop.f32.mrf.mxu0  ;;  %7601 = vmatmul.mubr.msk.f32.gmra.mxu0 %vm2194_vm1, %v12589_v44  ;;  %7633 = vmatmul.mubr.msk.f32.gmra.mxu1 %vm2194_vm1, %v11809_v20 }
 0x3c3   :  { %16310 = vst [vmem:[#allocation11_spill] sm:$0xff] %v12582_v59  ;;  %16311 = vst [vmem:[#allocation742_spill] sm:$0xff] %v12584_v21  ;;  %4894 = vmatprep.mubr.f32.mxu0 %v4184_v58  ;;  %3990 = vmatprep.mubr.f32.mxu1 %v15563_v39  ;;  %v4192_v59 = vmul.f32 %v10864_v0, %v8775_v41  ;;  %v4200_v0 = vmul.f32 %v10884_v14, %v8789_v9  ;;  %v4773_v14 = vld [vmem:[%s15539_s4 + $0x270] sm:$0xff] }
 0x3c4   :  { %v12598_v12 = vpop.f32.mrf.mxu1  ;;  %v12600_v21 = vpop.f32.mrf.mxu0  ;;  %5985 = vmatprep.subr.mxu1 %v15563_v39  ;;  %v4208_v9 = vmul.f32 %v10903_v1, %v8803_v13  ;;  %v4216_v13 = vmul.f32 %v10922_v10, %v8817_v16  ;;  %v4224_v16 = vmul.f32 %v10941_v6, %v8831_v18  ;;  %v4772_v10 = vld [vmem:[%s15539_s4 + $0x268] sm:$0xff]  ;;  %v4232_v6 = vmul.f32 %v10960_v3, %v8845_v22  ;;  %v4771_v22 = vld [vmem:[%s15539_s4 + $0x260] sm:$0xff] }
 0x3c5   :  { %v4240_v3 = vmul.f32 %v10979_v36, %v8859_v24  ;;  %v16323_v36 = vld [vmem:[#allocation35_spill] sm:$0xff] }
 0x3c6   :  { %v12608_v20 = vpop.f32.mrf.mxu1  ;;  %v12610_v58 = vpop.f32.mrf.mxu0  ;;  %7634 = vmatmul.mubr.msk.f32.gmra.mxu1 %vm2194_vm1, %v11833_v26  ;;  %4895 = vmatmul.mubr.f32.vlgmr.msra.gmra.mxu0 %v4183_v62 }
 0x3c7   :  { %16313 = vst [vmem:[#allocation9_spill] sm:$0xff] %v12610_v58  ;;  %4899 = vmatprep.mubr.f32.mxu0 %v4192_v59  ;;  %3996 = vmatprep.mubr.f32.mxu1 %v15563_v39 }
 0x3c8   :  { %v12617_v23 = vpop.f32.mrf.mxu1  ;;  %v12619_v41 = vpop.f32.mrf.mxu0  ;;  %5601 = vmatpush1.msra.mxu0 %v4774_v15 }
 0x3c9   :  { %5602 = vmatprep.subr.mxu0 %v15563_v39 }
 0x3ca   :  { %v12624_v58 = vpop.f32.mrf.mxu1  ;;  %v12626_v26 = vpop.f32.mrf.mxu0  ;;  %7635 = vmatmul.mubr.msk.f32.gmra.mxu1 %vm2194_vm1, %v11860_v11  ;;  %4900 = vmatmul.mubr.f32.gmra.mxu0 %v4191_v37  ;;  %v4207_v37 = vmul.f32 %v10888_v42, %v16315_v17  ;;  %v16316_v42 = vld [vmem:[#allocation21_spill] sm:$0xff] }
 0x3cb   :  { %4904 = vmatprep.mubr.f32.mxu0 %v4200_v0  ;;  %4002 = vmatprep.mubr.f32.mxu1 %v15563_v39 }
 0x3cc   :  { %v12633_v15 = vpop.f32.mrf.mxu1  ;;  %v12635_v59 = vpop.f32.mrf.mxu0  ;;  %5603 = vmatpush1.msra.mxu0 %v4773_v14 }
 0x3cd   :  { %5604 = vmatprep.subr.mxu0 %v15563_v39 }
 0x3ce   :  { %v12642_v62 = vpop.f32.mrf.mxu1  ;;  %v12644_v11 = vpop.f32.mrf.mxu0  ;;  %7636 = vmatmul.mubr.msk.f32.gmra.mxu1 %vm2194_vm1, %v11887_v4  ;;  %4905 = vmatmul.mubr.f32.gmra.mxu0 %v4199_v2  ;;  %v4215_v2 = vmul.f32 %v10907_v40, %v16316_v42  ;;  %v16317_v40 = vld [vmem:[#allocation24_spill] sm:$0xff] }
 0x3cf   :  { %4909 = vmatprep.mubr.f32.mxu0 %v4208_v9  ;;  %4008 = vmatprep.mubr.f32.mxu1 %v15563_v39 }
 0x3d0   :  { %v12651_v0 = vpop.f32.mrf.mxu1  ;;  %v12653_v1 = vpop.f32.mrf.mxu0  ;;  %5605 = vmatpush1.msra.mxu0 %v4772_v10 }
 0x3d1   :  { %5606 = vmatprep.subr.mxu0 %v15563_v39 }
 0x3d2   :  { %v12658_v5 = vpop.f32.mrf.mxu1  ;;  %v12660_v4 = vpop.f32.mrf.mxu0  ;;  %7637 = vmatmul.mubr.msk.f32.gmra.mxu1 %vm2194_vm1, %v11914_v8  ;;  %4910 = vmatmul.mubr.f32.gmra.mxu0 %v4207_v37  ;;  %v4223_v37 = vmul.f32 %v10926_v63, %v16317_v40  ;;  %v16318_v63 = vld [vmem:[#allocation27_spill] sm:$0xff] }
 0x3d3   :  { %4914 = vmatprep.mubr.f32.mxu0 %v4216_v13  ;;  %4014 = vmatprep.mubr.f32.mxu1 %v15563_v39 }
 0x3d4   :  { %v12667_v9 = vpop.f32.mrf.mxu1  ;;  %v12669_v14 = vpop.f32.mrf.mxu0  ;;  %5607 = vmatpush1.msra.mxu0 %v4771_v22 }
 0x3d5   :  { %5608 = vmatprep.subr.mxu0 %v15563_v39 }
 0x3d6   :  { %v12676_v17 = vpop.f32.mrf.mxu1  ;;  %v12678_v8 = vpop.f32.mrf.mxu0  ;;  %7638 = vmatmul.mubr.msk.f32.gmra.mxu1 %vm2194_vm1, %v11941_v28  ;;  %4915 = vmatmul.mubr.f32.gmra.mxu0 %v4215_v2  ;;  %v4231_v2 = vmul.f32 %v10945_v38, %v16318_v63  ;;  %v16321_v38 = vld [vmem:[#allocation30_spill] sm:$0xff]  ;;  %v16324_v63 = vld [vmem:[#allocation461_spill] sm:$0xff] }
 0x3d7   :  { %4919 = vmatprep.mubr.f32.mxu0 %v4224_v16  ;;  %4020 = vmatprep.mubr.f32.mxu1 %v15563_v39 }
 0x3d8   :  { %v12685_v13 = vpop.f32.mrf.mxu1  ;;  %v12687_v18 = vpop.f32.mrf.mxu0 }
 0x3da   :  { %v12692_v42 = vpop.f32.mrf.mxu1  ;;  %v12694_v28 = vpop.f32.mrf.mxu0  ;;  %7639 = vmatmul.mubr.msk.f32.gmra.mxu1 %vm2194_vm1, %v11968_v30  ;;  %4920 = vmatmul.mubr.f32.gmra.mxu0 %v4223_v37  ;;  %v4239_v37 = vmul.f32 %v10964_v34, %v16321_v38  ;;  %v16327_v34 = vld [vmem:[#allocation33_spill] sm:$0xff] }
 0x3db   :  { %4924 = vmatprep.mubr.f32.mxu0 %v4232_v6  ;;  %4026 = vmatprep.mubr.f32.mxu1 %v15563_v39 }
 0x3dc   :  { %v12701_v16 = vpop.f32.mrf.mxu1  ;;  %v12703_v10 = vpop.f32.mrf.mxu0 }
 0x3de   :  { %v12710_v40 = vpop.f32.mrf.mxu1  ;;  %v12712_v30 = vpop.f32.mrf.mxu0  ;;  %7640 = vmatmul.mubr.msk.f32.gmra.mxu1 %vm2194_vm1, %v11995_v61  ;;  %4925 = vmatmul.mubr.f32.gmra.mxu0 %v4231_v2  ;;  %v16328_v2 = vld [vmem:[#allocation459_spill] sm:$0xff] }
 0x3df   :  { %16319 = vst [vmem:[#allocation15_spill] sm:$0xff] %v12710_v40  ;;  %16320 = vst [vmem:[#allocation18_spill] sm:$0xff] %v12712_v30  ;;  %4929 = vmatprep.mubr.f32.mxu0 %v4240_v3  ;;  %4032 = vmatprep.mubr.f32.mxu1 %v15563_v39  ;;  %v4248_v40 = vmul.f32 %v16324_v63, %v16323_v36  ;;  %v4247_v3 = vmul.f32 %v16328_v2, %v16327_v34  ;;  %v16330_v36 = vld [vmem:[#allocation39_spill] sm:$0xff]  ;;  %v16331_v63 = vld [vmem:[#allocation465_spill] sm:$0xff] }
 0x3e0   :  { %v12719_v6 = vpop.f32.mrf.mxu1  ;;  %v12721_v24 = vpop.f32.mrf.mxu0 }
 0x3e1   :  { %16322 = vst [vmem:[#allocation21_spill] sm:$0xff] %v12721_v24  ;;  %v4256_v24 = vmul.f32 %v16331_v63, %v16330_v36  ;;  %v16337_v63 = vld [vmem:[#allocation43_spill] sm:$0xff] }
 0x3e2   :  { %v12726_v30 = vpop.f32.mrf.mxu1  ;;  %v12728_v61 = vpop.f32.mrf.mxu0  ;;  %7641 = vmatmul.mubr.msk.f32.gmra.mxu1 %vm2194_vm1, %v12022_v19  ;;  %4930 = vmatmul.mubr.f32.gmra.mxu0 %v4239_v37  ;;  %v16335_v37 = vld [vmem:[#allocation463_spill] sm:$0xff] }
 0x3e3   :  { %16325 = vst [vmem:[#allocation24_spill] sm:$0xff] %v12726_v30  ;;  %16326 = vst [vmem:[#allocation27_spill] sm:$0xff] %v12728_v61  ;;  %4934 = vmatprep.mubr.f32.mxu0 %v4248_v40  ;;  %4038 = vmatprep.mubr.f32.mxu1 %v15563_v39  ;;  %v4770_v61 = vld [vmem:[%s15539_s4 + $0x258] sm:$0xff] }
 0x3e4   :  { %v12735_v22 = vpop.f32.mrf.mxu1  ;;  %v12737_v38 = vpop.f32.mrf.mxu0  ;;  %v16334_v40 = vld [vmem:[#allocation37_spill] sm:$0xff]  ;;  %5609 = vmatpush1.msra.mxu0 %v4770_v61 }
 0x3e5   :  { %16329 = vst [vmem:[#allocation30_spill] sm:$0xff] %v12737_v38  ;;  %v4255_v34 = vmul.f32 %v16335_v37, %v16334_v40  ;;  %v16338_v38 = vld [vmem:[#allocation469_spill] sm:$0xff]  ;;  %5610 = vmatprep.subr.mxu0 %v15563_v39 }
 0x3e6   :  { %v12744_v30 = vpop.f32.mrf.mxu1  ;;  %v12746_v19 = vpop.f32.mrf.mxu0  ;;  %7642 = vmatmul.mubr.msk.f32.gmra.mxu1 %vm2194_vm1, %v12049_v56  ;;  %4935 = vmatmul.mubr.f32.gmra.mxu0 %v4247_v3  ;;  %v16342_v3 = vld [vmem:[#allocation467_spill] sm:$0xff] }
 0x3e7   :  { %16332 = vst [vmem:[#allocation35_spill] sm:$0xff] %v12744_v30  ;;  %16333 = vst [vmem:[#allocation461_spill] sm:$0xff] %v12746_v19  ;;  %4939 = vmatprep.mubr.f32.mxu0 %v4256_v24  ;;  %4044 = vmatprep.mubr.f32.mxu1 %v15563_v39  ;;  %v4264_v30 = vmul.f32 %v16338_v38, %v16337_v63  ;;  %v16341_v24 = vld [vmem:[#allocation41_spill] sm:$0xff]  ;;  %v16344_v38 = vld [vmem:[#allocation47_spill] sm:$0xff] }
 0x3e8   :  { %v12753_v2 = vpop.f32.mrf.mxu1  ;;  %v12755_v36 = vpop.f32.mrf.mxu0  ;;  %v4263_v40 = vmul.f32 %v16342_v3, %v16341_v24  ;;  %v16345_v63 = vld [vmem:[#allocation473_spill] sm:$0xff] }
 0x3e9   :  { %16336 = vst [vmem:[#allocation33_spill] sm:$0xff] %v12755_v36  ;;  %v4272_v36 = vmul.f32 %v16345_v63, %v16344_v38  ;;  %v16351_v63 = vld [vmem:[#allocation51_spill] sm:$0xff] }
 0x3ea   :  { %v12760_v19 = vpop.f32.mrf.mxu1  ;;  %v12762_v56 = vpop.f32.mrf.mxu0  ;;  %7643 = vmatmul.mubr.msk.f32.gmra.mxu1 %vm2194_vm1, %v12076_v43  ;;  %4940 = vmatmul.mubr.f32.gmra.mxu0 %v4255_v34  ;;  %v16349_v34 = vld [vmem:[#allocation471_spill] sm:$0xff] }
 0x3eb   :  { %16339 = vst [vmem:[#allocation459_spill] sm:$0xff] %v12760_v19  ;;  %16340 = vst [vmem:[#allocation39_spill] sm:$0xff] %v12762_v56  ;;  %4944 = vmatprep.mubr.f32.mxu0 %v4264_v30  ;;  %4050 = vmatprep.mubr.f32.mxu1 %v15563_v39  ;;  %v4769_v56 = vld [vmem:[%s15539_s4 + $0x250] sm:$0xff]  ;;  %v16348_v30 = vld [vmem:[#allocation45_spill] sm:$0xff] }
 0x3ec   :  { %v12769_v61 = vpop.f32.mrf.mxu1  ;;  %v12771_v37 = vpop.f32.mrf.mxu0  ;;  %v4271_v24 = vmul.f32 %v16349_v34, %v16348_v30  ;;  %5611 = vmatpush1.msra.mxu0 %v4769_v56 }
 0x3ed   :  { %16343 = vst [vmem:[#allocation465_spill] sm:$0xff] %v12771_v37  ;;  %v16352_v37 = vld [vmem:[#allocation477_spill] sm:$0xff]  ;;  %5612 = vmatprep.subr.mxu0 %v15563_v39 }
 0x3ee   :  { %v12778_v19 = vpop.f32.mrf.mxu1  ;;  %v12780_v43 = vpop.f32.mrf.mxu0  ;;  %7644 = vmatmul.mubr.msk.f32.gmra.mxu1 %vm2194_vm1, %v12103_v57  ;;  %4945 = vmatmul.mubr.f32.gmra.mxu0 %v4263_v40  ;;  %v16356_v40 = vld [vmem:[#allocation475_spill] sm:$0xff] }
 0x3ef   :  { %16346 = vst [vmem:[#allocation37_spill] sm:$0xff] %v12778_v19  ;;  %16347 = vst [vmem:[#allocation463_spill] sm:$0xff] %v12780_v43  ;;  %4949 = vmatprep.mubr.f32.mxu0 %v4272_v36  ;;  %4056 = vmatprep.mubr.f32.mxu1 %v15563_v39  ;;  %v4280_v19 = vmul.f32 %v16352_v37, %v16351_v63  ;;  %v16355_v36 = vld [vmem:[#allocation49_spill] sm:$0xff]  ;;  %v16358_v37 = vld [vmem:[#allocation55_spill] sm:$0xff] }
 0x3f0   :  { %v12787_v3 = vpop.f32.mrf.mxu1  ;;  %v12789_v38 = vpop.f32.mrf.mxu0  ;;  %v4279_v30 = vmul.f32 %v16356_v40, %v16355_v36  ;;  %v16359_v63 = vld [vmem:[#allocation481_spill] sm:$0xff] }
 0x3f1   :  { %16350 = vst [vmem:[#allocation43_spill] sm:$0xff] %v12789_v38  ;;  %v4288_v38 = vmul.f32 %v16359_v63, %v16358_v37  ;;  %v16365_v63 = vld [vmem:[#allocation59_spill] sm:$0xff] }
 0x3f2   :  { %v12794_v43 = vpop.f32.mrf.mxu1  ;;  %v12796_v57 = vpop.f32.mrf.mxu0  ;;  %7645 = vmatmul.mubr.msk.f32.gmra.mxu1 %vm2194_vm1, %v12127_v7  ;;  %4950 = vmatmul.mubr.f32.gmra.mxu0 %v4271_v24  ;;  %v16363_v24 = vld [vmem:[#allocation479_spill] sm:$0xff] }
 0x3f3   :  { %16353 = vst [vmem:[#allocation469_spill] sm:$0xff] %v12794_v43  ;;  %16354 = vst [vmem:[#allocation41_spill] sm:$0xff] %v12796_v57  ;;  %4954 = vmatprep.mubr.f32.mxu0 %v4280_v19  ;;  %4062 = vmatprep.mubr.f32.mxu1 %v15563_v39  ;;  %v4768_v57 = vld [vmem:[%s15539_s4 + $0x248] sm:$0xff]  ;;  %v16362_v19 = vld [vmem:[#allocation53_spill] sm:$0xff] }
 0x3f4   :  { %v12803_v56 = vpop.f32.mrf.mxu1  ;;  %v12805_v34 = vpop.f32.mrf.mxu0  ;;  %v4287_v36 = vmul.f32 %v16363_v24, %v16362_v19  ;;  %5613 = vmatpush1.msra.mxu0 %v4768_v57 }
 0x3f5   :  { %16357 = vst [vmem:[#allocation467_spill] sm:$0xff] %v12805_v34  ;;  %v16366_v34 = vld [vmem:[#allocation485_spill] sm:$0xff]  ;;  %5614 = vmatprep.subr.mxu0 %v15563_v39 }
 0x3f6   :  { %v12812_v43 = vpop.f32.mrf.mxu1  ;;  %v12814_v7 = vpop.f32.mrf.mxu0  ;;  %7646 = vmatmul.mubr.msk.f32.gmra.mxu1 %vm2194_vm1, %v12150_v33  ;;  %4955 = vmatmul.mubr.f32.gmra.mxu0 %v4279_v30  ;;  %v16370_v30 = vld [vmem:[#allocation483_spill] sm:$0xff] }
 0x3f7   :  { %16360 = vst [vmem:[#allocation47_spill] sm:$0xff] %v12812_v43  ;;  %16361 = vst [vmem:[#allocation473_spill] sm:$0xff] %v12814_v7  ;;  %4959 = vmatprep.mubr.f32.mxu0 %v4288_v38  ;;  %4068 = vmatprep.mubr.f32.mxu1 %v15563_v39  ;;  %v4296_v43 = vmul.f32 %v16366_v34, %v16365_v63  ;;  %v16369_v38 = vld [vmem:[#allocation57_spill] sm:$0xff]  ;;  %v16373_v34 = vld [vmem:[#allocation63_spill] sm:$0xff] }
 0x3f8   :  { %v12821_v40 = vpop.f32.mrf.mxu1  ;;  %v12823_v37 = vpop.f32.mrf.mxu0  ;;  %v4295_v19 = vmul.f32 %v16370_v30, %v16369_v38  ;;  %v16374_v63 = vld [vmem:[#allocation489_spill] sm:$0xff] }
 0x3f9   :  { %16364 = vst [vmem:[#allocation45_spill] sm:$0xff] %v12823_v37  ;;  %v4304_v37 = vmul.f32 %v16374_v63, %v16373_v34  ;;  %v16381_v63 = vld [vmem:[#allocation67_spill] sm:$0xff] }
 0x3fa   :  { %v12828_v7 = vpop.f32.mrf.mxu1  ;;  %v12830_v33 = vpop.f32.mrf.mxu0  ;;  %7647 = vmatmul.mubr.msk.f32.gmra.mxu1 %vm2194_vm1, %v12173_v35  ;;  %4960 = vmatmul.mubr.f32.gmra.mxu0 %v4287_v36  ;;  %v16378_v36 = vld [vmem:[#allocation487_spill] sm:$0xff] }
 0x3fb   :  { %16367 = vst [vmem:[#allocation471_spill] sm:$0xff] %v12828_v7  ;;  %16368 = vst [vmem:[#allocation51_spill] sm:$0xff] %v12830_v33  ;;  %4964 = vmatprep.mubr.f32.mxu0 %v4296_v43  ;;  %4074 = vmatprep.mubr.f32.mxu1 %v15563_v39  ;;  %v4767_v33 = vld [vmem:[%s15539_s4 + $0x240] sm:$0xff]  ;;  %v16377_v43 = vld [vmem:[#allocation61_spill] sm:$0xff] }
 0x3fc   :  { %v12837_v57 = vpop.f32.mrf.mxu1  ;;  %v12839_v24 = vpop.f32.mrf.mxu0  ;;  %v4303_v38 = vmul.f32 %v16378_v36, %v16377_v43  ;;  %5615 = vmatpush1.msra.mxu0 %v4767_v33 }
 0x3fd   :  { %16371 = vst [vmem:[#allocation477_spill] sm:$0xff] %v12837_v57  ;;  %16372 = vst [vmem:[#allocation49_spill] sm:$0xff] %v12839_v24  ;;  %v16382_v24 = vld [vmem:[#allocation493_spill] sm:$0xff]  ;;  %5616 = vmatprep.subr.mxu0 %v15563_v39 }
 0x3fe   :  { %v12846_v7 = vpop.f32.mrf.mxu1  ;;  %v12848_v35 = vpop.f32.mrf.mxu0  ;;  %7648 = vmatmul.mubr.msk.f32.gmra.mxu1 %vm2194_vm1, %v12196_v31  ;;  %4965 = vmatmul.mubr.f32.gmra.mxu0 %v4295_v19  ;;  %v16386_v19 = vld [vmem:[#allocation491_spill] sm:$0xff] }
 0x3ff   :  { %16375 = vst [vmem:[#allocation475_spill] sm:$0xff] %v12846_v7  ;;  %16376 = vst [vmem:[#allocation55_spill] sm:$0xff] %v12848_v35  ;;  %4969 = vmatprep.mubr.f32.mxu0 %v4304_v37  ;;  %4080 = vmatprep.mubr.f32.mxu1 %v15563_v39  ;;  %v4312_v7 = vmul.f32 %v16382_v24, %v16381_v63  ;;  %v16385_v37 = vld [vmem:[#allocation65_spill] sm:$0xff]  ;;  %v16389_v24 = vld [vmem:[#allocation71_spill] sm:$0xff] }
 0x400   :  { %v12855_v30 = vpop.f32.mrf.mxu1  ;;  %v12857_v34 = vpop.f32.mrf.mxu0  ;;  %v4311_v43 = vmul.f32 %v16386_v19, %v16385_v37  ;;  %v16390_v63 = vld [vmem:[#allocation497_spill] sm:$0xff] }
 0x401   :  { %16379 = vst [vmem:[#allocation481_spill] sm:$0xff] %v12855_v30  ;;  %16380 = vst [vmem:[#allocation53_spill] sm:$0xff] %v12857_v34  ;;  %v4320_v34 = vmul.f32 %v16390_v63, %v16389_v24  ;;  %v16397_v63 = vld [vmem:[#allocation75_spill] sm:$0xff] }
 0x402   :  { %v12862_v35 = vpop.f32.mrf.mxu1  ;;  %v12864_v31 = vpop.f32.mrf.mxu0  ;;  %7649 = vmatmul.mubr.msk.f32.gmra.mxu1 %vm2194_vm1, %v12219_v60  ;;  %4970 = vmatmul.mubr.f32.gmra.mxu0 %v4303_v38  ;;  %v16394_v38 = vld [vmem:[#allocation495_spill] sm:$0xff] }
 0x403   :  { %16383 = vst [vmem:[#allocation479_spill] sm:$0xff] %v12862_v35  ;;  %16384 = vst [vmem:[#allocation59_spill] sm:$0xff] %v12864_v31  ;;  %4974 = vmatprep.mubr.f32.mxu0 %v4312_v7  ;;  %4086 = vmatprep.mubr.f32.mxu1 %v15563_v39  ;;  %v4766_v31 = vld [vmem:[%s15539_s4 + $0x238] sm:$0xff] }
 0x404   :  { %v12871_v33 = vpop.f32.mrf.mxu1  ;;  %v12873_v36 = vpop.f32.mrf.mxu0  ;;  %v16393_v7 = vld [vmem:[#allocation69_spill] sm:$0xff]  ;;  %5617 = vmatpush1.msra.mxu0 %v4766_v31 }
 0x405   :  { %16387 = vst [vmem:[#allocation485_spill] sm:$0xff] %v12871_v33  ;;  %16388 = vst [vmem:[#allocation57_spill] sm:$0xff] %v12873_v36  ;;  %v4319_v37 = vmul.f32 %v16394_v38, %v16393_v7  ;;  %v16398_v36 = vld [vmem:[#allocation501_spill] sm:$0xff]  ;;  %5618 = vmatprep.subr.mxu0 %v15563_v39 }
 0x406   :  { %v12880_v35 = vpop.f32.mrf.mxu0  ;;  %v12882_v60 = vpop.f32.mrf.mxu1  ;;  %7650 = vmatmul.mubr.msk.f32.gmra.mxu1 %vm2194_vm1, %v12242_v29  ;;  %4975 = vmatmul.mubr.f32.gmra.mxu0 %v4311_v43  ;;  %v16402_v43 = vld [vmem:[#allocation499_spill] sm:$0xff] }
 0x407   :  { %16391 = vst [vmem:[#allocation483_spill] sm:$0xff] %v12880_v35  ;;  %16392 = vst [vmem:[#allocation63_spill] sm:$0xff] %v12882_v60  ;;  %4979 = vmatprep.mubr.f32.mxu0 %v4320_v34  ;;  %4092 = vmatprep.mubr.f32.mxu1 %v15563_v39  ;;  %v4328_v35 = vmul.f32 %v16398_v36, %v16397_v63  ;;  %v16401_v34 = vld [vmem:[#allocation73_spill] sm:$0xff]  ;;  %v16405_v36 = vld [vmem:[#allocation79_spill] sm:$0xff] }
 0x408   :  { %v12889_v19 = vpop.f32.mrf.mxu0  ;;  %v12891_v24 = vpop.f32.mrf.mxu1  ;;  %v4327_v7 = vmul.f32 %v16402_v43, %v16401_v34  ;;  %v16406_v63 = vld [vmem:[#allocation505_spill] sm:$0xff] }
 0x409   :  { %16395 = vst [vmem:[#allocation489_spill] sm:$0xff] %v12889_v19  ;;  %16396 = vst [vmem:[#allocation61_spill] sm:$0xff] %v12891_v24  ;;  %v4336_v24 = vmul.f32 %v16406_v63, %v16405_v36  ;;  %v16413_v63 = vld [vmem:[#allocation83_spill] sm:$0xff] }
 0x40a   :  { %v12896_v60 = vpop.f32.mrf.mxu0  ;;  %v12898_v29 = vpop.f32.mrf.mxu1  ;;  %7651 = vmatmul.mubr.msk.f32.gmra.mxu1 %vm2194_vm1, %v12265_v54  ;;  %4980 = vmatmul.mubr.f32.gmra.mxu0 %v4319_v37  ;;  %v16410_v37 = vld [vmem:[#allocation503_spill] sm:$0xff] }
 0x40b   :  { %16399 = vst [vmem:[#allocation487_spill] sm:$0xff] %v12896_v60  ;;  %16400 = vst [vmem:[#allocation67_spill] sm:$0xff] %v12898_v29  ;;  %4984 = vmatprep.mubr.f32.mxu0 %v4328_v35  ;;  %4098 = vmatprep.mubr.f32.mxu1 %v15563_v39  ;;  %v4765_v29 = vld [vmem:[%s15539_s4 + $0x230] sm:$0xff]  ;;  %v16409_v35 = vld [vmem:[#allocation77_spill] sm:$0xff] }
 0x40c   :  { %v12905_v31 = vpop.f32.mrf.mxu0  ;;  %v12907_v38 = vpop.f32.mrf.mxu1  ;;  %v4335_v34 = vmul.f32 %v16410_v37, %v16409_v35  ;;  %5619 = vmatpush1.msra.mxu0 %v4765_v29 }
 0x40d   :  { %16403 = vst [vmem:[#allocation493_spill] sm:$0xff] %v12905_v31  ;;  %16404 = vst [vmem:[#allocation65_spill] sm:$0xff] %v12907_v38  ;;  %v16414_v38 = vld [vmem:[#allocation509_spill] sm:$0xff]  ;;  %5620 = vmatprep.subr.mxu0 %v15563_v39 }
 0x40e   :  { %v12914_v60 = vpop.f32.mrf.mxu0  ;;  %v12916_v54 = vpop.f32.mrf.mxu1  ;;  %7652 = vmatmul.mubr.msk.f32.gmra.mxu1 %vm2194_vm1, %v12288_v27  ;;  %4985 = vmatmul.mubr.f32.gmra.mxu0 %v4327_v7  ;;  %v16418_v7 = vld [vmem:[#allocation507_spill] sm:$0xff] }
 0x40f   :  { %16407 = vst [vmem:[#allocation491_spill] sm:$0xff] %v12914_v60  ;;  %16408 = vst [vmem:[#allocation71_spill] sm:$0xff] %v12916_v54  ;;  %4989 = vmatprep.mubr.f32.mxu0 %v4336_v24  ;;  %4104 = vmatprep.mubr.f32.mxu1 %v15563_v39  ;;  %v4344_v60 = vmul.f32 %v16414_v38, %v16413_v63  ;;  %v16417_v24 = vld [vmem:[#allocation81_spill] sm:$0xff]  ;;  %v16421_v38 = vld [vmem:[#allocation87_spill] sm:$0xff] }
 0x410   :  { %v12923_v43 = vpop.f32.mrf.mxu0  ;;  %v12925_v36 = vpop.f32.mrf.mxu1  ;;  %v4343_v35 = vmul.f32 %v16418_v7, %v16417_v24  ;;  %v16422_v63 = vld [vmem:[#allocation513_spill] sm:$0xff] }
 0x411   :  { %16411 = vst [vmem:[#allocation497_spill] sm:$0xff] %v12923_v43  ;;  %16412 = vst [vmem:[#allocation69_spill] sm:$0xff] %v12925_v36  ;;  %v4352_v36 = vmul.f32 %v16422_v63, %v16421_v38  ;;  %v16429_v63 = vld [vmem:[#allocation91_spill] sm:$0xff] }
 0x412   :  { %v12930_v54 = vpop.f32.mrf.mxu0  ;;  %v12932_v27 = vpop.f32.mrf.mxu1  ;;  %7653 = vmatmul.mubr.msk.f32.gmra.mxu1 %vm2194_vm1, %v12311_v52  ;;  %4990 = vmatmul.mubr.f32.gmra.mxu0 %v4335_v34  ;;  %v16426_v34 = vld [vmem:[#allocation511_spill] sm:$0xff] }
 0x413   :  { %16415 = vst [vmem:[#allocation495_spill] sm:$0xff] %v12930_v54  ;;  %16416 = vst [vmem:[#allocation75_spill] sm:$0xff] %v12932_v27  ;;  %4994 = vmatprep.mubr.f32.mxu0 %v4344_v60  ;;  %4110 = vmatprep.mubr.f32.mxu1 %v15563_v39  ;;  %v4764_v27 = vld [vmem:[%s15539_s4 + $0x228] sm:$0xff]  ;;  %v16425_v60 = vld [vmem:[#allocation85_spill] sm:$0xff] }
 0x414   :  { %v12939_v29 = vpop.f32.mrf.mxu0  ;;  %v12941_v37 = vpop.f32.mrf.mxu1  ;;  %v4351_v24 = vmul.f32 %v16426_v34, %v16425_v60  ;;  %5621 = vmatpush1.msra.mxu0 %v4764_v27 }
 0x415   :  { %16419 = vst [vmem:[#allocation501_spill] sm:$0xff] %v12939_v29  ;;  %16420 = vst [vmem:[#allocation73_spill] sm:$0xff] %v12941_v37  ;;  %v16430_v37 = vld [vmem:[#allocation517_spill] sm:$0xff]  ;;  %5622 = vmatprep.subr.mxu0 %v15563_v39 }
 0x416   :  { %v12948_v54 = vpop.f32.mrf.mxu0  ;;  %v12950_v52 = vpop.f32.mrf.mxu1  ;;  %7654 = vmatmul.mubr.msk.f32.gmra.mxu1 %vm2194_vm1, %v12334_v51  ;;  %4995 = vmatmul.mubr.f32.gmra.mxu0 %v4343_v35  ;;  %v16434_v35 = vld [vmem:[#allocation515_spill] sm:$0xff] }
 0x417   :  { %16423 = vst [vmem:[#allocation499_spill] sm:$0xff] %v12948_v54  ;;  %16424 = vst [vmem:[#allocation79_spill] sm:$0xff] %v12950_v52  ;;  %4999 = vmatprep.mubr.f32.mxu0 %v4352_v36  ;;  %4116 = vmatprep.mubr.f32.mxu1 %v15563_v39  ;;  %v4360_v54 = vmul.f32 %v16430_v37, %v16429_v63  ;;  %v16433_v36 = vld [vmem:[#allocation89_spill] sm:$0xff]  ;;  %v4763_v37 = vld [vmem:[%s15539_s4 + $0x220] sm:$0xff] }
 0x418   :  { %v12957_v7 = vpop.f32.mrf.mxu0  ;;  %v12959_v38 = vpop.f32.mrf.mxu1  ;;  %v4359_v60 = vmul.f32 %v16434_v35, %v16433_v36  ;;  %v16437_v63 = vld [vmem:[#allocation95_spill] sm:$0xff]  ;;  %5623 = vmatpush1.msra.mxu0 %v4763_v37  ;;  %v16441_v36 = vld [vmem:[#allocation93_spill] sm:$0xff] }
 0x419   :  { %16427 = vst [vmem:[#allocation505_spill] sm:$0xff] %v12957_v7  ;;  %16428 = vst [vmem:[#allocation77_spill] sm:$0xff] %v12959_v38  ;;  %v16442_v35 = vld [vmem:[#allocation519_spill] sm:$0xff]  ;;  %5624 = vmatprep.subr.mxu0 %v15563_v39 }
 0x41a   :  { %v12964_v52 = vpop.f32.mrf.mxu0  ;;  %v12966_v51 = vpop.f32.mrf.mxu1  ;;  %7655 = vmatmul.mubr.msk.f32.gmra.mxu1 %vm2194_vm1, %v12357_v25  ;;  %5000 = vmatmul.mubr.f32.gmra.mxu0 %v4351_v24  ;;  %v4762_v24 = vld [vmem:[%s15539_s4 + $0x218] sm:$0xff] }
 0x41b   :  { %16431 = vst [vmem:[#allocation503_spill] sm:$0xff] %v12964_v52  ;;  %16432 = vst [vmem:[#allocation83_spill] sm:$0xff] %v12966_v51  ;;  %5004 = vmatprep.mubr.f32.mxu0 %v4360_v54  ;;  %4122 = vmatprep.mubr.f32.mxu1 %v15563_v39  ;;  %v16438_v51 = vld [vmem:[#allocation521_spill] sm:$0xff] }
 0x41c   :  { %v12973_v27 = vpop.f32.mrf.mxu0  ;;  %v12975_v34 = vpop.f32.mrf.mxu1  ;;  %v4368_v52 = vmul.f32 %v16438_v51, %v16437_v63  ;;  %v16445_v63 = vld [vmem:[#allocation99_spill] sm:$0xff]  ;;  %5625 = vmatpush1.msra.mxu0 %v4762_v24 }
 0x41d   :  { %16435 = vst [vmem:[#allocation509_spill] sm:$0xff] %v12973_v27  ;;  %16436 = vst [vmem:[#allocation81_spill] sm:$0xff] %v12975_v34  ;;  %v4367_v34 = vmul.f32 %v16442_v35, %v16441_v36  ;;  %v16449_v36 = vld [vmem:[#allocation97_spill] sm:$0xff]  ;;  %v16450_v35 = vld [vmem:[#allocation523_spill] sm:$0xff]  ;;  %5626 = vmatprep.subr.mxu0 %v15563_v39 }
 0x41e   :  { %v12982_v25 = vpop.f32.mrf.mxu0  ;;  %v12984_v54 = vpop.f32.mrf.mxu1  ;;  %7656 = vmatmul.mubr.msk.f32.gmra.mxu1 %vm2194_vm1, %v12380_v50  ;;  %5005 = vmatmul.mubr.f32.gmra.mxu0 %v4359_v60 }
 0x41f   :  { %16439 = vst [vmem:[#allocation507_spill] sm:$0xff] %v12982_v25  ;;  %16440 = vst [vmem:[#allocation87_spill] sm:$0xff] %v12984_v54  ;;  %5009 = vmatprep.mubr.f32.mxu0 %v4368_v52  ;;  %4128 = vmatprep.mubr.f32.mxu1 %v15563_v39  ;;  %v16446_v54 = vld [vmem:[#allocation525_spill] sm:$0xff]  ;;  %v4761_v52 = vld [vmem:[%s15539_s4 + $0x210] sm:$0xff] }
 0x420   :  { %v12994_v51 = vpop.f32.mrf.mxu0  ;;  %v12996_v37 = vpop.f32.mrf.mxu1  ;;  %v4376_v50 = vmul.f32 %v16446_v54, %v16445_v63  ;;  %v16453_v63 = vld [vmem:[#allocation103_spill] sm:$0xff]  ;;  %5627 = vmatpush1.msra.mxu0 %v4761_v52 }
 0x421   :  { %16443 = vst [vmem:[#allocation513_spill] sm:$0xff] %v12994_v51  ;;  %16444 = vst [vmem:[#allocation85_spill] sm:$0xff] %v12996_v37  ;;  %v4375_v37 = vmul.f32 %v16450_v35, %v16449_v36  ;;  %v16457_v36 = vld [vmem:[#allocation101_spill] sm:$0xff]  ;;  %v16458_v35 = vld [vmem:[#allocation527_spill] sm:$0xff]  ;;  %5628 = vmatprep.subr.mxu0 %v15563_v39 }
 0x422   :  { %v13001_v60 = vpop.f32.mrf.mxu0  ;;  %v13003_v25 = vpop.f32.mrf.mxu1  ;;  %7657 = vmatmul.mubr.msk.f32.gmra.mxu1 %vm2194_vm1, %v12403_v49  ;;  %5010 = vmatmul.mubr.f32.gmra.mxu0 %v4367_v34 }
 0x423   :  { %16447 = vst [vmem:[#allocation511_spill] sm:$0xff] %v13001_v60  ;;  %16448 = vst [vmem:[#allocation91_spill] sm:$0xff] %v13003_v25  ;;  %5014 = vmatprep.mubr.f32.mxu0 %v4376_v50  ;;  %4134 = vmatprep.mubr.f32.mxu1 %v15563_v39  ;;  %v16454_v25 = vld [vmem:[#allocation529_spill] sm:$0xff]  ;;  %v4760_v50 = vld [vmem:[%s15539_s4 + $0x208] sm:$0xff] }
 0x424   :  { %v13013_v54 = vpop.f32.mrf.mxu0  ;;  %v13015_v24 = vpop.f32.mrf.mxu1  ;;  %v4384_v49 = vmul.f32 %v16454_v25, %v16453_v63  ;;  %v16461_v63 = vld [vmem:[#allocation107_spill] sm:$0xff]  ;;  %5629 = vmatpush1.msra.mxu0 %v4760_v50 }
 0x425   :  { %16451 = vst [vmem:[#allocation517_spill] sm:$0xff] %v13013_v54  ;;  %16452 = vst [vmem:[#allocation89_spill] sm:$0xff] %v13015_v24  ;;  %v4383_v24 = vmul.f32 %v16458_v35, %v16457_v36  ;;  %v16465_v36 = vld [vmem:[#allocation105_spill] sm:$0xff]  ;;  %v16466_v35 = vld [vmem:[#allocation531_spill] sm:$0xff]  ;;  %5630 = vmatprep.subr.mxu0 %v15563_v39 }
 0x426   :  { %v13020_v34 = vpop.f32.mrf.mxu0  ;;  %v13022_v60 = vpop.f32.mrf.mxu1  ;;  %7658 = vmatmul.mubr.msk.f32.gmra.mxu1 %vm2194_vm1, %v12426_v55  ;;  %5015 = vmatmul.mubr.f32.gmra.mxu0 %v4375_v37  ;;  %v16727_v54 = vld [vmem:[#allocation629_spill] sm:$0xff] }
 0x427   :  { %16455 = vst [vmem:[#allocation515_spill] sm:$0xff] %v13020_v34  ;;  %16456 = vst [vmem:[#allocation95_spill] sm:$0xff] %v13022_v60  ;;  %5019 = vmatprep.mubr.f32.mxu0 %v4384_v49  ;;  %4140 = vmatprep.mubr.f32.mxu1 %v15563_v39  ;;  %v16462_v60 = vld [vmem:[#allocation533_spill] sm:$0xff]  ;;  %v4759_v49 = vld [vmem:[%s15539_s4 + $0x200] sm:$0xff] }
 0x428   :  { %v13032_v25 = vpop.f32.mrf.mxu0  ;;  %v13034_v52 = vpop.f32.mrf.mxu1  ;;  %v4392_v55 = vmul.f32 %v16462_v60, %v16461_v63  ;;  %v16469_v63 = vld [vmem:[#allocation111_spill] sm:$0xff]  ;;  %5631 = vmatpush1.msra.mxu0 %v4759_v49 }
 0x429   :  { %16459 = vst [vmem:[#allocation521_spill] sm:$0xff] %v13032_v25  ;;  %16460 = vst [vmem:[#allocation93_spill] sm:$0xff] %v13034_v52  ;;  %v4391_v52 = vmul.f32 %v16466_v35, %v16465_v36  ;;  %v16473_v36 = vld [vmem:[#allocation109_spill] sm:$0xff]  ;;  %v16474_v35 = vld [vmem:[#allocation535_spill] sm:$0xff]  ;;  %5632 = vmatprep.subr.mxu0 %v15563_v39 }
 0x42a   :  { %v13039_v37 = vpop.f32.mrf.mxu0  ;;  %v13041_v34 = vpop.f32.mrf.mxu1  ;;  %7659 = vmatmul.mubr.msk.f32.gmra.mxu1 %vm2194_vm1, %v12449_v46  ;;  %5020 = vmatmul.mubr.f32.gmra.mxu0 %v4383_v24  ;;  %v16656_v25 = vld [vmem:[#allocation116_spill] sm:$0xff] }
 0x42b   :  { %16463 = vst [vmem:[#allocation519_spill] sm:$0xff] %v13039_v37  ;;  %16464 = vst [vmem:[#allocation99_spill] sm:$0xff] %v13041_v34  ;;  %5024 = vmatprep.mubr.f32.mxu0 %v4392_v55  ;;  %4146 = vmatprep.mubr.f32.mxu1 %v15563_v39  ;;  %v16470_v34 = vld [vmem:[#allocation537_spill] sm:$0xff] }
 0x42c   :  { %v13051_v60 = vpop.f32.mrf.mxu0  ;;  %v13053_v50 = vpop.f32.mrf.mxu1  ;;  %v4400_v46 = vmul.f32 %v16470_v34, %v16469_v63  ;;  %v4790_v55 = vld [vmem:[%s15539_s4 + $0x2f8] sm:$0xff]  ;;  %v16477_v63 = vld [vmem:[#allocation115_spill] sm:$0xff] }
 0x42d   :  { %16467 = vst [vmem:[#allocation525_spill] sm:$0xff] %v13051_v60  ;;  %16468 = vst [vmem:[#allocation97_spill] sm:$0xff] %v13053_v50  ;;  %v4399_v50 = vmul.f32 %v16474_v35, %v16473_v36  ;;  %5633 = vmatpush2.msra.mxu0 %v4790_v55  ;;  %v16481_v36 = vld [vmem:[#allocation113_spill] sm:$0xff]  ;;  %v16482_v35 = vld [vmem:[#allocation539_spill] sm:$0xff] }
 0x42e   :  { %v13058_v24 = vpop.f32.mrf.mxu0  ;;  %v13060_v37 = vpop.f32.mrf.mxu1  ;;  %7660 = vmatmul.mubr.msk.f32.gmra.mxu1 %vm2194_vm1, %v12472_v45  ;;  %5025 = vmatmul.mubr.f32.gmra.mxu0 %v4391_v52 }
 0x42f   :  { %16471 = vst [vmem:[#allocation523_spill] sm:$0xff] %v13058_v24  ;;  %16472 = vst [vmem:[#allocation103_spill] sm:$0xff] %v13060_v37  ;;  %5029 = vmatprep.mubr.f32.mxu0 %v4400_v46  ;;  %4152 = vmatprep.mubr.f32.mxu1 %v15563_v39  ;;  %v16478_v37 = vld [vmem:[#allocation541_spill] sm:$0xff]  ;;  %v4789_v46 = vld [vmem:[%s15539_s4 + $0x2f0] sm:$0xff] }
 0x430   :  { %v13070_v34 = vpop.f32.mrf.mxu0  ;;  %v13072_v49 = vpop.f32.mrf.mxu1  ;;  %v4408_v45 = vmul.f32 %v16478_v37, %v16477_v63  ;;  %5634 = vmatprep.subr.mxu0 %v15563_v39  ;;  %v16485_v63 = vld [vmem:[#allocation2_spill] sm:$0xff] }
 0x431   :  { %16475 = vst [vmem:[#allocation529_spill] sm:$0xff] %v13070_v34  ;;  %16476 = vst [vmem:[#allocation101_spill] sm:$0xff] %v13072_v49  ;;  %v4407_v49 = vmul.f32 %v16482_v35, %v16481_v36  ;;  %5635 = vmatpush2.msra.mxu0 %v4789_v46  ;;  %v16489_v36 = vld [vmem:[#allocation117_spill] sm:$0xff]  ;;  %v16490_v35 = vld [vmem:[#allocation543_spill] sm:$0xff] }
 0x432   :  { %v13077_v52 = vpop.f32.mrf.mxu0  ;;  %v13079_v24 = vpop.f32.mrf.mxu1  ;;  %7661 = vmatmul.mubr.msk.f32.gmra.mxu1 %vm2194_vm1, %v12495_v53  ;;  %5030 = vmatmul.mubr.f32.gmra.mxu0 %v4399_v50  ;;  %v16525_v34 = vld [vmem:[#allocation561_spill] sm:$0xff] }
 0x433   :  { %16479 = vst [vmem:[#allocation527_spill] sm:$0xff] %v13077_v52  ;;  %16480 = vst [vmem:[#allocation107_spill] sm:$0xff] %v13079_v24  ;;  %5034 = vmatprep.mubr.f32.mxu0 %v4408_v45  ;;  %4158 = vmatprep.mubr.f32.mxu1 %v15563_v39  ;;  %v16486_v24 = vld [vmem:[#allocation545_spill] sm:$0xff]  ;;  %v4788_v45 = vld [vmem:[%s15539_s4 + $0x2e8] sm:$0xff] }
 0x434   :  { %v13089_v37 = vpop.f32.mrf.mxu0  ;;  %v13091_v55 = vpop.f32.mrf.mxu1  ;;  %v4416_v53 = vmul.f32 %v16486_v24, %v16485_v63  ;;  %5636 = vmatprep.subr.mxu0 %v15563_v39  ;;  %v16493_v63 = vld [vmem:[#allocation3_spill] sm:$0xff] }
 0x435   :  { %16483 = vst [vmem:[#allocation533_spill] sm:$0xff] %v13089_v37  ;;  %16484 = vst [vmem:[#allocation105_spill] sm:$0xff] %v13091_v55  ;;  %v4415_v55 = vmul.f32 %v16490_v35, %v16489_v36  ;;  %5637 = vmatpush2.msra.mxu0 %v4788_v45  ;;  %v16497_v36 = vld [vmem:[#allocation119_spill] sm:$0xff] }
 0x436   :  { %v13096_v50 = vpop.f32.mrf.mxu0  ;;  %v13098_v52 = vpop.f32.mrf.mxu1  ;;  %7662 = vmatmul.mubr.msk.f32.gmra.mxu1 %vm2194_vm1, %v12518_v32  ;;  %5035 = vmatmul.mubr.f32.gmra.mxu0 %v4407_v49  ;;  %v16498_v35 = vld [vmem:[#allocation547_spill] sm:$0xff] }
 0x437   :  { %16487 = vst [vmem:[#allocation531_spill] sm:$0xff] %v13096_v50  ;;  %16488 = vst [vmem:[#allocation111_spill] sm:$0xff] %v13098_v52  ;;  %5039 = vmatprep.mubr.f32.mxu0 %v4416_v53  ;;  %4164 = vmatprep.mubr.f32.mxu1 %v15563_v39  ;;  %v16494_v52 = vld [vmem:[#allocation549_spill] sm:$0xff]  ;;  %v4787_v53 = vld [vmem:[%s15539_s4 + $0x2e0] sm:$0xff] }
 0x438   :  { %v13108_v24 = vpop.f32.mrf.mxu0  ;;  %v13110_v46 = vpop.f32.mrf.mxu1  ;;  %v4424_v32 = vmul.f32 %v16494_v52, %v16493_v63  ;;  %5638 = vmatprep.subr.mxu0 %v15563_v39  ;;  %v16501_v63 = vld [vmem:[#allocation4_spill] sm:$0xff] }
 0x439   :  { %16491 = vst [vmem:[#allocation537_spill] sm:$0xff] %v13108_v24  ;;  %16492 = vst [vmem:[#allocation109_spill] sm:$0xff] %v13110_v46  ;;  %v4423_v46 = vmul.f32 %v16498_v35, %v16497_v36  ;;  %5639 = vmatpush2.msra.mxu0 %v4787_v53  ;;  %v4786_v36 = vld [vmem:[%s15539_s4 + $0x2d8] sm:$0xff] }
 0x43a   :  { %v13115_v49 = vpop.f32.mrf.mxu0  ;;  %v13117_v50 = vpop.f32.mrf.mxu1  ;;  %7663 = vmatmul.mubr.msk.f32.gmra.mxu1 %vm2194_vm1, %v12541_v48  ;;  %5040 = vmatmul.mubr.f32.gmra.mxu0 %v4415_v55  ;;  %v16506_v35 = vld [vmem:[#allocation121_spill] sm:$0xff] }
 0x43b   :  { %16495 = vst [vmem:[#allocation535_spill] sm:$0xff] %v13115_v49  ;;  %16496 = vst [vmem:[#allocation115_spill] sm:$0xff] %v13117_v50  ;;  %5044 = vmatprep.mubr.f32.mxu0 %v4424_v32  ;;  %4170 = vmatprep.mubr.f32.mxu1 %v15563_v39  ;;  %v16502_v50 = vld [vmem:[#allocation553_spill] sm:$0xff]  ;;  %v16505_v32 = vld [vmem:[#allocation740_spill] sm:$0xff] }
 0x43c   :  { %v13127_v52 = vpop.f32.mrf.mxu0  ;;  %v13129_v45 = vpop.f32.mrf.mxu1  ;;  %v4432_v48 = vmul.f32 %v16502_v50, %v16501_v63  ;;  %5640 = vmatprep.subr.mxu0 %v15563_v39  ;;  %v16510_v63 = vld [vmem:[#allocation8_spill] sm:$0xff] }
 0x43d   :  { %16499 = vst [vmem:[#allocation541_spill] sm:$0xff] %v13127_v52  ;;  %16500 = vst [vmem:[#allocation113_spill] sm:$0xff] %v13129_v45  ;;  %v16507_v45 = vld [vmem:[#allocation551_spill] sm:$0xff]  ;;  %5641 = vmatpush2.msra.mxu0 %v4786_v36 }
 0x43e   :  { %v13134_v55 = vpop.f32.mrf.mxu0  ;;  %v13136_v49 = vpop.f32.mrf.mxu1  ;;  %7664 = vmatmul.mubr.msk.f32.gmra.mxu1 %vm2194_vm1, %v16505_v32  ;;  %5045 = vmatmul.mubr.f32.gmra.mxu0 %v4423_v46  ;;  %v4431_v52 = vmul.f32 %v16507_v45, %v16506_v35  ;;  %v16512_v46 = vld [vmem:[#allocation68_spill] sm:$0xff]  ;;  %v16516_v35 = vld [vmem:[#allocation123_spill] sm:$0xff] }
 0x43f   :  { %16503 = vst [vmem:[#allocation539_spill] sm:$0xff] %v13134_v55  ;;  %16504 = vst [vmem:[#allocation2_spill] sm:$0xff] %v13136_v49  ;;  %5049 = vmatprep.mubr.f32.mxu0 %v4432_v48  ;;  %4176 = vmatprep.mubr.f32.mxu1 %v15563_v39  ;;  %v16511_v49 = vld [vmem:[#allocation556_spill] sm:$0xff]  ;;  %v16513_v55 = vld [vmem:[#allocation557_spill] sm:$0xff] }
 0x440   :  { %v13146_v50 = vpop.f32.mrf.mxu0  ;;  %v13148_v53 = vpop.f32.mrf.mxu1  ;;  %v4440_v32 = vmul.f32 %v16511_v49, %v16510_v63  ;;  %v4186_v24 = vmul.f32 %v16513_v55, %v16512_v46  ;;  %v4785_v45 = vld [vmem:[%s15539_s4 + $0x2d0] sm:$0xff]  ;;  %v16517_v49 = vld [vmem:[#allocation554_spill] sm:$0xff]  ;;  %v16519_v55 = vld [vmem:[#allocation555_spill] sm:$0xff]  ;;  %5642 = vmatprep.subr.mxu0 %v15563_v39 }
 0x441   :  { %16508 = vst [vmem:[#allocation545_spill] sm:$0xff] %v13146_v50  ;;  %16509 = vst [vmem:[#allocation117_spill] sm:$0xff] %v13148_v53  ;;  %v4439_v63 = vmul.f32 %v16517_v49, %v16516_v35  ;;  %v16518_v53 = vld [vmem:[#allocation66_spill] sm:$0xff]  ;;  %v16524_v50 = vld [vmem:[#allocation72_spill] sm:$0xff]  ;;  %5643 = vmatpush2.msra.mxu0 %v4785_v45 }
 0x442   :  { %v13155_v37 = vpop.f32.mrf.mxu0  ;;  %v13157_v48 = vpop.f32.mrf.mxu1  ;;  %7665 = vmatmul.mubr.msk.f32.gmra.mxu1 %vm2194_vm1, %v12589_v44  ;;  %5050 = vmatmul.mubr.f32.gmra.mxu0 %v4431_v52  ;;  %v4185_v36 = vmul.f32 %v16519_v55, %v16518_v53  ;;  %v16522_v44 = vld [vmem:[#allocation128_spill] sm:$0xff]  ;;  %v4194_v60 = vmul.f32 %v16525_v34, %v16524_v50  ;;  %v4784_v35 = vld [vmem:[%s15539_s4 + $0x2c8] sm:$0xff]  ;;  %v16528_v49 = vld [vmem:[#allocation126_spill] sm:$0xff] }
 0x443   :  { %16514 = vst [vmem:[#allocation543_spill] sm:$0xff] %v13155_v37  ;;  %16515 = vst [vmem:[#allocation3_spill] sm:$0xff] %v13157_v48  ;;  %5054 = vmatprep.mubr.f32.mxu0 %v4440_v32  ;;  %5279 = vmatprep.mubr.f32.mxu1 %v4186_v24  ;;  %v16523_v52 = vld [vmem:[#allocation560_spill] sm:$0xff]  ;;  %v4806_v24 = vld [vmem:[%s15539_s4 + $0x378] sm:$0xff] }
 0x444   :  { %v13168_v46 = vpop.f32.mrf.mxu0  ;;  %v13170_v37 = vpop.f32.mrf.mxu1  ;;  %v4448_v48 = vmul.f32 %v16523_v52, %v16522_v44  ;;  %v16529_v55 = vld [vmem:[#allocation558_spill] sm:$0xff]  ;;  %v16531_v44 = vld [vmem:[#allocation559_spill] sm:$0xff]  ;;  %5644 = vmatprep.subr.mxu0 %v15563_v39 }
 0x445   :  { %16520 = vst [vmem:[#allocation549_spill] sm:$0xff] %v13168_v46  ;;  %16521 = vst [vmem:[#allocation119_spill] sm:$0xff] %v13170_v37  ;;  %v4447_v34 = vmul.f32 %v16529_v55, %v16528_v49  ;;  %v16530_v50 = vld [vmem:[#allocation70_spill] sm:$0xff]  ;;  %v16536_v37 = vld [vmem:[#allocation76_spill] sm:$0xff]  ;;  %5645 = vmatpush2.msra.mxu0 %v4784_v35 }
 0x446   :  { %v13180_v32 = vpop.f32.mrf.mxu0  ;;  %v13182_v53 = vpop.f32.mrf.mxu1  ;;  %5055 = vmatmul.mubr.f32.gmra.mxu0 %v4439_v63  ;;  %5280 = vmatmul.mubr.f32.vlgmr.msra.gmra.mxu1 %v4185_v36  ;;  %v4193_v52 = vmul.f32 %v16531_v44, %v16530_v50  ;;  %v16534_v63 = vld [vmem:[#allocation132_spill] sm:$0xff]  ;;  %v16537_v46 = vld [vmem:[#allocation565_spill] sm:$0xff]  ;;  %v4783_v55 = vld [vmem:[%s15539_s4 + $0x2c0] sm:$0xff] }
 0x447   :  { %16526 = vst [vmem:[#allocation547_spill] sm:$0xff] %v13180_v32  ;;  %16527 = vst [vmem:[#allocation4_spill] sm:$0xff] %v13182_v53  ;;  %5059 = vmatprep.mubr.f32.mxu0 %v4448_v48  ;;  %5284 = vmatprep.mubr.f32.mxu1 %v4194_v60  ;;  %v16535_v36 = vld [vmem:[#allocation564_spill] sm:$0xff]  ;;  %v4202_v48 = vmul.f32 %v16537_v46, %v16536_v37  ;;  %v16540_v37 = vld [vmem:[#allocation130_spill] sm:$0xff] }
 0x448   :  { %5986 = vmatpush1.msra.mxu1 %v4806_v24  ;;  %v13191_v45 = vpop.f32.mrf.mxu0  ;;  %v13193_v32 = vpop.f32.mrf.mxu1  ;;  %v4456_v53 = vmul.f32 %v16535_v36, %v16534_v63  ;;  %v4805_v60 = vld [vmem:[%s15539_s4 + $0x370] sm:$0xff]  ;;  %v16541_v46 = vld [vmem:[#allocation562_spill] sm:$0xff]  ;;  %v16543_v63 = vld [vmem:[#allocation563_spill] sm:$0xff]  ;;  %5646 = vmatprep.subr.mxu0 %v15563_v39 }
 0x449   :  { %16532 = vst [vmem:[#allocation553_spill] sm:$0xff] %v13191_v45  ;;  %16533 = vst [vmem:[#allocation740_spill] sm:$0xff] %v13193_v32  ;;  %5987 = vmatprep.subr.mxu1 %v15563_v39  ;;  %v4455_v50 = vmul.f32 %v16541_v46, %v16540_v37  ;;  %v16542_v44 = vld [vmem:[#allocation74_spill] sm:$0xff]  ;;  %v16549_v45 = vld [vmem:[#allocation569_spill] sm:$0xff]  ;;  %5647 = vmatpush2.msra.mxu0 %v4783_v55 }
 0x44a   :  { %v13204_v24 = vpop.f32.mrf.mxu0  ;;  %v13206_v49 = vpop.f32.mrf.mxu1  ;;  %5060 = vmatmul.mubr.f32.gmra.mxu0 %v4447_v34  ;;  %5285 = vmatmul.mubr.f32.gmra.mxu1 %v4193_v52  ;;  %v4201_v36 = vmul.f32 %v16543_v63, %v16542_v44  ;;  %v16546_v34 = vld [vmem:[#allocation136_spill] sm:$0xff]  ;;  %v16554_v63 = vld [vmem:[#allocation78_spill] sm:$0xff] }
 0x44b   :  { %16538 = vst [vmem:[#allocation121_spill] sm:$0xff] %v13204_v24  ;;  %16539 = vst [vmem:[#allocation551_spill] sm:$0xff] %v13206_v49  ;;  %5064 = vmatprep.mubr.f32.mxu0 %v4456_v53  ;;  %5289 = vmatprep.mubr.f32.mxu1 %v4202_v48  ;;  %v16547_v52 = vld [vmem:[#allocation568_spill] sm:$0xff]  ;;  %v4804_v48 = vld [vmem:[%s15539_s4 + $0x368] sm:$0xff] }
 0x44c   :  { %v13215_v32 = vpop.f32.mrf.mxu0  ;;  %v13217_v35 = vpop.f32.mrf.mxu1  ;;  %5988 = vmatpush1.msra.mxu1 %v4805_v60  ;;  %v4464_v49 = vmul.f32 %v16547_v52, %v16546_v34  ;;  %v16548_v24 = vld [vmem:[#allocation80_spill] sm:$0xff]  ;;  %v4782_v60 = vld [vmem:[%s15539_s4 + $0x2b8] sm:$0xff]  ;;  %v16555_v34 = vld [vmem:[#allocation567_spill] sm:$0xff]  ;;  %5648 = vmatprep.subr.mxu0 %v15563_v39 }
 0x44d   :  { %16544 = vst [vmem:[#allocation8_spill] sm:$0xff] %v13215_v32  ;;  %16545 = vst [vmem:[#allocation556_spill] sm:$0xff] %v13217_v35  ;;  %v4210_v53 = vmul.f32 %v16549_v45, %v16548_v24  ;;  %5989 = vmatprep.subr.mxu1 %v15563_v39  ;;  %v16552_v45 = vld [vmem:[#allocation134_spill] sm:$0xff]  ;;  %v4209_v52 = vmul.f32 %v16555_v34, %v16554_v63  ;;  %v16561_v32 = vld [vmem:[#allocation573_spill] sm:$0xff]  ;;  %5649 = vmatpush2.msra.mxu0 %v4782_v60 }
 0x44e   :  { %v13228_v37 = vpop.f32.mrf.mxu0  ;;  %v13230_v46 = vpop.f32.mrf.mxu1  ;;  %5065 = vmatmul.mubr.f32.gmra.mxu0 %v4455_v50  ;;  %5290 = vmatmul.mubr.f32.gmra.mxu1 %v4201_v36  ;;  %v16553_v24 = vld [vmem:[#allocation566_spill] sm:$0xff]  ;;  %v16558_v50 = vld [vmem:[#allocation140_spill] sm:$0xff] }
 0x44f   :  { %16550 = vst [vmem:[#allocation68_spill] sm:$0xff] %v13228_v37  ;;  %16551 = vst [vmem:[#allocation557_spill] sm:$0xff] %v13230_v46  ;;  %5069 = vmatprep.mubr.f32.mxu0 %v4464_v49  ;;  %5294 = vmatprep.mubr.f32.mxu1 %v4210_v53  ;;  %v4463_v44 = vmul.f32 %v16553_v24, %v16552_v45  ;;  %v16559_v36 = vld [vmem:[#allocation572_spill] sm:$0xff]  ;;  %v4803_v53 = vld [vmem:[%s15539_s4 + $0x360] sm:$0xff] }
 0x450   :  { %v13239_v35 = vpop.f32.mrf.mxu0  ;;  %v13241_v55 = vpop.f32.mrf.mxu1  ;;  %5990 = vmatpush1.msra.mxu1 %v4804_v48  ;;  %v4472_v46 = vmul.f32 %v16559_v36, %v16558_v50  ;;  %v16560_v37 = vld [vmem:[#allocation84_spill] sm:$0xff]  ;;  %v16566_v34 = vld [vmem:[#allocation82_spill] sm:$0xff]  ;;  %v16567_v50 = vld [vmem:[#allocation571_spill] sm:$0xff]  ;;  %5650 = vmatprep.subr.mxu0 %v15563_v39 }
 0x451   :  { %16556 = vst [vmem:[#allocation123_spill] sm:$0xff] %v13239_v35  ;;  %16557 = vst [vmem:[#allocation554_spill] sm:$0xff] %v13241_v55  ;;  %v4218_v49 = vmul.f32 %v16561_v32, %v16560_v37  ;;  %5991 = vmatprep.subr.mxu1 %v15563_v39  ;;  %v4781_v48 = vld [vmem:[%s15539_s4 + $0x2b0] sm:$0xff]  ;;  %v16564_v32 = vld [vmem:[#allocation138_spill] sm:$0xff]  ;;  %v4217_v36 = vmul.f32 %v16567_v50, %v16566_v34 }
 0x452   :  { %v13252_v45 = vpop.f32.mrf.mxu0  ;;  %v13254_v24 = vpop.f32.mrf.mxu1  ;;  %5070 = vmatmul.mubr.f32.gmra.mxu0 %v4463_v44  ;;  %5295 = vmatmul.mubr.f32.gmra.mxu1 %v4209_v52  ;;  %v16565_v37 = vld [vmem:[#allocation570_spill] sm:$0xff]  ;;  %v16570_v44 = vld [vmem:[#allocation144_spill] sm:$0xff]  ;;  %v16573_v35 = vld [vmem:[#allocation577_spill] sm:$0xff] }
 0x453   :  { %16562 = vst [vmem:[#allocation66_spill] sm:$0xff] %v13252_v45  ;;  %16563 = vst [vmem:[#allocation555_spill] sm:$0xff] %v13254_v24  ;;  %5074 = vmatprep.mubr.f32.mxu0 %v4472_v46  ;;  %5299 = vmatprep.mubr.f32.mxu1 %v4218_v49  ;;  %v4471_v63 = vmul.f32 %v16565_v37, %v16564_v32  ;;  %v16571_v52 = vld [vmem:[#allocation576_spill] sm:$0xff]  ;;  %v4802_v49 = vld [vmem:[%s15539_s4 + $0x358] sm:$0xff] }
 0x454   :  { %v13263_v55 = vpop.f32.mrf.mxu0  ;;  %v13265_v60 = vpop.f32.mrf.mxu1  ;;  %5992 = vmatpush1.msra.mxu1 %v4803_v53  ;;  %v4480_v24 = vmul.f32 %v16571_v52, %v16570_v44  ;;  %v16572_v45 = vld [vmem:[#allocation88_spill] sm:$0xff]  ;;  %5651 = vmatpush2.msra.mxu0 %v4781_v48  ;;  %v4780_v53 = vld [vmem:[%s15539_s4 + $0x2a8] sm:$0xff]  ;;  %v16578_v50 = vld [vmem:[#allocation86_spill] sm:$0xff] }
 0x455   :  { %16568 = vst [vmem:[#allocation128_spill] sm:$0xff] %v13263_v55  ;;  %16569 = vst [vmem:[#allocation560_spill] sm:$0xff] %v13265_v60  ;;  %v4226_v46 = vmul.f32 %v16573_v35, %v16572_v45  ;;  %5993 = vmatprep.subr.mxu1 %v15563_v39  ;;  %v16576_v35 = vld [vmem:[#allocation142_spill] sm:$0xff]  ;;  %v16579_v44 = vld [vmem:[#allocation575_spill] sm:$0xff]  ;;  %5652 = vmatprep.subr.mxu0 %v15563_v39 }
 0x456   :  { %v13276_v32 = vpop.f32.mrf.mxu0  ;;  %v13278_v37 = vpop.f32.mrf.mxu1  ;;  %5075 = vmatmul.mubr.f32.gmra.mxu0 %v4471_v63  ;;  %5300 = vmatmul.mubr.f32.gmra.mxu1 %v4217_v36  ;;  %v16577_v45 = vld [vmem:[#allocation574_spill] sm:$0xff]  ;;  %v4225_v52 = vmul.f32 %v16579_v44, %v16578_v50  ;;  %v16582_v63 = vld [vmem:[#allocation148_spill] sm:$0xff]  ;;  %v16585_v55 = vld [vmem:[#allocation581_spill] sm:$0xff] }
 0x457   :  { %16574 = vst [vmem:[#allocation72_spill] sm:$0xff] %v13276_v32  ;;  %16575 = vst [vmem:[#allocation561_spill] sm:$0xff] %v13278_v37  ;;  %5079 = vmatprep.mubr.f32.mxu0 %v4480_v24  ;;  %5304 = vmatprep.mubr.f32.mxu1 %v4226_v46  ;;  %v4479_v34 = vmul.f32 %v16577_v45, %v16576_v35  ;;  %v16583_v36 = vld [vmem:[#allocation580_spill] sm:$0xff]  ;;  %v16590_v44 = vld [vmem:[#allocation90_spill] sm:$0xff] }
 0x458   :  { %v13287_v60 = vpop.f32.mrf.mxu0  ;;  %v13289_v48 = vpop.f32.mrf.mxu1  ;;  %5994 = vmatpush1.msra.mxu1 %v4802_v49  ;;  %v4488_v37 = vmul.f32 %v16583_v36, %v16582_v63  ;;  %v16584_v32 = vld [vmem:[#allocation92_spill] sm:$0xff]  ;;  %5653 = vmatpush2.msra.mxu0 %v4780_v53  ;;  %v4779_v49 = vld [vmem:[%s15539_s4 + $0x2a0] sm:$0xff]  ;;  %v16591_v63 = vld [vmem:[#allocation579_spill] sm:$0xff] }
 0x459   :  { %16580 = vst [vmem:[#allocation126_spill] sm:$0xff] %v13287_v60  ;;  %16581 = vst [vmem:[#allocation558_spill] sm:$0xff] %v13289_v48  ;;  %v4234_v24 = vmul.f32 %v16585_v55, %v16584_v32  ;;  %5995 = vmatprep.subr.mxu1 %v15563_v39  ;;  %v4801_v46 = vld [vmem:[%s15539_s4 + $0x350] sm:$0xff]  ;;  %v16588_v55 = vld [vmem:[#allocation146_spill] sm:$0xff]  ;;  %v4233_v36 = vmul.f32 %v16591_v63, %v16590_v44  ;;  %5654 = vmatprep.subr.mxu0 %v15563_v39 }
 0x45a   :  { %v13300_v35 = vpop.f32.mrf.mxu0  ;;  %v13302_v45 = vpop.f32.mrf.mxu1  ;;  %5080 = vmatmul.mubr.f32.gmra.mxu0 %v4479_v34  ;;  %5305 = vmatmul.mubr.f32.gmra.mxu1 %v4225_v52  ;;  %v16589_v32 = vld [vmem:[#allocation578_spill] sm:$0xff]  ;;  %v16594_v34 = vld [vmem:[#allocation152_spill] sm:$0xff]  ;;  %v16597_v60 = vld [vmem:[#allocation585_spill] sm:$0xff] }
 0x45b   :  { %16586 = vst [vmem:[#allocation70_spill] sm:$0xff] %v13300_v35  ;;  %16587 = vst [vmem:[#allocation559_spill] sm:$0xff] %v13302_v45  ;;  %5084 = vmatprep.mubr.f32.mxu0 %v4488_v37  ;;  %5309 = vmatprep.mubr.f32.mxu1 %v4234_v24  ;;  %v4487_v50 = vmul.f32 %v16589_v32, %v16588_v55  ;;  %v16595_v52 = vld [vmem:[#allocation584_spill] sm:$0xff]  ;;  %v4800_v24 = vld [vmem:[%s15539_s4 + $0x348] sm:$0xff] }
 0x45c   :  { %v13311_v48 = vpop.f32.mrf.mxu0  ;;  %v13313_v53 = vpop.f32.mrf.mxu1  ;;  %5996 = vmatpush1.msra.mxu1 %v4801_v46  ;;  %v4496_v45 = vmul.f32 %v16595_v52, %v16594_v34  ;;  %v16596_v35 = vld [vmem:[#allocation96_spill] sm:$0xff]  ;;  %5655 = vmatpush2.msra.mxu0 %v4779_v49  ;;  %v4778_v46 = vld [vmem:[%s15539_s4 + $0x298] sm:$0xff]  ;;  %v16602_v63 = vld [vmem:[#allocation94_spill] sm:$0xff] }
 0x45d   :  { %16592 = vst [vmem:[#allocation132_spill] sm:$0xff] %v13311_v48  ;;  %16593 = vst [vmem:[#allocation564_spill] sm:$0xff] %v13313_v53  ;;  %v4242_v37 = vmul.f32 %v16597_v60, %v16596_v35  ;;  %5997 = vmatprep.subr.mxu1 %v15563_v39  ;;  %v16600_v60 = vld [vmem:[#allocation150_spill] sm:$0xff]  ;;  %v16603_v34 = vld [vmem:[#allocation583_spill] sm:$0xff]  ;;  %5656 = vmatprep.subr.mxu0 %v15563_v39 }
 0x45e   :  { %v13324_v55 = vpop.f32.mrf.mxu0  ;;  %v13326_v32 = vpop.f32.mrf.mxu1  ;;  %5085 = vmatmul.mubr.f32.gmra.mxu0 %v4487_v50  ;;  %5310 = vmatmul.mubr.f32.gmra.mxu1 %v4233_v36  ;;  %v16601_v35 = vld [vmem:[#allocation582_spill] sm:$0xff]  ;;  %v4241_v52 = vmul.f32 %v16603_v34, %v16602_v63  ;;  %v16606_v50 = vld [vmem:[#allocation156_spill] sm:$0xff]  ;;  %v16609_v48 = vld [vmem:[#allocation589_spill] sm:$0xff] }
 0x45f   :  { %16598 = vst [vmem:[#allocation76_spill] sm:$0xff] %v13324_v55  ;;  %16599 = vst [vmem:[#allocation565_spill] sm:$0xff] %v13326_v32  ;;  %5089 = vmatprep.mubr.f32.mxu0 %v4496_v45  ;;  %5314 = vmatprep.mubr.f32.mxu1 %v4242_v37  ;;  %v4495_v44 = vmul.f32 %v16601_v35, %v16600_v60  ;;  %v16607_v36 = vld [vmem:[#allocation588_spill] sm:$0xff]  ;;  %v4799_v37 = vld [vmem:[%s15539_s4 + $0x340] sm:$0xff] }
 0x460   :  { %v13335_v53 = vpop.f32.mrf.mxu0  ;;  %v13337_v49 = vpop.f32.mrf.mxu1  ;;  %5998 = vmatpush1.msra.mxu1 %v4800_v24  ;;  %v4504_v32 = vmul.f32 %v16607_v36, %v16606_v50  ;;  %v16608_v55 = vld [vmem:[#allocation100_spill] sm:$0xff]  ;;  %5657 = vmatpush2.msra.mxu0 %v4778_v46  ;;  %v16614_v34 = vld [vmem:[#allocation98_spill] sm:$0xff]  ;;  %v16615_v50 = vld [vmem:[#allocation587_spill] sm:$0xff] }
 0x461   :  { %16604 = vst [vmem:[#allocation130_spill] sm:$0xff] %v13335_v53  ;;  %16605 = vst [vmem:[#allocation562_spill] sm:$0xff] %v13337_v49  ;;  %v4250_v45 = vmul.f32 %v16609_v48, %v16608_v55  ;;  %5999 = vmatprep.subr.mxu1 %v15563_v39  ;;  %v4777_v24 = vld [vmem:[%s15539_s4 + $0x290] sm:$0xff]  ;;  %v16612_v48 = vld [vmem:[#allocation154_spill] sm:$0xff]  ;;  %v4249_v36 = vmul.f32 %v16615_v50, %v16614_v34  ;;  %5658 = vmatprep.subr.mxu0 %v15563_v39 }
 0x462   :  { %v13348_v60 = vpop.f32.mrf.mxu0  ;;  %v13350_v35 = vpop.f32.mrf.mxu1  ;;  %5090 = vmatmul.mubr.f32.gmra.mxu0 %v4495_v44  ;;  %5315 = vmatmul.mubr.f32.gmra.mxu1 %v4241_v52  ;;  %v16613_v55 = vld [vmem:[#allocation586_spill] sm:$0xff]  ;;  %v16618_v44 = vld [vmem:[#allocation160_spill] sm:$0xff]  ;;  %v16621_v53 = vld [vmem:[#allocation593_spill] sm:$0xff] }
 0x463   :  { %16610 = vst [vmem:[#allocation74_spill] sm:$0xff] %v13348_v60  ;;  %16611 = vst [vmem:[#allocation563_spill] sm:$0xff] %v13350_v35  ;;  %5094 = vmatprep.mubr.f32.mxu0 %v4504_v32  ;;  %5319 = vmatprep.mubr.f32.mxu1 %v4250_v45  ;;  %v4503_v63 = vmul.f32 %v16613_v55, %v16612_v48  ;;  %v16619_v52 = vld [vmem:[#allocation592_spill] sm:$0xff]  ;;  %v4798_v45 = vld [vmem:[%s15539_s4 + $0x338] sm:$0xff] }
 0x464   :  { %v13359_v49 = vpop.f32.mrf.mxu0  ;;  %v13361_v46 = vpop.f32.mrf.mxu1  ;;  %6000 = vmatpush1.msra.mxu1 %v4799_v37  ;;  %v4512_v35 = vmul.f32 %v16619_v52, %v16618_v44  ;;  %v16620_v60 = vld [vmem:[#allocation104_spill] sm:$0xff]  ;;  %5659 = vmatpush2.msra.mxu0 %v4777_v24  ;;  %v4776_v37 = vld [vmem:[%s15539_s4 + $0x288] sm:$0xff]  ;;  %v16626_v50 = vld [vmem:[#allocation102_spill] sm:$0xff] }
 0x465   :  { %16616 = vst [vmem:[#allocation136_spill] sm:$0xff] %v13359_v49  ;;  %16617 = vst [vmem:[#allocation568_spill] sm:$0xff] %v13361_v46  ;;  %v4258_v32 = vmul.f32 %v16621_v53, %v16620_v60  ;;  %6001 = vmatprep.subr.mxu1 %v15563_v39  ;;  %v16624_v53 = vld [vmem:[#allocation158_spill] sm:$0xff]  ;;  %v16627_v44 = vld [vmem:[#allocation591_spill] sm:$0xff]  ;;  %5660 = vmatprep.subr.mxu0 %v15563_v39 }
 0x466   :  { %v13372_v48 = vpop.f32.mrf.mxu0  ;;  %v13374_v55 = vpop.f32.mrf.mxu1  ;;  %5095 = vmatmul.mubr.f32.gmra.mxu0 %v4503_v63  ;;  %5320 = vmatmul.mubr.f32.gmra.mxu1 %v4249_v36  ;;  %v16625_v60 = vld [vmem:[#allocation590_spill] sm:$0xff]  ;;  %v4257_v52 = vmul.f32 %v16627_v44, %v16626_v50  ;;  %v16630_v63 = vld [vmem:[#allocation164_spill] sm:$0xff]  ;;  %v16633_v49 = vld [vmem:[#allocation597_spill] sm:$0xff] }
 0x467   :  { %16622 = vst [vmem:[#allocation80_spill] sm:$0xff] %v13372_v48  ;;  %16623 = vst [vmem:[#allocation569_spill] sm:$0xff] %v13374_v55  ;;  %5099 = vmatprep.mubr.f32.mxu0 %v4512_v35  ;;  %5324 = vmatprep.mubr.f32.mxu1 %v4258_v32  ;;  %v4511_v34 = vmul.f32 %v16625_v60, %v16624_v53  ;;  %v16631_v36 = vld [vmem:[#allocation596_spill] sm:$0xff]  ;;  %v16638_v44 = vld [vmem:[#allocation106_spill] sm:$0xff] }
 0x468   :  { %v13383_v46 = vpop.f32.mrf.mxu0  ;;  %v13385_v24 = vpop.f32.mrf.mxu1  ;;  %6002 = vmatpush1.msra.mxu1 %v4798_v45  ;;  %v4520_v55 = vmul.f32 %v16631_v36, %v16630_v63  ;;  %v16632_v48 = vld [vmem:[#allocation108_spill] sm:$0xff]  ;;  %5661 = vmatpush2.msra.mxu0 %v4776_v37  ;;  %v4775_v45 = vld [vmem:[%s15539_s4 + $0x280] sm:$0xff]  ;;  %v16639_v63 = vld [vmem:[#allocation595_spill] sm:$0xff] }
 0x469   :  { %16628 = vst [vmem:[#allocation134_spill] sm:$0xff] %v13383_v46  ;;  %16629 = vst [vmem:[#allocation566_spill] sm:$0xff] %v13385_v24  ;;  %v4266_v35 = vmul.f32 %v16633_v49, %v16632_v48  ;;  %6003 = vmatprep.subr.mxu1 %v15563_v39  ;;  %v4797_v32 = vld [vmem:[%s15539_s4 + $0x330] sm:$0xff]  ;;  %v16636_v49 = vld [vmem:[#allocation162_spill] sm:$0xff]  ;;  %v4265_v36 = vmul.f32 %v16639_v63, %v16638_v44  ;;  %5662 = vmatprep.subr.mxu0 %v15563_v39 }
 0x46a   :  { %v13396_v53 = vpop.f32.mrf.mxu0  ;;  %v13398_v60 = vpop.f32.mrf.mxu1  ;;  %5100 = vmatmul.mubr.f32.gmra.mxu0 %v4511_v34  ;;  %5325 = vmatmul.mubr.f32.gmra.mxu1 %v4257_v52  ;;  %v16637_v48 = vld [vmem:[#allocation594_spill] sm:$0xff]  ;;  %v16642_v34 = vld [vmem:[#allocation168_spill] sm:$0xff]  ;;  %v16645_v46 = vld [vmem:[#allocation601_spill] sm:$0xff] }
 0x46b   :  { %16634 = vst [vmem:[#allocation78_spill] sm:$0xff] %v13396_v53  ;;  %16635 = vst [vmem:[#allocation567_spill] sm:$0xff] %v13398_v60  ;;  %5104 = vmatprep.mubr.f32.mxu0 %v4520_v55  ;;  %5329 = vmatprep.mubr.f32.mxu1 %v4266_v35  ;;  %v4519_v50 = vmul.f32 %v16637_v48, %v16636_v49  ;;  %v16643_v52 = vld [vmem:[#allocation600_spill] sm:$0xff]  ;;  %v4796_v35 = vld [vmem:[%s15539_s4 + $0x328] sm:$0xff] }
 0x46c   :  { %v13407_v24 = vpop.f32.mrf.mxu0  ;;  %v13409_v37 = vpop.f32.mrf.mxu1  ;;  %6004 = vmatpush1.msra.mxu1 %v4797_v32  ;;  %v4528_v60 = vmul.f32 %v16643_v52, %v16642_v34  ;;  %v16644_v53 = vld [vmem:[#allocation112_spill] sm:$0xff]  ;;  %5663 = vmatpush2.msra.mxu0 %v4775_v45  ;;  %v16648_v32 = vld [vmem:[#allocation166_spill] sm:$0xff] }
 0x46d   :  { %16640 = vst [vmem:[#allocation140_spill] sm:$0xff] %v13407_v24  ;;  %16641 = vst [vmem:[#allocation572_spill] sm:$0xff] %v13409_v37  ;;  %v4274_v55 = vmul.f32 %v16645_v46, %v16644_v53  ;;  %6005 = vmatprep.subr.mxu1 %v15563_v39  ;;  %v16649_v44 = vld [vmem:[#allocation598_spill] sm:$0xff]  ;;  %v16651_v46 = vld [vmem:[#allocation599_spill] sm:$0xff] }
 0x46e   :  { %v13420_v49 = vpop.f32.mrf.mxu0  ;;  %v13422_v48 = vpop.f32.mrf.mxu1  ;;  %5105 = vmatmul.mubr.f32.gmra.mxu0 %v4519_v50  ;;  %5330 = vmatmul.mubr.f32.gmra.mxu1 %v4265_v36  ;;  %v4527_v63 = vmul.f32 %v16649_v44, %v16648_v32  ;;  %v16650_v34 = vld [vmem:[#allocation110_spill] sm:$0xff]  ;;  %v16654_v45 = vld [vmem:[#allocation172_spill] sm:$0xff] }
 0x46f   :  { %16646 = vst [vmem:[#allocation84_spill] sm:$0xff] %v13420_v49  ;;  %16647 = vst [vmem:[#allocation573_spill] sm:$0xff] %v13422_v48  ;;  %5109 = vmatprep.mubr.f32.mxu0 %v4528_v60  ;;  %5334 = vmatprep.mubr.f32.mxu1 %v4274_v55  ;;  %v4273_v53 = vmul.f32 %v16651_v46, %v16650_v34  ;;  %v16655_v24 = vld [vmem:[#allocation604_spill] sm:$0xff]  ;;  %v16657_v48 = vld [vmem:[#allocation605_spill] sm:$0xff] }
 0x470   :  { %v13428_v52 = vpop.f32.mrf.mxu0  ;;  %v13430_v37 = vpop.f32.mrf.mxu1  ;;  %6006 = vmatpush1.msra.mxu1 %v4796_v35  ;;  %v4536_v49 = vmul.f32 %v16655_v24, %v16654_v45  ;;  %v4282_v50 = vmul.f32 %v16657_v48, %v16656_v25  ;;  %v4795_v60 = vld [vmem:[%s15539_s4 + $0x320] sm:$0xff]  ;;  %v16663_v34 = vld [vmem:[#allocation603_spill] sm:$0xff]  ;;  %v16666_v45 = vld [vmem:[#allocation176_spill] sm:$0xff] }
 0x471   :  { %16652 = vst [vmem:[#allocation138_spill] sm:$0xff] %v13428_v52  ;;  %16653 = vst [vmem:[#allocation570_spill] sm:$0xff] %v13430_v37  ;;  %6007 = vmatprep.subr.mxu1 %v15563_v39  ;;  %v16660_v35 = vld [vmem:[#allocation170_spill] sm:$0xff]  ;;  %v16667_v37 = vld [vmem:[#allocation608_spill] sm:$0xff] }
 0x472   :  { %v13440_v36 = vpop.f32.mrf.mxu0  ;;  %v13442_v55 = vpop.f32.mrf.mxu1  ;;  %5110 = vmatmul.mubr.f32.gmra.mxu0 %v4527_v63  ;;  %5335 = vmatmul.mubr.f32.gmra.mxu1 %v4273_v53  ;;  %v16661_v32 = vld [vmem:[#allocation602_spill] sm:$0xff]  ;;  %v16668_v52 = vld [vmem:[#allocation5_spill] sm:$0xff] }
 0x473   :  { %16658 = vst [vmem:[#allocation82_spill] sm:$0xff] %v13440_v36  ;;  %16659 = vst [vmem:[#allocation571_spill] sm:$0xff] %v13442_v55  ;;  %5114 = vmatprep.mubr.f32.mxu0 %v4536_v49  ;;  %5339 = vmatprep.mubr.f32.mxu1 %v4282_v50  ;;  %v4535_v24 = vmul.f32 %v16661_v32, %v16660_v35  ;;  %v16662_v44 = vld [vmem:[#allocation114_spill] sm:$0xff]  ;;  %v4544_v36 = vmul.f32 %v16667_v37, %v16666_v45  ;;  %v16669_v55 = vld [vmem:[#allocation609_spill] sm:$0xff] }
 0x474   :  { %v4281_v25 = vmul.f32 %v16663_v34, %v16662_v44  ;;  %v13448_v48 = vpop.f32.mrf.mxu0  ;;  %v13450_v46 = vpop.f32.mrf.mxu1  ;;  %6008 = vmatpush1.msra.mxu1 %v4795_v60  ;;  %v4290_v63 = vmul.f32 %v16669_v55, %v16668_v52  ;;  %v4794_v49 = vld [vmem:[%s15539_s4 + $0x318] sm:$0xff]  ;;  %v16672_v60 = vld [vmem:[#allocation174_spill] sm:$0xff]  ;;  %v16675_v44 = vld [vmem:[#allocation607_spill] sm:$0xff] }
 0x475   :  { %16664 = vst [vmem:[#allocation144_spill] sm:$0xff] %v13448_v48  ;;  %16665 = vst [vmem:[#allocation576_spill] sm:$0xff] %v13450_v46  ;;  %6009 = vmatprep.subr.mxu1 %v15563_v39  ;;  %v16673_v35 = vld [vmem:[#allocation606_spill] sm:$0xff]  ;;  %v16678_v45 = vld [vmem:[#allocation180_spill] sm:$0xff] }
 0x476   :  { %v13460_v53 = vpop.f32.mrf.mxu0  ;;  %v13462_v50 = vpop.f32.mrf.mxu1  ;;  %5115 = vmatmul.mubr.f32.gmra.mxu0 %v4535_v24  ;;  %5340 = vmatmul.mubr.f32.gmra.mxu1 %v4281_v25  ;;  %v4543_v37 = vmul.f32 %v16673_v35, %v16672_v60  ;;  %v16674_v32 = vld [vmem:[#allocation118_spill] sm:$0xff]  ;;  %v16679_v46 = vld [vmem:[#allocation612_spill] sm:$0xff] }
 0x477   :  { %16670 = vst [vmem:[#allocation88_spill] sm:$0xff] %v13460_v53  ;;  %16671 = vst [vmem:[#allocation577_spill] sm:$0xff] %v13462_v50  ;;  %5119 = vmatprep.mubr.f32.mxu0 %v4544_v36  ;;  %5344 = vmatprep.mubr.f32.mxu1 %v4290_v63  ;;  %v4289_v52 = vmul.f32 %v16675_v44, %v16674_v32  ;;  %v4552_v53 = vmul.f32 %v16679_v46, %v16678_v45  ;;  %v16680_v48 = vld [vmem:[#allocation6_spill] sm:$0xff]  ;;  %v16681_v50 = vld [vmem:[#allocation613_spill] sm:$0xff] }
 0x478   :  { %v13468_v55 = vpop.f32.mrf.mxu0  ;;  %v13470_v34 = vpop.f32.mrf.mxu1  ;;  %6010 = vmatpush1.msra.mxu1 %v4794_v49  ;;  %v4298_v24 = vmul.f32 %v16681_v50, %v16680_v48  ;;  %v4793_v36 = vld [vmem:[%s15539_s4 + $0x310] sm:$0xff]  ;;  %v16684_v49 = vld [vmem:[#allocation178_spill] sm:$0xff]  ;;  %v16687_v32 = vld [vmem:[#allocation611_spill] sm:$0xff] }
 0x479   :  { %16676 = vst [vmem:[#allocation142_spill] sm:$0xff] %v13468_v55  ;;  %16677 = vst [vmem:[#allocation574_spill] sm:$0xff] %v13470_v34  ;;  %6011 = vmatprep.subr.mxu1 %v15563_v39  ;;  %v16685_v60 = vld [vmem:[#allocation610_spill] sm:$0xff]  ;;  %v16686_v35 = vld [vmem:[#allocation120_spill] sm:$0xff] }
 0x47a   :  { %v13480_v25 = vpop.f32.mrf.mxu0  ;;  %v13482_v63 = vpop.f32.mrf.mxu1  ;;  %5120 = vmatmul.mubr.f32.gmra.mxu0 %v4543_v37  ;;  %5345 = vmatmul.mubr.f32.gmra.mxu1 %v4289_v52  ;;  %v4551_v46 = vmul.f32 %v16685_v60, %v16684_v49  ;;  %v4297_v48 = vmul.f32 %v16687_v32, %v16686_v35  ;;  %v16690_v45 = vld [vmem:[#allocation184_spill] sm:$0xff]  ;;  %v16692_v55 = vld [vmem:[#allocation7_spill] sm:$0xff]  ;;  %v16697_v49 = vld [vmem:[#allocation614_spill] sm:$0xff] }
 0x47b   :  { %16682 = vst [vmem:[#allocation86_spill] sm:$0xff] %v13480_v25  ;;  %16683 = vst [vmem:[#allocation575_spill] sm:$0xff] %v13482_v63  ;;  %5124 = vmatprep.mubr.f32.mxu0 %v4552_v53  ;;  %5349 = vmatprep.mubr.f32.mxu1 %v4298_v24  ;;  %v16691_v34 = vld [vmem:[#allocation616_spill] sm:$0xff]  ;;  %v16693_v63 = vld [vmem:[#allocation617_spill] sm:$0xff] }
 0x47c   :  { %v13488_v50 = vpop.f32.mrf.mxu0  ;;  %v13490_v44 = vpop.f32.mrf.mxu1  ;;  %6012 = vmatpush1.msra.mxu1 %v4793_v36  ;;  %v4560_v25 = vmul.f32 %v16691_v34, %v16690_v45  ;;  %v4306_v37 = vmul.f32 %v16693_v63, %v16692_v55  ;;  %v4792_v53 = vld [vmem:[%s15539_s4 + $0x308] sm:$0xff]  ;;  %v16696_v36 = vld [vmem:[#allocation182_spill] sm:$0xff]  ;;  %v16702_v45 = vld [vmem:[#allocation12_spill] sm:$0xff] }
 0x47d   :  { %16688 = vst [vmem:[#allocation148_spill] sm:$0xff] %v13488_v50  ;;  %16689 = vst [vmem:[#allocation580_spill] sm:$0xff] %v13490_v44  ;;  %6013 = vmatprep.subr.mxu1 %v15563_v39  ;;  %v4559_v34 = vmul.f32 %v16697_v49, %v16696_v36  ;;  %v16698_v60 = vld [vmem:[#allocation122_spill] sm:$0xff]  ;;  %v16699_v35 = vld [vmem:[#allocation615_spill] sm:$0xff] }
 0x47e   :  { %v13500_v52 = vpop.f32.mrf.mxu0  ;;  %v13502_v24 = vpop.f32.mrf.mxu1  ;;  %5125 = vmatmul.mubr.f32.gmra.mxu0 %v4551_v46  ;;  %5350 = vmatmul.mubr.f32.gmra.mxu1 %v4297_v48  ;;  %v4305_v55 = vmul.f32 %v16699_v35, %v16698_v60  ;;  %v16703_v44 = vld [vmem:[#allocation620_spill] sm:$0xff]  ;;  %v16704_v50 = vld [vmem:[#allocation125_spill] sm:$0xff]  ;;  %v16709_v36 = vld [vmem:[#allocation618_spill] sm:$0xff] }
 0x47f   :  { %16694 = vst [vmem:[#allocation92_spill] sm:$0xff] %v13500_v52  ;;  %16695 = vst [vmem:[#allocation581_spill] sm:$0xff] %v13502_v24  ;;  %5129 = vmatprep.mubr.f32.mxu0 %v4560_v25  ;;  %5354 = vmatprep.mubr.f32.mxu1 %v4306_v37  ;;  %v4568_v52 = vmul.f32 %v16703_v44, %v16702_v45  ;;  %v16705_v24 = vld [vmem:[#allocation621_spill] sm:$0xff]  ;;  %v4791_v25 = vld [vmem:[%s15539_s4 + $0x300] sm:$0xff] }
 0x480   :  { %v13508_v63 = vpop.f32.mrf.mxu0  ;;  %v13510_v32 = vpop.f32.mrf.mxu1  ;;  %6014 = vmatpush1.msra.mxu1 %v4792_v53  ;;  %v4314_v46 = vmul.f32 %v16705_v24, %v16704_v50  ;;  %v16708_v53 = vld [vmem:[#allocation10_spill] sm:$0xff]  ;;  %v16710_v49 = vld [vmem:[#allocation124_spill] sm:$0xff]  ;;  %v16711_v60 = vld [vmem:[#allocation619_spill] sm:$0xff] }
 0x481   :  { %16700 = vst [vmem:[#allocation146_spill] sm:$0xff] %v13508_v63  ;;  %16701 = vst [vmem:[#allocation578_spill] sm:$0xff] %v13510_v32  ;;  %6015 = vmatprep.subr.mxu1 %v15563_v39  ;;  %v4567_v44 = vmul.f32 %v16709_v36, %v16708_v53  ;;  %v4313_v50 = vmul.f32 %v16711_v60, %v16710_v49  ;;  %v16714_v45 = vld [vmem:[#allocation14_spill] sm:$0xff]  ;;  %v16715_v32 = vld [vmem:[#allocation624_spill] sm:$0xff] }
 0x482   :  { %v13520_v48 = vpop.f32.mrf.mxu0  ;;  %v13522_v37 = vpop.f32.mrf.mxu1  ;;  %5130 = vmatmul.mubr.f32.gmra.mxu0 %v4559_v34  ;;  %5355 = vmatmul.mubr.f32.gmra.mxu1 %v4305_v55  ;;  %v16716_v63 = vld [vmem:[#allocation129_spill] sm:$0xff]  ;;  %v16720_v53 = vld [vmem:[#allocation622_spill] sm:$0xff]  ;;  %v16721_v36 = vld [vmem:[#allocation127_spill] sm:$0xff] }
 0x483   :  { %16706 = vst [vmem:[#allocation90_spill] sm:$0xff] %v13520_v48  ;;  %16707 = vst [vmem:[#allocation579_spill] sm:$0xff] %v13522_v37  ;;  %5134 = vmatprep.mubr.f32.mxu0 %v4568_v52  ;;  %5359 = vmatprep.mubr.f32.mxu1 %v4314_v46  ;;  %v4576_v48 = vmul.f32 %v16715_v32, %v16714_v45  ;;  %v16717_v37 = vld [vmem:[#allocation625_spill] sm:$0xff]  ;;  %v16722_v49 = vld [vmem:[#allocation623_spill] sm:$0xff] }
 0x484   :  { %v13528_v24 = vpop.f32.mrf.mxu0  ;;  %v13530_v35 = vpop.f32.mrf.mxu1  ;;  %6016 = vmatpush1.msra.mxu1 %v4791_v25  ;;  %v4322_v34 = vmul.f32 %v16717_v37, %v16716_v63  ;;  %v4822_v52 = vld [vmem:[%s15539_s4 + $0x3f8] sm:$0xff]  ;;  %v4321_v63 = vmul.f32 %v16722_v49, %v16721_v36  ;;  %v16734_v49 = vld [vmem:[#allocation20_spill] sm:$0xff] }
 0x485   :  { %16712 = vst [vmem:[#allocation152_spill] sm:$0xff] %v13528_v24  ;;  %16713 = vst [vmem:[#allocation584_spill] sm:$0xff] %v13530_v35  ;;  %6017 = vmatprep.subr.mxu1 %v15563_v39  ;;  %v16719_v25 = vld [vmem:[#allocation13_spill] sm:$0xff]  ;;  %v16725_v35 = vld [vmem:[#allocation628_spill] sm:$0xff] }
 0x486   :  { %v13540_v55 = vpop.f32.mrf.mxu1  ;;  %v13542_v46 = vpop.f32.mrf.mxu0  ;;  %5135 = vmatmul.mubr.f32.gmra.mxu0 %v4567_v44  ;;  %5360 = vmatmul.mubr.f32.gmra.mxu1 %v4313_v50  ;;  %v4575_v32 = vmul.f32 %v16720_v53, %v16719_v25  ;;  %v16724_v45 = vld [vmem:[#allocation17_spill] sm:$0xff]  ;;  %v16731_v25 = vld [vmem:[#allocation131_spill] sm:$0xff] }
 0x487   :  { %16718 = vst [vmem:[#allocation96_spill] sm:$0xff] %v13540_v55  ;;  %5139 = vmatprep.mubr.f32.mxu0 %v4576_v48  ;;  %5364 = vmatprep.mubr.f32.mxu1 %v4322_v34  ;;  %v4584_v24 = vmul.f32 %v16725_v35, %v16724_v45  ;;  %v16726_v55 = vld [vmem:[#allocation133_spill] sm:$0xff]  ;;  %v4821_v48 = vld [vmem:[%s15539_s4 + $0x3f0] sm:$0xff]  ;;  %v16732_v53 = vld [vmem:[#allocation627_spill] sm:$0xff] }
 0x488   :  { %v13548_v37 = vpop.f32.mrf.mxu1  ;;  %v4898_v60 = vpop.f32.mrf.mxu0  ;;  %6018 = vmatpush2.msra.mxu1 %v4822_v52  ;;  %v4330_v51 = vmul.f32 %v16727_v54, %v16726_v55  ;;  %v16729_v34 = vld [vmem:[#allocation16_spill] sm:$0xff]  ;;  %v16730_v52 = vld [vmem:[#allocation626_spill] sm:$0xff]  ;;  %v4329_v54 = vmul.f32 %v16732_v53, %v16731_v25  ;;  %v16742_v25 = vld [vmem:[#allocation631_spill] sm:$0xff] }
 0x489   :  { %16723 = vst [vmem:[#allocation585_spill] sm:$0xff] %v13548_v37  ;;  %6019 = vmatprep.subr.mxu1 %v15563_v39  ;;  %v4583_v35 = vmul.f32 %v16730_v52, %v16729_v34  ;;  %v16735_v60 = vld [vmem:[#allocation632_spill] sm:$0xff]  ;;  %v16737_v37 = vld [vmem:[#allocation633_spill] sm:$0xff]  ;;  %v16741_v52 = vld [vmem:[#allocation135_spill] sm:$0xff] }
 0x48a   :  { %v13558_v44 = vpop.f32.mrf.mxu1  ;;  %v13560_v50 = vpop.f32.mrf.mxu0  ;;  %5140 = vmatmul.mubr.f32.gmra.mxu0 %v4575_v32  ;;  %5365 = vmatmul.mubr.f32.gmra.mxu1 %v4321_v63  ;;  %v4592_v45 = vmul.f32 %v16735_v60, %v16734_v49  ;;  %v16739_v63 = vld [vmem:[#allocation19_spill] sm:$0xff]  ;;  %v16745_v49 = vld [vmem:[#allocation636_spill] sm:$0xff] }
 0x48b   :  { %16728 = vst [vmem:[#allocation150_spill] sm:$0xff] %v13558_v44  ;;  %5144 = vmatprep.mubr.f32.mxu0 %v4584_v24  ;;  %5369 = vmatprep.mubr.f32.mxu1 %v4330_v51  ;;  %v16736_v44 = vld [vmem:[#allocation137_spill] sm:$0xff]  ;;  %v4820_v51 = vld [vmem:[%s15539_s4 + $0x3e8] sm:$0xff] }
 0x48c   :  { %v13566_v55 = vpop.f32.mrf.mxu1  ;;  %v4903_v36 = vpop.f32.mrf.mxu0  ;;  %6020 = vmatpush2.msra.mxu1 %v4821_v48  ;;  %v4338_v27 = vmul.f32 %v16737_v37, %v16736_v44  ;;  %v16740_v48 = vld [vmem:[#allocation630_spill] sm:$0xff]  ;;  %v4337_v37 = vmul.f32 %v16742_v25, %v16741_v52  ;;  %v16752_v52 = vld [vmem:[#allocation635_spill] sm:$0xff] }
 0x48d   :  { %16733 = vst [vmem:[#allocation582_spill] sm:$0xff] %v13566_v55  ;;  %6021 = vmatprep.subr.mxu1 %v15563_v39  ;;  %v4591_v34 = vmul.f32 %v16740_v48, %v16739_v63  ;;  %v16744_v36 = vld [vmem:[#allocation23_spill] sm:$0xff]  ;;  %v16747_v55 = vld [vmem:[#allocation637_spill] sm:$0xff] }
 0x48e   :  { %v13576_v24 = vpop.f32.mrf.mxu1  ;;  %v13578_v32 = vpop.f32.mrf.mxu0  ;;  %5145 = vmatmul.mubr.f32.gmra.mxu0 %v4583_v35  ;;  %5370 = vmatmul.mubr.f32.gmra.mxu1 %v4329_v54  ;;  %v4600_v60 = vmul.f32 %v16745_v49, %v16744_v36  ;;  %v16751_v48 = vld [vmem:[#allocation139_spill] sm:$0xff]  ;;  %v16755_v36 = vld [vmem:[#allocation640_spill] sm:$0xff] }
 0x48f   :  { %16738 = vst [vmem:[#allocation94_spill] sm:$0xff] %v13576_v24  ;;  %5149 = vmatprep.mubr.f32.mxu0 %v4592_v45  ;;  %5374 = vmatprep.mubr.f32.mxu1 %v4338_v27  ;;  %v16746_v24 = vld [vmem:[#allocation141_spill] sm:$0xff]  ;;  %v4819_v27 = vld [vmem:[%s15539_s4 + $0x3e0] sm:$0xff] }
 0x490   :  { %v13584_v44 = vpop.f32.mrf.mxu1  ;;  %v4908_v53 = vpop.f32.mrf.mxu0  ;;  %6022 = vmatpush2.msra.mxu1 %v4820_v51  ;;  %v4346_v38 = vmul.f32 %v16747_v55, %v16746_v24  ;;  %v16749_v45 = vld [vmem:[#allocation22_spill] sm:$0xff]  ;;  %v4345_v55 = vmul.f32 %v16752_v52, %v16751_v48  ;;  %v16762_v48 = vld [vmem:[#allocation639_spill] sm:$0xff] }
 0x491   :  { %16743 = vst [vmem:[#allocation583_spill] sm:$0xff] %v13584_v44  ;;  %6023 = vmatprep.subr.mxu1 %v15563_v39  ;;  %v16750_v51 = vld [vmem:[#allocation634_spill] sm:$0xff]  ;;  %v16757_v44 = vld [vmem:[#allocation641_spill] sm:$0xff] }
 0x492   :  { %v13594_v35 = vpop.f32.mrf.mxu1  ;;  %v13596_v54 = vpop.f32.mrf.mxu0  ;;  %5150 = vmatmul.mubr.f32.gmra.mxu0 %v4591_v34  ;;  %5375 = vmatmul.mubr.f32.gmra.mxu1 %v4337_v37  ;;  %v4599_v63 = vmul.f32 %v16750_v51, %v16749_v45  ;;  %v16754_v53 = vld [vmem:[#allocation26_spill] sm:$0xff]  ;;  %v16761_v51 = vld [vmem:[#allocation143_spill] sm:$0xff] }
 0x493   :  { %16748 = vst [vmem:[#allocation156_spill] sm:$0xff] %v13594_v35  ;;  %5154 = vmatprep.mubr.f32.mxu0 %v4600_v60  ;;  %5379 = vmatprep.mubr.f32.mxu1 %v4346_v38  ;;  %v4608_v49 = vmul.f32 %v16755_v36, %v16754_v53  ;;  %v16756_v35 = vld [vmem:[#allocation145_spill] sm:$0xff]  ;;  %v16765_v53 = vld [vmem:[#allocation644_spill] sm:$0xff] }
 0x494   :  { %v13602_v24 = vpop.f32.mrf.mxu1  ;;  %v4913_v25 = vpop.f32.mrf.mxu0  ;;  %6024 = vmatpush2.msra.mxu1 %v4819_v27  ;;  %v4354_v7 = vmul.f32 %v16757_v44, %v16756_v35  ;;  %v4818_v38 = vld [vmem:[%s15539_s4 + $0x3d8] sm:$0xff]  ;;  %v16760_v27 = vld [vmem:[#allocation638_spill] sm:$0xff]  ;;  %v4353_v44 = vmul.f32 %v16762_v48, %v16761_v51  ;;  %v16772_v51 = vld [vmem:[#allocation643_spill] sm:$0xff] }
 0x495   :  { %16753 = vst [vmem:[#allocation588_spill] sm:$0xff] %v13602_v24  ;;  %6025 = vmatprep.subr.mxu1 %v15563_v39  ;;  %v16759_v60 = vld [vmem:[#allocation25_spill] sm:$0xff] }
 0x496   :  { %v13612_v34 = vpop.f32.mrf.mxu1  ;;  %v13614_v37 = vpop.f32.mrf.mxu0  ;;  %5155 = vmatmul.mubr.f32.gmra.mxu0 %v4599_v63  ;;  %5380 = vmatmul.mubr.f32.gmra.mxu1 %v4345_v55  ;;  %v4607_v45 = vmul.f32 %v16760_v27, %v16759_v60  ;;  %v16764_v25 = vld [vmem:[#allocation29_spill] sm:$0xff]  ;;  %v16771_v27 = vld [vmem:[#allocation147_spill] sm:$0xff] }
 0x497   :  { %16758 = vst [vmem:[#allocation100_spill] sm:$0xff] %v13612_v34  ;;  %5159 = vmatprep.mubr.f32.mxu0 %v4608_v49  ;;  %5384 = vmatprep.mubr.f32.mxu1 %v4354_v7  ;;  %v4616_v36 = vmul.f32 %v16765_v53, %v16764_v25  ;;  %v16766_v34 = vld [vmem:[#allocation149_spill] sm:$0xff]  ;;  %v4817_v7 = vld [vmem:[%s15539_s4 + $0x3d0] sm:$0xff] }
 0x498   :  { %v13620_v35 = vpop.f32.mrf.mxu1  ;;  %v4918_v52 = vpop.f32.mrf.mxu0  ;;  %6026 = vmatpush2.msra.mxu1 %v4818_v38  ;;  %v16767_v24 = vld [vmem:[#allocation645_spill] sm:$0xff]  ;;  %v16769_v49 = vld [vmem:[#allocation28_spill] sm:$0xff]  ;;  %v16770_v38 = vld [vmem:[#allocation642_spill] sm:$0xff] }
 0x499   :  { %16763 = vst [vmem:[#allocation589_spill] sm:$0xff] %v13620_v35  ;;  %v4362_v29 = vmul.f32 %v16767_v24, %v16766_v34  ;;  %6027 = vmatprep.subr.mxu1 %v15563_v39  ;;  %v4615_v60 = vmul.f32 %v16770_v38, %v16769_v49  ;;  %v4361_v24 = vmul.f32 %v16772_v51, %v16771_v27  ;;  %v16774_v52 = vld [vmem:[#allocation32_spill] sm:$0xff]  ;;  %v16777_v35 = vld [vmem:[#allocation649_spill] sm:$0xff]  ;;  %v16781_v38 = vld [vmem:[#allocation151_spill] sm:$0xff] }
 0x49a   :  { %v13630_v63 = vpop.f32.mrf.mxu1  ;;  %v13632_v55 = vpop.f32.mrf.mxu0  ;;  %5160 = vmatmul.mubr.f32.gmra.mxu0 %v4607_v45  ;;  %5385 = vmatmul.mubr.f32.gmra.mxu1 %v4353_v44  ;;  %v16775_v25 = vld [vmem:[#allocation648_spill] sm:$0xff]  ;;  %v16782_v27 = vld [vmem:[#allocation647_spill] sm:$0xff] }
 0x49b   :  { %16768 = vst [vmem:[#allocation154_spill] sm:$0xff] %v13630_v63  ;;  %5164 = vmatprep.mubr.f32.mxu0 %v4616_v36  ;;  %5389 = vmatprep.mubr.f32.mxu1 %v4362_v29  ;;  %v4624_v53 = vmul.f32 %v16775_v25, %v16774_v52  ;;  %v16776_v63 = vld [vmem:[#allocation153_spill] sm:$0xff]  ;;  %v4816_v29 = vld [vmem:[%s15539_s4 + $0x3c8] sm:$0xff]  ;;  %v16785_v52 = vld [vmem:[#allocation652_spill] sm:$0xff] }
 0x49c   :  { %v13638_v34 = vpop.f32.mrf.mxu1  ;;  %v4923_v48 = vpop.f32.mrf.mxu0  ;;  %6028 = vmatpush2.msra.mxu1 %v4817_v7  ;;  %v4370_v43 = vmul.f32 %v16777_v35, %v16776_v63  ;;  %v16779_v36 = vld [vmem:[#allocation31_spill] sm:$0xff]  ;;  %v16780_v7 = vld [vmem:[#allocation646_spill] sm:$0xff]  ;;  %v4369_v35 = vmul.f32 %v16782_v27, %v16781_v38 }
 0x49d   :  { %16773 = vst [vmem:[#allocation586_spill] sm:$0xff] %v13638_v34  ;;  %6029 = vmatprep.subr.mxu1 %v15563_v39  ;;  %v4623_v49 = vmul.f32 %v16780_v7, %v16779_v36  ;;  %v16784_v48 = vld [vmem:[#allocation36_spill] sm:$0xff]  ;;  %v16787_v34 = vld [vmem:[#allocation653_spill] sm:$0xff]  ;;  %v16791_v7 = vld [vmem:[#allocation155_spill] sm:$0xff] }
 0x49e   :  { %v13648_v45 = vpop.f32.mrf.mxu1  ;;  %v13650_v44 = vpop.f32.mrf.mxu0  ;;  %5165 = vmatmul.mubr.f32.gmra.mxu0 %v4615_v60  ;;  %5390 = vmatmul.mubr.f32.gmra.mxu1 %v4361_v24  ;;  %v4632_v25 = vmul.f32 %v16785_v52, %v16784_v48  ;;  %v16792_v38 = vld [vmem:[#allocation651_spill] sm:$0xff]  ;;  %v16795_v48 = vld [vmem:[#allocation656_spill] sm:$0xff] }
 0x49f   :  { %16778 = vst [vmem:[#allocation98_spill] sm:$0xff] %v13648_v45  ;;  %5169 = vmatprep.mubr.f32.mxu0 %v4624_v53  ;;  %5394 = vmatprep.mubr.f32.mxu1 %v4370_v43  ;;  %v16786_v45 = vld [vmem:[#allocation157_spill] sm:$0xff]  ;;  %v4815_v43 = vld [vmem:[%s15539_s4 + $0x3c0] sm:$0xff] }
 0x4a0   :  { %v13656_v63 = vpop.f32.mrf.mxu1  ;;  %v4928_v51 = vpop.f32.mrf.mxu0  ;;  %6030 = vmatpush2.msra.mxu1 %v4816_v29  ;;  %v4378_v31 = vmul.f32 %v16787_v34, %v16786_v45  ;;  %v16789_v53 = vld [vmem:[#allocation34_spill] sm:$0xff]  ;;  %v4377_v34 = vmul.f32 %v16792_v38, %v16791_v7  ;;  %v16802_v7 = vld [vmem:[#allocation655_spill] sm:$0xff] }
 0x4a1   :  { %16783 = vst [vmem:[#allocation587_spill] sm:$0xff] %v13656_v63  ;;  %6031 = vmatprep.subr.mxu1 %v15563_v39  ;;  %v16790_v29 = vld [vmem:[#allocation650_spill] sm:$0xff]  ;;  %v16794_v51 = vld [vmem:[#allocation40_spill] sm:$0xff]  ;;  %v16797_v63 = vld [vmem:[#allocation657_spill] sm:$0xff] }
 0x4a2   :  { %v13666_v60 = vpop.f32.mrf.mxu1  ;;  %v13668_v24 = vpop.f32.mrf.mxu0  ;;  %5170 = vmatmul.mubr.f32.gmra.mxu0 %v4623_v49  ;;  %5395 = vmatmul.mubr.f32.gmra.mxu1 %v4369_v35  ;;  %v4631_v36 = vmul.f32 %v16790_v29, %v16789_v53  ;;  %v4640_v52 = vmul.f32 %v16795_v48, %v16794_v51  ;;  %v16801_v29 = vld [vmem:[#allocation159_spill] sm:$0xff]  ;;  %v16805_v51 = vld [vmem:[#allocation660_spill] sm:$0xff] }
 0x4a3   :  { %16788 = vst [vmem:[#allocation160_spill] sm:$0xff] %v13666_v60  ;;  %5174 = vmatprep.mubr.f32.mxu0 %v4632_v25  ;;  %5399 = vmatprep.mubr.f32.mxu1 %v4378_v31  ;;  %v16796_v60 = vld [vmem:[#allocation161_spill] sm:$0xff]  ;;  %v16799_v25 = vld [vmem:[#allocation38_spill] sm:$0xff] }
 0x4a4   :  { %v13674_v45 = vpop.f32.mrf.mxu1  ;;  %v4933_v27 = vpop.f32.mrf.mxu0  ;;  %6032 = vmatpush2.msra.mxu1 %v4815_v43  ;;  %v4386_v19 = vmul.f32 %v16797_v63, %v16796_v60  ;;  %v4814_v31 = vld [vmem:[%s15539_s4 + $0x3b8] sm:$0xff]  ;;  %v16800_v43 = vld [vmem:[#allocation654_spill] sm:$0xff]  ;;  %v4385_v63 = vmul.f32 %v16802_v7, %v16801_v29  ;;  %v16812_v29 = vld [vmem:[#allocation659_spill] sm:$0xff] }
 0x4a5   :  { %16793 = vst [vmem:[#allocation592_spill] sm:$0xff] %v13674_v45  ;;  %6033 = vmatprep.subr.mxu1 %v15563_v39  ;;  %v4639_v53 = vmul.f32 %v16800_v43, %v16799_v25  ;;  %v16804_v27 = vld [vmem:[#allocation44_spill] sm:$0xff]  ;;  %v16807_v45 = vld [vmem:[#allocation661_spill] sm:$0xff]  ;;  %v16811_v43 = vld [vmem:[#allocation163_spill] sm:$0xff] }
 0x4a6   :  { %v13684_v49 = vpop.f32.mrf.mxu1  ;;  %v13686_v35 = vpop.f32.mrf.mxu0  ;;  %5175 = vmatmul.mubr.f32.gmra.mxu0 %v4631_v36  ;;  %5400 = vmatmul.mubr.f32.gmra.mxu1 %v4377_v34  ;;  %v4648_v48 = vmul.f32 %v16805_v51, %v16804_v27  ;;  %v16815_v27 = vld [vmem:[#allocation664_spill] sm:$0xff] }
 0x4a7   :  { %16798 = vst [vmem:[#allocation104_spill] sm:$0xff] %v13684_v49  ;;  %5179 = vmatprep.mubr.f32.mxu0 %v4640_v52  ;;  %5404 = vmatprep.mubr.f32.mxu1 %v4386_v19  ;;  %v16806_v49 = vld [vmem:[#allocation165_spill] sm:$0xff]  ;;  %v4813_v19 = vld [vmem:[%s15539_s4 + $0x3b0] sm:$0xff]  ;;  %v16809_v52 = vld [vmem:[#allocation42_spill] sm:$0xff] }
 0x4a8   :  { %v13692_v60 = vpop.f32.mrf.mxu1  ;;  %v4938_v38 = vpop.f32.mrf.mxu0  ;;  %6034 = vmatpush2.msra.mxu1 %v4814_v31  ;;  %v4394_v33 = vmul.f32 %v16807_v45, %v16806_v49  ;;  %v16810_v31 = vld [vmem:[#allocation658_spill] sm:$0xff]  ;;  %v4393_v45 = vmul.f32 %v16812_v29, %v16811_v43  ;;  %v16822_v43 = vld [vmem:[#allocation663_spill] sm:$0xff] }
 0x4a9   :  { %16803 = vst [vmem:[#allocation593_spill] sm:$0xff] %v13692_v60  ;;  %6035 = vmatprep.subr.mxu1 %v15563_v39  ;;  %v4647_v25 = vmul.f32 %v16810_v31, %v16809_v52  ;;  %v16814_v38 = vld [vmem:[#allocation48_spill] sm:$0xff]  ;;  %v16817_v60 = vld [vmem:[#allocation665_spill] sm:$0xff]  ;;  %v16821_v31 = vld [vmem:[#allocation167_spill] sm:$0xff] }
 0x4aa   :  { %v13702_v36 = vpop.f32.mrf.mxu1  ;;  %v13704_v34 = vpop.f32.mrf.mxu0  ;;  %5180 = vmatmul.mubr.f32.gmra.mxu0 %v4639_v53  ;;  %5405 = vmatmul.mubr.f32.gmra.mxu1 %v4385_v63  ;;  %v4656_v51 = vmul.f32 %v16815_v27, %v16814_v38  ;;  %v16825_v38 = vld [vmem:[#allocation668_spill] sm:$0xff] }
 0x4ab   :  { %16808 = vst [vmem:[#allocation158_spill] sm:$0xff] %v13702_v36  ;;  %5184 = vmatprep.mubr.f32.mxu0 %v4648_v48  ;;  %5409 = vmatprep.mubr.f32.mxu1 %v4394_v33  ;;  %v16816_v36 = vld [vmem:[#allocation169_spill] sm:$0xff]  ;;  %v4812_v33 = vld [vmem:[%s15539_s4 + $0x3a8] sm:$0xff]  ;;  %v16819_v48 = vld [vmem:[#allocation46_spill] sm:$0xff] }
 0x4ac   :  { %v13710_v49 = vpop.f32.mrf.mxu1  ;;  %v4943_v7 = vpop.f32.mrf.mxu0  ;;  %6036 = vmatpush2.msra.mxu1 %v4813_v19  ;;  %v4402_v30 = vmul.f32 %v16817_v60, %v16816_v36  ;;  %v16820_v19 = vld [vmem:[#allocation662_spill] sm:$0xff]  ;;  %v4401_v60 = vmul.f32 %v16822_v43, %v16821_v31  ;;  %v16833_v31 = vld [vmem:[#allocation667_spill] sm:$0xff] }
 0x4ad   :  { %16813 = vst [vmem:[#allocation590_spill] sm:$0xff] %v13710_v49  ;;  %6037 = vmatprep.subr.mxu1 %v15563_v39  ;;  %v4655_v52 = vmul.f32 %v16820_v19, %v16819_v48  ;;  %v16824_v7 = vld [vmem:[#allocation52_spill] sm:$0xff]  ;;  %v16827_v49 = vld [vmem:[#allocation669_spill] sm:$0xff]  ;;  %v16832_v19 = vld [vmem:[#allocation171_spill] sm:$0xff] }
 0x4ae   :  { %v13720_v53 = vpop.f32.mrf.mxu1  ;;  %v13722_v63 = vpop.f32.mrf.mxu0  ;;  %5185 = vmatmul.mubr.f32.gmra.mxu0 %v4647_v25  ;;  %5410 = vmatmul.mubr.f32.gmra.mxu1 %v4393_v45  ;;  %v4664_v27 = vmul.f32 %v16825_v38, %v16824_v7  ;;  %v16836_v7 = vld [vmem:[#allocation672_spill] sm:$0xff] }
 0x4af   :  { %16818 = vst [vmem:[#allocation102_spill] sm:$0xff] %v13720_v53  ;;  %5189 = vmatprep.mubr.f32.mxu0 %v4656_v51  ;;  %5414 = vmatprep.mubr.f32.mxu1 %v4402_v30  ;;  %v16826_v53 = vld [vmem:[#allocation173_spill] sm:$0xff]  ;;  %v4811_v30 = vld [vmem:[%s15539_s4 + $0x3a0] sm:$0xff] }
 0x4b0   :  { %v13728_v36 = vpop.f32.mrf.mxu1  ;;  %v4948_v29 = vpop.f32.mrf.mxu0  ;;  %6038 = vmatpush2.msra.mxu1 %v4812_v33  ;;  %v4410_v57 = vmul.f32 %v16827_v49, %v16826_v53  ;;  %v16830_v51 = vld [vmem:[#allocation50_spill] sm:$0xff]  ;;  %v4409_v49 = vmul.f32 %v16833_v31, %v16832_v19  ;;  %v16844_v19 = vld [vmem:[#allocation671_spill] sm:$0xff] }
 0x4b1   :  { %16823 = vst [vmem:[#allocation591_spill] sm:$0xff] %v13728_v36  ;;  %6039 = vmatprep.subr.mxu1 %v15563_v39  ;;  %v16831_v33 = vld [vmem:[#allocation666_spill] sm:$0xff]  ;;  %v16835_v29 = vld [vmem:[#allocation56_spill] sm:$0xff]  ;;  %v16838_v36 = vld [vmem:[#allocation673_spill] sm:$0xff] }
 0x4b2   :  { %v13738_v25 = vpop.f32.mrf.mxu1  ;;  %v13740_v45 = vpop.f32.mrf.mxu0  ;;  %5190 = vmatmul.mubr.f32.gmra.mxu0 %v4655_v52  ;;  %5415 = vmatmul.mubr.f32.gmra.mxu1 %v4401_v60  ;;  %v4663_v48 = vmul.f32 %v16831_v33, %v16830_v51  ;;  %v4672_v38 = vmul.f32 %v16836_v7, %v16835_v29  ;;  %v16843_v33 = vld [vmem:[#allocation175_spill] sm:$0xff]  ;;  %v16847_v29 = vld [vmem:[#allocation676_spill] sm:$0xff] }
 0x4b3   :  { %16828 = vst [vmem:[#allocation164_spill] sm:$0xff] %v13738_v25  ;;  %16829 = vst [vmem:[#allocation596_spill] sm:$0xff] %v13740_v45  ;;  %5194 = vmatprep.mubr.f32.mxu0 %v4664_v27  ;;  %5419 = vmatprep.mubr.f32.mxu1 %v4410_v57  ;;  %v16837_v25 = vld [vmem:[#allocation177_spill] sm:$0xff]  ;;  %v16841_v27 = vld [vmem:[#allocation54_spill] sm:$0xff] }
 0x4b4   :  { %v13746_v53 = vpop.f32.mrf.mxu1  ;;  %v4953_v43 = vpop.f32.mrf.mxu0  ;;  %6040 = vmatpush2.msra.mxu1 %v4811_v30  ;;  %v4418_v45 = vmul.f32 %v16838_v36, %v16837_v25  ;;  %v4810_v57 = vld [vmem:[%s15539_s4 + $0x398] sm:$0xff]  ;;  %v16842_v30 = vld [vmem:[#allocation670_spill] sm:$0xff]  ;;  %v4417_v36 = vmul.f32 %v16844_v19, %v16843_v33  ;;  %v16855_v33 = vld [vmem:[#allocation675_spill] sm:$0xff] }
 0x4b5   :  { %16834 = vst [vmem:[#allocation108_spill] sm:$0xff] %v13746_v53  ;;  %6041 = vmatprep.subr.mxu1 %v15563_v39  ;;  %v4671_v51 = vmul.f32 %v16842_v30, %v16841_v27  ;;  %v16846_v43 = vld [vmem:[#allocation60_spill] sm:$0xff]  ;;  %v16849_v53 = vld [vmem:[#allocation677_spill] sm:$0xff]  ;;  %v16854_v30 = vld [vmem:[#allocation179_spill] sm:$0xff] }
 0x4b6   :  { %v13756_v52 = vpop.f32.mrf.mxu1  ;;  %v13758_v60 = vpop.f32.mrf.mxu0  ;;  %5195 = vmatmul.mubr.f32.gmra.mxu0 %v4663_v48  ;;  %5420 = vmatmul.mubr.f32.gmra.mxu1 %v4409_v49  ;;  %v4680_v7 = vmul.f32 %v16847_v29, %v16846_v43  ;;  %v16858_v43 = vld [vmem:[#allocation680_spill] sm:$0xff] }
 0x4b7   :  { %16839 = vst [vmem:[#allocation597_spill] sm:$0xff] %v13756_v52  ;;  %16840 = vst [vmem:[#allocation162_spill] sm:$0xff] %v13758_v60  ;;  %5199 = vmatprep.mubr.f32.mxu0 %v4672_v38  ;;  %5424 = vmatprep.mubr.f32.mxu1 %v4418_v45  ;;  %v16848_v52 = vld [vmem:[#allocation181_spill] sm:$0xff]  ;;  %v4809_v45 = vld [vmem:[%s15539_s4 + $0x390] sm:$0xff] }
 0x4b8   :  { %v13764_v25 = vpop.f32.mrf.mxu1  ;;  %v4958_v31 = vpop.f32.mrf.mxu0  ;;  %6042 = vmatpush2.msra.mxu1 %v4810_v57  ;;  %v4426_v60 = vmul.f32 %v16849_v53, %v16848_v52  ;;  %v16852_v38 = vld [vmem:[#allocation58_spill] sm:$0xff]  ;;  %v4425_v53 = vmul.f32 %v16855_v33, %v16854_v30  ;;  %v16866_v30 = vld [vmem:[#allocation679_spill] sm:$0xff] }
 0x4b9   :  { %16845 = vst [vmem:[#allocation594_spill] sm:$0xff] %v13764_v25  ;;  %6043 = vmatprep.subr.mxu1 %v15563_v39  ;;  %v16853_v57 = vld [vmem:[#allocation674_spill] sm:$0xff]  ;;  %v16857_v31 = vld [vmem:[#allocation64_spill] sm:$0xff]  ;;  %v16860_v25 = vld [vmem:[#allocation681_spill] sm:$0xff] }
 0x4ba   :  { %v13774_v48 = vpop.f32.mrf.mxu1  ;;  %v13776_v49 = vpop.f32.mrf.mxu0  ;;  %5200 = vmatmul.mubr.f32.gmra.mxu0 %v4671_v51  ;;  %5425 = vmatmul.mubr.f32.gmra.mxu1 %v4417_v36  ;;  %v4679_v27 = vmul.f32 %v16853_v57, %v16852_v38  ;;  %v4688_v29 = vmul.f32 %v16858_v43, %v16857_v31  ;;  %v16865_v57 = vld [vmem:[#allocation183_spill] sm:$0xff]  ;;  %v16869_v31 = vld [vmem:[#allocation684_spill] sm:$0xff] }
 0x4bb   :  { %16850 = vst [vmem:[#allocation106_spill] sm:$0xff] %v13774_v48  ;;  %16851 = vst [vmem:[#allocation595_spill] sm:$0xff] %v13776_v49  ;;  %5204 = vmatprep.mubr.f32.mxu0 %v4680_v7  ;;  %5429 = vmatprep.mubr.f32.mxu1 %v4426_v60  ;;  %v16859_v48 = vld [vmem:[#allocation185_spill] sm:$0xff]  ;;  %v4808_v60 = vld [vmem:[%s15539_s4 + $0x388] sm:$0xff] }
 0x4bc   :  { %v13782_v52 = vpop.f32.mrf.mxu1  ;;  %v4963_v19 = vpop.f32.mrf.mxu0  ;;  %6044 = vmatpush2.msra.mxu1 %v4809_v45  ;;  %v4434_v49 = vmul.f32 %v16860_v25, %v16859_v48  ;;  %v16863_v7 = vld [vmem:[#allocation62_spill] sm:$0xff]  ;;  %v4433_v25 = vmul.f32 %v16866_v30, %v16865_v57  ;;  %v16876_v57 = vld [vmem:[#allocation683_spill] sm:$0xff]  ;;  %v16878_v30 = vld [vmem:[#allocation192_spill] sm:$0xff] }
 0x4bd   :  { %16856 = vst [vmem:[#allocation168_spill] sm:$0xff] %v13782_v52  ;;  %6045 = vmatprep.subr.mxu1 %v15563_v39  ;;  %v16864_v45 = vld [vmem:[#allocation678_spill] sm:$0xff]  ;;  %v16868_v19 = vld [vmem:[#allocation188_spill] sm:$0xff]  ;;  %v16871_v52 = vld [vmem:[#allocation685_spill] sm:$0xff] }
 0x4be   :  { %v13792_v51 = vpop.f32.mrf.mxu1  ;;  %v13794_v36 = vpop.f32.mrf.mxu0  ;;  %5205 = vmatmul.mubr.f32.gmra.mxu0 %v4679_v27  ;;  %5430 = vmatmul.mubr.f32.gmra.mxu1 %v4425_v53  ;;  %v4687_v38 = vmul.f32 %v16864_v45, %v16863_v7  ;;  %v4442_v43 = vmul.f32 %v16869_v31, %v16868_v19  ;;  %v16875_v45 = vld [vmem:[#allocation187_spill] sm:$0xff]  ;;  %v16880_v31 = vld [vmem:[#allocation193_spill] sm:$0xff] }
 0x4bf   :  { %16861 = vst [vmem:[#allocation600_spill] sm:$0xff] %v13792_v51  ;;  %16862 = vst [vmem:[#allocation112_spill] sm:$0xff] %v13794_v36  ;;  %5209 = vmatprep.mubr.f32.mxu0 %v4688_v29  ;;  %5434 = vmatprep.mubr.f32.mxu1 %v4434_v49  ;;  %v16870_v51 = vld [vmem:[#allocation189_spill] sm:$0xff]  ;;  %v4807_v49 = vld [vmem:[%s15539_s4 + $0x380] sm:$0xff] }
 0x4c0   :  { %v13800_v48 = vpop.f32.mrf.mxu1  ;;  %v4968_v33 = vpop.f32.mrf.mxu0  ;;  %6046 = vmatpush2.msra.mxu1 %v4808_v60  ;;  %v4188_v36 = vmul.f32 %v16871_v52, %v16870_v51  ;;  %v16873_v29 = vld [vmem:[#allocation186_spill] sm:$0xff]  ;;  %v4187_v52 = vmul.f32 %v16876_v57, %v16875_v45  ;;  %v16887_v45 = vld [vmem:[#allocation687_spill] sm:$0xff] }
 0x4c1   :  { %16867 = vst [vmem:[#allocation601_spill] sm:$0xff] %v13800_v48  ;;  %6047 = vmatprep.subr.mxu1 %v15563_v39  ;;  %v16874_v60 = vld [vmem:[#allocation682_spill] sm:$0xff]  ;;  %v16879_v33 = vld [vmem:[#allocation688_spill] sm:$0xff] }
 0x4c2   :  { %v13810_v27 = vpop.f32.mrf.mxu1  ;;  %v13812_v53 = vpop.f32.mrf.mxu0  ;;  %5210 = vmatmul.mubr.f32.gmra.mxu0 %v4687_v38  ;;  %5435 = vmatmul.mubr.f32.gmra.mxu1 %v4433_v25  ;;  %v4441_v7 = vmul.f32 %v16874_v60, %v16873_v29  ;;  %v4450_v19 = vmul.f32 %v16879_v33, %v16878_v30  ;;  %v16886_v60 = vld [vmem:[#allocation191_spill] sm:$0xff]  ;;  %v16889_v30 = vld [vmem:[#allocation196_spill] sm:$0xff] }
 0x4c3   :  { %16872 = vst [vmem:[#allocation166_spill] sm:$0xff] %v13810_v27  ;;  %5439 = vmatprep.mubr.f32.mxu1 %v4442_v43  ;;  %5664 = vmatprep.mubr.f32.mxu0 %v4188_v36  ;;  %v16881_v27 = vld [vmem:[#allocation689_spill] sm:$0xff]  ;;  %v16884_v36 = vld [vmem:[#allocation190_spill] sm:$0xff]  ;;  %v16890_v33 = vld [vmem:[#allocation692_spill] sm:$0xff] }
 0x4c4   :  { %v13818_v51 = vpop.f32.mrf.mxu1  ;;  %v4973_v39 = vpop.f32.mrf.mxu0  ;;  %6048 = vmatpush2.msra.mxu1 %v4807_v49  ;;  %v4196_v48 = vmul.f32 %v16881_v27, %v16880_v31  ;;  %v16885_v43 = vld [vmem:[#allocation686_spill] sm:$0xff]  ;;  %v4195_v49 = vmul.f32 %v16887_v45, %v16886_v60  ;;  %v4458_v27 = vmul.f32 %v16890_v33, %v16889_v30  ;;  %v16891_v31 = vld [vmem:[#allocation197_spill] sm:$0xff]  ;;  %v16900_v30 = vld [vmem:[#allocation200_spill] sm:$0xff] }
 0x4c5   :  { %16877 = vst [vmem:[#allocation598_spill] sm:$0xff] %v13818_v51  ;;  %v4449_v29 = vmul.f32 %v16885_v43, %v16884_v36  ;;  %v16897_v36 = vld [vmem:[#allocation195_spill] sm:$0xff]  ;;  %v16901_v33 = vld [vmem:[#allocation696_spill] sm:$0xff] }
 0x4c6   :  { %v13824_v38 = vpop.f32.mrf.mxu1  ;;  %v13826_v25 = vpop.f32.mrf.mxu0  ;;  %5440 = vmatmul.mubr.f32.gmra.mxu1 %v4441_v7  ;;  %5665 = vmatmul.mubr.f32.vlgmr.msra.gmra.mxu0 %v4187_v52  ;;  %v16896_v52 = vld [vmem:[#allocation690_spill] sm:$0xff]  ;;  %v16898_v43 = vld [vmem:[#allocation691_spill] sm:$0xff] }
 0x4c7   :  { %16882 = vst [vmem:[#allocation110_spill] sm:$0xff] %v13824_v38  ;;  %16883 = vst [vmem:[#allocation599_spill] sm:$0xff] %v13826_v25  ;;  %5444 = vmatprep.mubr.f32.mxu1 %v4450_v19  ;;  %5669 = vmatprep.mubr.f32.mxu0 %v4196_v48  ;;  %v16892_v38 = vld [vmem:[#allocation693_spill] sm:$0xff]  ;;  %v16895_v48 = vld [vmem:[#allocation194_spill] sm:$0xff]  ;;  %v4203_v60 = vmul.f32 %v16898_v43, %v16897_v36 }
 0x4c8   :  { %v13832_v57 = vpop.f32.mrf.mxu1  ;;  %v4978_v39 = vpop.f32.mrf.mxu0  ;;  %v4204_v51 = vmul.f32 %v16892_v38, %v16891_v31  ;;  %v4457_v19 = vmul.f32 %v16896_v52, %v16895_v48  ;;  %v4466_v38 = vmul.f32 %v16901_v33, %v16900_v30  ;;  %v16902_v31 = vld [vmem:[#allocation201_spill] sm:$0xff]  ;;  %v16908_v48 = vld [vmem:[#allocation199_spill] sm:$0xff]  ;;  %v16911_v30 = vld [vmem:[#allocation204_spill] sm:$0xff] }
 0x4c9   :  { %16888 = vst [vmem:[#allocation172_spill] sm:$0xff] %v13832_v57  ;;  %v16909_v52 = vld [vmem:[#allocation695_spill] sm:$0xff]  ;;  %v16912_v33 = vld [vmem:[#allocation700_spill] sm:$0xff] }
 0x4ca   :  { %v13838_v25 = vpop.f32.mrf.mxu1  ;;  %v13840_v7 = vpop.f32.mrf.mxu0  ;;  %5445 = vmatmul.mubr.f32.gmra.mxu1 %v4449_v29  ;;  %5670 = vmatmul.mubr.f32.gmra.mxu0 %v4195_v49  ;;  %v16907_v49 = vld [vmem:[#allocation694_spill] sm:$0xff]  ;;  %v4211_v36 = vmul.f32 %v16909_v52, %v16908_v48 }
 0x4cb   :  { %16893 = vst [vmem:[#allocation604_spill] sm:$0xff] %v13838_v25  ;;  %16894 = vst [vmem:[#allocation116_spill] sm:$0xff] %v13840_v7  ;;  %5449 = vmatprep.mubr.f32.mxu1 %v4458_v27  ;;  %5674 = vmatprep.mubr.f32.mxu0 %v4204_v51  ;;  %v16903_v25 = vld [vmem:[#allocation697_spill] sm:$0xff]  ;;  %v16906_v51 = vld [vmem:[#allocation198_spill] sm:$0xff] }
 0x4cc   :  { %v13846_v45 = vpop.f32.mrf.mxu1  ;;  %v4983_v39 = vpop.f32.mrf.mxu0  ;;  %v4212_v57 = vmul.f32 %v16903_v25, %v16902_v31  ;;  %v4465_v27 = vmul.f32 %v16907_v49, %v16906_v51  ;;  %v4474_v25 = vmul.f32 %v16912_v33, %v16911_v30  ;;  %v16913_v31 = vld [vmem:[#allocation205_spill] sm:$0xff]  ;;  %v16919_v51 = vld [vmem:[#allocation203_spill] sm:$0xff]  ;;  %v16922_v30 = vld [vmem:[#allocation208_spill] sm:$0xff] }
 0x4cd   :  { %16899 = vst [vmem:[#allocation605_spill] sm:$0xff] %v13846_v45  ;;  %v16920_v49 = vld [vmem:[#allocation699_spill] sm:$0xff]  ;;  %v16923_v33 = vld [vmem:[#allocation704_spill] sm:$0xff] }
 0x4ce   :  { %v13852_v7 = vpop.f32.mrf.mxu1  ;;  %v13854_v29 = vpop.f32.mrf.mxu0  ;;  %5450 = vmatmul.mubr.f32.gmra.mxu1 %v4457_v19  ;;  %5675 = vmatmul.mubr.f32.gmra.mxu0 %v4203_v60  ;;  %v16918_v60 = vld [vmem:[#allocation698_spill] sm:$0xff]  ;;  %v4219_v48 = vmul.f32 %v16920_v49, %v16919_v51 }
 0x4cf   :  { %16904 = vst [vmem:[#allocation170_spill] sm:$0xff] %v13852_v7  ;;  %16905 = vst [vmem:[#allocation602_spill] sm:$0xff] %v13854_v29  ;;  %5454 = vmatprep.mubr.f32.mxu1 %v4466_v38  ;;  %5679 = vmatprep.mubr.f32.mxu0 %v4212_v57  ;;  %v16914_v7 = vld [vmem:[#allocation701_spill] sm:$0xff]  ;;  %v16917_v57 = vld [vmem:[#allocation202_spill] sm:$0xff] }
 0x4d0   :  { %v13860_v43 = vpop.f32.mrf.mxu1  ;;  %v4988_v39 = vpop.f32.mrf.mxu0  ;;  %v4220_v45 = vmul.f32 %v16914_v7, %v16913_v31  ;;  %v4473_v38 = vmul.f32 %v16918_v60, %v16917_v57  ;;  %v4482_v7 = vmul.f32 %v16923_v33, %v16922_v30  ;;  %v16924_v31 = vld [vmem:[#allocation209_spill] sm:$0xff]  ;;  %v16930_v57 = vld [vmem:[#allocation207_spill] sm:$0xff]  ;;  %v16933_v30 = vld [vmem:[#allocation212_spill] sm:$0xff] }
 0x4d1   :  { %16910 = vst [vmem:[#allocation114_spill] sm:$0xff] %v13860_v43  ;;  %v16931_v60 = vld [vmem:[#allocation703_spill] sm:$0xff]  ;;  %v16934_v33 = vld [vmem:[#allocation708_spill] sm:$0xff] }
 0x4d2   :  { %v13866_v29 = vpop.f32.mrf.mxu1  ;;  %v13868_v19 = vpop.f32.mrf.mxu0  ;;  %5455 = vmatmul.mubr.f32.gmra.mxu1 %v4465_v27  ;;  %5680 = vmatmul.mubr.f32.gmra.mxu0 %v4211_v36  ;;  %v16929_v36 = vld [vmem:[#allocation702_spill] sm:$0xff]  ;;  %v4227_v51 = vmul.f32 %v16931_v60, %v16930_v57 }
 0x4d3   :  { %16915 = vst [vmem:[#allocation603_spill] sm:$0xff] %v13866_v29  ;;  %16916 = vst [vmem:[#allocation176_spill] sm:$0xff] %v13868_v19  ;;  %5459 = vmatprep.mubr.f32.mxu1 %v4474_v25  ;;  %5684 = vmatprep.mubr.f32.mxu0 %v4220_v45  ;;  %v16925_v29 = vld [vmem:[#allocation705_spill] sm:$0xff]  ;;  %v16928_v45 = vld [vmem:[#allocation206_spill] sm:$0xff] }
 0x4d4   :  { %v13874_v52 = vpop.f32.mrf.mxu1  ;;  %v4993_v39 = vpop.f32.mrf.mxu0  ;;  %v4228_v43 = vmul.f32 %v16925_v29, %v16924_v31  ;;  %v4481_v25 = vmul.f32 %v16929_v36, %v16928_v45  ;;  %v4490_v29 = vmul.f32 %v16934_v33, %v16933_v30  ;;  %v16935_v31 = vld [vmem:[#allocation213_spill] sm:$0xff]  ;;  %v16941_v45 = vld [vmem:[#allocation211_spill] sm:$0xff]  ;;  %v16944_v30 = vld [vmem:[#allocation216_spill] sm:$0xff] }
 0x4d5   :  { %16921 = vst [vmem:[#allocation608_spill] sm:$0xff] %v13874_v52  ;;  %v16942_v36 = vld [vmem:[#allocation707_spill] sm:$0xff]  ;;  %v16945_v33 = vld [vmem:[#allocation712_spill] sm:$0xff] }
 0x4d6   :  { %v13880_v19 = vpop.f32.mrf.mxu1  ;;  %v13882_v27 = vpop.f32.mrf.mxu0  ;;  %5460 = vmatmul.mubr.f32.gmra.mxu1 %v4473_v38  ;;  %5685 = vmatmul.mubr.f32.gmra.mxu0 %v4219_v48  ;;  %v16940_v48 = vld [vmem:[#allocation706_spill] sm:$0xff]  ;;  %v4235_v57 = vmul.f32 %v16942_v36, %v16941_v45 }
 0x4d7   :  { %16926 = vst [vmem:[#allocation5_spill] sm:$0xff] %v13880_v19  ;;  %16927 = vst [vmem:[#allocation609_spill] sm:$0xff] %v13882_v27  ;;  %5464 = vmatprep.mubr.f32.mxu1 %v4482_v7  ;;  %5689 = vmatprep.mubr.f32.mxu0 %v4228_v43  ;;  %v16936_v19 = vld [vmem:[#allocation709_spill] sm:$0xff]  ;;  %v16939_v43 = vld [vmem:[#allocation210_spill] sm:$0xff] }
 0x4d8   :  { %v13888_v49 = vpop.f32.mrf.mxu1  ;;  %v4998_v39 = vpop.f32.mrf.mxu0  ;;  %v4236_v52 = vmul.f32 %v16936_v19, %v16935_v31  ;;  %v4489_v7 = vmul.f32 %v16940_v48, %v16939_v43  ;;  %v4498_v19 = vmul.f32 %v16945_v33, %v16944_v30  ;;  %v16946_v31 = vld [vmem:[#allocation217_spill] sm:$0xff]  ;;  %v16952_v43 = vld [vmem:[#allocation215_spill] sm:$0xff]  ;;  %v16955_v30 = vld [vmem:[#allocation220_spill] sm:$0xff] }
 0x4d9   :  { %16932 = vst [vmem:[#allocation174_spill] sm:$0xff] %v13888_v49  ;;  %v16953_v48 = vld [vmem:[#allocation711_spill] sm:$0xff]  ;;  %v16956_v33 = vld [vmem:[#allocation716_spill] sm:$0xff] }
 0x4da   :  { %v13894_v27 = vpop.f32.mrf.mxu1  ;;  %v13896_v38 = vpop.f32.mrf.mxu0  ;;  %5465 = vmatmul.mubr.f32.gmra.mxu1 %v4481_v25  ;;  %5690 = vmatmul.mubr.f32.gmra.mxu0 %v4227_v51  ;;  %v16951_v51 = vld [vmem:[#allocation710_spill] sm:$0xff]  ;;  %v4243_v45 = vmul.f32 %v16953_v48, %v16952_v43 }
 0x4db   :  { %16937 = vst [vmem:[#allocation606_spill] sm:$0xff] %v13894_v27  ;;  %16938 = vst [vmem:[#allocation118_spill] sm:$0xff] %v13896_v38  ;;  %5469 = vmatprep.mubr.f32.mxu1 %v4490_v29  ;;  %5694 = vmatprep.mubr.f32.mxu0 %v4236_v52  ;;  %v16947_v27 = vld [vmem:[#allocation713_spill] sm:$0xff]  ;;  %v16950_v52 = vld [vmem:[#allocation214_spill] sm:$0xff] }
 0x4dc   :  { %v13902_v60 = vpop.f32.mrf.mxu1  ;;  %v5003_v39 = vpop.f32.mrf.mxu0  ;;  %v4244_v49 = vmul.f32 %v16947_v27, %v16946_v31  ;;  %v4497_v29 = vmul.f32 %v16951_v51, %v16950_v52  ;;  %v4506_v27 = vmul.f32 %v16956_v33, %v16955_v30  ;;  %v16957_v31 = vld [vmem:[#allocation221_spill] sm:$0xff]  ;;  %v16963_v52 = vld [vmem:[#allocation219_spill] sm:$0xff]  ;;  %v16966_v30 = vld [vmem:[#allocation224_spill] sm:$0xff] }
 0x4dd   :  { %16943 = vst [vmem:[#allocation607_spill] sm:$0xff] %v13902_v60  ;;  %v16964_v51 = vld [vmem:[#allocation715_spill] sm:$0xff]  ;;  %v16967_v33 = vld [vmem:[#allocation720_spill] sm:$0xff] }
 0x4de   :  { %v13908_v38 = vpop.f32.mrf.mxu1  ;;  %v13910_v25 = vpop.f32.mrf.mxu0  ;;  %5470 = vmatmul.mubr.f32.gmra.mxu1 %v4489_v7  ;;  %5695 = vmatmul.mubr.f32.gmra.mxu0 %v4235_v57  ;;  %v16962_v57 = vld [vmem:[#allocation714_spill] sm:$0xff]  ;;  %v4251_v43 = vmul.f32 %v16964_v51, %v16963_v52 }
 0x4df   :  { %16948 = vst [vmem:[#allocation180_spill] sm:$0xff] %v13908_v38  ;;  %16949 = vst [vmem:[#allocation612_spill] sm:$0xff] %v13910_v25  ;;  %5474 = vmatprep.mubr.f32.mxu1 %v4498_v19  ;;  %5699 = vmatprep.mubr.f32.mxu0 %v4244_v49  ;;  %v16958_v38 = vld [vmem:[#allocation717_spill] sm:$0xff]  ;;  %v16961_v49 = vld [vmem:[#allocation218_spill] sm:$0xff] }
 0x4e0   :  { %v13916_v36 = vpop.f32.mrf.mxu1  ;;  %v5008_v39 = vpop.f32.mrf.mxu0  ;;  %v4252_v60 = vmul.f32 %v16958_v38, %v16957_v31  ;;  %v4505_v19 = vmul.f32 %v16962_v57, %v16961_v49  ;;  %v4514_v38 = vmul.f32 %v16967_v33, %v16966_v30  ;;  %v16968_v31 = vld [vmem:[#allocation225_spill] sm:$0xff]  ;;  %v16974_v49 = vld [vmem:[#allocation223_spill] sm:$0xff]  ;;  %v16977_v30 = vld [vmem:[#allocation228_spill] sm:$0xff] }
 0x4e1   :  { %16954 = vst [vmem:[#allocation6_spill] sm:$0xff] %v13916_v36  ;;  %v16975_v57 = vld [vmem:[#allocation719_spill] sm:$0xff]  ;;  %v16978_v33 = vld [vmem:[#allocation724_spill] sm:$0xff] }
 0x4e2   :  { %v13922_v25 = vpop.f32.mrf.mxu1  ;;  %v13924_v7 = vpop.f32.mrf.mxu0  ;;  %5475 = vmatmul.mubr.f32.gmra.mxu1 %v4497_v29  ;;  %5700 = vmatmul.mubr.f32.gmra.mxu0 %v4243_v45  ;;  %v16973_v45 = vld [vmem:[#allocation718_spill] sm:$0xff]  ;;  %v4259_v52 = vmul.f32 %v16975_v57, %v16974_v49 }
 0x4e3   :  { %16959 = vst [vmem:[#allocation613_spill] sm:$0xff] %v13922_v25  ;;  %16960 = vst [vmem:[#allocation178_spill] sm:$0xff] %v13924_v7  ;;  %5479 = vmatprep.mubr.f32.mxu1 %v4506_v27  ;;  %5704 = vmatprep.mubr.f32.mxu0 %v4252_v60  ;;  %v16969_v25 = vld [vmem:[#allocation721_spill] sm:$0xff]  ;;  %v16972_v60 = vld [vmem:[#allocation222_spill] sm:$0xff] }
 0x4e4   :  { %v13930_v48 = vpop.f32.mrf.mxu1  ;;  %v5013_v39 = vpop.f32.mrf.mxu0  ;;  %v4260_v36 = vmul.f32 %v16969_v25, %v16968_v31  ;;  %v4513_v27 = vmul.f32 %v16973_v45, %v16972_v60  ;;  %v4522_v25 = vmul.f32 %v16978_v33, %v16977_v30  ;;  %v16979_v31 = vld [vmem:[#allocation229_spill] sm:$0xff]  ;;  %v16985_v60 = vld [vmem:[#allocation227_spill] sm:$0xff]  ;;  %v16988_v30 = vld [vmem:[#allocation232_spill] sm:$0xff] }
 0x4e5   :  { %16965 = vst [vmem:[#allocation610_spill] sm:$0xff] %v13930_v48  ;;  %v16986_v45 = vld [vmem:[#allocation723_spill] sm:$0xff]  ;;  %v16989_v33 = vld [vmem:[#allocation728_spill] sm:$0xff] }
 0x4e6   :  { %v13936_v7 = vpop.f32.mrf.mxu1  ;;  %v13938_v29 = vpop.f32.mrf.mxu0  ;;  %5480 = vmatmul.mubr.f32.gmra.mxu1 %v4505_v19  ;;  %5705 = vmatmul.mubr.f32.gmra.mxu0 %v4251_v43  ;;  %v16984_v43 = vld [vmem:[#allocation722_spill] sm:$0xff]  ;;  %v4267_v49 = vmul.f32 %v16986_v45, %v16985_v60 }
 0x4e7   :  { %16970 = vst [vmem:[#allocation120_spill] sm:$0xff] %v13936_v7  ;;  %16971 = vst [vmem:[#allocation611_spill] sm:$0xff] %v13938_v29  ;;  %5484 = vmatprep.mubr.f32.mxu1 %v4514_v38  ;;  %5709 = vmatprep.mubr.f32.mxu0 %v4260_v36  ;;  %v16980_v7 = vld [vmem:[#allocation725_spill] sm:$0xff]  ;;  %v16983_v36 = vld [vmem:[#allocation226_spill] sm:$0xff] }
 0x4e8   :  { %v13944_v51 = vpop.f32.mrf.mxu1  ;;  %v5018_v39 = vpop.f32.mrf.mxu0  ;;  %v4268_v48 = vmul.f32 %v16980_v7, %v16979_v31  ;;  %v4521_v38 = vmul.f32 %v16984_v43, %v16983_v36  ;;  %v4530_v7 = vmul.f32 %v16989_v33, %v16988_v30  ;;  %v16990_v31 = vld [vmem:[#allocation233_spill] sm:$0xff]  ;;  %v16996_v36 = vld [vmem:[#allocation231_spill] sm:$0xff]  ;;  %v16999_v30 = vld [vmem:[#allocation236_spill] sm:$0xff] }
 0x4e9   :  { %16976 = vst [vmem:[#allocation184_spill] sm:$0xff] %v13944_v51  ;;  %v16997_v43 = vld [vmem:[#allocation727_spill] sm:$0xff]  ;;  %v17000_v33 = vld [vmem:[#allocation732_spill] sm:$0xff] }
 0x4ea   :  { %v13950_v29 = vpop.f32.mrf.mxu1  ;;  %v13952_v19 = vpop.f32.mrf.mxu0  ;;  %5485 = vmatmul.mubr.f32.gmra.mxu1 %v4513_v27  ;;  %5710 = vmatmul.mubr.f32.gmra.mxu0 %v4259_v52  ;;  %v16995_v52 = vld [vmem:[#allocation726_spill] sm:$0xff]  ;;  %v4275_v60 = vmul.f32 %v16997_v43, %v16996_v36 }
 0x4eb   :  { %16981 = vst [vmem:[#allocation616_spill] sm:$0xff] %v13950_v29  ;;  %16982 = vst [vmem:[#allocation7_spill] sm:$0xff] %v13952_v19  ;;  %5489 = vmatprep.mubr.f32.mxu1 %v4522_v25  ;;  %5714 = vmatprep.mubr.f32.mxu0 %v4268_v48  ;;  %v16991_v29 = vld [vmem:[#allocation729_spill] sm:$0xff]  ;;  %v16994_v48 = vld [vmem:[#allocation230_spill] sm:$0xff] }
 0x4ec   :  { %v13958_v57 = vpop.f32.mrf.mxu1  ;;  %v5023_v39 = vpop.f32.mrf.mxu0  ;;  %v4276_v51 = vmul.f32 %v16991_v29, %v16990_v31  ;;  %v4529_v25 = vmul.f32 %v16995_v52, %v16994_v48  ;;  %v4538_v29 = vmul.f32 %v17000_v33, %v16999_v30  ;;  %v17001_v31 = vld [vmem:[#allocation237_spill] sm:$0xff]  ;;  %v17007_v48 = vld [vmem:[#allocation235_spill] sm:$0xff]  ;;  %v17010_v30 = vld [vmem:[#allocation240_spill] sm:$0xff] }
 0x4ed   :  { %16987 = vst [vmem:[#allocation617_spill] sm:$0xff] %v13958_v57  ;;  %v17008_v52 = vld [vmem:[#allocation731_spill] sm:$0xff]  ;;  %v17011_v33 = vld [vmem:[#allocation736_spill] sm:$0xff] }
 0x4ee   :  { %v13964_v19 = vpop.f32.mrf.mxu1  ;;  %v13966_v27 = vpop.f32.mrf.mxu0  ;;  %5490 = vmatmul.mubr.f32.gmra.mxu1 %v4521_v38  ;;  %5715 = vmatmul.mubr.f32.gmra.mxu0 %v4267_v49  ;;  %v17006_v49 = vld [vmem:[#allocation730_spill] sm:$0xff]  ;;  %v4283_v36 = vmul.f32 %v17008_v52, %v17007_v48 }
 0x4ef   :  { %16992 = vst [vmem:[#allocation182_spill] sm:$0xff] %v13964_v19  ;;  %16993 = vst [vmem:[#allocation614_spill] sm:$0xff] %v13966_v27  ;;  %5494 = vmatprep.mubr.f32.mxu1 %v4530_v7  ;;  %5719 = vmatprep.mubr.f32.mxu0 %v4276_v51  ;;  %v17002_v19 = vld [vmem:[#allocation733_spill] sm:$0xff]  ;;  %v17005_v51 = vld [vmem:[#allocation234_spill] sm:$0xff] }
 0x4f0   :  { %v13972_v45 = vpop.f32.mrf.mxu1  ;;  %v5028_v39 = vpop.f32.mrf.mxu0  ;;  %v4284_v57 = vmul.f32 %v17002_v19, %v17001_v31  ;;  %v4537_v7 = vmul.f32 %v17006_v49, %v17005_v51  ;;  %v4546_v19 = vmul.f32 %v17011_v33, %v17010_v30  ;;  %v17012_v31 = vld [vmem:[#allocation241_spill] sm:$0xff]  ;;  %v17017_v51 = vld [vmem:[#allocation239_spill] sm:$0xff]  ;;  %v17020_v30 = vld [vmem:[#allocation244_spill] sm:$0xff] }
 0x4f1   :  { %16998 = vst [vmem:[#allocation122_spill] sm:$0xff] %v13972_v45  ;;  %v17018_v49 = vld [vmem:[#allocation735_spill] sm:$0xff]  ;;  %v17021_v33 = vld [vmem:[#allocation245_spill] sm:$0xff] }
 0x4f2   :  { %v13978_v27 = vpop.f32.mrf.mxu1  ;;  %v13980_v38 = vpop.f32.mrf.mxu0  ;;  %5495 = vmatmul.mubr.f32.gmra.mxu1 %v4529_v25  ;;  %5720 = vmatmul.mubr.f32.gmra.mxu0 %v4275_v60  ;;  %v17016_v60 = vld [vmem:[#allocation734_spill] sm:$0xff]  ;;  %v4291_v48 = vmul.f32 %v17018_v49, %v17017_v51 }
 0x4f3   :  { %17003 = vst [vmem:[#allocation615_spill] sm:$0xff] %v13978_v27  ;;  %17004 = vst [vmem:[#allocation12_spill] sm:$0xff] %v13980_v38  ;;  %5499 = vmatprep.mubr.f32.mxu1 %v4538_v29  ;;  %5724 = vmatprep.mubr.f32.mxu0 %v4284_v57  ;;  %v17013_v27 = vld [vmem:[#allocation737_spill] sm:$0xff]  ;;  %v17015_v57 = vld [vmem:[#allocation238_spill] sm:$0xff] }
 0x4f4   :  { %v13986_v43 = vpop.f32.mrf.mxu1  ;;  %v5033_v39 = vpop.f32.mrf.mxu0  ;;  %v4292_v45 = vmul.f32 %v17013_v27, %v17012_v31  ;;  %v4545_v29 = vmul.f32 %v17016_v60, %v17015_v57  ;;  %v4554_v27 = vmul.f32 %v12575_v47, %v17020_v30  ;;  %v17022_v31 = vld [vmem:[#allocation741_spill] sm:$0xff]  ;;  %v17026_v57 = vld [vmem:[#allocation243_spill] sm:$0xff] }
 0x4f5   :  { %17009 = vst [vmem:[#allocation620_spill] sm:$0xff] %v13986_v43  ;;  %v17027_v60 = vld [vmem:[#allocation739_spill] sm:$0xff] }
 0x4f6   :  { %v13992_v38 = vpop.f32.mrf.mxu1  ;;  %v13994_v25 = vpop.f32.mrf.mxu0  ;;  %5500 = vmatmul.mubr.f32.gmra.mxu1 %v4537_v7  ;;  %5725 = vmatmul.mubr.f32.gmra.mxu0 %v4283_v36  ;;  %v17025_v36 = vld [vmem:[#allocation738_spill] sm:$0xff]  ;;  %v4299_v51 = vmul.f32 %v17027_v60, %v17026_v57 }
 0x4f7   :  { %17014 = vst [vmem:[#allocation125_spill] sm:$0xff] %v13992_v38  ;;  %5504 = vmatprep.mubr.f32.mxu1 %v4546_v19  ;;  %5729 = vmatprep.mubr.f32.mxu0 %v4292_v45  ;;  %v4300_v38 = vmul.f32 %v17022_v31, %v17021_v33  ;;  %v17024_v45 = vld [vmem:[#allocation242_spill] sm:$0xff]  ;;  %v17030_v33 = vld [vmem:[#allocation249_spill] sm:$0xff] }
 0x4f8   :  { %v14000_v52 = vpop.f32.mrf.mxu1  ;;  %v5038_v39 = vpop.f32.mrf.mxu0  ;;  %v4553_v19 = vmul.f32 %v17025_v36, %v17024_v45  ;;  %v4308_v31 = vmul.f32 %v12600_v21, %v17030_v33  ;;  %v17034_v45 = vld [vmem:[#allocation247_spill] sm:$0xff]  ;;  %v17035_v36 = vld [vmem:[#allocation742_spill] sm:$0xff] }
 0x4f9   :  { %17019 = vst [vmem:[#allocation621_spill] sm:$0xff] %v14000_v52  ;;  %v17029_v39 = vld [vmem:[#allocation248_spill] sm:$0xff]  ;;  %v4307_v57 = vmul.f32 %v17035_v36, %v17034_v45  ;;  %v17190_v52 = vld [vmem:[#allocation81_spill] sm:$0xff] }
 0x4fa   :  { %v14006_v43 = vpop.f32.mrf.mxu1  ;;  %v14008_v7 = vpop.f32.mrf.mxu0  ;;  %5505 = vmatmul.mubr.f32.gmra.mxu1 %v4545_v29  ;;  %5730 = vmatmul.mubr.f32.gmra.mxu0 %v4291_v48  ;;  %v4562_v30 = vmul.f32 %v12598_v12, %v17029_v39  ;;  %v17033_v48 = vld [vmem:[#allocation11_spill] sm:$0xff]  ;;  %v17038_v39 = vld [vmem:[#allocation253_spill] sm:$0xff] }
 0x4fb   :  { %17023 = vst [vmem:[#allocation10_spill] sm:$0xff] %v14006_v43  ;;  %5509 = vmatprep.mubr.f32.mxu1 %v4554_v27  ;;  %5734 = vmatprep.mubr.f32.mxu0 %v4300_v38  ;;  %v17032_v38 = vld [vmem:[#allocation246_spill] sm:$0xff]  ;;  %v4316_v33 = vmul.f32 %v12619_v41, %v17038_v39  ;;  %v17045_v39 = vld [vmem:[#allocation257_spill] sm:$0xff] }
 0x4fc   :  { %v14014_v49 = vpop.f32.mrf.mxu1  ;;  %v5043_v47 = vpop.f32.mrf.mxu0  ;;  %v4561_v27 = vmul.f32 %v17033_v48, %v17032_v38  ;;  %v17042_v48 = vld [vmem:[#allocation9_spill] sm:$0xff] }
 0x4fd   :  { %17028 = vst [vmem:[#allocation618_spill] sm:$0xff] %v14014_v49  ;;  %v17037_v47 = vld [vmem:[#allocation252_spill] sm:$0xff] }
 0x4fe   :  { %v14020_v43 = vpop.f32.mrf.mxu1  ;;  %v14022_v29 = vpop.f32.mrf.mxu0  ;;  %5510 = vmatmul.mubr.f32.gmra.mxu1 %v4553_v19  ;;  %5735 = vmatmul.mubr.f32.gmra.mxu0 %v4299_v51  ;;  %v4570_v21 = vmul.f32 %v12617_v23, %v17037_v47  ;;  %v14037_v19 = vld [vmem:[%s15540_s5] ss:$0 sm:$0xff]  ;;  %v17041_v23 = vld [vmem:[#allocation251_spill] sm:$0xff] }
 0x4ff   :  { %17031 = vst [vmem:[#allocation124_spill] sm:$0xff] %v14020_v43  ;;  %5514 = vmatprep.mubr.f32.mxu1 %v4562_v30  ;;  %5739 = vmatprep.mubr.f32.mxu0 %v4308_v31  ;;  %v17040_v31 = vld [vmem:[#allocation250_spill] sm:$0xff]  ;;  %v4315_v45 = vmul.f32 %v17042_v48, %v17041_v23  ;;  %v17047_v23 = vld [vmem:[#allocation255_spill] sm:$0xff]  ;;  %v17178_v43 = vld [vmem:[#allocation333_spill] sm:$0xff] }
 0x500   :  { %v14028_v60 = vpop.f32.mrf.mxu1  ;;  %v5048_v12 = vpop.f32.mrf.mxu0  ;;  %v4569_v38 = vmul.f32 %v12608_v20, %v17040_v31 }
 0x501   :  { %17036 = vst [vmem:[#allocation619_spill] sm:$0xff] %v14028_v60  ;;  %v17044_v12 = vld [vmem:[#allocation256_spill] sm:$0xff]  ;;  %v17179_v60 = vld [vmem:[#allocation77_spill] sm:$0xff] }
 0x502   :  { %v14039_v51 = vpop.f32.mrf.mxu1  ;;  %v14041_v30 = vpop.f32.mrf.mxu0  ;;  %5515 = vmatmul.mubr.f32.gmra.mxu1 %v4561_v27  ;;  %5740 = vmatmul.mubr.f32.gmra.mxu0 %v4307_v57  ;;  %v4578_v47 = vmul.f32 %v12633_v15, %v17044_v12  ;;  %v4897_v27 = vadd.f32 %v14037_v19, %v13542_v46  ;;  %v4323_v15 = vmul.f32 %v12626_v26, %v17047_v23  ;;  %v17049_v12 = vld [vmem:[#allocation261_spill] sm:$0xff]  ;;  %v17050_v26 = vld [vmem:[#allocation258_spill] sm:$0xff] }
 0x503   :  { %17039 = vst [vmem:[#allocation14_spill] sm:$0xff] %v14039_v51  ;;  %5519 = vmatprep.mubr.f32.mxu1 %v4570_v21  ;;  %5744 = vmatprep.mubr.f32.mxu0 %v4316_v33  ;;  %v4324_v51 = vmul.f32 %v12635_v59, %v17045_v39  ;;  %v17046_v33 = vld [vmem:[#allocation254_spill] sm:$0xff]  ;;  %v4332_v39 = vmul.f32 %v12653_v1, %v17049_v12  ;;  %v17053_v23 = vld [vmem:[#allocation265_spill] sm:$0xff] }
 0x504   :  { %v14047_v41 = vpop.f32.mrf.mxu1  ;;  %v5053_v36 = vpop.f32.mrf.mxu0  ;;  %v4577_v31 = vmul.f32 %v12624_v58, %v17046_v33  ;;  %v17052_v33 = vld [vmem:[#allocation264_spill] sm:$0xff]  ;;  %v4222_v49 = vmul.f32 %v17179_v60, %v17178_v43 }
 0x505   :  { %17043 = vst [vmem:[#allocation624_spill] sm:$0xff] %v14047_v41  ;;  %v17048_v36 = vld [vmem:[#allocation260_spill] sm:$0xff] }
 0x506   :  { %v14055_v57 = vpop.f32.mrf.mxu0  ;;  %v5281_v21 = vpop.f32.mrf.mxu1  ;;  %5520 = vmatmul.mubr.f32.gmra.mxu1 %v4569_v38  ;;  %5745 = vmatmul.mubr.f32.gmra.mxu0 %v4315_v45  ;;  %v4586_v46 = vmul.f32 %v12651_v0, %v17048_v36  ;;  %v4902_v38 = vadd.f32 %v14037_v19, %v13560_v50  ;;  %v6437_v50 = vld [vmem:[%s15541_s6 + $0x18] sm:$0xff]  ;;  %v17054_v36 = vld [vmem:[#allocation262_spill] sm:$0xff]  ;;  %v17187_v60 = vld [vmem:[#allocation336_spill] sm:$0xff] }
 0x507   :  { %v14057_v20 = vadd.f32 %v5281_v21, %v4897_v27  ;;  %5524 = vmatprep.mubr.f32.mxu1 %v4578_v47  ;;  %5749 = vmatprep.mubr.f32.mxu0 %v4324_v51  ;;  %v4585_v47 = vmul.f32 %v12642_v62, %v17050_v26  ;;  %v17051_v27 = vld [vmem:[#allocation259_spill] sm:$0xff] }
 0x508   :  { %v5058_v48 = vpop.f32.mrf.mxu0  ;;  %v5283_v59 = vpop.f32.mrf.mxu1  ;;  %v4331_v0 = vmul.f32 %v12644_v11, %v17051_v27  ;;  %7800 = vmatprep.subr.mxu0 %v6437_v50 }
 0x509   :  { %v4907_v48 = vadd.f32 %v14037_v19, %v13578_v32  ;;  %7801 = vmatpush3.msra.mxu0 %v6437_v50  ;;  %v17056_v32 = vld [vmem:[#allocation268_spill] sm:$0xff] }
 0x50a   :  { %v14069_v45 = vpop.f32.mrf.mxu0  ;;  %v5286_v51 = vpop.f32.mrf.mxu1  ;;  %5525 = vmatmul.mubr.f32.gmra.mxu1 %v4577_v31  ;;  %5750 = vmatmul.mubr.f32.gmra.mxu0 %v4323_v15  ;;  %v4594_v31 = vmul.f32 %v12667_v9, %v17052_v33  ;;  %v4340_v15 = vmul.f32 %v12669_v14, %v17053_v23  ;;  %v17055_v9 = vld [vmem:[#allocation263_spill] sm:$0xff]  ;;  %v17060_v33 = vld [vmem:[#allocation272_spill] sm:$0xff] }
 0x50b   :  { %v14071_v58 = vadd.f32 %v5286_v51, %v4902_v38  ;;  %5529 = vmatprep.mubr.f32.mxu1 %v4586_v46  ;;  %5754 = vmatprep.mubr.f32.mxu0 %v4332_v39  ;;  %v4593_v46 = vmul.f32 %v12658_v5, %v17054_v36  ;;  %v4339_v12 = vmul.f32 %v12660_v4, %v17055_v9  ;;  %v17057_v51 = vld [vmem:[#allocation269_spill] sm:$0xff]  ;;  %v17058_v4 = vld [vmem:[#allocation266_spill] sm:$0xff] }
 0x50c   :  { %v5063_v21 = vpop.f32.mrf.mxu0  ;;  %v5288_v1 = vpop.f32.mrf.mxu1  ;;  %v4602_v38 = vmul.f32 %v12685_v13, %v17056_v32  ;;  %v4348_v26 = vmul.f32 %v12687_v18, %v17057_v51 }
 0x50d   :  { %v4601_v21 = vmul.f32 %v12676_v17, %v17058_v4  ;;  %v17059_v1 = vld [vmem:[#allocation267_spill] sm:$0xff] }
 0x50e   :  { %v14086_v62 = vpop.f32.mrf.mxu0  ;;  %v5291_v59 = vpop.f32.mrf.mxu1  ;;  %5530 = vmatmul.mubr.f32.gmra.mxu1 %v4585_v47  ;;  %5755 = vmatmul.mubr.f32.gmra.mxu0 %v4331_v0  ;;  %v4912_v47 = vadd.f32 %v14037_v19, %v13596_v54  ;;  %v4347_v13 = vmul.f32 %v12678_v8, %v17059_v1  ;;  %v4610_v54 = vmul.f32 %v12701_v16, %v17060_v33  ;;  %v17062_v8 = vld [vmem:[#allocation270_spill] sm:$0xff]  ;;  %v17069_v4 = vld [vmem:[#allocation275_spill] sm:$0xff] }
 0x50f   :  { %v14088_v11 = vadd.f32 %v5291_v59, %v4907_v48  ;;  %5534 = vmatprep.mubr.f32.mxu1 %v4594_v31  ;;  %5759 = vmatprep.mubr.f32.mxu0 %v4340_v15  ;;  %v17061_v31 = vld [vmem:[#allocation273_spill] sm:$0xff]  ;;  %v4917_v15 = vadd.f32 %v14037_v19, %v13614_v37  ;;  %v4609_v36 = vmul.f32 %v12692_v42, %v17062_v8  ;;  %v17073_v33 = vld [vmem:[#allocation30_spill] sm:$0xff] }
 0x510   :  { %v5068_v14 = vpop.f32.mrf.mxu0  ;;  %v5293_v39 = vpop.f32.mrf.mxu1  ;;  %v4356_v23 = vmul.f32 %v12703_v10, %v17061_v31  ;;  %v4927_v31 = vadd.f32 %v14037_v19, %v13650_v44  ;;  %v17074_v8 = vld [vmem:[#allocation278_spill] sm:$0xff] }
 0x511   :  { %v17065_v14 = vld [vmem:[#allocation277_spill] sm:$0xff] }
 0x512   :  { %v14100_v27 = vpop.f32.mrf.mxu0  ;;  %v5296_v0 = vpop.f32.mrf.mxu1  ;;  %5535 = vmatmul.mubr.f32.gmra.mxu1 %v4593_v46  ;;  %5760 = vmatmul.mubr.f32.gmra.mxu0 %v4339_v12  ;;  %v17063_v46 = vld [vmem:[#allocation271_spill] sm:$0xff]  ;;  %v17064_v12 = vld [vmem:[#allocation276_spill] sm:$0xff]  ;;  %v17066_v39 = vld [vmem:[#allocation21_spill] sm:$0xff] }
 0x513   :  { %v14102_v5 = vadd.f32 %v5296_v0, %v4912_v47  ;;  %5539 = vmatprep.mubr.f32.mxu1 %v4602_v38  ;;  %5764 = vmatprep.mubr.f32.mxu0 %v4348_v26  ;;  %v4355_v16 = vmul.f32 %v12694_v28, %v17063_v46  ;;  %v4618_v37 = vmul.f32 %v12719_v6, %v17064_v12  ;;  %v17067_v28 = vld [vmem:[#allocation274_spill] sm:$0xff]  ;;  %v17068_v47 = vld [vmem:[#allocation15_spill] sm:$0xff] }
 0x514   :  { %v5073_v50 = vpop.f32.mrf.mxu0  ;;  %v5298_v18 = vpop.f32.mrf.mxu1  ;;  %v4364_v32 = vmul.f32 %v17066_v39, %v17065_v14  ;;  %v4922_v38 = vadd.f32 %v14037_v19, %v13632_v55  ;;  %v4617_v0 = vmul.f32 %v17068_v47, %v17067_v28  ;;  %v17070_v6 = vld [vmem:[#allocation18_spill] sm:$0xff]  ;;  %v17079_v14 = vld [vmem:[#allocation285_spill] sm:$0xff] }
 0x515   :  { %v17071_v50 = vld [vmem:[#allocation280_spill] sm:$0xff]  ;;  %v17072_v18 = vld [vmem:[#allocation281_spill] sm:$0xff] }
 0x516   :  { %v14114_v48 = vpop.f32.mrf.mxu0  ;;  %v5301_v59 = vpop.f32.mrf.mxu1  ;;  %5540 = vmatmul.mubr.f32.gmra.mxu1 %v4601_v21  ;;  %5765 = vmatmul.mubr.f32.gmra.mxu0 %v4347_v13  ;;  %v4363_v21 = vmul.f32 %v17070_v6, %v17069_v4  ;;  %v4626_v55 = vmul.f32 %v12735_v22, %v17071_v50  ;;  %v17077_v22 = vld [vmem:[#allocation27_spill] sm:$0xff]  ;;  %v17080_v39 = vld [vmem:[#allocation33_spill] sm:$0xff] }
 0x517   :  { %v14116_v17 = vadd.f32 %v5301_v59, %v4917_v15  ;;  %5544 = vmatprep.mubr.f32.mxu1 %v4610_v54  ;;  %5769 = vmatprep.mubr.f32.mxu0 %v4356_v23  ;;  %v4372_v54 = vmul.f32 %v17073_v33, %v17072_v18  ;;  %v17082_v4 = vld [vmem:[#allocation35_spill] sm:$0xff]  ;;  %v17086_v18 = vld [vmem:[#allocation289_spill] sm:$0xff] }
 0x518   :  { %v5078_v9 = vpop.f32.mrf.mxu0  ;;  %v5303_v10 = vpop.f32.mrf.mxu1  ;;  %v17087_v33 = vld [vmem:[#allocation465_spill] sm:$0xff] }
 0x51a   :  { %v14128_v51 = vpop.f32.mrf.mxu0  ;;  %v5306_v26 = vpop.f32.mrf.mxu1  ;;  %5545 = vmatmul.mubr.f32.gmra.mxu1 %v4609_v36  ;;  %5770 = vmatmul.mubr.f32.gmra.mxu0 %v4355_v16  ;;  %v17075_v36 = vld [vmem:[#allocation24_spill] sm:$0xff]  ;;  %v17076_v16 = vld [vmem:[#allocation279_spill] sm:$0xff] }
 0x51b   :  { %v14130_v42 = vadd.f32 %v5306_v26, %v4922_v38  ;;  %5549 = vmatprep.mubr.f32.mxu1 %v4618_v37  ;;  %5774 = vmatprep.mubr.f32.mxu0 %v4364_v32  ;;  %v4625_v46 = vmul.f32 %v17075_v36, %v17074_v8  ;;  %v4371_v9 = vmul.f32 %v17077_v22, %v17076_v16  ;;  %v17078_v37 = vld [vmem:[#allocation284_spill] sm:$0xff]  ;;  %v17089_v16 = vld [vmem:[#allocation459_spill] sm:$0xff] }
 0x51c   :  { %v5083_v1 = vpop.f32.mrf.mxu0  ;;  %v5308_v13 = vpop.f32.mrf.mxu1  ;;  %v4634_v44 = vmul.f32 %v12753_v2, %v17078_v37  ;;  %v4380_v32 = vmul.f32 %v17080_v39, %v17079_v14  ;;  %v4932_v38 = vadd.f32 %v14037_v19, %v13668_v24  ;;  %v17084_v2 = vld [vmem:[#allocation461_spill] sm:$0xff]  ;;  %v17094_v39 = vld [vmem:[#allocation43_spill] sm:$0xff] }
 0x51d   :  { %v17093_v14 = vld [vmem:[#allocation293_spill] sm:$0xff] }
 0x51e   :  { %v14142_v23 = vpop.f32.mrf.mxu0  ;;  %v5311_v15 = vpop.f32.mrf.mxu1  ;;  %5550 = vmatmul.mubr.f32.gmra.mxu1 %v4617_v0  ;;  %5775 = vmatmul.mubr.f32.gmra.mxu0 %v4363_v21  ;;  %v17081_v0 = vld [vmem:[#allocation282_spill] sm:$0xff]  ;;  %v17083_v21 = vld [vmem:[#allocation283_spill] sm:$0xff] }
 0x51f   :  { %v14144_v59 = vadd.f32 %v5311_v15, %v4927_v31  ;;  %5554 = vmatprep.mubr.f32.mxu1 %v4626_v55  ;;  %5779 = vmatprep.mubr.f32.mxu0 %v4372_v54  ;;  %v4633_v6 = vmul.f32 %v17082_v4, %v17081_v0  ;;  %v4379_v1 = vmul.f32 %v17084_v2, %v17083_v21  ;;  %v17085_v55 = vld [vmem:[#allocation288_spill] sm:$0xff]  ;;  %v17096_v21 = vld [vmem:[#allocation37_spill] sm:$0xff] }
 0x520   :  { %v5088_v10 = vpop.f32.mrf.mxu0  ;;  %v5313_v12 = vpop.f32.mrf.mxu1  ;;  %v4642_v24 = vmul.f32 %v12769_v61, %v17085_v55  ;;  %v4388_v54 = vmul.f32 %v17087_v33, %v17086_v18  ;;  %v4937_v31 = vadd.f32 %v14037_v19, %v13686_v35  ;;  %v17091_v61 = vld [vmem:[#allocation39_spill] sm:$0xff]  ;;  %v17100_v18 = vld [vmem:[#allocation297_spill] sm:$0xff] }
 0x521   :  { %v17101_v33 = vld [vmem:[#allocation467_spill] sm:$0xff] }
 0x522   :  { %v14156_v26 = vpop.f32.mrf.mxu0  ;;  %v5316_v28 = vpop.f32.mrf.mxu1  ;;  %5555 = vmatmul.mubr.f32.gmra.mxu1 %v4625_v46  ;;  %5780 = vmatmul.mubr.f32.gmra.mxu0 %v4371_v9  ;;  %v17088_v46 = vld [vmem:[#allocation286_spill] sm:$0xff]  ;;  %v17090_v9 = vld [vmem:[#allocation287_spill] sm:$0xff] }
 0x523   :  { %v14158_v47 = vadd.f32 %v5316_v28, %v4932_v38  ;;  %5559 = vmatprep.mubr.f32.mxu1 %v4634_v44  ;;  %5784 = vmatprep.mubr.f32.mxu0 %v4380_v32  ;;  %v4641_v22 = vmul.f32 %v17089_v16, %v17088_v46  ;;  %v4387_v10 = vmul.f32 %v17091_v61, %v17090_v9  ;;  %v17092_v44 = vld [vmem:[#allocation292_spill] sm:$0xff]  ;;  %v17103_v9 = vld [vmem:[#allocation469_spill] sm:$0xff] }
 0x524   :  { %v5093_v13 = vpop.f32.mrf.mxu0  ;;  %v5318_v50 = vpop.f32.mrf.mxu1  ;;  %v4650_v35 = vmul.f32 %v12787_v3, %v17092_v44  ;;  %v4396_v32 = vmul.f32 %v17094_v39, %v17093_v14  ;;  %v4942_v38 = vadd.f32 %v14037_v19, %v13704_v34  ;;  %v17098_v3 = vld [vmem:[#allocation463_spill] sm:$0xff]  ;;  %v17107_v14 = vld [vmem:[#allocation301_spill] sm:$0xff] }
 0x525   :  { %v17108_v39 = vld [vmem:[#allocation45_spill] sm:$0xff] }
 0x526   :  { %v14170_v15 = vpop.f32.mrf.mxu0  ;;  %v5321_v8 = vpop.f32.mrf.mxu1  ;;  %5560 = vmatmul.mubr.f32.gmra.mxu1 %v4633_v6  ;;  %5785 = vmatmul.mubr.f32.gmra.mxu0 %v4379_v1  ;;  %v17095_v6 = vld [vmem:[#allocation290_spill] sm:$0xff]  ;;  %v17097_v1 = vld [vmem:[#allocation291_spill] sm:$0xff] }
 0x527   :  { %v14172_v36 = vadd.f32 %v5321_v8, %v4937_v31  ;;  %5564 = vmatprep.mubr.f32.mxu1 %v4642_v24  ;;  %5789 = vmatprep.mubr.f32.mxu0 %v4388_v54  ;;  %v4649_v2 = vmul.f32 %v17096_v21, %v17095_v6  ;;  %v4395_v13 = vmul.f32 %v17098_v3, %v17097_v1  ;;  %v17099_v24 = vld [vmem:[#allocation296_spill] sm:$0xff]  ;;  %v17110_v1 = vld [vmem:[#allocation298_spill] sm:$0xff]  ;;  %v17111_v3 = vld [vmem:[#allocation47_spill] sm:$0xff] }
 0x528   :  { %v5098_v12 = vpop.f32.mrf.mxu0  ;;  %v5323_v37 = vpop.f32.mrf.mxu1  ;;  %v4658_v34 = vmul.f32 %v12803_v56, %v17099_v24  ;;  %v4404_v54 = vmul.f32 %v17101_v33, %v17100_v18  ;;  %v4947_v31 = vadd.f32 %v14037_v19, %v13722_v63  ;;  %v17105_v56 = vld [vmem:[#allocation41_spill] sm:$0xff]  ;;  %v17114_v18 = vld [vmem:[#allocation304_spill] sm:$0xff] }
 0x529   :  { %v17115_v33 = vld [vmem:[#allocation477_spill] sm:$0xff] }
 0x52a   :  { %v14184_v28 = vpop.f32.mrf.mxu0  ;;  %v5326_v0 = vpop.f32.mrf.mxu1  ;;  %5565 = vmatmul.mubr.f32.gmra.mxu1 %v4641_v22  ;;  %5790 = vmatmul.mubr.f32.gmra.mxu0 %v4387_v10  ;;  %v17102_v22 = vld [vmem:[#allocation294_spill] sm:$0xff]  ;;  %v17104_v10 = vld [vmem:[#allocation295_spill] sm:$0xff] }
 0x52b   :  { %v14186_v4 = vadd.f32 %v5326_v0, %v4942_v38  ;;  %5569 = vmatprep.mubr.f32.mxu1 %v4650_v35  ;;  %5794 = vmatprep.mubr.f32.mxu0 %v4396_v32  ;;  %v4657_v61 = vmul.f32 %v17103_v9, %v17102_v22  ;;  %v4403_v12 = vmul.f32 %v17105_v56, %v17104_v10  ;;  %v17106_v35 = vld [vmem:[#allocation300_spill] sm:$0xff]  ;;  %v17118_v9 = vld [vmem:[#allocation162_spill] sm:$0xff] }
 0x52c   :  { %v5103_v50 = vpop.f32.mrf.mxu0  ;;  %v5328_v55 = vpop.f32.mrf.mxu1  ;;  %v4666_v63 = vmul.f32 %v12821_v40, %v17106_v35  ;;  %v4412_v32 = vmul.f32 %v17108_v39, %v17107_v14  ;;  %v17109_v38 = vld [vmem:[#allocation596_spill] sm:$0xff]  ;;  %v17113_v40 = vld [vmem:[#allocation473_spill] sm:$0xff]  ;;  %v17122_v14 = vld [vmem:[#allocation51_spill] sm:$0xff] }
 0x52d   :  { %v4952_v0 = vadd.f32 %v14037_v19, %v17109_v38  ;;  %v17112_v50 = vld [vmem:[#allocation299_spill] sm:$0xff] }
 0x52e   :  { %v14198_v8 = vpop.f32.mrf.mxu0  ;;  %v5331_v46 = vpop.f32.mrf.mxu1  ;;  %5570 = vmatmul.mubr.f32.gmra.mxu1 %v4649_v2  ;;  %5795 = vmatmul.mubr.f32.gmra.mxu0 %v4395_v13  ;;  %v4665_v13 = vmul.f32 %v17111_v3, %v17110_v1  ;;  %v4411_v55 = vmul.f32 %v17113_v40, %v17112_v50  ;;  %v17125_v3 = vld [vmem:[#allocation309_spill] sm:$0xff] }
 0x52f   :  { %v14200_v16 = vadd.f32 %v5331_v46, %v4947_v31  ;;  %5574 = vmatprep.mubr.f32.mxu1 %v4658_v34  ;;  %5799 = vmatprep.mubr.f32.mxu0 %v4404_v54  ;;  %v4674_v54 = vmul.f32 %v17115_v33, %v17114_v18  ;;  %v17116_v31 = vld [vmem:[#allocation305_spill] sm:$0xff]  ;;  %v17128_v33 = vld [vmem:[#allocation306_spill] sm:$0xff] }
 0x530   :  { %v5108_v37 = vpop.f32.mrf.mxu0  ;;  %v5333_v44 = vpop.f32.mrf.mxu1  ;;  %v17117_v46 = vld [vmem:[#allocation49_spill] sm:$0xff] }
 0x531   :  { %v4420_v22 = vmul.f32 %v17117_v46, %v17116_v31  ;;  %v17119_v37 = vld [vmem:[#allocation302_spill] sm:$0xff]  ;;  %v17120_v44 = vld [vmem:[#allocation471_spill] sm:$0xff]  ;;  %v17126_v50 = vld [vmem:[#allocation53_spill] sm:$0xff] }
 0x532   :  { %v14212_v6 = vpop.f32.mrf.mxu0  ;;  %v5336_v21 = vpop.f32.mrf.mxu1  ;;  %5575 = vmatmul.mubr.f32.gmra.mxu1 %v4657_v61  ;;  %5800 = vmatmul.mubr.f32.gmra.mxu0 %v4403_v12  ;;  %v4957_v61 = vadd.f32 %v14037_v19, %v17118_v9  ;;  %v4673_v35 = vmul.f32 %v17120_v44, %v17119_v37  ;;  %v4428_v40 = vmul.f32 %v17126_v50, %v17125_v3  ;;  %v17130_v46 = vld [vmem:[#allocation307_spill] sm:$0xff]  ;;  %v17132_v37 = vld [vmem:[#allocation312_spill] sm:$0xff]  ;;  %v17133_v44 = vld [vmem:[#allocation485_spill] sm:$0xff] }
 0x533   :  { %v14214_v2 = vadd.f32 %v5336_v21, %v4952_v0  ;;  %5579 = vmatprep.mubr.f32.mxu1 %v4666_v63  ;;  %5804 = vmatprep.mubr.f32.mxu0 %v4412_v32  ;;  %v17121_v63 = vld [vmem:[#allocation303_spill] sm:$0xff]  ;;  %v17123_v0 = vld [vmem:[#allocation308_spill] sm:$0xff]  ;;  %v17124_v21 = vld [vmem:[#allocation481_spill] sm:$0xff] }
 0x534   :  { %v5113_v24 = vpop.f32.mrf.mxu0  ;;  %v5338_v34 = vpop.f32.mrf.mxu1  ;;  %v4419_v39 = vmul.f32 %v17122_v14, %v17121_v63  ;;  %v4682_v1 = vmul.f32 %v17124_v21, %v17123_v0  ;;  %v4690_v63 = vmul.f32 %v17133_v44, %v17132_v37  ;;  %v17134_v14 = vld [vmem:[#allocation313_spill] sm:$0xff]  ;;  %v17137_v3 = vld [vmem:[#allocation310_spill] sm:$0xff]  ;;  %v17138_v50 = vld [vmem:[#allocation479_spill] sm:$0xff] }
 0x535   :  { %v17144_v37 = vld [vmem:[#allocation61_spill] sm:$0xff] }
 0x536   :  { %v14226_v10 = vpop.f32.mrf.mxu0  ;;  %v5341_v56 = vpop.f32.mrf.mxu1  ;;  %5580 = vmatmul.mubr.f32.gmra.mxu1 %v4665_v13  ;;  %5805 = vmatmul.mubr.f32.gmra.mxu0 %v4411_v55  ;;  %v17127_v13 = vld [vmem:[#allocation595_spill] sm:$0xff] }
 0x537   :  { %v14228_v12 = vadd.f32 %v5341_v56, %v4957_v61  ;;  %5584 = vmatprep.mubr.f32.mxu1 %v4674_v54  ;;  %5809 = vmatprep.mubr.f32.mxu0 %v4420_v22  ;;  %v4962_v55 = vadd.f32 %v14037_v19, %v17127_v13  ;;  %v17129_v54 = vld [vmem:[#allocation475_spill] sm:$0xff] }
 0x538   :  { %v5118_v32 = vpop.f32.mrf.mxu0  ;;  %v5343_v38 = vpop.f32.mrf.mxu1  ;;  %v4681_v31 = vmul.f32 %v17129_v54, %v17128_v33  ;;  %v17131_v22 = vld [vmem:[#allocation55_spill] sm:$0xff] }
 0x539   :  { %v4427_v9 = vmul.f32 %v17131_v22, %v17130_v46  ;;  %v17135_v32 = vld [vmem:[#allocation57_spill] sm:$0xff]  ;;  %v17139_v13 = vld [vmem:[#allocation311_spill] sm:$0xff]  ;;  %v17141_v46 = vld [vmem:[#allocation316_spill] sm:$0xff] }
 0x53a   :  { %v14240_v24 = vpop.f32.mrf.mxu0  ;;  %v5346_v34 = vpop.f32.mrf.mxu1  ;;  %5585 = vmatmul.mubr.f32.gmra.mxu1 %v4673_v35  ;;  %5810 = vmatmul.mubr.f32.gmra.mxu0 %v4419_v39  ;;  %v4436_v38 = vmul.f32 %v17135_v32, %v17134_v14  ;;  %v17136_v35 = vld [vmem:[#allocation112_spill] sm:$0xff]  ;;  %v17142_v22 = vld [vmem:[#allocation489_spill] sm:$0xff]  ;;  %v17145_v32 = vld [vmem:[#allocation314_spill] sm:$0xff] }
 0x53b   :  { %v14242_v18 = vadd.f32 %v5346_v34, %v4962_v55  ;;  %5589 = vmatprep.mubr.f32.mxu1 %v4682_v1  ;;  %5814 = vmatprep.mubr.f32.mxu0 %v4428_v40  ;;  %v4967_v39 = vadd.f32 %v14037_v19, %v17136_v35  ;;  %v4689_v40 = vmul.f32 %v17138_v50, %v17137_v3  ;;  %v17140_v55 = vld [vmem:[#allocation59_spill] sm:$0xff] }
 0x53c   :  { %v5123_v61 = vpop.f32.mrf.mxu0  ;;  %v5348_v56 = vpop.f32.mrf.mxu1  ;;  %v4435_v34 = vmul.f32 %v17140_v55, %v17139_v13  ;;  %v17149_v55 = vld [vmem:[#allocation320_spill] sm:$0xff] }
 0x53d   :  { %v4444_v61 = vmul.f32 %v17142_v22, %v17141_v46  ;;  %v17143_v56 = vld [vmem:[#allocation317_spill] sm:$0xff] }
 0x53e   :  { %v14254_v0 = vpop.f32.mrf.mxu0  ;;  %v5351_v21 = vpop.f32.mrf.mxu1  ;;  %5590 = vmatmul.mubr.f32.gmra.mxu1 %v4681_v31  ;;  %5815 = vmatmul.mubr.f32.gmra.mxu0 %v4427_v9  ;;  %v4190_v44 = vmul.f32 %v17144_v37, %v17143_v56  ;;  %v4972_v31 = vadd.f32 %v14037_v19, %v13812_v53  ;;  %v17152_v46 = vld [vmem:[#allocation65_spill] sm:$0xff] }
 0x53f   :  { %v14256_v1 = vadd.f32 %v5351_v21, %v4967_v39  ;;  %5594 = vmatprep.mubr.f32.mxu1 %v4690_v63  ;;  %5819 = vmatprep.mubr.f32.mxu0 %v4436_v38  ;;  %v17146_v38 = vld [vmem:[#allocation483_spill] sm:$0xff] }
 0x540   :  { %v5128_v33 = vpop.f32.mrf.mxu0  ;;  %v5353_v54 = vpop.f32.mrf.mxu1  ;;  %v4443_v35 = vmul.f32 %v17146_v38, %v17145_v32  ;;  %v17147_v39 = vld [vmem:[#allocation315_spill] sm:$0xff] }
 0x541   :  { %v17148_v21 = vld [vmem:[#allocation63_spill] sm:$0xff]  ;;  %v17150_v33 = vld [vmem:[#allocation493_spill] sm:$0xff] }
 0x542   :  { %v14268_v9 = vpop.f32.mrf.mxu0  ;;  %v5356_v63 = vpop.f32.mrf.mxu1  ;;  %5595 = vmatmul.mubr.f32.gmra.mxu1 %v4689_v40  ;;  %5820 = vmatmul.mubr.f32.gmra.mxu0 %v4435_v34  ;;  %v4189_v3 = vmul.f32 %v17148_v21, %v17147_v39  ;;  %v4452_v53 = vmul.f32 %v17150_v33, %v17149_v55  ;;  %v17151_v54 = vld [vmem:[#allocation321_spill] sm:$0xff]  ;;  %v17153_v40 = vld [vmem:[#allocation599_spill] sm:$0xff] }
 0x543   :  { %v14270_v14 = vadd.f32 %v5356_v63, %v4972_v31  ;;  %5824 = vmatprep.mubr.f32.mxu0 %v4444_v61  ;;  %6049 = vmatprep.mubr.f32.mxu1 %v4190_v44  ;;  %v4198_v22 = vmul.f32 %v17152_v46, %v17151_v54  ;;  %v4977_v34 = vadd.f32 %v14037_v19, %v17153_v40  ;;  %v17154_v44 = vld [vmem:[#allocation318_spill] sm:$0xff]  ;;  %v17155_v31 = vld [vmem:[#allocation487_spill] sm:$0xff]  ;;  %v17159_v55 = vld [vmem:[#allocation497_spill] sm:$0xff] }
 0x544   :  { %v5133_v50 = vpop.f32.mrf.mxu0  ;;  %v5358_v13 = vpop.f32.mrf.mxu1  ;;  %v4451_v63 = vmul.f32 %v17155_v31, %v17154_v44  ;;  %v17156_v32 = vld [vmem:[#allocation319_spill] sm:$0xff]  ;;  %v17160_v54 = vld [vmem:[#allocation325_spill] sm:$0xff]  ;;  %v17163_v44 = vld [vmem:[#allocation322_spill] sm:$0xff] }
 0x545   :  { %v17157_v38 = vld [vmem:[#allocation67_spill] sm:$0xff]  ;;  %v17158_v13 = vld [vmem:[#allocation324_spill] sm:$0xff]  ;;  %v17161_v46 = vld [vmem:[#allocation69_spill] sm:$0xff] }
 0x546   :  { %v14282_v56 = vpop.f32.mrf.mxu0  ;;  %v5361_v61 = vpop.f32.mrf.mxu1  ;;  %5825 = vmatmul.mubr.f32.gmra.mxu0 %v4443_v35  ;;  %6050 = vmatmul.mubr.f32.vlgmr.msra.gmra.mxu1 %v4189_v3  ;;  %v4197_v39 = vmul.f32 %v17157_v38, %v17156_v32  ;;  %v4460_v33 = vmul.f32 %v17159_v55, %v17158_v13  ;;  %v4206_v40 = vmul.f32 %v17161_v46, %v17160_v54  ;;  %v17162_v35 = vld [vmem:[#allocation116_spill] sm:$0xff]  ;;  %v17164_v31 = vld [vmem:[#allocation491_spill] sm:$0xff]  ;;  %v17169_v46 = vld [vmem:[#allocation329_spill] sm:$0xff] }
 0x547   :  { %v14284_v37 = vadd.f32 %v5361_v61, %v4977_v34  ;;  %5829 = vmatprep.mubr.f32.mxu0 %v4452_v53  ;;  %6054 = vmatprep.mubr.f32.mxu1 %v4198_v22  ;;  %v4982_v3 = vadd.f32 %v14037_v19, %v17162_v35  ;;  %v6436_v61 = vld [vmem:[%s15541_s6 + $0x10] sm:$0xff]  ;;  %v4459_v32 = vmul.f32 %v17164_v31, %v17163_v44  ;;  %v17165_v38 = vld [vmem:[#allocation323_spill] sm:$0xff]  ;;  %v17170_v35 = vld [vmem:[#allocation73_spill] sm:$0xff] }
 0x548   :  { %v5138_v21 = vpop.f32.mrf.mxu0  ;;  %v5363_v50 = vpop.f32.mrf.mxu1  ;;  %7802 = vmatprep.subr.mxu0 %v6436_v61  ;;  %v17167_v54 = vld [vmem:[#allocation328_spill] sm:$0xff]  ;;  %v17172_v31 = vld [vmem:[#allocation326_spill] sm:$0xff] }
 0x549   :  { %v17166_v21 = vld [vmem:[#allocation71_spill] sm:$0xff]  ;;  %7803 = vmatpush3.msra.mxu0 %v6436_v61 }
 0x54a   :  { %v14296_v34 = vpop.f32.mrf.mxu0  ;;  %v5366_v53 = vpop.f32.mrf.mxu1  ;;  %5830 = vmatmul.mubr.f32.gmra.mxu0 %v4451_v63  ;;  %6055 = vmatmul.mubr.f32.gmra.mxu1 %v4197_v39  ;;  %v4205_v50 = vmul.f32 %v17166_v21, %v17165_v38  ;;  %v17168_v63 = vld [vmem:[#allocation501_spill] sm:$0xff]  ;;  %v17173_v38 = vld [vmem:[#allocation495_spill] sm:$0xff] }
 0x54b   :  { %v14298_v22 = vadd.f32 %v5366_v53, %v4982_v3  ;;  %5834 = vmatprep.mubr.f32.mxu0 %v4460_v33  ;;  %6059 = vmatprep.mubr.f32.mxu1 %v4206_v40  ;;  %v4468_v39 = vmul.f32 %v17168_v63, %v17167_v54  ;;  %v4214_v33 = vmul.f32 %v17170_v35, %v17169_v46  ;;  %v17171_v40 = vld [vmem:[#allocation602_spill] sm:$0xff]  ;;  %v17176_v35 = vld [vmem:[#allocation332_spill] sm:$0xff] }
 0x54c   :  { %v5143_v13 = vpop.f32.mrf.mxu0  ;;  %v5368_v55 = vpop.f32.mrf.mxu1  ;;  %v4987_v3 = vadd.f32 %v14037_v19, %v17171_v40  ;;  %v4467_v21 = vmul.f32 %v17173_v38, %v17172_v31  ;;  %v17177_v40 = vld [vmem:[#allocation505_spill] sm:$0xff]  ;;  %v17184_v31 = vld [vmem:[#allocation499_spill] sm:$0xff] }
 0x54d   :  { %v17174_v13 = vld [vmem:[#allocation327_spill] sm:$0xff]  ;;  %v4476_v61 = vmul.f32 %v17177_v40, %v17176_v35  ;;  %v17188_v35 = vld [vmem:[#allocation509_spill] sm:$0xff] }
 0x54e   :  { %v14313_v53 = vpop.f32.mrf.mxu0  ;;  %v5371_v41 = vpop.f32.mrf.mxu1  ;;  %5835 = vmatmul.mubr.f32.gmra.mxu0 %v4459_v32  ;;  %6060 = vmatmul.mubr.f32.gmra.mxu1 %v4205_v50  ;;  %v17175_v55 = vld [vmem:[#allocation75_spill] sm:$0xff]  ;;  %v17180_v32 = vld [vmem:[#allocation176_spill] sm:$0xff]  ;;  %v4484_v40 = vmul.f32 %v17188_v35, %v17187_v60  ;;  %v17199_v35 = vld [vmem:[#allocation513_spill] sm:$0xff] }
 0x54f   :  { %v14315_v44 = vadd.f32 %v5371_v41, %v4987_v3  ;;  %5839 = vmatprep.mubr.f32.mxu0 %v4468_v39  ;;  %6064 = vmatprep.mubr.f32.mxu1 %v4214_v33  ;;  %v4213_v54 = vmul.f32 %v17175_v55, %v17174_v13  ;;  %v4992_v41 = vadd.f32 %v14037_v19, %v17180_v32  ;;  %v17183_v3 = vld [vmem:[#allocation330_spill] sm:$0xff]  ;;  %v17185_v13 = vld [vmem:[#allocation331_spill] sm:$0xff]  ;;  %v17189_v32 = vld [vmem:[#allocation337_spill] sm:$0xff] }
 0x550   :  { %v5148_v63 = vpop.f32.mrf.mxu0  ;;  %v5373_v46 = vpop.f32.mrf.mxu1  ;;  %v4475_v38 = vmul.f32 %v17184_v31, %v17183_v3  ;;  %v17186_v55 = vld [vmem:[#allocation79_spill] sm:$0xff]  ;;  %v17198_v60 = vld [vmem:[#allocation340_spill] sm:$0xff] }
 0x551   :  { %v4221_v63 = vmul.f32 %v17186_v55, %v17185_v13  ;;  %v17195_v3 = vld [vmem:[#allocation503_spill] sm:$0xff] }
 0x552   :  { %v14327_v50 = vpop.f32.mrf.mxu0  ;;  %v5376_v39 = vpop.f32.mrf.mxu1  ;;  %5840 = vmatmul.mubr.f32.gmra.mxu0 %v4467_v21  ;;  %6065 = vmatmul.mubr.f32.gmra.mxu1 %v4213_v54  ;;  %v17191_v21 = vld [vmem:[#allocation609_spill] sm:$0xff]  ;;  %v17196_v13 = vld [vmem:[#allocation335_spill] sm:$0xff] }
 0x553   :  { %17181 = vst [vmem:[#allocation129_spill] sm:$0xff] %v14327_v50  ;;  %v14329_v33 = vadd.f32 %v5376_v39, %v4992_v41  ;;  %5844 = vmatprep.mubr.f32.mxu0 %v4476_v61  ;;  %6069 = vmatprep.mubr.f32.mxu1 %v4222_v49  ;;  %v4230_v50 = vmul.f32 %v17190_v52, %v17189_v32  ;;  %v17194_v39 = vld [vmem:[#allocation334_spill] sm:$0xff]  ;;  %v17197_v55 = vld [vmem:[#allocation83_spill] sm:$0xff] }
 0x554   :  { %v5153_v46 = vpop.f32.mrf.mxu0  ;;  %v5378_v43 = vpop.f32.mrf.mxu1  ;;  %v4997_v54 = vadd.f32 %v14037_v19, %v17191_v21  ;;  %v4483_v31 = vmul.f32 %v17195_v3, %v17194_v39  ;;  %v4492_v32 = vmul.f32 %v17199_v35, %v17198_v60  ;;  %v17200_v21 = vld [vmem:[#allocation341_spill] sm:$0xff]  ;;  %v17206_v39 = vld [vmem:[#allocation507_spill] sm:$0xff]  ;;  %v17209_v60 = vld [vmem:[#allocation344_spill] sm:$0xff] }
 0x555   :  { %17182 = vst [vmem:[#allocation625_spill] sm:$0xff] %v14329_v33  ;;  %v4229_v46 = vmul.f32 %v17197_v55, %v17196_v13  ;;  %v17207_v13 = vld [vmem:[#allocation339_spill] sm:$0xff]  ;;  %v17210_v35 = vld [vmem:[#allocation517_spill] sm:$0xff] }
 0x556   :  { %v14341_v41 = vpop.f32.mrf.mxu0  ;;  %v5381_v49 = vpop.f32.mrf.mxu1  ;;  %5845 = vmatmul.mubr.f32.gmra.mxu0 %v4475_v38  ;;  %6070 = vmatmul.mubr.f32.gmra.mxu1 %v4221_v63  ;;  %v17202_v38 = vld [vmem:[#allocation118_spill] sm:$0xff]  ;;  %v17208_v55 = vld [vmem:[#allocation87_spill] sm:$0xff] }
 0x557   :  { %17192 = vst [vmem:[#allocation13_spill] sm:$0xff] %v14341_v41  ;;  %v14343_v61 = vadd.f32 %v5381_v49, %v4997_v54  ;;  %5849 = vmatprep.mubr.f32.mxu0 %v4484_v40  ;;  %6074 = vmatprep.mubr.f32.mxu1 %v4230_v50  ;;  %v17201_v41 = vld [vmem:[#allocation85_spill] sm:$0xff]  ;;  %v5002_v63 = vadd.f32 %v14037_v19, %v17202_v38  ;;  %v17205_v49 = vld [vmem:[#allocation338_spill] sm:$0xff] }
 0x558   :  { %v5158_v43 = vpop.f32.mrf.mxu0  ;;  %v5383_v52 = vpop.f32.mrf.mxu1  ;;  %v4238_v33 = vmul.f32 %v17201_v41, %v17200_v21  ;;  %v4491_v3 = vmul.f32 %v17206_v39, %v17205_v49  ;;  %v4500_v21 = vmul.f32 %v17210_v35, %v17209_v60  ;;  %v17211_v38 = vld [vmem:[#allocation345_spill] sm:$0xff]  ;;  %v17217_v49 = vld [vmem:[#allocation511_spill] sm:$0xff]  ;;  %v17220_v60 = vld [vmem:[#allocation348_spill] sm:$0xff] }
 0x559   :  { %17193 = vst [vmem:[#allocation622_spill] sm:$0xff] %v14343_v61  ;;  %v4237_v43 = vmul.f32 %v17208_v55, %v17207_v13  ;;  %v17218_v13 = vld [vmem:[#allocation343_spill] sm:$0xff]  ;;  %v17221_v35 = vld [vmem:[#allocation521_spill] sm:$0xff] }
 0x55a   :  { %v14355_v54 = vpop.f32.mrf.mxu0  ;;  %v5386_v50 = vpop.f32.mrf.mxu1  ;;  %5850 = vmatmul.mubr.f32.gmra.mxu0 %v4483_v31  ;;  %6075 = vmatmul.mubr.f32.gmra.mxu1 %v4229_v46  ;;  %v17213_v31 = vld [vmem:[#allocation612_spill] sm:$0xff]  ;;  %v17219_v55 = vld [vmem:[#allocation91_spill] sm:$0xff] }
 0x55b   :  { %17203 = vst [vmem:[#allocation127_spill] sm:$0xff] %v14355_v54  ;;  %v14357_v40 = vadd.f32 %v5386_v50, %v5002_v63  ;;  %5854 = vmatprep.mubr.f32.mxu0 %v4492_v32  ;;  %6079 = vmatprep.mubr.f32.mxu1 %v4238_v33  ;;  %v17212_v54 = vld [vmem:[#allocation89_spill] sm:$0xff]  ;;  %v5007_v46 = vadd.f32 %v14037_v19, %v17213_v31  ;;  %v17216_v50 = vld [vmem:[#allocation342_spill] sm:$0xff] }
 0x55c   :  { %v5163_v52 = vpop.f32.mrf.mxu0  ;;  %v5388_v41 = vpop.f32.mrf.mxu1  ;;  %v4246_v61 = vmul.f32 %v17212_v54, %v17211_v38  ;;  %v4499_v39 = vmul.f32 %v17217_v49, %v17216_v50  ;;  %v4508_v38 = vmul.f32 %v17221_v35, %v17220_v60  ;;  %v17222_v31 = vld [vmem:[#allocation349_spill] sm:$0xff]  ;;  %v17228_v50 = vld [vmem:[#allocation515_spill] sm:$0xff]  ;;  %v17231_v60 = vld [vmem:[#allocation352_spill] sm:$0xff] }
 0x55d   :  { %17204 = vst [vmem:[#allocation623_spill] sm:$0xff] %v14357_v40  ;;  %v4245_v52 = vmul.f32 %v17219_v55, %v17218_v13  ;;  %v17229_v13 = vld [vmem:[#allocation347_spill] sm:$0xff]  ;;  %v17232_v35 = vld [vmem:[#allocation525_spill] sm:$0xff] }
 0x55e   :  { %v14369_v63 = vpop.f32.mrf.mxu0  ;;  %v5391_v33 = vpop.f32.mrf.mxu1  ;;  %5855 = vmatmul.mubr.f32.gmra.mxu0 %v4491_v3  ;;  %6080 = vmatmul.mubr.f32.gmra.mxu1 %v4237_v43  ;;  %v17224_v3 = vld [vmem:[#allocation178_spill] sm:$0xff]  ;;  %v17230_v55 = vld [vmem:[#allocation95_spill] sm:$0xff] }
 0x55f   :  { %17214 = vst [vmem:[#allocation17_spill] sm:$0xff] %v14369_v63  ;;  %v14371_v32 = vadd.f32 %v5391_v33, %v5007_v46  ;;  %5859 = vmatprep.mubr.f32.mxu0 %v4500_v21  ;;  %6084 = vmatprep.mubr.f32.mxu1 %v4246_v61  ;;  %v17223_v63 = vld [vmem:[#allocation93_spill] sm:$0xff]  ;;  %v5012_v43 = vadd.f32 %v14037_v19, %v17224_v3  ;;  %v17227_v33 = vld [vmem:[#allocation346_spill] sm:$0xff] }
 0x560   :  { %v5168_v41 = vpop.f32.mrf.mxu0  ;;  %v5393_v54 = vpop.f32.mrf.mxu1  ;;  %v4254_v40 = vmul.f32 %v17223_v63, %v17222_v31  ;;  %v4507_v49 = vmul.f32 %v17228_v50, %v17227_v33  ;;  %v4516_v31 = vmul.f32 %v17232_v35, %v17231_v60  ;;  %v17233_v3 = vld [vmem:[#allocation353_spill] sm:$0xff]  ;;  %v17239_v33 = vld [vmem:[#allocation519_spill] sm:$0xff]  ;;  %v17242_v60 = vld [vmem:[#allocation356_spill] sm:$0xff] }
 0x561   :  { %17215 = vst [vmem:[#allocation628_spill] sm:$0xff] %v14371_v32  ;;  %v4253_v41 = vmul.f32 %v17230_v55, %v17229_v13  ;;  %v17240_v13 = vld [vmem:[#allocation351_spill] sm:$0xff]  ;;  %v17243_v35 = vld [vmem:[#allocation529_spill] sm:$0xff] }
 0x562   :  { %v14383_v46 = vpop.f32.mrf.mxu0  ;;  %v5396_v61 = vpop.f32.mrf.mxu1  ;;  %5860 = vmatmul.mubr.f32.gmra.mxu0 %v4499_v39  ;;  %6085 = vmatmul.mubr.f32.gmra.mxu1 %v4245_v52  ;;  %v17235_v39 = vld [vmem:[#allocation611_spill] sm:$0xff] }
 0x563   :  { %17225 = vst [vmem:[#allocation133_spill] sm:$0xff] %v14383_v46  ;;  %v14385_v21 = vadd.f32 %v5396_v61, %v5012_v43  ;;  %5864 = vmatprep.mubr.f32.mxu0 %v4508_v38  ;;  %6089 = vmatprep.mubr.f32.mxu1 %v4254_v40  ;;  %v17234_v46 = vld [vmem:[#allocation97_spill] sm:$0xff]  ;;  %v5017_v52 = vadd.f32 %v14037_v19, %v17235_v39  ;;  %v17238_v61 = vld [vmem:[#allocation350_spill] sm:$0xff]  ;;  %v17241_v55 = vld [vmem:[#allocation99_spill] sm:$0xff] }
 0x564   :  { %v5173_v54 = vpop.f32.mrf.mxu0  ;;  %v5398_v63 = vpop.f32.mrf.mxu1  ;;  %v4262_v32 = vmul.f32 %v17234_v46, %v17233_v3  ;;  %v4515_v50 = vmul.f32 %v17239_v33, %v17238_v61  ;;  %v4524_v3 = vmul.f32 %v17243_v35, %v17242_v60  ;;  %v17244_v39 = vld [vmem:[#allocation357_spill] sm:$0xff]  ;;  %v17250_v61 = vld [vmem:[#allocation523_spill] sm:$0xff]  ;;  %v17253_v60 = vld [vmem:[#allocation360_spill] sm:$0xff] }
 0x565   :  { %17226 = vst [vmem:[#allocation629_spill] sm:$0xff] %v14385_v21  ;;  %v4261_v54 = vmul.f32 %v17241_v55, %v17240_v13  ;;  %v17251_v13 = vld [vmem:[#allocation355_spill] sm:$0xff]  ;;  %v17254_v35 = vld [vmem:[#allocation533_spill] sm:$0xff] }
 0x566   :  { %v14397_v43 = vpop.f32.mrf.mxu0  ;;  %v5401_v40 = vpop.f32.mrf.mxu1  ;;  %5865 = vmatmul.mubr.f32.gmra.mxu0 %v4507_v49  ;;  %6090 = vmatmul.mubr.f32.gmra.mxu1 %v4253_v41  ;;  %v17246_v49 = vld [vmem:[#allocation7_spill] sm:$0xff] }
 0x567   :  { %17236 = vst [vmem:[#allocation16_spill] sm:$0xff] %v14397_v43  ;;  %v14399_v38 = vadd.f32 %v5401_v40, %v5017_v52  ;;  %5869 = vmatprep.mubr.f32.mxu0 %v4516_v31  ;;  %6094 = vmatprep.mubr.f32.mxu1 %v4262_v32  ;;  %v17245_v43 = vld [vmem:[#allocation101_spill] sm:$0xff]  ;;  %v5022_v41 = vadd.f32 %v14037_v19, %v17246_v49  ;;  %v17249_v40 = vld [vmem:[#allocation354_spill] sm:$0xff]  ;;  %v17252_v55 = vld [vmem:[#allocation103_spill] sm:$0xff] }
 0x568   :  { %v5178_v63 = vpop.f32.mrf.mxu0  ;;  %v5403_v46 = vpop.f32.mrf.mxu1  ;;  %v4270_v21 = vmul.f32 %v17245_v43, %v17244_v39  ;;  %v4523_v33 = vmul.f32 %v17250_v61, %v17249_v40  ;;  %v4532_v39 = vmul.f32 %v17254_v35, %v17253_v60  ;;  %v17255_v49 = vld [vmem:[#allocation361_spill] sm:$0xff]  ;;  %v17261_v40 = vld [vmem:[#allocation527_spill] sm:$0xff]  ;;  %v17264_v60 = vld [vmem:[#allocation364_spill] sm:$0xff] }
 0x569   :  { %17237 = vst [vmem:[#allocation626_spill] sm:$0xff] %v14399_v38  ;;  %v4269_v63 = vmul.f32 %v17252_v55, %v17251_v13  ;;  %v17262_v13 = vld [vmem:[#allocation359_spill] sm:$0xff]  ;;  %v17265_v35 = vld [vmem:[#allocation537_spill] sm:$0xff] }
 0x56a   :  { %v14411_v52 = vpop.f32.mrf.mxu0  ;;  %v5406_v32 = vpop.f32.mrf.mxu1  ;;  %5870 = vmatmul.mubr.f32.gmra.mxu0 %v4515_v50  ;;  %6095 = vmatmul.mubr.f32.gmra.mxu1 %v4261_v54  ;;  %v17257_v50 = vld [vmem:[#allocation614_spill] sm:$0xff]  ;;  %v17263_v55 = vld [vmem:[#allocation107_spill] sm:$0xff] }
 0x56b   :  { %17247 = vst [vmem:[#allocation131_spill] sm:$0xff] %v14411_v52  ;;  %v14413_v31 = vadd.f32 %v5406_v32, %v5022_v41  ;;  %5874 = vmatprep.mubr.f32.mxu0 %v4524_v3  ;;  %6099 = vmatprep.mubr.f32.mxu1 %v4270_v21  ;;  %v17256_v52 = vld [vmem:[#allocation105_spill] sm:$0xff]  ;;  %v5027_v54 = vadd.f32 %v14037_v19, %v17257_v50  ;;  %v17260_v32 = vld [vmem:[#allocation358_spill] sm:$0xff] }
 0x56c   :  { %v5183_v46 = vpop.f32.mrf.mxu0  ;;  %v5408_v43 = vpop.f32.mrf.mxu1  ;;  %v4278_v38 = vmul.f32 %v17256_v52, %v17255_v49  ;;  %v4531_v61 = vmul.f32 %v17261_v40, %v17260_v32  ;;  %v4540_v49 = vmul.f32 %v17265_v35, %v17264_v60  ;;  %v17266_v50 = vld [vmem:[#allocation365_spill] sm:$0xff]  ;;  %v17271_v32 = vld [vmem:[#allocation531_spill] sm:$0xff]  ;;  %v17274_v60 = vld [vmem:[#allocation368_spill] sm:$0xff] }
 0x56d   :  { %17248 = vst [vmem:[#allocation627_spill] sm:$0xff] %v14413_v31  ;;  %v4277_v46 = vmul.f32 %v17263_v55, %v17262_v13  ;;  %v17272_v13 = vld [vmem:[#allocation363_spill] sm:$0xff]  ;;  %v17275_v35 = vld [vmem:[#allocation541_spill] sm:$0xff] }
 0x56e   :  { %v14425_v41 = vpop.f32.mrf.mxu0  ;;  %v5411_v21 = vpop.f32.mrf.mxu1  ;;  %5875 = vmatmul.mubr.f32.gmra.mxu0 %v4523_v33  ;;  %6100 = vmatmul.mubr.f32.gmra.mxu1 %v4269_v63  ;;  %v17268_v33 = vld [vmem:[#allocation12_spill] sm:$0xff]  ;;  %v17273_v55 = vld [vmem:[#allocation111_spill] sm:$0xff] }
 0x56f   :  { %17258 = vst [vmem:[#allocation20_spill] sm:$0xff] %v14425_v41  ;;  %v14427_v3 = vadd.f32 %v5411_v21, %v5027_v54  ;;  %5879 = vmatprep.mubr.f32.mxu0 %v4532_v39  ;;  %6104 = vmatprep.mubr.f32.mxu1 %v4278_v38  ;;  %v17267_v41 = vld [vmem:[#allocation109_spill] sm:$0xff]  ;;  %v5032_v63 = vadd.f32 %v14037_v19, %v17268_v33  ;;  %v17270_v21 = vld [vmem:[#allocation362_spill] sm:$0xff] }
 0x570   :  { %v5188_v43 = vpop.f32.mrf.mxu0  ;;  %v5413_v52 = vpop.f32.mrf.mxu1  ;;  %v4286_v31 = vmul.f32 %v17267_v41, %v17266_v50  ;;  %v4539_v40 = vmul.f32 %v17271_v32, %v17270_v21  ;;  %v4548_v50 = vmul.f32 %v17275_v35, %v17274_v60  ;;  %v17276_v33 = vld [vmem:[#allocation369_spill] sm:$0xff]  ;;  %v17281_v32 = vld [vmem:[#allocation367_spill] sm:$0xff] }
 0x571   :  { %17259 = vst [vmem:[#allocation632_spill] sm:$0xff] %v14427_v3  ;;  %v4285_v43 = vmul.f32 %v17273_v55, %v17272_v13  ;;  %v17282_v13 = vld [vmem:[#allocation115_spill] sm:$0xff]  ;;  %v17284_v60 = vld [vmem:[#allocation545_spill] sm:$0xff] }
 0x572   :  { %v14439_v54 = vpop.f32.mrf.mxu0  ;;  %v5416_v38 = vpop.f32.mrf.mxu1  ;;  %5880 = vmatmul.mubr.f32.gmra.mxu0 %v4531_v61  ;;  %6105 = vmatmul.mubr.f32.gmra.mxu1 %v4277_v46  ;;  %v5037_v61 = vadd.f32 %v14037_v19, %v13994_v25  ;;  %v4293_v55 = vmul.f32 %v17282_v13, %v17281_v32  ;;  %v17285_v35 = vld [vmem:[#allocation373_spill] sm:$0xff]  ;;  %v17291_v32 = vld [vmem:[#allocation2_spill] sm:$0xff] }
 0x573   :  { %17269 = vst [vmem:[#allocation137_spill] sm:$0xff] %v14439_v54  ;;  %v14441_v39 = vadd.f32 %v5416_v38, %v5032_v63  ;;  %5884 = vmatprep.mubr.f32.mxu0 %v4540_v49  ;;  %6109 = vmatprep.mubr.f32.mxu1 %v4286_v31  ;;  %v17277_v54 = vld [vmem:[#allocation113_spill] sm:$0xff]  ;;  %v17279_v63 = vld [vmem:[#allocation366_spill] sm:$0xff]  ;;  %v17280_v38 = vld [vmem:[#allocation535_spill] sm:$0xff] }
 0x574   :  { %v5193_v52 = vpop.f32.mrf.mxu0  ;;  %v5418_v41 = vpop.f32.mrf.mxu1  ;;  %v4294_v3 = vmul.f32 %v17277_v54, %v17276_v33  ;;  %v4547_v21 = vmul.f32 %v17280_v38, %v17279_v63  ;;  %v17286_v33 = vld [vmem:[#allocation117_spill] sm:$0xff]  ;;  %v17290_v38 = vld [vmem:[#allocation371_spill] sm:$0xff] }
 0x575   :  { %v17283_v41 = vld [vmem:[#allocation372_spill] sm:$0xff]  ;;  %v4301_v13 = vmul.f32 %v17291_v32, %v17290_v38  ;;  %v17300_v38 = vld [vmem:[#allocation3_spill] sm:$0xff] }
 0x576   :  { %v14453_v46 = vpop.f32.mrf.mxu0  ;;  %v5421_v31 = vpop.f32.mrf.mxu1  ;;  %5885 = vmatmul.mubr.f32.gmra.mxu0 %v4539_v40  ;;  %6110 = vmatmul.mubr.f32.gmra.mxu1 %v4285_v43  ;;  %v4556_v25 = vmul.f32 %v17284_v60, %v17283_v41  ;;  %v5042_v40 = vadd.f32 %v14037_v19, %v14008_v7  ;;  %v17292_v41 = vld [vmem:[#allocation376_spill] sm:$0xff]  ;;  %v17293_v60 = vld [vmem:[#allocation549_spill] sm:$0xff] }
 0x577   :  { %17278 = vst [vmem:[#allocation633_spill] sm:$0xff] %v14453_v46  ;;  %v14455_v49 = vadd.f32 %v5421_v31, %v5037_v61  ;;  %5889 = vmatprep.mubr.f32.mxu0 %v4548_v50  ;;  %6114 = vmatprep.mubr.f32.mxu1 %v4294_v3  ;;  %v4302_v46 = vmul.f32 %v17286_v33, %v17285_v35  ;;  %v17288_v61 = vld [vmem:[#allocation370_spill] sm:$0xff]  ;;  %v17289_v31 = vld [vmem:[#allocation539_spill] sm:$0xff]  ;;  %v17294_v35 = vld [vmem:[#allocation377_spill] sm:$0xff] }
 0x578   :  { %v5198_v52 = vpop.f32.mrf.mxu0  ;;  %v5423_v54 = vpop.f32.mrf.mxu1  ;;  %v4555_v63 = vmul.f32 %v17289_v31, %v17288_v61  ;;  %v4564_v7 = vmul.f32 %v17293_v60, %v17292_v41  ;;  %v17295_v33 = vld [vmem:[#allocation119_spill] sm:$0xff]  ;;  %v17301_v41 = vld [vmem:[#allocation380_spill] sm:$0xff]  ;;  %v17302_v60 = vld [vmem:[#allocation553_spill] sm:$0xff] }
 0x579   :  { %v17299_v31 = vld [vmem:[#allocation375_spill] sm:$0xff] }
 0x57a   :  { %v14467_v43 = vpop.f32.mrf.mxu0  ;;  %v5426_v3 = vpop.f32.mrf.mxu1  ;;  %5890 = vmatmul.mubr.f32.gmra.mxu0 %v4547_v21  ;;  %6115 = vmatmul.mubr.f32.gmra.mxu1 %v4293_v55  ;;  %v5047_v21 = vadd.f32 %v14037_v19, %v14022_v29  ;;  %v4309_v32 = vmul.f32 %v17300_v38, %v17299_v31  ;;  %v4572_v29 = vmul.f32 %v17302_v60, %v17301_v41  ;;  %v17309_v31 = vld [vmem:[#allocation4_spill] sm:$0xff] }
 0x57b   :  { %17287 = vst [vmem:[#allocation19_spill] sm:$0xff] %v14467_v43  ;;  %v14469_v50 = vadd.f32 %v5426_v3, %v5042_v40  ;;  %5894 = vmatprep.mubr.f32.mxu0 %v4556_v25  ;;  %6119 = vmatprep.mubr.f32.mxu1 %v4302_v46  ;;  %v4310_v43 = vmul.f32 %v17295_v33, %v17294_v35  ;;  %v17297_v40 = vld [vmem:[#allocation374_spill] sm:$0xff]  ;;  %v17298_v3 = vld [vmem:[#allocation543_spill] sm:$0xff]  ;;  %v17303_v35 = vld [vmem:[#allocation381_spill] sm:$0xff] }
 0x57c   :  { %v5203_v52 = vpop.f32.mrf.mxu0  ;;  %v5428_v54 = vpop.f32.mrf.mxu1  ;;  %v4563_v61 = vmul.f32 %v17298_v3, %v17297_v40  ;;  %v17304_v33 = vld [vmem:[#allocation740_spill] sm:$0xff]  ;;  %v17308_v3 = vld [vmem:[#allocation379_spill] sm:$0xff] }
 0x57d   :  { %v4317_v38 = vmul.f32 %v17309_v31, %v17308_v3  ;;  %v17310_v41 = vld [vmem:[#allocation384_spill] sm:$0xff]  ;;  %v17316_v3 = vld [vmem:[#allocation383_spill] sm:$0xff] }
 0x57e   :  { %v14481_v55 = vpop.f32.mrf.mxu0  ;;  %v5431_v46 = vpop.f32.mrf.mxu1  ;;  %5895 = vmatmul.mubr.f32.gmra.mxu0 %v4555_v63  ;;  %6120 = vmatmul.mubr.f32.gmra.mxu1 %v4301_v13  ;;  %v5052_v63 = vadd.f32 %v14037_v19, %v14041_v30  ;;  %v17311_v60 = vld [vmem:[#allocation8_spill] sm:$0xff]  ;;  %v17317_v31 = vld [vmem:[#allocation551_spill] sm:$0xff] }
 0x57f   :  { %17296 = vst [vmem:[#allocation630_spill] sm:$0xff] %v14481_v55  ;;  %v14483_v25 = vadd.f32 %v5431_v46, %v5047_v21  ;;  %5899 = vmatprep.mubr.f32.mxu0 %v4564_v7  ;;  %6124 = vmatprep.mubr.f32.mxu1 %v4310_v43  ;;  %v4318_v55 = vmul.f32 %v17304_v33, %v17303_v35  ;;  %v17306_v21 = vld [vmem:[#allocation378_spill] sm:$0xff]  ;;  %v17307_v46 = vld [vmem:[#allocation547_spill] sm:$0xff]  ;;  %v17312_v35 = vld [vmem:[#allocation385_spill] sm:$0xff] }
 0x580   :  { %v5208_v52 = vpop.f32.mrf.mxu0  ;;  %v5433_v54 = vpop.f32.mrf.mxu1  ;;  %v4571_v40 = vmul.f32 %v17307_v46, %v17306_v21  ;;  %v4580_v30 = vmul.f32 %v17311_v60, %v17310_v41  ;;  %v17313_v33 = vld [vmem:[#allocation556_spill] sm:$0xff]  ;;  %v17315_v21 = vld [vmem:[#allocation121_spill] sm:$0xff]  ;;  %v17319_v60 = vld [vmem:[#allocation123_spill] sm:$0xff] }
 0x582   :  { %v14495_v13 = vpop.f32.mrf.mxu0  ;;  %v5436_v43 = vpop.f32.mrf.mxu1  ;;  %5900 = vmatmul.mubr.f32.gmra.mxu0 %v4563_v61  ;;  %6125 = vmatmul.mubr.f32.gmra.mxu1 %v4309_v32  ;;  %v5057_v61 = vadd.f32 %v14037_v19, %v14055_v57  ;;  %v17318_v57 = vld [vmem:[#allocation388_spill] sm:$0xff] }
 0x583   :  { %17305 = vst [vmem:[#allocation135_spill] sm:$0xff] %v14495_v13  ;;  %v14497_v7 = vadd.f32 %v5436_v43, %v5052_v63  ;;  %5904 = vmatprep.mubr.f32.mxu0 %v4572_v29  ;;  %6129 = vmatprep.mubr.f32.mxu1 %v4318_v55  ;;  %v4326_v13 = vmul.f32 %v17313_v33, %v17312_v35  ;;  %v17314_v43 = vld [vmem:[#allocation382_spill] sm:$0xff] }
 0x584   :  { %v5213_v52 = vpop.f32.mrf.mxu0  ;;  %v5438_v54 = vpop.f32.mrf.mxu1  ;;  %v4579_v46 = vmul.f32 %v17315_v21, %v17314_v43  ;;  %v4588_v35 = vmul.f32 %v17319_v60, %v17318_v57  ;;  %v17322_v43 = vld [vmem:[#allocation386_spill] sm:$0xff]  ;;  %v17323_v21 = vld [vmem:[#allocation68_spill] sm:$0xff] }
 0x585   :  { %v4325_v52 = vmul.f32 %v17317_v31, %v17316_v3  ;;  %v4587_v3 = vmul.f32 %v17323_v21, %v17322_v43  ;;  %v17324_v31 = vld [vmem:[#allocation387_spill] sm:$0xff]  ;;  %v17327_v57 = vld [vmem:[#allocation128_spill] sm:$0xff]  ;;  %v17330_v21 = vld [vmem:[#allocation390_spill] sm:$0xff] }
 0x586   :  { %v5441_v32 = vpop.f32.mrf.mxu1  ;;  %v5666_v29 = vpop.f32.mrf.mxu0  ;;  %5905 = vmatmul.mubr.f32.gmra.mxu0 %v4571_v40  ;;  %6130 = vmatmul.mubr.f32.gmra.mxu1 %v4317_v38  ;;  %v17320_v40 = vld [vmem:[#allocation389_spill] sm:$0xff]  ;;  %v17321_v38 = vld [vmem:[#allocation554_spill] sm:$0xff] }
 0x587   :  { %v14509_v55 = vadd.f32 %v5441_v32, %v5057_v61  ;;  %v14512_v63 = vadd.f32 %v5666_v29, %v14057_v20  ;;  %5909 = vmatprep.mubr.f32.mxu0 %v4580_v30  ;;  %6134 = vmatprep.mubr.f32.mxu1 %v4326_v13  ;;  %v4334_v33 = vmul.f32 %v17321_v38, %v17320_v40  ;;  %v6435_v13 = vld [vmem:[%s15541_s6 + $0x8] sm:$0xff]  ;;  %v17328_v40 = vld [vmem:[#allocation393_spill] sm:$0xff]  ;;  %v17329_v38 = vld [vmem:[#allocation560_spill] sm:$0xff] }
 0x588   :  { %v5443_v54 = vpop.f32.mrf.mxu1  ;;  %v5668_v41 = vpop.f32.mrf.mxu0  ;;  %v5062_v20 = vadd.f32 %v14037_v19, %v14069_v45  ;;  %v17325_v45 = vld [vmem:[#allocation557_spill] sm:$0xff]  ;;  %7804 = vmatprep.subr.mxu0 %v6435_v13 }
 0x589   :  { %v4333_v54 = vmul.f32 %v17325_v45, %v17324_v31  ;;  %7805 = vmatpush3.msra.mxu0 %v6435_v13  ;;  %v17331_v31 = vld [vmem:[#allocation66_spill] sm:$0xff] }
 0x58a   :  { %v5446_v61 = vpop.f32.mrf.mxu1  ;;  %v5671_v30 = vpop.f32.mrf.mxu0  ;;  %5910 = vmatmul.mubr.f32.gmra.mxu0 %v4579_v46  ;;  %6135 = vmatmul.mubr.f32.gmra.mxu1 %v4325_v52  ;;  %v17326_v52 = vld [vmem:[#allocation392_spill] sm:$0xff]  ;;  %v4595_v45 = vmul.f32 %v17331_v31, %v17330_v21  ;;  %v17338_v21 = vld [vmem:[#allocation394_spill] sm:$0xff] }
 0x58b   :  { %v14527_v32 = vadd.f32 %v5446_v61, %v5062_v20  ;;  %v14530_v29 = vadd.f32 %v5671_v30, %v14071_v58  ;;  %5914 = vmatprep.mubr.f32.mxu0 %v4588_v35  ;;  %6139 = vmatprep.mubr.f32.mxu1 %v4334_v33  ;;  %v4596_v60 = vmul.f32 %v17327_v57, %v17326_v52  ;;  %v6434_v35 = vld [vmem:[%s15541_s6] sm:$0xff]  ;;  %v17334_v52 = vld [vmem:[#allocation396_spill] sm:$0xff] }
 0x58c   :  { %v5448_v41 = vpop.f32.mrf.mxu1  ;;  %v5673_v46 = vpop.f32.mrf.mxu0  ;;  %v4342_v20 = vmul.f32 %v17329_v38, %v17328_v40  ;;  %v5067_v58 = vadd.f32 %v14037_v19, %v14086_v62  ;;  %v17332_v19 = vld [vmem:[#allocation391_spill] sm:$0xff]  ;;  %7806 = vmatprep.subr.mxu0 %v6434_v35  ;;  %v17335_v57 = vld [vmem:[#allocation126_spill] sm:$0xff]  ;;  %v17339_v31 = vld [vmem:[#allocation72_spill] sm:$0xff] }
 0x58d   :  { %v17333_v62 = vld [vmem:[#allocation555_spill] sm:$0xff]  ;;  %v17337_v40 = vld [vmem:[#allocation558_spill] sm:$0xff]  ;;  %7807 = vmatpush3.msra.mxu0 %v6434_v35  ;;  %v17342_v35 = vld [vmem:[#allocation400_spill] sm:$0xff] }
 0x58e   :  { %v5451_v33 = vpop.f32.mrf.mxu1  ;;  %v5676_v61 = vpop.f32.mrf.mxu0  ;;  %5915 = vmatmul.mubr.f32.gmra.mxu0 %v4587_v3  ;;  %6140 = vmatmul.mubr.f32.gmra.mxu1 %v4333_v54  ;;  %v4341_v13 = vmul.f32 %v17333_v62, %v17332_v19  ;;  %v4604_v3 = vmul.f32 %v17335_v57, %v17334_v52  ;;  %v17336_v54 = vld [vmem:[#allocation397_spill] sm:$0xff]  ;;  %v4603_v19 = vmul.f32 %v17339_v31, %v17338_v21  ;;  %v17340_v62 = vld [vmem:[#allocation395_spill] sm:$0xff]  ;;  %v17343_v57 = vld [vmem:[#allocation132_spill] sm:$0xff] }
 0x58f   :  { %v14545_v30 = vadd.f32 %v5451_v33, %v5067_v58  ;;  %v14548_v43 = vadd.f32 %v5676_v61, %v14088_v11  ;;  %5919 = vmatprep.mubr.f32.mxu0 %v4596_v60  ;;  %6144 = vmatprep.mubr.f32.mxu1 %v4342_v20  ;;  %v4350_v38 = vmul.f32 %v17337_v40, %v17336_v54  ;;  %v14561_v11 = vld [vmem:[%s15540_s5] ss:$0 sm:$0xff] }
 0x590   :  { %v5453_v41 = vpop.f32.mrf.mxu1  ;;  %v5678_v46 = vpop.f32.mrf.mxu0  ;;  %v5072_v60 = vadd.f32 %v14561_v11, %v14100_v27  ;;  %v4612_v54 = vmul.f32 %v17343_v57, %v17342_v35  ;;  %v17347_v21 = vld [vmem:[#allocation70_spill] sm:$0xff] }
 0x591   :  { %v17341_v41 = vld [vmem:[#allocation561_spill] sm:$0xff]  ;;  %v17351_v57 = vld [vmem:[#allocation130_spill] sm:$0xff] }
 0x592   :  { %v5456_v20 = vpop.f32.mrf.mxu1  ;;  %v5681_v58 = vpop.f32.mrf.mxu0  ;;  %5920 = vmatmul.mubr.f32.gmra.mxu0 %v4595_v45  ;;  %6145 = vmatmul.mubr.f32.gmra.mxu1 %v4341_v13  ;;  %v4349_v46 = vmul.f32 %v17341_v41, %v17340_v62  ;;  %v17344_v45 = vld [vmem:[#allocation401_spill] sm:$0xff]  ;;  %v17345_v13 = vld [vmem:[#allocation564_spill] sm:$0xff]  ;;  %v17348_v62 = vld [vmem:[#allocation399_spill] sm:$0xff] }
 0x593   :  { %v14565_v33 = vadd.f32 %v5456_v20, %v5072_v60  ;;  %v14568_v61 = vadd.f32 %v5681_v58, %v14102_v5  ;;  %5924 = vmatprep.mubr.f32.mxu0 %v4604_v3  ;;  %6149 = vmatprep.mubr.f32.mxu1 %v4350_v38  ;;  %v4358_v40 = vmul.f32 %v17345_v13, %v17344_v45  ;;  %v17346_v58 = vld [vmem:[#allocation398_spill] sm:$0xff]  ;;  %v17349_v41 = vld [vmem:[#allocation559_spill] sm:$0xff] }
 0x594   :  { %v5458_v52 = vpop.f32.mrf.mxu1  ;;  %v5683_v27 = vpop.f32.mrf.mxu0  ;;  %v5077_v5 = vadd.f32 %v14561_v11, %v14114_v48  ;;  %v4611_v31 = vmul.f32 %v17347_v21, %v17346_v58  ;;  %v17350_v48 = vld [vmem:[#allocation404_spill] sm:$0xff] }
 0x595   :  { %v4357_v52 = vmul.f32 %v17349_v41, %v17348_v62  ;;  %v4620_v45 = vmul.f32 %v17351_v57, %v17350_v48  ;;  %v17355_v58 = vld [vmem:[#allocation76_spill] sm:$0xff]  ;;  %v17356_v62 = vld [vmem:[#allocation403_spill] sm:$0xff]  ;;  %v17357_v41 = vld [vmem:[#allocation565_spill] sm:$0xff] }
 0x596   :  { %v5461_v60 = vpop.f32.mrf.mxu1  ;;  %v5686_v3 = vpop.f32.mrf.mxu0  ;;  %5925 = vmatmul.mubr.f32.gmra.mxu0 %v4603_v19  ;;  %6150 = vmatmul.mubr.f32.gmra.mxu1 %v4349_v46  ;;  %v17352_v19 = vld [vmem:[#allocation405_spill] sm:$0xff]  ;;  %v17353_v46 = vld [vmem:[#allocation562_spill] sm:$0xff]  ;;  %v17359_v57 = vld [vmem:[#allocation136_spill] sm:$0xff] }
 0x597   :  { %v14580_v38 = vadd.f32 %v5461_v60, %v5077_v5  ;;  %v14583_v20 = vadd.f32 %v5686_v3, %v14116_v17  ;;  %5929 = vmatprep.mubr.f32.mxu0 %v4612_v54  ;;  %6154 = vmatprep.mubr.f32.mxu1 %v4358_v40  ;;  %v4366_v13 = vmul.f32 %v17353_v46, %v17352_v19  ;;  %v17354_v3 = vld [vmem:[#allocation402_spill] sm:$0xff] }
 0x598   :  { %v5463_v27 = vpop.f32.mrf.mxu1  ;;  %v5688_v35 = vpop.f32.mrf.mxu0  ;;  %v5082_v17 = vadd.f32 %v14561_v11, %v14128_v51  ;;  %v4619_v21 = vmul.f32 %v17355_v58, %v17354_v3  ;;  %v17358_v51 = vld [vmem:[#allocation408_spill] sm:$0xff]  ;;  %v17363_v3 = vld [vmem:[#allocation74_spill] sm:$0xff] }
 0x599   :  { %v4365_v27 = vmul.f32 %v17357_v41, %v17356_v62  ;;  %v4628_v19 = vmul.f32 %v17359_v57, %v17358_v51  ;;  %v17364_v62 = vld [vmem:[#allocation407_spill] sm:$0xff]  ;;  %v17367_v57 = vld [vmem:[#allocation134_spill] sm:$0xff] }
 0x59a   :  { %v5466_v5 = vpop.f32.mrf.mxu1  ;;  %v5691_v54 = vpop.f32.mrf.mxu0  ;;  %5930 = vmatmul.mubr.f32.gmra.mxu0 %v4611_v31  ;;  %6155 = vmatmul.mubr.f32.gmra.mxu1 %v4357_v52  ;;  %v17360_v31 = vld [vmem:[#allocation409_spill] sm:$0xff]  ;;  %v17361_v52 = vld [vmem:[#allocation568_spill] sm:$0xff]  ;;  %v17365_v41 = vld [vmem:[#allocation563_spill] sm:$0xff] }
 0x59b   :  { %v14595_v40 = vadd.f32 %v5466_v5, %v5082_v17  ;;  %v14598_v60 = vadd.f32 %v5691_v54, %v14130_v42  ;;  %5934 = vmatprep.mubr.f32.mxu0 %v4620_v45  ;;  %6159 = vmatprep.mubr.f32.mxu1 %v4366_v13  ;;  %v4374_v46 = vmul.f32 %v17361_v52, %v17360_v31  ;;  %v17362_v54 = vld [vmem:[#allocation406_spill] sm:$0xff] }
 0x59c   :  { %v5468_v35 = vpop.f32.mrf.mxu1  ;;  %v5693_v48 = vpop.f32.mrf.mxu0  ;;  %v5087_v42 = vadd.f32 %v14561_v11, %v14142_v23  ;;  %v4627_v58 = vmul.f32 %v17363_v3, %v17362_v54  ;;  %v17366_v23 = vld [vmem:[#allocation412_spill] sm:$0xff] }
 0x59d   :  { %v4373_v35 = vmul.f32 %v17365_v41, %v17364_v62  ;;  %v4636_v31 = vmul.f32 %v17367_v57, %v17366_v23  ;;  %v17371_v54 = vld [vmem:[#allocation80_spill] sm:$0xff]  ;;  %v17372_v62 = vld [vmem:[#allocation411_spill] sm:$0xff]  ;;  %v17373_v41 = vld [vmem:[#allocation569_spill] sm:$0xff] }
 0x59e   :  { %v5471_v17 = vpop.f32.mrf.mxu1  ;;  %v5696_v45 = vpop.f32.mrf.mxu0  ;;  %5935 = vmatmul.mubr.f32.gmra.mxu0 %v4619_v21  ;;  %6160 = vmatmul.mubr.f32.gmra.mxu1 %v4365_v27  ;;  %v17368_v21 = vld [vmem:[#allocation413_spill] sm:$0xff]  ;;  %v17369_v27 = vld [vmem:[#allocation566_spill] sm:$0xff]  ;;  %v17375_v57 = vld [vmem:[#allocation140_spill] sm:$0xff] }
 0x59f   :  { %v14610_v13 = vadd.f32 %v5471_v17, %v5087_v42  ;;  %v14613_v5 = vadd.f32 %v5696_v45, %v14144_v59  ;;  %5939 = vmatprep.mubr.f32.mxu0 %v4628_v19  ;;  %6164 = vmatprep.mubr.f32.mxu1 %v4374_v46  ;;  %v4382_v52 = vmul.f32 %v17369_v27, %v17368_v21  ;;  %v17370_v45 = vld [vmem:[#allocation410_spill] sm:$0xff] }
 0x5a0   :  { %v5473_v48 = vpop.f32.mrf.mxu1  ;;  %v5698_v51 = vpop.f32.mrf.mxu0  ;;  %v5092_v59 = vadd.f32 %v14561_v11, %v14156_v26  ;;  %v4635_v3 = vmul.f32 %v17371_v54, %v17370_v45  ;;  %v17374_v26 = vld [vmem:[#allocation416_spill] sm:$0xff]  ;;  %v17379_v45 = vld [vmem:[#allocation78_spill] sm:$0xff] }
 0x5a1   :  { %v4381_v48 = vmul.f32 %v17373_v41, %v17372_v62  ;;  %v4644_v21 = vmul.f32 %v17375_v57, %v17374_v26  ;;  %v17380_v62 = vld [vmem:[#allocation415_spill] sm:$0xff]  ;;  %v17383_v57 = vld [vmem:[#allocation138_spill] sm:$0xff] }
 0x5a2   :  { %v5476_v42 = vpop.f32.mrf.mxu1  ;;  %v5701_v19 = vpop.f32.mrf.mxu0  ;;  %5940 = vmatmul.mubr.f32.gmra.mxu0 %v4627_v58  ;;  %6165 = vmatmul.mubr.f32.gmra.mxu1 %v4373_v35  ;;  %v17376_v58 = vld [vmem:[#allocation417_spill] sm:$0xff]  ;;  %v17377_v35 = vld [vmem:[#allocation572_spill] sm:$0xff]  ;;  %v17381_v41 = vld [vmem:[#allocation567_spill] sm:$0xff] }
 0x5a3   :  { %v14625_v46 = vadd.f32 %v5476_v42, %v5092_v59  ;;  %v14628_v17 = vadd.f32 %v5701_v19, %v14158_v47  ;;  %5944 = vmatprep.mubr.f32.mxu0 %v4636_v31  ;;  %6169 = vmatprep.mubr.f32.mxu1 %v4382_v52  ;;  %v4390_v27 = vmul.f32 %v17377_v35, %v17376_v58  ;;  %v17378_v19 = vld [vmem:[#allocation414_spill] sm:$0xff] }
 0x5a4   :  { %v5478_v51 = vpop.f32.mrf.mxu1  ;;  %v5703_v23 = vpop.f32.mrf.mxu0  ;;  %v5097_v47 = vadd.f32 %v14561_v11, %v14170_v15  ;;  %v4643_v54 = vmul.f32 %v17379_v45, %v17378_v19  ;;  %v17382_v15 = vld [vmem:[#allocation420_spill] sm:$0xff] }
 0x5a5   :  { %v4389_v51 = vmul.f32 %v17381_v41, %v17380_v62  ;;  %v4652_v58 = vmul.f32 %v17383_v57, %v17382_v15  ;;  %v17387_v19 = vld [vmem:[#allocation84_spill] sm:$0xff]  ;;  %v17388_v62 = vld [vmem:[#allocation419_spill] sm:$0xff]  ;;  %v17389_v41 = vld [vmem:[#allocation573_spill] sm:$0xff] }
 0x5a6   :  { %v5481_v59 = vpop.f32.mrf.mxu1  ;;  %v5706_v31 = vpop.f32.mrf.mxu0  ;;  %5945 = vmatmul.mubr.f32.gmra.mxu0 %v4635_v3  ;;  %6170 = vmatmul.mubr.f32.gmra.mxu1 %v4381_v48  ;;  %v17384_v3 = vld [vmem:[#allocation421_spill] sm:$0xff]  ;;  %v17385_v48 = vld [vmem:[#allocation570_spill] sm:$0xff]  ;;  %v17391_v57 = vld [vmem:[#allocation144_spill] sm:$0xff] }
 0x5a7   :  { %v14640_v52 = vadd.f32 %v5481_v59, %v5097_v47  ;;  %v14643_v42 = vadd.f32 %v5706_v31, %v14172_v36  ;;  %5949 = vmatprep.mubr.f32.mxu0 %v4644_v21  ;;  %6174 = vmatprep.mubr.f32.mxu1 %v4390_v27  ;;  %v4398_v35 = vmul.f32 %v17385_v48, %v17384_v3  ;;  %v17386_v31 = vld [vmem:[#allocation418_spill] sm:$0xff] }
 0x5a8   :  { %v5483_v23 = vpop.f32.mrf.mxu1  ;;  %v5708_v26 = vpop.f32.mrf.mxu0  ;;  %v5102_v36 = vadd.f32 %v14561_v11, %v14184_v28  ;;  %v4651_v45 = vmul.f32 %v17387_v19, %v17386_v31  ;;  %v17390_v28 = vld [vmem:[#allocation424_spill] sm:$0xff]  ;;  %v17395_v31 = vld [vmem:[#allocation82_spill] sm:$0xff] }
 0x5a9   :  { %v4397_v23 = vmul.f32 %v17389_v41, %v17388_v62  ;;  %v4660_v3 = vmul.f32 %v17391_v57, %v17390_v28  ;;  %v17396_v62 = vld [vmem:[#allocation423_spill] sm:$0xff]  ;;  %v17399_v57 = vld [vmem:[#allocation142_spill] sm:$0xff] }
 0x5aa   :  { %v5486_v47 = vpop.f32.mrf.mxu1  ;;  %v5711_v21 = vpop.f32.mrf.mxu0  ;;  %5950 = vmatmul.mubr.f32.gmra.mxu0 %v4643_v54  ;;  %6175 = vmatmul.mubr.f32.gmra.mxu1 %v4389_v51  ;;  %v17392_v54 = vld [vmem:[#allocation425_spill] sm:$0xff]  ;;  %v17393_v51 = vld [vmem:[#allocation576_spill] sm:$0xff]  ;;  %v17397_v41 = vld [vmem:[#allocation571_spill] sm:$0xff] }
 0x5ab   :  { %v14655_v27 = vadd.f32 %v5486_v47, %v5102_v36  ;;  %v14658_v59 = vadd.f32 %v5711_v21, %v14186_v4  ;;  %5954 = vmatprep.mubr.f32.mxu0 %v4652_v58  ;;  %6179 = vmatprep.mubr.f32.mxu1 %v4398_v35  ;;  %v4406_v48 = vmul.f32 %v17393_v51, %v17392_v54  ;;  %v17394_v21 = vld [vmem:[#allocation422_spill] sm:$0xff] }
 0x5ac   :  { %v5488_v26 = vpop.f32.mrf.mxu1  ;;  %v5713_v15 = vpop.f32.mrf.mxu0  ;;  %v5107_v4 = vadd.f32 %v14561_v11, %v14198_v8  ;;  %v4659_v19 = vmul.f32 %v17395_v31, %v17394_v21  ;;  %v17398_v8 = vld [vmem:[#allocation428_spill] sm:$0xff] }
 0x5ad   :  { %v4405_v26 = vmul.f32 %v17397_v41, %v17396_v62  ;;  %v4668_v54 = vmul.f32 %v17399_v57, %v17398_v8  ;;  %v17403_v21 = vld [vmem:[#allocation88_spill] sm:$0xff]  ;;  %v17404_v62 = vld [vmem:[#allocation427_spill] sm:$0xff]  ;;  %v17405_v41 = vld [vmem:[#allocation577_spill] sm:$0xff] }
 0x5ae   :  { %v5491_v36 = vpop.f32.mrf.mxu1  ;;  %v5716_v58 = vpop.f32.mrf.mxu0  ;;  %5955 = vmatmul.mubr.f32.gmra.mxu0 %v4651_v45  ;;  %6180 = vmatmul.mubr.f32.gmra.mxu1 %v4397_v23  ;;  %v17400_v45 = vld [vmem:[#allocation429_spill] sm:$0xff]  ;;  %v17401_v23 = vld [vmem:[#allocation574_spill] sm:$0xff]  ;;  %v17407_v57 = vld [vmem:[#allocation148_spill] sm:$0xff] }
 0x5af   :  { %v14670_v35 = vadd.f32 %v5491_v36, %v5107_v4  ;;  %v14673_v47 = vadd.f32 %v5716_v58, %v14200_v16  ;;  %5959 = vmatprep.mubr.f32.mxu0 %v4660_v3  ;;  %6184 = vmatprep.mubr.f32.mxu1 %v4406_v48  ;;  %v4414_v51 = vmul.f32 %v17401_v23, %v17400_v45  ;;  %v17402_v58 = vld [vmem:[#allocation426_spill] sm:$0xff] }
 0x5b0   :  { %v5493_v15 = vpop.f32.mrf.mxu1  ;;  %v5718_v28 = vpop.f32.mrf.mxu0  ;;  %v5112_v16 = vadd.f32 %v14561_v11, %v14212_v6  ;;  %v4667_v31 = vmul.f32 %v17403_v21, %v17402_v58  ;;  %v17406_v6 = vld [vmem:[#allocation432_spill] sm:$0xff]  ;;  %v17411_v58 = vld [vmem:[#allocation86_spill] sm:$0xff] }
 0x5b1   :  { %v4413_v15 = vmul.f32 %v17405_v41, %v17404_v62  ;;  %v4676_v45 = vmul.f32 %v17407_v57, %v17406_v6  ;;  %v17412_v62 = vld [vmem:[#allocation431_spill] sm:$0xff]  ;;  %v17415_v57 = vld [vmem:[#allocation146_spill] sm:$0xff] }
 0x5b2   :  { %v5496_v4 = vpop.f32.mrf.mxu1  ;;  %v5721_v3 = vpop.f32.mrf.mxu0  ;;  %5960 = vmatmul.mubr.f32.gmra.mxu0 %v4659_v19  ;;  %6185 = vmatmul.mubr.f32.gmra.mxu1 %v4405_v26  ;;  %v17408_v19 = vld [vmem:[#allocation433_spill] sm:$0xff]  ;;  %v17409_v26 = vld [vmem:[#allocation580_spill] sm:$0xff]  ;;  %v17413_v41 = vld [vmem:[#allocation575_spill] sm:$0xff] }
 0x5b3   :  { %v14685_v48 = vadd.f32 %v5496_v4, %v5112_v16  ;;  %v14688_v36 = vadd.f32 %v5721_v3, %v14214_v2  ;;  %5964 = vmatprep.mubr.f32.mxu0 %v4668_v54  ;;  %6189 = vmatprep.mubr.f32.mxu1 %v4414_v51  ;;  %v4422_v23 = vmul.f32 %v17409_v26, %v17408_v19  ;;  %v17410_v3 = vld [vmem:[#allocation430_spill] sm:$0xff] }
 0x5b4   :  { %v5498_v28 = vpop.f32.mrf.mxu1  ;;  %v5723_v8 = vpop.f32.mrf.mxu0  ;;  %v5117_v2 = vadd.f32 %v14561_v11, %v14226_v10  ;;  %v4675_v21 = vmul.f32 %v17411_v58, %v17410_v3  ;;  %v17414_v10 = vld [vmem:[#allocation436_spill] sm:$0xff] }
 0x5b5   :  { %v4421_v28 = vmul.f32 %v17413_v41, %v17412_v62  ;;  %v4684_v19 = vmul.f32 %v17415_v57, %v17414_v10  ;;  %v17419_v3 = vld [vmem:[#allocation92_spill] sm:$0xff]  ;;  %v17420_v62 = vld [vmem:[#allocation435_spill] sm:$0xff]  ;;  %v17421_v41 = vld [vmem:[#allocation581_spill] sm:$0xff] }
 0x5b6   :  { %v5501_v16 = vpop.f32.mrf.mxu1  ;;  %v5726_v54 = vpop.f32.mrf.mxu0  ;;  %5965 = vmatmul.mubr.f32.gmra.mxu0 %v4667_v31  ;;  %6190 = vmatmul.mubr.f32.gmra.mxu1 %v4413_v15  ;;  %v17416_v31 = vld [vmem:[#allocation437_spill] sm:$0xff]  ;;  %v17417_v15 = vld [vmem:[#allocation578_spill] sm:$0xff]  ;;  %v17423_v57 = vld [vmem:[#allocation152_spill] sm:$0xff] }
 0x5b7   :  { %v14700_v51 = vadd.f32 %v5501_v16, %v5117_v2  ;;  %v14703_v4 = vadd.f32 %v5726_v54, %v14228_v12  ;;  %5969 = vmatprep.mubr.f32.mxu0 %v4676_v45  ;;  %6194 = vmatprep.mubr.f32.mxu1 %v4422_v23  ;;  %v4430_v26 = vmul.f32 %v17417_v15, %v17416_v31  ;;  %v17418_v54 = vld [vmem:[#allocation434_spill] sm:$0xff] }
 0x5b8   :  { %v5503_v8 = vpop.f32.mrf.mxu1  ;;  %v5728_v6 = vpop.f32.mrf.mxu0  ;;  %v5122_v12 = vadd.f32 %v14561_v11, %v14240_v24  ;;  %v4683_v58 = vmul.f32 %v17419_v3, %v17418_v54  ;;  %v17422_v24 = vld [vmem:[#allocation440_spill] sm:$0xff]  ;;  %v17427_v54 = vld [vmem:[#allocation90_spill] sm:$0xff] }
 0x5b9   :  { %v4429_v8 = vmul.f32 %v17421_v41, %v17420_v62  ;;  %v4692_v31 = vmul.f32 %v17423_v57, %v17422_v24  ;;  %v17428_v62 = vld [vmem:[#allocation439_spill] sm:$0xff]  ;;  %v17431_v57 = vld [vmem:[#allocation585_spill] sm:$0xff] }
 0x5ba   :  { %v5506_v2 = vpop.f32.mrf.mxu1  ;;  %v5731_v45 = vpop.f32.mrf.mxu0  ;;  %5970 = vmatmul.mubr.f32.gmra.mxu0 %v4675_v21  ;;  %6195 = vmatmul.mubr.f32.gmra.mxu1 %v4421_v28  ;;  %v17424_v21 = vld [vmem:[#allocation441_spill] sm:$0xff]  ;;  %v17425_v28 = vld [vmem:[#allocation584_spill] sm:$0xff]  ;;  %v17429_v41 = vld [vmem:[#allocation579_spill] sm:$0xff] }
 0x5bb   :  { %v14715_v23 = vadd.f32 %v5506_v2, %v5122_v12  ;;  %v14718_v16 = vadd.f32 %v5731_v45, %v14242_v18  ;;  %5974 = vmatprep.mubr.f32.mxu0 %v4684_v19  ;;  %6199 = vmatprep.mubr.f32.mxu1 %v4430_v26  ;;  %v4438_v15 = vmul.f32 %v17425_v28, %v17424_v21  ;;  %v17426_v45 = vld [vmem:[#allocation438_spill] sm:$0xff] }
 0x5bc   :  { %v5508_v6 = vpop.f32.mrf.mxu1  ;;  %v5733_v10 = vpop.f32.mrf.mxu0  ;;  %v5127_v18 = vadd.f32 %v14561_v11, %v14254_v0  ;;  %v4691_v3 = vmul.f32 %v17427_v54, %v17426_v45  ;;  %v17430_v0 = vld [vmem:[#allocation443_spill] sm:$0xff]  ;;  %v17434_v54 = vld [vmem:[#allocation445_spill] sm:$0xff] }
 0x5bd   :  { %v4437_v6 = vmul.f32 %v17429_v41, %v17428_v62  ;;  %v4446_v21 = vmul.f32 %v17431_v57, %v17430_v0  ;;  %v17435_v62 = vld [vmem:[#allocation582_spill] sm:$0xff] }
 0x5be   :  { %v5511_v12 = vpop.f32.mrf.mxu1  ;;  %v5736_v19 = vpop.f32.mrf.mxu0  ;;  %5975 = vmatmul.mubr.f32.gmra.mxu0 %v4683_v58  ;;  %6200 = vmatmul.mubr.f32.gmra.mxu1 %v4429_v8  ;;  %v5132_v58 = vadd.f32 %v14561_v11, %v14268_v9  ;;  %v4454_v41 = vmul.f32 %v17435_v62, %v17434_v54  ;;  %v5137_v9 = vadd.f32 %v14561_v11, %v14282_v56  ;;  %v17437_v0 = vld [vmem:[#allocation150_spill] sm:$0xff] }
 0x5bf   :  { %v14730_v26 = vadd.f32 %v5511_v12, %v5127_v18  ;;  %v14733_v2 = vadd.f32 %v5736_v19, %v14256_v1  ;;  %5979 = vmatprep.mubr.f32.mxu0 %v4692_v31  ;;  %6204 = vmatprep.mubr.f32.mxu1 %v4438_v15  ;;  %v17432_v15 = vld [vmem:[#allocation442_spill] sm:$0xff]  ;;  %v17433_v18 = vld [vmem:[#allocation96_spill] sm:$0xff]  ;;  %v5142_v56 = vadd.f32 %v14561_v11, %v14296_v34 }
 0x5c0   :  { %v5513_v10 = vpop.f32.mrf.mxu1  ;;  %v5738_v24 = vpop.f32.mrf.mxu0  ;;  %v4445_v12 = vmul.f32 %v17433_v18, %v17432_v15  ;;  %v17441_v54 = vld [vmem:[#allocation94_spill] sm:$0xff]  ;;  %v5147_v34 = vadd.f32 %v14561_v11, %v14313_v53 }
 0x5c1   :  { %v17436_v24 = vld [vmem:[#allocation444_spill] sm:$0xff] }
 0x5c2   :  { %v5516_v8 = vpop.f32.mrf.mxu1  ;;  %v5741_v28 = vpop.f32.mrf.mxu0  ;;  %5980 = vmatmul.mubr.f32.gmra.mxu0 %v4691_v3  ;;  %6205 = vmatmul.mubr.f32.gmra.mxu1 %v4437_v6  ;;  %v4453_v57 = vmul.f32 %v17437_v0, %v17436_v24 }
 0x5c3   :  { %v14743_v1 = vadd.f32 %v5516_v8, %v5132_v58  ;;  %v14746_v31 = vadd.f32 %v5741_v28, %v14270_v14  ;;  %6209 = vmatprep.mubr.f32.mxu1 %v4446_v21  ;;  %v17438_v8 = vld [vmem:[#allocation447_spill] sm:$0xff] }
 0x5c4   :  { %v5518_v19 = vpop.f32.mrf.mxu1  ;;  %v5743_v45 = vpop.f32.mrf.mxu0  ;;  %v17439_v28 = vld [vmem:[#allocation583_spill] sm:$0xff] }
 0x5c5   :  { %v4462_v15 = vmul.f32 %v17439_v28, %v17438_v8  ;;  %v17440_v45 = vld [vmem:[#allocation446_spill] sm:$0xff]  ;;  %v17445_v8 = vld [vmem:[#allocation156_spill] sm:$0xff] }
 0x5c6   :  { %v5521_v10 = vpop.f32.mrf.mxu1  ;;  %v5746_v3 = vpop.f32.mrf.mxu0  ;;  %6210 = vmatmul.mubr.f32.gmra.mxu1 %v4445_v12  ;;  %v4461_v62 = vmul.f32 %v17441_v54, %v17440_v45  ;;  %v17448_v54 = vld [vmem:[#allocation129_spill] sm:$0xff] }
 0x5c7   :  { %v14754_v6 = vadd.f32 %v5521_v10, %v5137_v9  ;;  %v14757_v14 = vadd.f32 %v5746_v3, %v14284_v37  ;;  %6214 = vmatprep.mubr.f32.mxu1 %v4454_v41  ;;  %v17442_v10 = vld [vmem:[#allocation449_spill] sm:$0xff]  ;;  %v17443_v3 = vld [vmem:[#allocation588_spill] sm:$0xff]  ;;  %v5152_v53 = vadd.f32 %v14561_v11, %v17448_v54 }
 0x5c8   :  { %v5523_v21 = vpop.f32.mrf.mxu1  ;;  %v5748_v58 = vpop.f32.mrf.mxu0  ;;  %v4470_v24 = vmul.f32 %v17443_v3, %v17442_v10  ;;  %v17450_v10 = vld [vmem:[#allocation625_spill] sm:$0xff]  ;;  %v17452_v3 = vld [vmem:[#allocation450_spill] sm:$0xff] }
 0x5c9   :  { %v17444_v58 = vld [vmem:[#allocation448_spill] sm:$0xff] }
 0x5ca   :  { %v5526_v18 = vpop.f32.mrf.mxu1  ;;  %v5751_v19 = vpop.f32.mrf.mxu0  ;;  %6215 = vmatmul.mubr.f32.gmra.mxu1 %v4453_v57  ;;  %v4469_v28 = vmul.f32 %v17445_v8, %v17444_v58  ;;  %v17454_v58 = vld [vmem:[#allocation453_spill] sm:$0xff]  ;;  %v17455_v8 = vld [vmem:[#allocation586_spill] sm:$0xff] }
 0x5cb   :  { %v14765_v12 = vadd.f32 %v5526_v18, %v5142_v56  ;;  %v14768_v37 = vadd.f32 %v5751_v19, %v14298_v22  ;;  %6219 = vmatprep.mubr.f32.mxu1 %v4462_v15  ;;  %v17446_v18 = vld [vmem:[#allocation451_spill] sm:$0xff]  ;;  %v17447_v19 = vld [vmem:[#allocation589_spill] sm:$0xff] }
 0x5cc   :  { %v5528_v41 = vpop.f32.mrf.mxu1  ;;  %v5753_v9 = vpop.f32.mrf.mxu0  ;;  %v4478_v45 = vmul.f32 %v17447_v19, %v17446_v18 }
 0x5ce   :  { %v5531_v0 = vpop.f32.mrf.mxu1  ;;  %v5756_v21 = vpop.f32.mrf.mxu0  ;;  %6220 = vmatmul.mubr.f32.gmra.mxu1 %v4461_v62 }
 0x5cf   :  { %v14776_v57 = vadd.f32 %v5531_v0, %v5147_v34  ;;  %v14779_v22 = vadd.f32 %v5756_v21, %v14315_v44  ;;  %6224 = vmatprep.mubr.f32.mxu1 %v4470_v24  ;;  %v17453_v24 = vld [vmem:[#allocation100_spill] sm:$0xff] }
 0x5d0   :  { %v5533_v15 = vpop.f32.mrf.mxu1  ;;  %v5758_v56 = vpop.f32.mrf.mxu0  ;;  %v4477_v34 = vmul.f32 %v17453_v24, %v17452_v3 }
 0x5d1   :  { %v4486_v15 = vmul.f32 %v17455_v8, %v17454_v58  ;;  %v17456_v56 = vld [vmem:[#allocation13_spill] sm:$0xff]  ;;  %v17464_v8 = vld [vmem:[#allocation127_spill] sm:$0xff] }
 0x5d2   :  { %v5536_v41 = vpop.f32.mrf.mxu1  ;;  %v5761_v9 = vpop.f32.mrf.mxu0  ;;  %6225 = vmatmul.mubr.f32.gmra.mxu1 %v4469_v28  ;;  %v5157_v18 = vadd.f32 %v14561_v11, %v17456_v56  ;;  %v5162_v56 = vadd.f32 %v14561_v11, %v17464_v8 }
 0x5d3   :  { %v14787_v62 = vadd.f32 %v5536_v41, %v5152_v53  ;;  %v14790_v44 = vadd.f32 %v5761_v9, %v17450_v10  ;;  %6229 = vmatprep.mubr.f32.mxu1 %v4478_v45  ;;  %v17458_v53 = vld [vmem:[#allocation622_spill] sm:$0xff]  ;;  %v17460_v45 = vld [vmem:[#allocation452_spill] sm:$0xff] }
 0x5d4   :  { %v5538_v0 = vpop.f32.mrf.mxu1  ;;  %v5763_v21 = vpop.f32.mrf.mxu0  ;;  %v17461_v9 = vld [vmem:[#allocation154_spill] sm:$0xff] }
 0x5d5   :  { %17449 = vst [vmem:[#allocation631_spill] sm:$0xff] %v14787_v62  ;;  %17451 = vst [vmem:[#allocation23_spill] sm:$0xff] %v14790_v44  ;;  %v4485_v10 = vmul.f32 %v17461_v9, %v17460_v45  ;;  %v17462_v0 = vld [vmem:[#allocation455_spill] sm:$0xff] }
 0x5d6   :  { %v5541_v19 = vpop.f32.mrf.mxu1  ;;  %v5766_v54 = vpop.f32.mrf.mxu0  ;;  %6230 = vmatmul.mubr.f32.gmra.mxu1 %v4477_v34  ;;  %v17463_v21 = vld [vmem:[#allocation587_spill] sm:$0xff] }
 0x5d7   :  { %v14798_v28 = vadd.f32 %v5541_v19, %v5157_v18  ;;  %v14801_v41 = vadd.f32 %v5766_v54, %v17458_v53  ;;  %6234 = vmatprep.mubr.f32.mxu1 %v4486_v15  ;;  %v4494_v58 = vmul.f32 %v17463_v21, %v17462_v0  ;;  %v17466_v18 = vld [vmem:[#allocation623_spill] sm:$0xff]  ;;  %v17468_v15 = vld [vmem:[#allocation454_spill] sm:$0xff]  ;;  %v17472_v21 = vld [vmem:[#allocation17_spill] sm:$0xff] }
 0x5d8   :  { %v5543_v3 = vpop.f32.mrf.mxu1  ;;  %v5768_v24 = vpop.f32.mrf.mxu0  ;;  %v17469_v54 = vld [vmem:[#allocation98_spill] sm:$0xff]  ;;  %v5167_v8 = vadd.f32 %v14561_v11, %v17472_v21 }
 0x5d9   :  { %17457 = vst [vmem:[#allocation636_spill] sm:$0xff] %v14798_v28  ;;  %17459 = vst [vmem:[#allocation141_spill] sm:$0xff] %v14801_v41  ;;  %v4493_v53 = vmul.f32 %v17469_v54, %v17468_v15  ;;  %v17470_v3 = vld [vmem:[#allocation457_spill] sm:$0xff]  ;;  %v17471_v24 = vld [vmem:[#allocation592_spill] sm:$0xff] }
 0x5da   :  { %v5546_v44 = vpop.f32.mrf.mxu1  ;;  %v5771_v62 = vpop.f32.mrf.mxu0  ;;  %6235 = vmatmul.mubr.f32.gmra.mxu1 %v4485_v10  ;;  %v4502_v0 = vmul.f32 %v17471_v24, %v17470_v3  ;;  %v17474_v10 = vld [vmem:[#allocation628_spill] sm:$0xff]  ;;  %v17480_v24 = vld [vmem:[#allocation133_spill] sm:$0xff] }
 0x5db   :  { %v14809_v34 = vadd.f32 %v5546_v44, %v5162_v56  ;;  %v14812_v19 = vadd.f32 %v5771_v62, %v17466_v18  ;;  %6239 = vmatprep.mubr.f32.mxu1 %v4494_v58  ;;  %v17476_v58 = vld [vmem:[#allocation456_spill] sm:$0xff]  ;;  %v5172_v21 = vadd.f32 %v14561_v11, %v17480_v24 }
 0x5dc   :  { %v5548_v45 = vpop.f32.mrf.mxu1  ;;  %v5773_v9 = vpop.f32.mrf.mxu0  ;;  %v17477_v56 = vld [vmem:[#allocation160_spill] sm:$0xff] }
 0x5dd   :  { %17465 = vst [vmem:[#allocation637_spill] sm:$0xff] %v14809_v34  ;;  %17467 = vst [vmem:[#allocation22_spill] sm:$0xff] %v14812_v19  ;;  %v4501_v18 = vmul.f32 %v17477_v56, %v17476_v58  ;;  %v17478_v45 = vld [vmem:[#allocation460_spill] sm:$0xff]  ;;  %v17479_v9 = vld [vmem:[#allocation593_spill] sm:$0xff] }
 0x5de   :  { %v5551_v41 = vpop.f32.mrf.mxu1  ;;  %v5776_v28 = vpop.f32.mrf.mxu0  ;;  %6240 = vmatmul.mubr.f32.gmra.mxu1 %v4493_v53  ;;  %v4510_v3 = vmul.f32 %v17479_v9, %v17478_v45  ;;  %v17482_v53 = vld [vmem:[#allocation629_spill] sm:$0xff]  ;;  %v17488_v9 = vld [vmem:[#allocation16_spill] sm:$0xff] }
 0x5df   :  { %v14820_v44 = vadd.f32 %v5551_v41, %v5167_v8  ;;  %v14823_v62 = vadd.f32 %v5776_v28, %v17474_v10  ;;  %6244 = vmatprep.mubr.f32.mxu1 %v4502_v0  ;;  %v17484_v0 = vld [vmem:[#allocation458_spill] sm:$0xff]  ;;  %v17485_v8 = vld [vmem:[#allocation104_spill] sm:$0xff]  ;;  %v5177_v24 = vadd.f32 %v14561_v11, %v17488_v9 }
 0x5e0   :  { %v5553_v15 = vpop.f32.mrf.mxu1  ;;  %v5778_v54 = vpop.f32.mrf.mxu0  ;;  %v4509_v10 = vmul.f32 %v17485_v8, %v17484_v0 }
 0x5e1   :  { %17473 = vst [vmem:[#allocation634_spill] sm:$0xff] %v14820_v44  ;;  %17475 = vst [vmem:[#allocation139_spill] sm:$0xff] %v14823_v62  ;;  %v17486_v15 = vld [vmem:[#allocation464_spill] sm:$0xff]  ;;  %v17487_v54 = vld [vmem:[#allocation590_spill] sm:$0xff] }
 0x5e2   :  { %v5556_v19 = vpop.f32.mrf.mxu1  ;;  %v5781_v34 = vpop.f32.mrf.mxu0  ;;  %6245 = vmatmul.mubr.f32.gmra.mxu1 %v4501_v18  ;;  %v4518_v45 = vmul.f32 %v17487_v54, %v17486_v15  ;;  %v17490_v18 = vld [vmem:[#allocation626_spill] sm:$0xff]  ;;  %v17496_v54 = vld [vmem:[#allocation131_spill] sm:$0xff] }
 0x5e3   :  { %v14831_v41 = vadd.f32 %v5556_v19, %v5172_v21  ;;  %v14834_v28 = vadd.f32 %v5781_v34, %v17482_v53  ;;  %6249 = vmatprep.mubr.f32.mxu1 %v4510_v3  ;;  %v17492_v3 = vld [vmem:[#allocation462_spill] sm:$0xff]  ;;  %v5182_v9 = vadd.f32 %v14561_v11, %v17496_v54 }
 0x5e4   :  { %v5558_v58 = vpop.f32.mrf.mxu1  ;;  %v5783_v56 = vpop.f32.mrf.mxu0  ;;  %v17493_v21 = vld [vmem:[#allocation158_spill] sm:$0xff] }
 0x5e5   :  { %17481 = vst [vmem:[#allocation635_spill] sm:$0xff] %v14831_v41  ;;  %17483 = vst [vmem:[#allocation26_spill] sm:$0xff] %v14834_v28  ;;  %v4517_v53 = vmul.f32 %v17493_v21, %v17492_v3  ;;  %v17494_v58 = vld [vmem:[#allocation468_spill] sm:$0xff]  ;;  %v17495_v56 = vld [vmem:[#allocation591_spill] sm:$0xff] }
 0x5e6   :  { %v5561_v62 = vpop.f32.mrf.mxu1  ;;  %v5786_v44 = vpop.f32.mrf.mxu0  ;;  %6250 = vmatmul.mubr.f32.gmra.mxu1 %v4509_v10  ;;  %v4526_v15 = vmul.f32 %v17495_v56, %v17494_v58  ;;  %v17498_v10 = vld [vmem:[#allocation627_spill] sm:$0xff]  ;;  %v17504_v56 = vld [vmem:[#allocation20_spill] sm:$0xff] }
 0x5e7   :  { %v14842_v19 = vadd.f32 %v5561_v62, %v5177_v24  ;;  %v14845_v34 = vadd.f32 %v5786_v44, %v17490_v18  ;;  %6254 = vmatprep.mubr.f32.mxu1 %v4518_v45  ;;  %v17500_v45 = vld [vmem:[#allocation466_spill] sm:$0xff]  ;;  %v5187_v54 = vadd.f32 %v14561_v11, %v17504_v56 }
 0x5e8   :  { %v5563_v0 = vpop.f32.mrf.mxu1  ;;  %v5788_v8 = vpop.f32.mrf.mxu0  ;;  %v17501_v24 = vld [vmem:[#allocation102_spill] sm:$0xff] }
 0x5e9   :  { %17489 = vst [vmem:[#allocation640_spill] sm:$0xff] %v14842_v19  ;;  %17491 = vst [vmem:[#allocation145_spill] sm:$0xff] %v14845_v34  ;;  %v4525_v18 = vmul.f32 %v17501_v24, %v17500_v45  ;;  %v17502_v0 = vld [vmem:[#allocation472_spill] sm:$0xff] }
 0x5ea   :  { %v5566_v28 = vpop.f32.mrf.mxu1  ;;  %v5791_v41 = vpop.f32.mrf.mxu0  ;;  %6255 = vmatmul.mubr.f32.gmra.mxu1 %v4517_v53  ;;  %v17503_v8 = vld [vmem:[#allocation108_spill] sm:$0xff] }
 0x5eb   :  { %v14853_v62 = vadd.f32 %v5566_v28, %v5182_v9  ;;  %v14856_v44 = vadd.f32 %v5791_v41, %v17498_v10  ;;  %6259 = vmatprep.mubr.f32.mxu1 %v4526_v15  ;;  %v4534_v58 = vmul.f32 %v17503_v8, %v17502_v0  ;;  %v17505_v53 = vld [vmem:[#allocation632_spill] sm:$0xff]  ;;  %v17507_v15 = vld [vmem:[#allocation470_spill] sm:$0xff]  ;;  %v17511_v8 = vld [vmem:[#allocation137_spill] sm:$0xff] }
 0x5ec   :  { %v5568_v3 = vpop.f32.mrf.mxu1  ;;  %v5793_v21 = vpop.f32.mrf.mxu0  ;;  %v17508_v9 = vld [vmem:[#allocation164_spill] sm:$0xff]  ;;  %v5192_v56 = vadd.f32 %v14561_v11, %v17511_v8 }
 0x5ed   :  { %17497 = vst [vmem:[#allocation641_spill] sm:$0xff] %v14853_v62  ;;  %17499 = vst [vmem:[#allocation25_spill] sm:$0xff] %v14856_v44  ;;  %v4533_v10 = vmul.f32 %v17508_v9, %v17507_v15  ;;  %v17509_v3 = vld [vmem:[#allocation476_spill] sm:$0xff]  ;;  %v17510_v21 = vld [vmem:[#allocation594_spill] sm:$0xff] }
 0x5ee   :  { %v5571_v34 = vpop.f32.mrf.mxu1  ;;  %v5796_v19 = vpop.f32.mrf.mxu0  ;;  %6260 = vmatmul.mubr.f32.gmra.mxu1 %v4525_v18  ;;  %v4542_v0 = vmul.f32 %v17510_v21, %v17509_v3  ;;  %v17513_v18 = vld [vmem:[#allocation474_spill] sm:$0xff]  ;;  %v17515_v9 = vld [vmem:[#allocation480_spill] sm:$0xff]  ;;  %v17517_v3 = vld [vmem:[#allocation633_spill] sm:$0xff] }
 0x5ef   :  { %v14864_v28 = vadd.f32 %v5571_v34, %v5187_v54  ;;  %v14867_v41 = vadd.f32 %v5796_v19, %v17505_v53  ;;  %6264 = vmatprep.mubr.f32.mxu1 %v4534_v58  ;;  %v17514_v58 = vld [vmem:[#allocation597_spill] sm:$0xff]  ;;  %v5197_v21 = vadd.f32 %v14561_v11, %v17517_v3 }
 0x5f0   :  { %v5573_v45 = vpop.f32.mrf.mxu1  ;;  %v5798_v24 = vpop.f32.mrf.mxu0  ;;  %v4541_v54 = vmul.f32 %v17514_v58, %v17513_v18  ;;  %v17521_v58 = vld [vmem:[#allocation484_spill] sm:$0xff] }
 0x5f1   :  { %17506 = vst [vmem:[#allocation638_spill] sm:$0xff] %v14867_v41  ;;  %v17516_v45 = vld [vmem:[#allocation168_spill] sm:$0xff] }
 0x5f2   :  { %v5576_v44 = vpop.f32.mrf.mxu1  ;;  %v5801_v62 = vpop.f32.mrf.mxu0  ;;  %6265 = vmatmul.mubr.f32.gmra.mxu1 %v4533_v10  ;;  %v4550_v24 = vmul.f32 %v17516_v45, %v17515_v9  ;;  %v17520_v10 = vld [vmem:[#allocation106_spill] sm:$0xff]  ;;  %v17523_v9 = vld [vmem:[#allocation19_spill] sm:$0xff] }
 0x5f3   :  { %v14875_v34 = vadd.f32 %v5576_v44, %v5192_v56  ;;  %v14878_v19 = vadd.f32 %v5801_v62, %v14441_v39  ;;  %6269 = vmatprep.mubr.f32.mxu1 %v4542_v0  ;;  %v17519_v62 = vld [vmem:[#allocation478_spill] sm:$0xff]  ;;  %v5202_v45 = vadd.f32 %v14561_v11, %v17523_v9 }
 0x5f4   :  { %v5578_v53 = vpop.f32.mrf.mxu1  ;;  %v5803_v15 = vpop.f32.mrf.mxu0  ;;  %v4549_v0 = vmul.f32 %v17520_v10, %v17519_v62  ;;  %v17527_v10 = vld [vmem:[#allocation488_spill] sm:$0xff] }
 0x5f5   :  { %17512 = vst [vmem:[#allocation143_spill] sm:$0xff] %v14878_v19  ;;  %v17522_v53 = vld [vmem:[#allocation601_spill] sm:$0xff] }
 0x5f6   :  { %v5581_v8 = vpop.f32.mrf.mxu1  ;;  %v5806_v41 = vpop.f32.mrf.mxu0  ;;  %6270 = vmatmul.mubr.f32.gmra.mxu1 %v4541_v54  ;;  %v4558_v15 = vmul.f32 %v17522_v53, %v17521_v58  ;;  %v17529_v58 = vld [vmem:[#allocation630_spill] sm:$0xff] }
 0x5f7   :  { %v14886_v44 = vadd.f32 %v5581_v8, %v5197_v21  ;;  %v14889_v39 = vadd.f32 %v5806_v41, %v14455_v49  ;;  %6274 = vmatprep.mubr.f32.mxu1 %v4550_v24  ;;  %v17525_v41 = vld [vmem:[#allocation482_spill] sm:$0xff]  ;;  %v17526_v24 = vld [vmem:[#allocation600_spill] sm:$0xff]  ;;  %v5207_v53 = vadd.f32 %v14561_v11, %v17529_v58 }
 0x5f8   :  { %v5583_v56 = vpop.f32.mrf.mxu1  ;;  %v5808_v18 = vpop.f32.mrf.mxu0  ;;  %v4557_v21 = vmul.f32 %v17526_v24, %v17525_v41  ;;  %v17532_v24 = vld [vmem:[#allocation492_spill] sm:$0xff] }
 0x5f9   :  { %17518 = vst [vmem:[#allocation639_spill] sm:$0xff] %v14889_v39  ;;  %v17528_v56 = vld [vmem:[#allocation598_spill] sm:$0xff] }
 0x5fa   :  { %v5586_v3 = vpop.f32.mrf.mxu1  ;;  %v5811_v19 = vpop.f32.mrf.mxu0  ;;  %6275 = vmatmul.mubr.f32.gmra.mxu1 %v4549_v0  ;;  %v4566_v18 = vmul.f32 %v17528_v56, %v17527_v10  ;;  %v17534_v10 = vld [vmem:[#allocation135_spill] sm:$0xff] }
 0x5fb   :  { %v14897_v54 = vadd.f32 %v5586_v3, %v5202_v45  ;;  %v14900_v49 = vadd.f32 %v5811_v19, %v14469_v50  ;;  %6279 = vmatprep.mubr.f32.mxu1 %v4558_v15  ;;  %v17530_v19 = vld [vmem:[#allocation486_spill] sm:$0xff]  ;;  %v5212_v56 = vadd.f32 %v14561_v11, %v17534_v10 }
 0x5fc   :  { %v5588_v8 = vpop.f32.mrf.mxu1  ;;  %v5813_v62 = vpop.f32.mrf.mxu0  ;;  %v17531_v15 = vld [vmem:[#allocation166_spill] sm:$0xff] }
 0x5fd   :  { %17524 = vst [vmem:[#allocation29_spill] sm:$0xff] %v14900_v49  ;;  %v4565_v45 = vmul.f32 %v17531_v15, %v17530_v19  ;;  %v17533_v8 = vld [vmem:[#allocation172_spill] sm:$0xff] }
 0x5fe   :  { %v5591_v9 = vpop.f32.mrf.mxu1  ;;  %v5816_v39 = vpop.f32.mrf.mxu0  ;;  %6280 = vmatmul.mubr.f32.gmra.mxu1 %v4557_v21  ;;  %v4574_v62 = vmul.f32 %v17533_v8, %v17532_v24  ;;  %v17537_v15 = vld [vmem:[#allocation496_spill] sm:$0xff] }
 0x5ff   :  { %v14908_v0 = vadd.f32 %v5591_v9, %v5207_v53  ;;  %v14911_v50 = vadd.f32 %v5816_v39, %v14483_v25  ;;  %6284 = vmatprep.mubr.f32.mxu1 %v4566_v18  ;;  %v17535_v39 = vld [vmem:[#allocation490_spill] sm:$0xff] }
 0x600   :  { %v5593_v3 = vpop.f32.mrf.mxu1  ;;  %v5818_v41 = vpop.f32.mrf.mxu0  ;;  %v17536_v18 = vld [vmem:[#allocation110_spill] sm:$0xff] }
 0x601   :  { %v4573_v53 = vmul.f32 %v17536_v18, %v17535_v39  ;;  %v17538_v3 = vld [vmem:[#allocation605_spill] sm:$0xff]  ;;  %v17542_v39 = vld [vmem:[#allocation114_spill] sm:$0xff] }
 0x602   :  { %v5596_v58 = vpop.f32.mrf.mxu1  ;;  %v5821_v49 = vpop.f32.mrf.mxu0  ;;  %6285 = vmatmul.mubr.f32.gmra.mxu1 %v4565_v45  ;;  %v4582_v41 = vmul.f32 %v17538_v3, %v17537_v15  ;;  %v17544_v3 = vld [vmem:[#allocation170_spill] sm:$0xff] }
 0x603   :  { %v14919_v21 = vadd.f32 %v5596_v58, %v5212_v56  ;;  %v14922_v25 = vadd.f32 %v5821_v49, %v14497_v7  ;;  %6289 = vmatprep.mubr.f32.mxu1 %v4574_v62  ;;  %v17539_v7 = vld [vmem:[#allocation494_spill] sm:$0xff]  ;;  %v17540_v49 = vld [vmem:[#allocation604_spill] sm:$0xff] }
 0x604   :  { %v5598_v9 = vpop.f32.mrf.mxu1  ;;  %v5823_v19 = vpop.f32.mrf.mxu0  ;;  %v4581_v62 = vmul.f32 %v17540_v49, %v17539_v7  ;;  %v17541_v58 = vld [vmem:[#allocation500_spill] sm:$0xff] }
 0x605   :  { %v4590_v18 = vmul.f32 %v17542_v39, %v17541_v58  ;;  %v17545_v7 = vld [vmem:[#allocation504_spill] sm:$0xff]  ;;  %v17548_v39 = vld [vmem:[#allocation603_spill] sm:$0xff] }
 0x606   :  { %v5826_v24 = vpop.f32.mrf.mxu0  ;;  %v6051_v8 = vpop.f32.mrf.mxu1  ;;  %6290 = vmatmul.mubr.f32.gmra.mxu1 %v4573_v53  ;;  %v17546_v49 = vld [vmem:[#allocation608_spill] sm:$0xff] }
 0x607   :  { %v14929_v11 = vadd.f32 %v5826_v24, %v14509_v55  ;;  %v6052_v45 = vadd.f32 %v6051_v8, %v14512_v63  ;;  %6294 = vmatprep.mubr.f32.mxu1 %v4582_v41  ;;  %v17543_v63 = vld [vmem:[#allocation498_spill] sm:$0xff] }
 0x608   :  { %v5828_v10 = vpop.f32.mrf.mxu0  ;;  %v6053_v56 = vpop.f32.mrf.mxu1  ;;  %v4589_v41 = vmul.f32 %v17544_v3, %v17543_v63  ;;  %v17550_v63 = vld [vmem:[#allocation174_spill] sm:$0xff] }
 0x609   :  { %v6370_v9 = vmax.f32 %v6052_v45, 0.0  ;;  %v4598_v10 = vmul.f32 %v17546_v49, %v17545_v7  ;;  %v17552_v7 = vld [vmem:[#allocation5_spill] sm:$0xff] }
 0x60a   :  { %v5831_v19 = vpop.f32.mrf.mxu0  ;;  %v6056_v15 = vpop.f32.mrf.mxu1  ;;  %6295 = vmatmul.mubr.f32.gmra.mxu1 %v4581_v62  ;;  %v17547_v62 = vld [vmem:[#allocation502_spill] sm:$0xff] }
 0x60b   :  { %v14937_v53 = vadd.f32 %v5831_v19, %v14527_v32  ;;  %v6057_v55 = vadd.f32 %v6056_v15, %v14530_v29  ;;  %6299 = vmatprep.mubr.f32.mxu1 %v4590_v18  ;;  %7808 = vmatprep.mubr.msk.f32.mxu0 %vm2194_vm1, %v6370_v9  ;;  %v4597_v18 = vmul.f32 %v17548_v39, %v17547_v62  ;;  %v17549_v15 = vld [vmem:[#allocation508_spill] sm:$0xff] }
 0x60c   :  { %v5833_v24 = vpop.f32.mrf.mxu0  ;;  %v6058_v8 = vpop.f32.mrf.mxu1  ;;  %v4606_v3 = vmul.f32 %v17550_v63, %v17549_v15 }
 0x60d   :  { %v6371_v45 = vmax.f32 %v6057_v55, 0.0 }
 0x60e   :  { %v5836_v56 = vpop.f32.mrf.mxu0  ;;  %v6061_v58 = vpop.f32.mrf.mxu1  ;;  %6300 = vmatmul.mubr.f32.gmra.mxu1 %v4589_v41  ;;  %v17551_v41 = vld [vmem:[#allocation506_spill] sm:$0xff] }
 0x60f   :  { %v14946_v32 = vadd.f32 %v5836_v56, %v14545_v30  ;;  %v6062_v29 = vadd.f32 %v6061_v58, %v14548_v43  ;;  %6304 = vmatprep.mubr.f32.mxu1 %v4598_v10  ;;  %7809 = vmatmul.mubr.msk.f32.vlgmr.msra.gmra.mxu0 %vm2194_vm1, %v6371_v45  ;;  %v4605_v49 = vmul.f32 %v17552_v7, %v17551_v41  ;;  %v17553_v56 = vld [vmem:[#allocation512_spill] sm:$0xff]  ;;  %v17554_v58 = vld [vmem:[#allocation607_spill] sm:$0xff] }
 0x610   :  { %v5838_v9 = vpop.f32.mrf.mxu0  ;;  %v6063_v19 = vpop.f32.mrf.mxu1  ;;  %v4614_v62 = vmul.f32 %v17554_v58, %v17553_v56 }
 0x611   :  { %v6372_v55 = vmax.f32 %v6062_v29, 0.0  ;;  %v17556_v19 = vld [vmem:[#allocation606_spill] sm:$0xff] }
 0x612   :  { %v5841_v24 = vpop.f32.mrf.mxu0  ;;  %v6066_v8 = vpop.f32.mrf.mxu1  ;;  %6305 = vmatmul.mubr.f32.gmra.mxu1 %v4597_v18  ;;  %v17555_v18 = vld [vmem:[#allocation510_spill] sm:$0xff] }
 0x613   :  { %v14955_v30 = vadd.f32 %v5841_v24, %v14565_v33  ;;  %v6067_v43 = vadd.f32 %v6066_v8, %v14568_v61  ;;  %6309 = vmatprep.mubr.f32.mxu1 %v4606_v3  ;;  %7811 = vmatprep.mubr.msk.f32.mxu0 %vm2194_vm1, %v6372_v55  ;;  %v4613_v15 = vmul.f32 %v17556_v19, %v17555_v18  ;;  %v17557_v55 = vld [vmem:[#allocation516_spill] sm:$0xff]  ;;  %v17558_v24 = vld [vmem:[#allocation6_spill] sm:$0xff] }
 0x614   :  { %v5843_v10 = vpop.f32.mrf.mxu0  ;;  %v6068_v45 = vpop.f32.mrf.mxu1  ;;  %v4622_v8 = vmul.f32 %v17558_v24, %v17557_v55  ;;  %v17563_v19 = vld [vmem:[#allocation518_spill] sm:$0xff]  ;;  %v17565_v24 = vld [vmem:[#allocation524_spill] sm:$0xff] }
 0x615   :  { %v6373_v29 = vmax.f32 %v6067_v43, 0.0  ;;  %v17560_v10 = vld [vmem:[#allocation180_spill] sm:$0xff] }
 0x616   :  { %v5846_v39 = vpop.f32.mrf.mxu0  ;;  %v6071_v9 = vpop.f32.mrf.mxu1  ;;  %6310 = vmatmul.mubr.f32.gmra.mxu1 %v4605_v49  ;;  %v17559_v49 = vld [vmem:[#allocation514_spill] sm:$0xff] }
 0x617   :  { %v14964_v33 = vadd.f32 %v5846_v39, %v14580_v38  ;;  %v6072_v61 = vadd.f32 %v6071_v9, %v14583_v20  ;;  %6314 = vmatprep.mubr.f32.mxu1 %v4614_v62  ;;  %7812 = vmatmul.mubr.msk.f32.gmra.mxu0 %vm2194_vm1, %v6373_v29  ;;  %v4621_v45 = vmul.f32 %v17560_v10, %v17559_v49  ;;  %v17561_v62 = vld [vmem:[#allocation520_spill] sm:$0xff]  ;;  %v17562_v29 = vld [vmem:[#allocation610_spill] sm:$0xff] }
 0x618   :  { %v5848_v63 = vpop.f32.mrf.mxu0  ;;  %v6073_v3 = vpop.f32.mrf.mxu1  ;;  %v4630_v39 = vmul.f32 %v17562_v29, %v17561_v62  ;;  %v17567_v49 = vld [vmem:[#allocation522_spill] sm:$0xff]  ;;  %v17568_v10 = vld [vmem:[#allocation120_spill] sm:$0xff]  ;;  %v17570_v29 = vld [vmem:[#allocation617_spill] sm:$0xff] }
 0x619   :  { %v6374_v43 = vmax.f32 %v6072_v61, 0.0  ;;  %v17569_v62 = vld [vmem:[#allocation528_spill] sm:$0xff] }
 0x61a   :  { %v5851_v41 = vpop.f32.mrf.mxu0  ;;  %v6076_v7 = vpop.f32.mrf.mxu1  ;;  %6315 = vmatmul.mubr.f32.gmra.mxu1 %v4613_v15  ;;  %v17564_v15 = vld [vmem:[#allocation613_spill] sm:$0xff] }
 0x61b   :  { %v14973_v38 = vadd.f32 %v5851_v41, %v14595_v40  ;;  %v6077_v20 = vadd.f32 %v6076_v7, %v14598_v60  ;;  %6319 = vmatprep.mubr.f32.mxu1 %v4622_v8  ;;  %7814 = vmatprep.mubr.msk.f32.mxu0 %vm2194_vm1, %v6374_v43  ;;  %v4629_v63 = vmul.f32 %v17564_v15, %v17563_v19  ;;  %v17566_v8 = vld [vmem:[#allocation184_spill] sm:$0xff] }
 0x61c   :  { %v5853_v56 = vpop.f32.mrf.mxu0  ;;  %v6078_v58 = vpop.f32.mrf.mxu1  ;;  %v4638_v43 = vmul.f32 %v17566_v8, %v17565_v24  ;;  %v17572_v19 = vld [vmem:[#allocation616_spill] sm:$0xff]  ;;  %v17574_v24 = vld [vmem:[#allocation122_spill] sm:$0xff] }
 0x61d   :  { %v6375_v9 = vmax.f32 %v6077_v20, 0.0 }
 0x61e   :  { %v5856_v61 = vpop.f32.mrf.mxu0  ;;  %v6081_v18 = vpop.f32.mrf.mxu1  ;;  %6320 = vmatmul.mubr.f32.gmra.mxu1 %v4621_v45  ;;  %v4637_v45 = vmul.f32 %v17568_v10, %v17567_v49 }
 0x61f   :  { %v14982_v40 = vadd.f32 %v5856_v61, %v14610_v13  ;;  %v6082_v60 = vadd.f32 %v6081_v18, %v14613_v5  ;;  %6324 = vmatprep.mubr.f32.mxu1 %v4630_v39  ;;  %7815 = vmatmul.mubr.msk.f32.gmra.mxu0 %vm2194_vm1, %v6375_v9  ;;  %v4646_v39 = vmul.f32 %v17570_v29, %v17569_v62 }
 0x620   :  { %v5858_v3 = vpop.f32.mrf.mxu0  ;;  %v6083_v55 = vpop.f32.mrf.mxu1 }
 0x621   :  { %v6376_v41 = vmax.f32 %v6082_v60, 0.0  ;;  %v17571_v60 = vld [vmem:[#allocation526_spill] sm:$0xff]  ;;  %v17573_v55 = vld [vmem:[#allocation532_spill] sm:$0xff] }
 0x622   :  { %v5861_v7 = vpop.f32.mrf.mxu0  ;;  %v6086_v20 = vpop.f32.mrf.mxu1  ;;  %6325 = vmatmul.mubr.f32.gmra.mxu1 %v4629_v63  ;;  %v4645_v15 = vmul.f32 %v17572_v19, %v17571_v60  ;;  %v4654_v8 = vmul.f32 %v17574_v24, %v17573_v55 }
 0x623   :  { %v14991_v13 = vadd.f32 %v5861_v7, %v14625_v46  ;;  %v6087_v5 = vadd.f32 %v6086_v20, %v14628_v17  ;;  %6329 = vmatprep.mubr.f32.mxu1 %v4638_v43  ;;  %7817 = vmatprep.mubr.msk.f32.mxu0 %vm2194_vm1, %v6376_v41  ;;  %v17575_v20 = vld [vmem:[#allocation530_spill] sm:$0xff] }
 0x624   :  { %v5863_v56 = vpop.f32.mrf.mxu0  ;;  %v6088_v58 = vpop.f32.mrf.mxu1 }
 0x625   :  { %v6377_v9 = vmax.f32 %v6087_v5, 0.0  ;;  %v17576_v5 = vld [vmem:[#allocation182_spill] sm:$0xff]  ;;  %v17577_v56 = vld [vmem:[#allocation536_spill] sm:$0xff] }
 0x626   :  { %v5866_v61 = vpop.f32.mrf.mxu0  ;;  %v6091_v18 = vpop.f32.mrf.mxu1  ;;  %6330 = vmatmul.mubr.f32.gmra.mxu1 %v4637_v45  ;;  %v4653_v49 = vmul.f32 %v17576_v5, %v17575_v20  ;;  %v17578_v58 = vld [vmem:[#allocation620_spill] sm:$0xff] }
 0x627   :  { %v15000_v46 = vadd.f32 %v5866_v61, %v14640_v52  ;;  %v6092_v17 = vadd.f32 %v6091_v18, %v14643_v42  ;;  %6334 = vmatprep.mubr.f32.mxu1 %v4646_v39  ;;  %7818 = vmatmul.mubr.msk.f32.gmra.mxu0 %vm2194_vm1, %v6377_v9  ;;  %v4662_v62 = vmul.f32 %v17578_v58, %v17577_v56  ;;  %v17579_v61 = vld [vmem:[#allocation534_spill] sm:$0xff]  ;;  %v17580_v18 = vld [vmem:[#allocation615_spill] sm:$0xff]  ;;  %v17585_v5 = vld [vmem:[#allocation544_spill] sm:$0xff] }
 0x628   :  { %v5868_v63 = vpop.f32.mrf.mxu0  ;;  %v6093_v3 = vpop.f32.mrf.mxu1 }
 0x629   :  { %v6378_v43 = vmax.f32 %v6092_v17, 0.0  ;;  %v4661_v17 = vmul.f32 %v17580_v18, %v17579_v61  ;;  %v17582_v63 = vld [vmem:[#allocation621_spill] sm:$0xff]  ;;  %v17589_v61 = vld [vmem:[#allocation548_spill] sm:$0xff]  ;;  %v17590_v18 = vld [vmem:[#allocation619_spill] sm:$0xff] }
 0x62a   :  { %v5871_v41 = vpop.f32.mrf.mxu0  ;;  %v6096_v7 = vpop.f32.mrf.mxu1  ;;  %6335 = vmatmul.mubr.f32.gmra.mxu1 %v4645_v15  ;;  %v17581_v15 = vld [vmem:[#allocation540_spill] sm:$0xff] }
 0x62b   :  { %v15009_v52 = vadd.f32 %v5871_v41, %v14655_v27  ;;  %v6097_v42 = vadd.f32 %v6096_v7, %v14658_v59  ;;  %6339 = vmatprep.mubr.f32.mxu1 %v4654_v8  ;;  %7820 = vmatprep.mubr.msk.f32.mxu0 %vm2194_vm1, %v6378_v43  ;;  %v4670_v3 = vmul.f32 %v17582_v63, %v17581_v15  ;;  %v17583_v43 = vld [vmem:[#allocation538_spill] sm:$0xff]  ;;  %v17584_v41 = vld [vmem:[#allocation125_spill] sm:$0xff] }
 0x62c   :  { %v5873_v10 = vpop.f32.mrf.mxu0  ;;  %v6098_v45 = vpop.f32.mrf.mxu1  ;;  %v4669_v7 = vmul.f32 %v17584_v41, %v17583_v43  ;;  %v17591_v63 = vld [vmem:[#allocation546_spill] sm:$0xff]  ;;  %v17594_v43 = vld [vmem:[#allocation624_spill] sm:$0xff] }
 0x62d   :  { %v6379_v29 = vmax.f32 %v6097_v42, 0.0 }
 0x62e   :  { %v5876_v39 = vpop.f32.mrf.mxu0  ;;  %v6101_v9 = vpop.f32.mrf.mxu1  ;;  %6340 = vmatmul.mubr.f32.gmra.mxu1 %v4653_v49  ;;  %v17586_v49 = vld [vmem:[#allocation618_spill] sm:$0xff] }
 0x62f   :  { %v15018_v27 = vadd.f32 %v5876_v39, %v14670_v35  ;;  %v6102_v59 = vadd.f32 %v6101_v9, %v14673_v47  ;;  %6344 = vmatprep.mubr.f32.mxu1 %v4662_v62  ;;  %7821 = vmatmul.mubr.msk.f32.gmra.mxu0 %vm2194_vm1, %v6379_v29  ;;  %v4678_v10 = vmul.f32 %v17586_v49, %v17585_v5  ;;  %v17587_v62 = vld [vmem:[#allocation542_spill] sm:$0xff] }
 0x630   :  { %v5878_v60 = vpop.f32.mrf.mxu0  ;;  %v6103_v19 = vpop.f32.mrf.mxu1  ;;  %v17588_v29 = vld [vmem:[#allocation10_spill] sm:$0xff] }
 0x631   :  { %v6380_v55 = vmax.f32 %v6102_v59, 0.0  ;;  %v4677_v39 = vmul.f32 %v17588_v29, %v17587_v62  ;;  %v17595_v5 = vld [vmem:[#allocation550_spill] sm:$0xff] }
 0x632   :  { %v5881_v24 = vpop.f32.mrf.mxu0  ;;  %v6106_v8 = vpop.f32.mrf.mxu1  ;;  %6345 = vmatmul.mubr.f32.gmra.mxu1 %v4661_v17  ;;  %v4686_v17 = vmul.f32 %v17590_v18, %v17589_v61  ;;  %v17596_v49 = vld [vmem:[#allocation14_spill] sm:$0xff] }
 0x633   :  { %v15027_v35 = vadd.f32 %v5881_v24, %v14685_v48  ;;  %v6107_v47 = vadd.f32 %v6106_v8, %v14688_v36  ;;  %6349 = vmatprep.mubr.f32.mxu1 %v4670_v3  ;;  %7823 = vmatprep.mubr.msk.f32.mxu0 %vm2194_vm1, %v6380_v55  ;;  %v17592_v3 = vld [vmem:[#allocation124_spill] sm:$0xff] }
 0x634   :  { %v5883_v42 = vpop.f32.mrf.mxu0  ;;  %v6108_v20 = vpop.f32.mrf.mxu1  ;;  %v4685_v55 = vmul.f32 %v17592_v3, %v17591_v63 }
 0x635   :  { %v6381_v45 = vmax.f32 %v6107_v47, 0.0  ;;  %v17593_v47 = vld [vmem:[#allocation552_spill] sm:$0xff] }
 0x636   :  { %v5886_v56 = vpop.f32.mrf.mxu0  ;;  %v6111_v58 = vpop.f32.mrf.mxu1  ;;  %6350 = vmatmul.mubr.f32.gmra.mxu1 %v4669_v7  ;;  %v4694_v41 = vmul.f32 %v17594_v43, %v17593_v47 }
 0x637   :  { %v15036_v48 = vadd.f32 %v5886_v56, %v14700_v51  ;;  %v6112_v36 = vadd.f32 %v6111_v58, %v14703_v4  ;;  %6354 = vmatprep.mubr.f32.mxu1 %v4678_v10  ;;  %7824 = vmatmul.mubr.msk.f32.gmra.mxu0 %vm2194_vm1, %v6381_v45  ;;  %v4693_v10 = vmul.f32 %v17596_v49, %v17595_v5 }
 0x638   :  { %v5888_v9 = vpop.f32.mrf.mxu0  ;;  %v6113_v59 = vpop.f32.mrf.mxu1 }
 0x639   :  { %v6382_v60 = vmax.f32 %v6112_v36, 0.0 }
 0x63a   :  { %v5891_v19 = vpop.f32.mrf.mxu0  ;;  %v6116_v15 = vpop.f32.mrf.mxu1  ;;  %6355 = vmatmul.mubr.f32.gmra.mxu1 %v4677_v39 }
 0x63b   :  { %v15045_v51 = vadd.f32 %v5891_v19, %v14715_v23  ;;  %v6117_v4 = vadd.f32 %v6116_v15, %v14718_v16  ;;  %6359 = vmatprep.mubr.f32.mxu1 %v4686_v17  ;;  %7826 = vmatprep.mubr.msk.f32.mxu0 %vm2194_vm1, %v6382_v60 }
 0x63c   :  { %v5893_v24 = vpop.f32.mrf.mxu0  ;;  %v6118_v8 = vpop.f32.mrf.mxu1 }
 0x63d   :  { %v6383_v7 = vmax.f32 %v6117_v4, 0.0 }
 0x63e   :  { %v5896_v42 = vpop.f32.mrf.mxu0  ;;  %v6121_v20 = vpop.f32.mrf.mxu1  ;;  %6360 = vmatmul.mubr.f32.gmra.mxu1 %v4685_v55 }
 0x63f   :  { %v15054_v23 = vadd.f32 %v5896_v42, %v14730_v26  ;;  %v6122_v16 = vadd.f32 %v6121_v20, %v14733_v2  ;;  %6364 = vmatprep.mubr.f32.mxu1 %v4694_v41  ;;  %7827 = vmatmul.mubr.msk.f32.gmra.mxu0 %vm2194_vm1, %v6383_v7 }
 0x640   :  { %v5898_v45 = vpop.f32.mrf.mxu0  ;;  %v6123_v56 = vpop.f32.mrf.mxu1 }
 0x641   :  { %v6384_v58 = vmax.f32 %v6122_v16, 0.0  ;;  %v17598_v16 = vld [vmem:[#allocation23_spill] sm:$0xff] }
 0x642   :  { %v5901_v36 = vpop.f32.mrf.mxu0  ;;  %v6126_v62 = vpop.f32.mrf.mxu1  ;;  %6365 = vmatmul.mubr.f32.gmra.mxu1 %v4693_v10 }
 0x643   :  { %v15061_v29 = vadd.f32 %v5901_v36, %v14743_v1  ;;  %v6127_v26 = vadd.f32 %v6126_v62, %v14746_v31  ;;  %7829 = vmatprep.mubr.msk.f32.mxu0 %vm2194_vm1, %v6384_v58  ;;  %v17600_v36 = vld [vmem:[#allocation141_spill] sm:$0xff] }
 0x644   :  { %v5903_v2 = vpop.f32.mrf.mxu0  ;;  %v6128_v39 = vpop.f32.mrf.mxu1 }
 0x645   :  { %v6385_v9 = vmax.f32 %v6127_v26, 0.0 }
 0x646   :  { %v5906_v59 = vpop.f32.mrf.mxu0  ;;  %v6131_v61 = vpop.f32.mrf.mxu1 }
 0x647   :  { %v15066_v18 = vadd.f32 %v5906_v59, %v14754_v6  ;;  %v6132_v17 = vadd.f32 %v6131_v61, %v14757_v14  ;;  %7830 = vmatmul.mubr.msk.f32.gmra.mxu0 %vm2194_vm1, %v6385_v9  ;;  %v17601_v61 = vld [vmem:[#allocation637_spill] sm:$0xff] }
 0x648   :  { %v5908_v60 = vpop.f32.mrf.mxu0  ;;  %v6133_v19 = vpop.f32.mrf.mxu1 }
 0x649   :  { %v6386_v1 = vmax.f32 %v6132_v17, 0.0  ;;  %v17602_v60 = vld [vmem:[#allocation22_spill] sm:$0xff] }
 0x64a   :  { %v5911_v15 = vpop.f32.mrf.mxu0  ;;  %v6136_v4 = vpop.f32.mrf.mxu1 }
 0x64b   :  { %v15071_v31 = vadd.f32 %v5911_v15, %v14765_v12  ;;  %v6137_v63 = vadd.f32 %v6136_v4, %v14768_v37  ;;  %7832 = vmatprep.mubr.msk.f32.mxu0 %vm2194_vm1, %v6386_v1  ;;  %v17597_v37 = vld [vmem:[#allocation631_spill] sm:$0xff] }
 0x64c   :  { %v5913_v3 = vpop.f32.mrf.mxu0  ;;  %v6138_v55 = vpop.f32.mrf.mxu1 }
 0x64d   :  { %v6387_v6 = vmax.f32 %v6137_v63, 0.0  ;;  %v17603_v55 = vld [vmem:[#allocation634_spill] sm:$0xff] }
 0x64e   :  { %v5916_v24 = vpop.f32.mrf.mxu0  ;;  %v6141_v8 = vpop.f32.mrf.mxu1 }
 0x64f   :  { %v15076_v14 = vadd.f32 %v5916_v24, %v14776_v57  ;;  %v6142_v47 = vadd.f32 %v6141_v8, %v14779_v22  ;;  %7833 = vmatmul.mubr.msk.f32.gmra.mxu0 %vm2194_vm1, %v6387_v6  ;;  %v17599_v22 = vld [vmem:[#allocation636_spill] sm:$0xff]  ;;  %v17604_v24 = vld [vmem:[#allocation139_spill] sm:$0xff] }
 0x650   :  { %v5918_v43 = vpop.f32.mrf.mxu0  ;;  %v6143_v41 = vpop.f32.mrf.mxu1 }
 0x651   :  { %v6388_v12 = vmax.f32 %v6142_v47, 0.0 }
 0x652   :  { %v5921_v7 = vpop.f32.mrf.mxu0  ;;  %v6146_v42 = vpop.f32.mrf.mxu1 }
 0x653   :  { %v15081_v20 = vadd.f32 %v5921_v7, %v17597_v37  ;;  %v6147_v5 = vadd.f32 %v6146_v42, %v17598_v16  ;;  %7835 = vmatprep.mubr.msk.f32.mxu0 %vm2194_vm1, %v6388_v12  ;;  %v17605_v42 = vld [vmem:[#allocation635_spill] sm:$0xff]  ;;  %v17606_v16 = vld [vmem:[#allocation26_spill] sm:$0xff] }
 0x654   :  { %v5923_v49 = vpop.f32.mrf.mxu0  ;;  %v6148_v10 = vpop.f32.mrf.mxu1 }
 0x655   :  { %v6389_v57 = vmax.f32 %v6147_v5, 0.0 }
 0x656   :  { %v5926_v45 = vpop.f32.mrf.mxu0  ;;  %v6151_v56 = vpop.f32.mrf.mxu1 }
 0x657   :  { %v15086_v58 = vadd.f32 %v5926_v45, %v17599_v22  ;;  %v6152_v62 = vadd.f32 %v6151_v56, %v17600_v36  ;;  %7836 = vmatmul.mubr.msk.f32.gmra.mxu0 %vm2194_vm1, %v6389_v57  ;;  %v17607_v22 = vld [vmem:[#allocation640_spill] sm:$0xff] }
 0x658   :  { %v5928_v26 = vpop.f32.mrf.mxu0  ;;  %v6153_v2 = vpop.f32.mrf.mxu1 }
 0x659   :  { %v6390_v39 = vmax.f32 %v6152_v62, 0.0  ;;  %v17608_v62 = vld [vmem:[#allocation145_spill] sm:$0xff] }
 0x65a   :  { %v5931_v9 = vpop.f32.mrf.mxu0  ;;  %v6156_v59 = vpop.f32.mrf.mxu1 }
 0x65b   :  { %v15091_v17 = vadd.f32 %v5931_v9, %v17601_v61  ;;  %v6157_v19 = vadd.f32 %v6156_v59, %v17602_v60  ;;  %7838 = vmatprep.mubr.msk.f32.mxu0 %vm2194_vm1, %v6390_v39  ;;  %v17609_v60 = vld [vmem:[#allocation641_spill] sm:$0xff] }
 0x65c   :  { %v5933_v1 = vpop.f32.mrf.mxu0  ;;  %v6158_v15 = vpop.f32.mrf.mxu1 }
 0x65d   :  { %v6391_v4 = vmax.f32 %v6157_v19, 0.0  ;;  %v17610_v1 = vld [vmem:[#allocation25_spill] sm:$0xff] }
 0x65e   :  { %v5936_v63 = vpop.f32.mrf.mxu0  ;;  %v6161_v3 = vpop.f32.mrf.mxu1 }
 0x65f   :  { %v15096_v6 = vadd.f32 %v5936_v63, %v17603_v55  ;;  %v6162_v8 = vadd.f32 %v6161_v3, %v17604_v24  ;;  %7839 = vmatmul.mubr.msk.f32.gmra.mxu0 %vm2194_vm1, %v6391_v4 }
 0x660   :  { %v5938_v47 = vpop.f32.mrf.mxu0  ;;  %v6163_v43 = vpop.f32.mrf.mxu1 }
 0x661   :  { %v6392_v41 = vmax.f32 %v6162_v8, 0.0  ;;  %v17611_v47 = vld [vmem:[#allocation638_spill] sm:$0xff] }
 0x662   :  { %v5941_v12 = vpop.f32.mrf.mxu0  ;;  %v6166_v7 = vpop.f32.mrf.mxu1 }
 0x663   :  { %v15101_v37 = vadd.f32 %v5941_v12, %v17605_v42  ;;  %v6167_v5 = vadd.f32 %v6166_v7, %v17606_v16  ;;  %7841 = vmatprep.mubr.msk.f32.mxu0 %vm2194_vm1, %v6392_v41 }
 0x664   :  { %v5943_v49 = vpop.f32.mrf.mxu0  ;;  %v6168_v10 = vpop.f32.mrf.mxu1 }
 0x665   :  { %v6393_v57 = vmax.f32 %v6167_v5, 0.0  ;;  %v17612_v49 = vld [vmem:[#allocation143_spill] sm:$0xff] }
 0x666   :  { %v5946_v45 = vpop.f32.mrf.mxu0  ;;  %v6171_v56 = vpop.f32.mrf.mxu1 }
 0x667   :  { %v15106_v36 = vadd.f32 %v5946_v45, %v17607_v22  ;;  %v6172_v26 = vadd.f32 %v6171_v56, %v17608_v62  ;;  %7842 = vmatmul.mubr.msk.f32.gmra.mxu0 %vm2194_vm1, %v6393_v57 }
 0x668   :  { %v5948_v2 = vpop.f32.mrf.mxu0  ;;  %v6173_v39 = vpop.f32.mrf.mxu1 }
 0x669   :  { %v6394_v9 = vmax.f32 %v6172_v26, 0.0  ;;  %v17613_v26 = vld [vmem:[#allocation639_spill] sm:$0xff] }
 0x66a   :  { %v5951_v59 = vpop.f32.mrf.mxu0  ;;  %v6176_v61 = vpop.f32.mrf.mxu1 }
 0x66b   :  { %v15111_v19 = vadd.f32 %v5951_v59, %v17609_v60  ;;  %v6177_v15 = vadd.f32 %v6176_v61, %v17610_v1  ;;  %7844 = vmatprep.mubr.msk.f32.mxu0 %vm2194_vm1, %v6394_v9  ;;  %v17614_v1 = vld [vmem:[#allocation29_spill] sm:$0xff] }
 0x66c   :  { %v5953_v4 = vpop.f32.mrf.mxu0  ;;  %v6178_v63 = vpop.f32.mrf.mxu1 }
 0x66d   :  { %v6395_v3 = vmax.f32 %v6177_v15, 0.0 }
 0x66e   :  { %v5956_v55 = vpop.f32.mrf.mxu0  ;;  %v6181_v24 = vpop.f32.mrf.mxu1 }
 0x66f   :  { %v15116_v8 = vadd.f32 %v5956_v55, %v14864_v28  ;;  %v6182_v43 = vadd.f32 %v6181_v24, %v17611_v47  ;;  %7845 = vmatmul.mubr.msk.f32.gmra.mxu0 %vm2194_vm1, %v6395_v3 }
 0x670   :  { %v5958_v41 = vpop.f32.mrf.mxu0  ;;  %v6183_v12 = vpop.f32.mrf.mxu1 }
 0x671   :  { %v6396_v7 = vmax.f32 %v6182_v43, 0.0 }
 0x672   :  { %v5961_v42 = vpop.f32.mrf.mxu0  ;;  %v6186_v16 = vpop.f32.mrf.mxu1 }
 0x673   :  { %v15121_v5 = vadd.f32 %v5961_v42, %v14875_v34  ;;  %v6187_v10 = vadd.f32 %v6186_v16, %v17612_v49  ;;  %7847 = vmatprep.mubr.msk.f32.mxu0 %vm2194_vm1, %v6396_v7 }
 0x674   :  { %v5963_v57 = vpop.f32.mrf.mxu0  ;;  %v6188_v45 = vpop.f32.mrf.mxu1 }
 0x675   :  { %v6397_v28 = vmax.f32 %v6187_v10, 0.0 }
 0x676   :  { %v5966_v56 = vpop.f32.mrf.mxu0  ;;  %v6191_v22 = vpop.f32.mrf.mxu1 }
 0x677   :  { %v15126_v62 = vadd.f32 %v5966_v56, %v14886_v44  ;;  %v6192_v2 = vadd.f32 %v6191_v22, %v17613_v26  ;;  %7848 = vmatmul.mubr.msk.f32.gmra.mxu0 %vm2194_vm1, %v6397_v28 }
 0x678   :  { %v5968_v39 = vpop.f32.mrf.mxu0  ;;  %v6193_v9 = vpop.f32.mrf.mxu1 }
 0x679   :  { %v6398_v34 = vmax.f32 %v6192_v2, 0.0 }
 0x67a   :  { %v5971_v59 = vpop.f32.mrf.mxu0  ;;  %v6196_v61 = vpop.f32.mrf.mxu1 }
 0x67b   :  { %v15131_v60 = vadd.f32 %v5971_v59, %v14897_v54  ;;  %v6197_v15 = vadd.f32 %v6196_v61, %v17614_v1  ;;  %7850 = vmatprep.mubr.msk.f32.mxu0 %vm2194_vm1, %v6398_v34 }
 0x67c   :  { %v5973_v4 = vpop.f32.mrf.mxu0  ;;  %v6198_v63 = vpop.f32.mrf.mxu1 }
 0x67d   :  { %v6399_v44 = vmax.f32 %v6197_v15, 0.0 }
 0x67e   :  { %v5976_v3 = vpop.f32.mrf.mxu0  ;;  %v6201_v55 = vpop.f32.mrf.mxu1 }
 0x67f   :  { %v15136_v24 = vadd.f32 %v5976_v3, %v14908_v0  ;;  %v6202_v47 = vadd.f32 %v6201_v55, %v14911_v50  ;;  %7851 = vmatmul.mubr.msk.f32.gmra.mxu0 %vm2194_vm1, %v6399_v44 }
 0x680   :  { %v5978_v43 = vpop.f32.mrf.mxu0  ;;  %v6203_v41 = vpop.f32.mrf.mxu1 }
 0x681   :  { %v6400_v54 = vmax.f32 %v6202_v47, 0.0 }
 0x682   :  { %v5981_v12 = vpop.f32.mrf.mxu0  ;;  %v6206_v7 = vpop.f32.mrf.mxu1 }
 0x683   :  { %v15141_v42 = vadd.f32 %v5981_v12, %v14919_v21  ;;  %v6207_v16 = vadd.f32 %v6206_v7, %v14922_v25  ;;  %7853 = vmatprep.mubr.msk.f32.mxu0 %vm2194_vm1, %v6400_v54 }
 0x684   :  { %v5983_v49 = vpop.f32.mrf.mxu0  ;;  %v6208_v10 = vpop.f32.mrf.mxu1 }
 0x685   :  { %v6401_v0 = vmax.f32 %v6207_v16, 0.0 }
 0x686   :  { %v6211_v57 = vpop.f32.mrf.mxu1 }
 0x687   :  { %v6212_v50 = vadd.f32 %v6211_v57, %v14929_v11  ;;  %7854 = vmatmul.mubr.msk.f32.gmra.mxu0 %vm2194_vm1, %v6401_v0 }
 0x688   :  { %v6213_v45 = vpop.f32.mrf.mxu1 }
 0x689   :  { %v6402_v28 = vmax.f32 %v6212_v50, 0.0 }
 0x68a   :  { %v6216_v56 = vpop.f32.mrf.mxu1 }
 0x68b   :  { %v6217_v22 = vadd.f32 %v6216_v56, %v14937_v53  ;;  %7856 = vmatprep.mubr.msk.f32.mxu0 %vm2194_vm1, %v6402_v28 }
 0x68c   :  { %v6218_v21 = vpop.f32.mrf.mxu1 }
 0x68d   :  { %v6403_v26 = vmax.f32 %v6217_v22, 0.0 }
 0x68e   :  { %v6221_v25 = vpop.f32.mrf.mxu1 }
 0x68f   :  { %v6222_v2 = vadd.f32 %v6221_v25, %v14946_v32  ;;  %7857 = vmatmul.mubr.msk.f32.gmra.mxu0 %vm2194_vm1, %v6403_v26 }
 0x690   :  { %v6223_v39 = vpop.f32.mrf.mxu1 }
 0x691   :  { %v6404_v9 = vmax.f32 %v6222_v2, 0.0 }
 0x692   :  { %v6226_v34 = vpop.f32.mrf.mxu1 }
 0x693   :  { %v6227_v11 = vadd.f32 %v6226_v34, %v14955_v30  ;;  %7859 = vmatprep.mubr.msk.f32.mxu0 %vm2194_vm1, %v6404_v9 }
 0x694   :  { %v6228_v59 = vpop.f32.mrf.mxu1 }
 0x695   :  { %v6405_v61 = vmax.f32 %v6227_v11, 0.0 }
 0x696   :  { %v6231_v1 = vpop.f32.mrf.mxu1 }
 0x697   :  { %v6232_v53 = vadd.f32 %v6231_v1, %v14964_v33  ;;  %7860 = vmatmul.mubr.msk.f32.gmra.mxu0 %vm2194_vm1, %v6405_v61 }
 0x698   :  { %v6233_v15 = vpop.f32.mrf.mxu1 }
 0x699   :  { %v6406_v4 = vmax.f32 %v6232_v53, 0.0 }
 0x69a   :  { %v6236_v63 = vpop.f32.mrf.mxu1 }
 0x69b   :  { %v6237_v32 = vadd.f32 %v6236_v63, %v14973_v38  ;;  %7862 = vmatprep.mubr.msk.f32.mxu0 %vm2194_vm1, %v6406_v4 }
 0x69c   :  { %v6238_v44 = vpop.f32.mrf.mxu1 }
 0x69d   :  { %v6407_v3 = vmax.f32 %v6237_v32, 0.0 }
 0x69e   :  { %v6241_v55 = vpop.f32.mrf.mxu1 }
 0x69f   :  { %v6242_v30 = vadd.f32 %v6241_v55, %v14982_v40  ;;  %7863 = vmatmul.mubr.msk.f32.gmra.mxu0 %vm2194_vm1, %v6407_v3 }
 0x6a0   :  { %v6243_v47 = vpop.f32.mrf.mxu1 }
 0x6a1   :  { %v6408_v43 = vmax.f32 %v6242_v30, 0.0 }
 0x6a2   :  { %v6246_v41 = vpop.f32.mrf.mxu1 }
 0x6a3   :  { %v6247_v33 = vadd.f32 %v6246_v41, %v14991_v13  ;;  %7865 = vmatprep.mubr.msk.f32.mxu0 %vm2194_vm1, %v6408_v43 }
 0x6a4   :  { %v6248_v54 = vpop.f32.mrf.mxu1 }
 0x6a5   :  { %v6409_v12 = vmax.f32 %v6247_v33, 0.0 }
 0x6a6   :  { %v6251_v7 = vpop.f32.mrf.mxu1 }
 0x6a7   :  { %v6252_v38 = vadd.f32 %v6251_v7, %v15000_v46  ;;  %7866 = vmatmul.mubr.msk.f32.gmra.mxu0 %vm2194_vm1, %v6409_v12 }
 0x6a8   :  { %v6253_v16 = vpop.f32.mrf.mxu1 }
 0x6a9   :  { %v6410_v49 = vmax.f32 %v6252_v38, 0.0 }
 0x6aa   :  { %v6256_v10 = vpop.f32.mrf.mxu1 }
 0x6ab   :  { %v6257_v40 = vadd.f32 %v6256_v10, %v15009_v52  ;;  %7868 = vmatprep.mubr.msk.f32.mxu0 %vm2194_vm1, %v6410_v49 }
 0x6ac   :  { %v6258_v0 = vpop.f32.mrf.mxu1 }
 0x6ad   :  { %v6411_v57 = vmax.f32 %v6257_v40, 0.0 }
 0x6ae   :  { %v6261_v50 = vpop.f32.mrf.mxu1 }
 0x6af   :  { %v6262_v13 = vadd.f32 %v6261_v50, %v15018_v27  ;;  %7869 = vmatmul.mubr.msk.f32.gmra.mxu0 %vm2194_vm1, %v6411_v57 }
 0x6b0   :  { %v6263_v45 = vpop.f32.mrf.mxu1 }
 0x6b1   :  { %v6412_v28 = vmax.f32 %v6262_v13, 0.0 }
 0x6b2   :  { %v6266_v56 = vpop.f32.mrf.mxu1 }
 0x6b3   :  { %v6267_v46 = vadd.f32 %v6266_v56, %v15027_v35  ;;  %7871 = vmatprep.mubr.msk.f32.mxu0 %vm2194_vm1, %v6412_v28 }
 0x6b4   :  { %v6268_v22 = vpop.f32.mrf.mxu1 }
 0x6b5   :  { %v6413_v21 = vmax.f32 %v6267_v46, 0.0 }
 0x6b6   :  { %v6271_v26 = vpop.f32.mrf.mxu1 }
 0x6b7   :  { %v6272_v52 = vadd.f32 %v6271_v26, %v15036_v48  ;;  %7872 = vmatmul.mubr.msk.f32.gmra.mxu0 %vm2194_vm1, %v6413_v21 }
 0x6b8   :  { %v6273_v25 = vpop.f32.mrf.mxu1 }
 0x6b9   :  { %v6414_v2 = vmax.f32 %v6272_v52, 0.0 }
 0x6ba   :  { %v6276_v39 = vpop.f32.mrf.mxu1 }
 0x6bb   :  { %v6277_v27 = vadd.f32 %v6276_v39, %v15045_v51  ;;  %7874 = vmatprep.mubr.msk.f32.mxu0 %vm2194_vm1, %v6414_v2 }
 0x6bc   :  { %v6278_v9 = vpop.f32.mrf.mxu1 }
 0x6bd   :  { %v6415_v34 = vmax.f32 %v6277_v27, 0.0 }
 0x6be   :  { %v6281_v11 = vpop.f32.mrf.mxu1 }
 0x6bf   :  { %v6282_v35 = vadd.f32 %v6281_v11, %v15054_v23  ;;  %7875 = vmatmul.mubr.msk.f32.gmra.mxu0 %vm2194_vm1, %v6415_v34 }
 0x6c0   :  { %v6283_v59 = vpop.f32.mrf.mxu1 }
 0x6c1   :  { %v6416_v61 = vmax.f32 %v6282_v35, 0.0 }
 0x6c2   :  { %v6286_v1 = vpop.f32.mrf.mxu1 }
 0x6c3   :  { %v6287_v48 = vadd.f32 %v6286_v1, %v15061_v29  ;;  %7877 = vmatprep.mubr.msk.f32.mxu0 %vm2194_vm1, %v6416_v61  ;;  %v15184_v29 = vld [vmem:[%s15542_s7] ss:$0 sm:$0xff] }
 0x6c4   :  { %v6288_v53 = vpop.f32.mrf.mxu1 }
 0x6c5   :  { %v6417_v15 = vmax.f32 %v6287_v48, 0.0 }
 0x6c6   :  { %v6291_v4 = vpop.f32.mrf.mxu1 }
 0x6c7   :  { %v6292_v51 = vadd.f32 %v6291_v4, %v15066_v18  ;;  %7878 = vmatmul.mubr.msk.f32.gmra.mxu0 %vm2194_vm1, %v6417_v15 }
 0x6c8   :  { %v6293_v63 = vpop.f32.mrf.mxu1 }
 0x6c9   :  { %v6418_v32 = vmax.f32 %v6292_v51, 0.0 }
 0x6ca   :  { %v6296_v44 = vpop.f32.mrf.mxu1 }
 0x6cb   :  { %v6297_v23 = vadd.f32 %v6296_v44, %v15071_v31  ;;  %7880 = vmatprep.mubr.msk.f32.mxu0 %vm2194_vm1, %v6418_v32 }
 0x6cc   :  { %v6298_v3 = vpop.f32.mrf.mxu1 }
 0x6cd   :  { %v6419_v55 = vmax.f32 %v6297_v23, 0.0 }
 0x6ce   :  { %v6301_v30 = vpop.f32.mrf.mxu1 }
 0x6cf   :  { %v6302_v47 = vadd.f32 %v6301_v30, %v15076_v14  ;;  %v7810_v18 = vpop.f32.mrf.mxu0  ;;  %7881 = vmatmul.mubr.msk.f32.gmra.mxu0 %vm2194_vm1, %v6419_v55 }
 0x6d0   :  { %v6709_v43 = vadd.f32 %v7810_v18, %v15184_v29  ;;  %v6303_v41 = vpop.f32.mrf.mxu1 }
 0x6d1   :  { %v6420_v33 = vmax.f32 %v6302_v47, 0.0  ;;  %v6703_v31 = vpop.f32.mrf.mxu0 }
 0x6d2   :  { %v7023_v54 = vmax.f32 %v6709_v43, 0.0  ;;  %v6704_v12 = vadd.f32 %v15184_v29, %v6703_v31  ;;  %v6306_v7 = vpop.f32.mrf.mxu1 }
 0x6d3   :  { %v6307_v38 = vadd.f32 %v6306_v7, %v15081_v20  ;;  %7883 = vmatprep.mubr.msk.f32.mxu0 %vm2194_vm1, %v6420_v33 }
 0x6d4   :  { %7087 = vst.msk [vmem:[%s15543_s8 + $0x8] sm:$0xff] %vm2194_vm1, %v7023_v54  ;;  %v7022_v14 = vmax.f32 %v6704_v12, 0.0  ;;  %v6308_v16 = vpop.f32.mrf.mxu1 }
 0x6d5   :  { %v6421_v49 = vmax.f32 %v6307_v38, 0.0 }
 0x6d6   :  { %7086 = vst.msk [vmem:[%s15543_s8] sm:$0xff] %vm2194_vm1, %v7022_v14  ;;  %v6311_v10 = vpop.f32.mrf.mxu1 }
 0x6d7   :  { %v6312_v40 = vadd.f32 %v6311_v10, %v15086_v58  ;;  %v7813_v0 = vpop.f32.mrf.mxu0  ;;  %7884 = vmatmul.mubr.msk.f32.gmra.mxu0 %vm2194_vm1, %v6421_v49 }
 0x6d8   :  { %v6719_v20 = vadd.f32 %v7813_v0, %v15184_v29  ;;  %v6313_v57 = vpop.f32.mrf.mxu1 }
 0x6d9   :  { %v6422_v50 = vmax.f32 %v6312_v40, 0.0  ;;  %v6713_v13 = vpop.f32.mrf.mxu0 }
 0x6da   :  { %v7025_v45 = vmax.f32 %v6719_v20, 0.0  ;;  %v6714_v28 = vadd.f32 %v15184_v29, %v6713_v13  ;;  %v6316_v56 = vpop.f32.mrf.mxu1 }
 0x6db   :  { %v6317_v46 = vadd.f32 %v6316_v56, %v15091_v17  ;;  %7886 = vmatprep.mubr.msk.f32.mxu0 %vm2194_vm1, %v6422_v50 }
 0x6dc   :  { %7089 = vst.msk [vmem:[%s15543_s8 + $0x18] sm:$0xff] %vm2194_vm1, %v7025_v45  ;;  %v7024_v58 = vmax.f32 %v6714_v28, 0.0  ;;  %v6318_v22 = vpop.f32.mrf.mxu1 }
 0x6dd   :  { %v6423_v21 = vmax.f32 %v6317_v46, 0.0 }
 0x6de   :  { %7088 = vst.msk [vmem:[%s15543_s8 + $0x10] sm:$0xff] %vm2194_vm1, %v7024_v58  ;;  %v6321_v26 = vpop.f32.mrf.mxu1 }
 0x6df   :  { %v6322_v52 = vadd.f32 %v6321_v26, %v15096_v6  ;;  %v7816_v25 = vpop.f32.mrf.mxu0  ;;  %7887 = vmatmul.mubr.msk.f32.gmra.mxu0 %vm2194_vm1, %v6423_v21 }
 0x6e0   :  { %v6729_v17 = vadd.f32 %v7816_v25, %v15184_v29  ;;  %v6323_v2 = vpop.f32.mrf.mxu1 }
 0x6e1   :  { %v6424_v39 = vmax.f32 %v6322_v52, 0.0  ;;  %v6723_v27 = vpop.f32.mrf.mxu0 }
 0x6e2   :  { %v7027_v9 = vmax.f32 %v6729_v17, 0.0  ;;  %v6724_v34 = vadd.f32 %v15184_v29, %v6723_v27  ;;  %v6326_v11 = vpop.f32.mrf.mxu1 }
 0x6e3   :  { %v6327_v35 = vadd.f32 %v6326_v11, %v15101_v37  ;;  %7889 = vmatprep.mubr.msk.f32.mxu0 %vm2194_vm1, %v6424_v39 }
 0x6e4   :  { %7091 = vst.msk [vmem:[%s15543_s8 + $0x28] sm:$0xff] %vm2194_vm1, %v7027_v9  ;;  %v7026_v6 = vmax.f32 %v6724_v34, 0.0  ;;  %v6328_v59 = vpop.f32.mrf.mxu1 }
 0x6e5   :  { %v6425_v61 = vmax.f32 %v6327_v35, 0.0 }
 0x6e6   :  { %7090 = vst.msk [vmem:[%s15543_s8 + $0x20] sm:$0xff] %vm2194_vm1, %v7026_v6  ;;  %v6331_v1 = vpop.f32.mrf.mxu1 }
 0x6e7   :  { %v6332_v48 = vadd.f32 %v6331_v1, %v15106_v36  ;;  %v7819_v53 = vpop.f32.mrf.mxu0  ;;  %7890 = vmatmul.mubr.msk.f32.gmra.mxu0 %vm2194_vm1, %v6425_v61 }
 0x6e8   :  { %v6739_v37 = vadd.f32 %v7819_v53, %v15184_v29  ;;  %v6333_v15 = vpop.f32.mrf.mxu1 }
 0x6e9   :  { %v6426_v4 = vmax.f32 %v6332_v48, 0.0  ;;  %v6733_v51 = vpop.f32.mrf.mxu0 }
 0x6ea   :  { %v7029_v63 = vmax.f32 %v6739_v37, 0.0  ;;  %v6734_v32 = vadd.f32 %v15184_v29, %v6733_v51  ;;  %v6336_v44 = vpop.f32.mrf.mxu1 }
 0x6eb   :  { %v6337_v23 = vadd.f32 %v6336_v44, %v15111_v19  ;;  %7892 = vmatprep.mubr.msk.f32.mxu0 %vm2194_vm1, %v6426_v4 }
 0x6ec   :  { %7093 = vst.msk [vmem:[%s15543_s8 + $0x38] sm:$0xff] %vm2194_vm1, %v7029_v63  ;;  %v7028_v36 = vmax.f32 %v6734_v32, 0.0  ;;  %v6338_v3 = vpop.f32.mrf.mxu1 }
 0x6ed   :  { %v6427_v55 = vmax.f32 %v6337_v23, 0.0 }
 0x6ee   :  { %7092 = vst.msk [vmem:[%s15543_s8 + $0x30] sm:$0xff] %vm2194_vm1, %v7028_v36  ;;  %v6341_v30 = vpop.f32.mrf.mxu1 }
 0x6ef   :  { %v6342_v47 = vadd.f32 %v6341_v30, %v15116_v8  ;;  %v7822_v18 = vpop.f32.mrf.mxu0  ;;  %7893 = vmatmul.mubr.msk.f32.gmra.mxu0 %vm2194_vm1, %v6427_v55 }
 0x6f0   :  { %v6749_v19 = vadd.f32 %v7822_v18, %v15184_v29  ;;  %v6343_v43 = vpop.f32.mrf.mxu1 }
 0x6f1   :  { %v6428_v41 = vmax.f32 %v6342_v47, 0.0  ;;  %v6743_v33 = vpop.f32.mrf.mxu0 }
 0x6f2   :  { %v7031_v31 = vmax.f32 %v6749_v19, 0.0  ;;  %v6744_v54 = vadd.f32 %v15184_v29, %v6743_v33  ;;  %v6346_v12 = vpop.f32.mrf.mxu1 }
 0x6f3   :  { %v6347_v7 = vadd.f32 %v6346_v12, %v15121_v5  ;;  %7895 = vmatprep.mubr.msk.f32.mxu0 %vm2194_vm1, %v6428_v41 }
 0x6f4   :  { %7095 = vst.msk [vmem:[%s15543_s8 + $0x48] sm:$0xff] %vm2194_vm1, %v7031_v31  ;;  %v7030_v8 = vmax.f32 %v6744_v54, 0.0  ;;  %v6348_v38 = vpop.f32.mrf.mxu1 }
 0x6f5   :  { %v6429_v14 = vmax.f32 %v6347_v7, 0.0 }
 0x6f6   :  { %7094 = vst.msk [vmem:[%s15543_s8 + $0x40] sm:$0xff] %vm2194_vm1, %v7030_v8  ;;  %v6351_v16 = vpop.f32.mrf.mxu1 }
 0x6f7   :  { %v6352_v49 = vadd.f32 %v6351_v16, %v15126_v62  ;;  %v7825_v10 = vpop.f32.mrf.mxu0  ;;  %7896 = vmatmul.mubr.msk.f32.gmra.mxu0 %vm2194_vm1, %v6429_v14 }
 0x6f8   :  { %v6759_v5 = vadd.f32 %v7825_v10, %v15184_v29  ;;  %v6353_v40 = vpop.f32.mrf.mxu1 }
 0x6f9   :  { %v6430_v0 = vmax.f32 %v6352_v49, 0.0  ;;  %v6753_v20 = vpop.f32.mrf.mxu0 }
 0x6fa   :  { %v7033_v57 = vmax.f32 %v6759_v5, 0.0  ;;  %v6754_v50 = vadd.f32 %v15184_v29, %v6753_v20  ;;  %v6356_v13 = vpop.f32.mrf.mxu1 }
 0x6fb   :  { %v6357_v45 = vadd.f32 %v6356_v13, %v15131_v60  ;;  %7898 = vmatprep.mubr.msk.f32.mxu0 %vm2194_vm1, %v6430_v0 }
 0x6fc   :  { %7097 = vst.msk [vmem:[%s15543_s8 + $0x58] sm:$0xff] %vm2194_vm1, %v7033_v57  ;;  %v7032_v62 = vmax.f32 %v6754_v50, 0.0  ;;  %v6358_v28 = vpop.f32.mrf.mxu1 }
 0x6fd   :  { %v6431_v56 = vmax.f32 %v6357_v45, 0.0 }
 0x6fe   :  { %7096 = vst.msk [vmem:[%s15543_s8 + $0x50] sm:$0xff] %vm2194_vm1, %v7032_v62  ;;  %v6361_v46 = vpop.f32.mrf.mxu1 }
 0x6ff   :  { %v6362_v58 = vadd.f32 %v6361_v46, %v15136_v24  ;;  %v7828_v22 = vpop.f32.mrf.mxu0  ;;  %7899 = vmatmul.mubr.msk.f32.gmra.mxu0 %vm2194_vm1, %v6431_v56 }
 0x700   :  { %v6769_v60 = vadd.f32 %v7828_v22, %v15184_v29  ;;  %v6363_v21 = vpop.f32.mrf.mxu1 }
 0x701   :  { %v6432_v26 = vmax.f32 %v6362_v58, 0.0  ;;  %v6763_v52 = vpop.f32.mrf.mxu0 }
 0x702   :  { %v7035_v25 = vmax.f32 %v6769_v60, 0.0  ;;  %v6764_v17 = vadd.f32 %v15184_v29, %v6763_v52  ;;  %v6366_v2 = vpop.f32.mrf.mxu1 }
 0x703   :  { %v6367_v39 = vadd.f32 %v6366_v2, %v15141_v42  ;;  %7901 = vmatprep.mubr.msk.f32.mxu0 %vm2194_vm1, %v6432_v26 }
 0x704   :  { %7099 = vst.msk [vmem:[%s15543_s8 + $0x68] sm:$0xff] %vm2194_vm1, %v7035_v25  ;;  %v7034_v24 = vmax.f32 %v6764_v17, 0.0  ;;  %v6368_v27 = vpop.f32.mrf.mxu1 }
 0x705   :  { %v6433_v9 = vmax.f32 %v6367_v39, 0.0 }
 0x706   :  { %7098 = vst.msk [vmem:[%s15543_s8 + $0x60] sm:$0xff] %vm2194_vm1, %v7034_v24 }
 0x707   :  { %v7831_v34 = vpop.f32.mrf.mxu0  ;;  %7902 = vmatmul.mubr.msk.f32.gmra.mxu0 %vm2194_vm1, %v6433_v9 }
 0x708   :  { %v6779_v42 = vadd.f32 %v7831_v34, %v15184_v29 }
 0x709   :  { %v6773_v11 = vpop.f32.mrf.mxu0 }
 0x70a   :  { %v7037_v35 = vmax.f32 %v6779_v42, 0.0  ;;  %v6774_v6 = vadd.f32 %v15184_v29, %v6773_v11 }
 0x70c   :  { %7101 = vst.msk [vmem:[%s15543_s8 + $0x78] sm:$0xff] %vm2194_vm1, %v7037_v35  ;;  %v7036_v59 = vmax.f32 %v6774_v6, 0.0 }
 0x70e   :  { %7100 = vst.msk [vmem:[%s15543_s8 + $0x70] sm:$0xff] %vm2194_vm1, %v7036_v59 }
 0x70f   :  { %v7834_v61 = vpop.f32.mrf.mxu0 }
 0x710   :  { %v6789_v1 = vadd.f32 %v7834_v61, %v15184_v29 }
 0x711   :  { %v6783_v48 = vpop.f32.mrf.mxu0 }
 0x712   :  { %v7039_v53 = vmax.f32 %v6789_v1, 0.0  ;;  %v6784_v37 = vadd.f32 %v15184_v29, %v6783_v48 }
 0x714   :  { %7103 = vst.msk [vmem:[%s15543_s8 + $0x88] sm:$0xff] %vm2194_vm1, %v7039_v53  ;;  %v7038_v15 = vmax.f32 %v6784_v37, 0.0 }
 0x716   :  { %7102 = vst.msk [vmem:[%s15543_s8 + $0x80] sm:$0xff] %vm2194_vm1, %v7038_v15 }
 0x717   :  { %v7837_v4 = vpop.f32.mrf.mxu0 }
 0x718   :  { %v6799_v51 = vadd.f32 %v7837_v4, %v15184_v29 }
 0x719   :  { %v6793_v63 = vpop.f32.mrf.mxu0 }
 0x71a   :  { %v7041_v32 = vmax.f32 %v6799_v51, 0.0  ;;  %v6794_v44 = vadd.f32 %v15184_v29, %v6793_v63 }
 0x71c   :  { %7105 = vst.msk [vmem:[%s15543_s8 + $0x98] sm:$0xff] %vm2194_vm1, %v7041_v32  ;;  %v7040_v23 = vmax.f32 %v6794_v44, 0.0 }
 0x71e   :  { %7104 = vst.msk [vmem:[%s15543_s8 + $0x90] sm:$0xff] %vm2194_vm1, %v7040_v23 }
 0x71f   :  { %v7840_v36 = vpop.f32.mrf.mxu0 }
 0x720   :  { %v6809_v3 = vadd.f32 %v7840_v36, %v15184_v29 }
 0x721   :  { %v6803_v55 = vpop.f32.mrf.mxu0 }
 0x722   :  { %v7043_v30 = vmax.f32 %v6809_v3, 0.0  ;;  %v6804_v47 = vadd.f32 %v15184_v29, %v6803_v55 }
 0x724   :  { %7107 = vst.msk [vmem:[%s15543_s8 + $0xa8] sm:$0xff] %vm2194_vm1, %v7043_v30  ;;  %v7042_v18 = vmax.f32 %v6804_v47, 0.0 }
 0x726   :  { %7106 = vst.msk [vmem:[%s15543_s8 + $0xa0] sm:$0xff] %vm2194_vm1, %v7042_v18 }
 0x727   :  { %v7843_v19 = vpop.f32.mrf.mxu0 }
 0x728   :  { %v6819_v43 = vadd.f32 %v7843_v19, %v15184_v29 }
 0x729   :  { %v6813_v41 = vpop.f32.mrf.mxu0 }
 0x72a   :  { %v7045_v33 = vmax.f32 %v6819_v43, 0.0  ;;  %v6814_v31 = vadd.f32 %v15184_v29, %v6813_v41 }
 0x72c   :  { %7109 = vst.msk [vmem:[%s15543_s8 + $0xb8] sm:$0xff] %vm2194_vm1, %v7045_v33  ;;  %v7044_v54 = vmax.f32 %v6814_v31, 0.0 }
 0x72e   :  { %7108 = vst.msk [vmem:[%s15543_s8 + $0xb0] sm:$0xff] %vm2194_vm1, %v7044_v54 }
 0x72f   :  { %v7846_v12 = vpop.f32.mrf.mxu0 }
 0x730   :  { %v6829_v7 = vadd.f32 %v7846_v12, %v15184_v29 }
 0x731   :  { %v6823_v8 = vpop.f32.mrf.mxu0 }
 0x732   :  { %v7047_v38 = vmax.f32 %v6829_v7, 0.0  ;;  %v6824_v14 = vadd.f32 %v15184_v29, %v6823_v8 }
 0x734   :  { %7111 = vst.msk [vmem:[%s15543_s8 + $0xc8] sm:$0xff] %vm2194_vm1, %v7047_v38  ;;  %v7046_v16 = vmax.f32 %v6824_v14, 0.0 }
 0x736   :  { %7110 = vst.msk [vmem:[%s15543_s8 + $0xc0] sm:$0xff] %vm2194_vm1, %v7046_v16 }
 0x737   :  { %v7849_v49 = vpop.f32.mrf.mxu0 }
 0x738   :  { %v6839_v10 = vadd.f32 %v7849_v49, %v15184_v29 }
 0x739   :  { %v6833_v5 = vpop.f32.mrf.mxu0 }
 0x73a   :  { %v7049_v40 = vmax.f32 %v6839_v10, 0.0  ;;  %v6834_v0 = vadd.f32 %v15184_v29, %v6833_v5 }
 0x73c   :  { %7113 = vst.msk [vmem:[%s15543_s8 + $0xd8] sm:$0xff] %vm2194_vm1, %v7049_v40  ;;  %v7048_v20 = vmax.f32 %v6834_v0, 0.0 }
 0x73e   :  { %7112 = vst.msk [vmem:[%s15543_s8 + $0xd0] sm:$0xff] %vm2194_vm1, %v7048_v20 }
 0x73f   :  { %v7852_v57 = vpop.f32.mrf.mxu0 }
 0x740   :  { %v6849_v50 = vadd.f32 %v7852_v57, %v15184_v29 }
 0x741   :  { %v6843_v13 = vpop.f32.mrf.mxu0 }
 0x742   :  { %v7051_v45 = vmax.f32 %v6849_v50, 0.0  ;;  %v6844_v62 = vadd.f32 %v15184_v29, %v6843_v13 }
 0x744   :  { %7115 = vst.msk [vmem:[%s15543_s8 + $0xe8] sm:$0xff] %vm2194_vm1, %v7051_v45  ;;  %v7050_v28 = vmax.f32 %v6844_v62, 0.0 }
 0x746   :  { %7114 = vst.msk [vmem:[%s15543_s8 + $0xe0] sm:$0xff] %vm2194_vm1, %v7050_v28 }
 0x747   :  { %v7855_v56 = vpop.f32.mrf.mxu0 }
 0x748   :  { %v6859_v46 = vadd.f32 %v7855_v56, %v15184_v29 }
 0x749   :  { %v6853_v58 = vpop.f32.mrf.mxu0 }
 0x74a   :  { %v7053_v22 = vmax.f32 %v6859_v46, 0.0  ;;  %v6854_v60 = vadd.f32 %v15184_v29, %v6853_v58 }
 0x74c   :  { %7117 = vst.msk [vmem:[%s15543_s8 + $0xf8] sm:$0xff] %vm2194_vm1, %v7053_v22  ;;  %v7052_v21 = vmax.f32 %v6854_v60, 0.0 }
 0x74e   :  { %7116 = vst.msk [vmem:[%s15543_s8 + $0xf0] sm:$0xff] %vm2194_vm1, %v7052_v21 }
 0x74f   :  { %v7858_v26 = vpop.f32.mrf.mxu0 }
 0x750   :  { %v6869_v52 = vadd.f32 %v7858_v26, %v15184_v29 }
 0x751   :  { %v6863_v25 = vpop.f32.mrf.mxu0 }
 0x752   :  { %v7055_v17 = vmax.f32 %v6869_v52, 0.0  ;;  %v6864_v2 = vadd.f32 %v15184_v29, %v6863_v25 }
 0x754   :  { %7119 = vst.msk [vmem:[%s15543_s8 + $0x108] sm:$0xff] %vm2194_vm1, %v7055_v17  ;;  %v7054_v39 = vmax.f32 %v6864_v2, 0.0 }
 0x756   :  { %7118 = vst.msk [vmem:[%s15543_s8 + $0x100] sm:$0xff] %vm2194_vm1, %v7054_v39 }
 0x757   :  { %v7861_v24 = vpop.f32.mrf.mxu0 }
 0x758   :  { %v6879_v27 = vadd.f32 %v7861_v24, %v15184_v29 }
 0x759   :  { %v6873_v9 = vpop.f32.mrf.mxu0 }
 0x75a   :  { %v7057_v34 = vmax.f32 %v6879_v27, 0.0  ;;  %v6874_v42 = vadd.f32 %v15184_v29, %v6873_v9 }
 0x75c   :  { %7121 = vst.msk [vmem:[%s15543_s8 + $0x118] sm:$0xff] %vm2194_vm1, %v7057_v34  ;;  %v7056_v11 = vmax.f32 %v6874_v42, 0.0 }
 0x75e   :  { %7120 = vst.msk [vmem:[%s15543_s8 + $0x110] sm:$0xff] %vm2194_vm1, %v7056_v11 }
 0x75f   :  { %v7864_v35 = vpop.f32.mrf.mxu0 }
 0x760   :  { %v6889_v6 = vadd.f32 %v7864_v35, %v15184_v29 }
 0x761   :  { %v6883_v59 = vpop.f32.mrf.mxu0 }
 0x762   :  { %v7059_v61 = vmax.f32 %v6889_v6, 0.0  ;;  %v6884_v1 = vadd.f32 %v15184_v29, %v6883_v59 }
 0x764   :  { %7123 = vst.msk [vmem:[%s15543_s8 + $0x128] sm:$0xff] %vm2194_vm1, %v7059_v61  ;;  %v7058_v48 = vmax.f32 %v6884_v1, 0.0 }
 0x766   :  { %7122 = vst.msk [vmem:[%s15543_s8 + $0x120] sm:$0xff] %vm2194_vm1, %v7058_v48 }
 0x767   :  { %v7867_v53 = vpop.f32.mrf.mxu0 }
 0x768   :  { %v6899_v37 = vadd.f32 %v7867_v53, %v15184_v29 }
 0x769   :  { %v6893_v15 = vpop.f32.mrf.mxu0 }
 0x76a   :  { %v7061_v4 = vmax.f32 %v6899_v37, 0.0  ;;  %v6894_v51 = vadd.f32 %v15184_v29, %v6893_v15 }
 0x76c   :  { %7125 = vst.msk [vmem:[%s15543_s8 + $0x138] sm:$0xff] %vm2194_vm1, %v7061_v4  ;;  %v7060_v63 = vmax.f32 %v6894_v51, 0.0 }
 0x76e   :  { %7124 = vst.msk [vmem:[%s15543_s8 + $0x130] sm:$0xff] %vm2194_vm1, %v7060_v63 }
 0x76f   :  { %v7870_v32 = vpop.f32.mrf.mxu0 }
 0x770   :  { %v6909_v44 = vadd.f32 %v7870_v32, %v15184_v29 }
 0x771   :  { %v6903_v23 = vpop.f32.mrf.mxu0 }
 0x772   :  { %v7063_v36 = vmax.f32 %v6909_v44, 0.0  ;;  %v6904_v3 = vadd.f32 %v15184_v29, %v6903_v23 }
 0x774   :  { %7127 = vst.msk [vmem:[%s15543_s8 + $0x148] sm:$0xff] %vm2194_vm1, %v7063_v36  ;;  %v7062_v55 = vmax.f32 %v6904_v3, 0.0 }
 0x776   :  { %7126 = vst.msk [vmem:[%s15543_s8 + $0x140] sm:$0xff] %vm2194_vm1, %v7062_v55 }
 0x777   :  { %v7873_v30 = vpop.f32.mrf.mxu0 }
 0x778   :  { %v6919_v47 = vadd.f32 %v7873_v30, %v15184_v29 }
 0x779   :  { %v6913_v18 = vpop.f32.mrf.mxu0 }
 0x77a   :  { %v7065_v19 = vmax.f32 %v6919_v47, 0.0  ;;  %v6914_v43 = vadd.f32 %v15184_v29, %v6913_v18 }
 0x77c   :  { %7129 = vst.msk [vmem:[%s15543_s8 + $0x158] sm:$0xff] %vm2194_vm1, %v7065_v19  ;;  %v7064_v41 = vmax.f32 %v6914_v43, 0.0 }
 0x77e   :  { %7128 = vst.msk [vmem:[%s15543_s8 + $0x150] sm:$0xff] %vm2194_vm1, %v7064_v41 }
 0x77f   :  { %v7876_v33 = vpop.f32.mrf.mxu0 }
 0x780   :  { %v6929_v31 = vadd.f32 %v7876_v33, %v15184_v29 }
 0x781   :  { %v6923_v54 = vpop.f32.mrf.mxu0 }
 0x782   :  { %v7067_v12 = vmax.f32 %v6929_v31, 0.0  ;;  %v6924_v7 = vadd.f32 %v15184_v29, %v6923_v54 }
 0x784   :  { %7131 = vst.msk [vmem:[%s15543_s8 + $0x168] sm:$0xff] %vm2194_vm1, %v7067_v12  ;;  %v7066_v8 = vmax.f32 %v6924_v7, 0.0 }
 0x786   :  { %7130 = vst.msk [vmem:[%s15543_s8 + $0x160] sm:$0xff] %vm2194_vm1, %v7066_v8 }
 0x787   :  { %v7879_v38 = vpop.f32.mrf.mxu0 }
 0x788   :  { %v6939_v14 = vadd.f32 %v7879_v38, %v15184_v29 }
 0x789   :  { %v6933_v16 = vpop.f32.mrf.mxu0 }
 0x78a   :  { %v7069_v49 = vmax.f32 %v6939_v14, 0.0  ;;  %v6934_v10 = vadd.f32 %v15184_v29, %v6933_v16 }
 0x78c   :  { %7133 = vst.msk [vmem:[%s15543_s8 + $0x178] sm:$0xff] %vm2194_vm1, %v7069_v49  ;;  %v7068_v5 = vmax.f32 %v6934_v10, 0.0 }
 0x78e   :  { %7132 = vst.msk [vmem:[%s15543_s8 + $0x170] sm:$0xff] %vm2194_vm1, %v7068_v5 }
 0x78f   :  { %v7882_v40 = vpop.f32.mrf.mxu0 }
 0x790   :  { %v6949_v0 = vadd.f32 %v7882_v40, %v15184_v29 }
 0x791   :  { %v6943_v20 = vpop.f32.mrf.mxu0 }
 0x792   :  { %v7071_v57 = vmax.f32 %v6949_v0, 0.0  ;;  %v6944_v50 = vadd.f32 %v15184_v29, %v6943_v20 }
 0x794   :  { %7135 = vst.msk [vmem:[%s15543_s8 + $0x188] sm:$0xff] %vm2194_vm1, %v7071_v57  ;;  %v7070_v13 = vmax.f32 %v6944_v50, 0.0 }
 0x796   :  { %7134 = vst.msk [vmem:[%s15543_s8 + $0x180] sm:$0xff] %vm2194_vm1, %v7070_v13 }
 0x797   :  { %v7885_v45 = vpop.f32.mrf.mxu0 }
 0x798   :  { %v6959_v62 = vadd.f32 %v7885_v45, %v15184_v29 }
 0x799   :  { %v6953_v28 = vpop.f32.mrf.mxu0 }
 0x79a   :  { %v7073_v56 = vmax.f32 %v6959_v62, 0.0  ;;  %v6954_v46 = vadd.f32 %v15184_v29, %v6953_v28 }
 0x79c   :  { %7137 = vst.msk [vmem:[%s15543_s8 + $0x198] sm:$0xff] %vm2194_vm1, %v7073_v56  ;;  %v7072_v58 = vmax.f32 %v6954_v46, 0.0 }
 0x79e   :  { %7136 = vst.msk [vmem:[%s15543_s8 + $0x190] sm:$0xff] %vm2194_vm1, %v7072_v58 }
 0x79f   :  { %v7888_v22 = vpop.f32.mrf.mxu0 }
 0x7a0   :  { %v6969_v60 = vadd.f32 %v7888_v22, %v15184_v29 }
 0x7a1   :  { %v6963_v21 = vpop.f32.mrf.mxu0 }
 0x7a2   :  { %v7075_v26 = vmax.f32 %v6969_v60, 0.0  ;;  %v6964_v52 = vadd.f32 %v15184_v29, %v6963_v21 }
 0x7a4   :  { %7139 = vst.msk [vmem:[%s15543_s8 + $0x1a8] sm:$0xff] %vm2194_vm1, %v7075_v26  ;;  %v7074_v25 = vmax.f32 %v6964_v52, 0.0 }
 0x7a6   :  { %7138 = vst.msk [vmem:[%s15543_s8 + $0x1a0] sm:$0xff] %vm2194_vm1, %v7074_v25 }
 0x7a7   :  { %v7891_v17 = vpop.f32.mrf.mxu0 }
 0x7a8   :  { %v6979_v2 = vadd.f32 %v7891_v17, %v15184_v29 }
 0x7a9   :  { %v6973_v39 = vpop.f32.mrf.mxu0 }
 0x7aa   :  { %v7077_v24 = vmax.f32 %v6979_v2, 0.0  ;;  %v6974_v27 = vadd.f32 %v15184_v29, %v6973_v39 }
 0x7ac   :  { %7141 = vst.msk [vmem:[%s15543_s8 + $0x1b8] sm:$0xff] %vm2194_vm1, %v7077_v24  ;;  %v7076_v9 = vmax.f32 %v6974_v27, 0.0 }
 0x7ae   :  { %7140 = vst.msk [vmem:[%s15543_s8 + $0x1b0] sm:$0xff] %vm2194_vm1, %v7076_v9 }
 0x7af   :  { %v7894_v34 = vpop.f32.mrf.mxu0 }
 0x7b0   :  { %v6989_v42 = vadd.f32 %v7894_v34, %v15184_v29 }
 0x7b1   :  { %v6983_v11 = vpop.f32.mrf.mxu0 }
 0x7b2   :  { %v7079_v35 = vmax.f32 %v6989_v42, 0.0  ;;  %v6984_v6 = vadd.f32 %v15184_v29, %v6983_v11 }
 0x7b4   :  { %7143 = vst.msk [vmem:[%s15543_s8 + $0x1c8] sm:$0xff] %vm2194_vm1, %v7079_v35  ;;  %v7078_v59 = vmax.f32 %v6984_v6, 0.0 }
 0x7b6   :  { %7142 = vst.msk [vmem:[%s15543_s8 + $0x1c0] sm:$0xff] %vm2194_vm1, %v7078_v59 }
 0x7b7   :  { %v7897_v61 = vpop.f32.mrf.mxu0 }
 0x7b8   :  { %v6999_v1 = vadd.f32 %v7897_v61, %v15184_v29 }
 0x7b9   :  { %v6993_v48 = vpop.f32.mrf.mxu0 }
 0x7ba   :  { %v7081_v53 = vmax.f32 %v6999_v1, 0.0  ;;  %v6994_v37 = vadd.f32 %v15184_v29, %v6993_v48 }
 0x7bc   :  { %7145 = vst.msk [vmem:[%s15543_s8 + $0x1d8] sm:$0xff] %vm2194_vm1, %v7081_v53  ;;  %v7080_v15 = vmax.f32 %v6994_v37, 0.0 }
 0x7be   :  { %7144 = vst.msk [vmem:[%s15543_s8 + $0x1d0] sm:$0xff] %vm2194_vm1, %v7080_v15 }
 0x7bf   :  { %v7900_v4 = vpop.f32.mrf.mxu0 }
 0x7c0   :  { %v7009_v51 = vadd.f32 %v7900_v4, %v15184_v29 }
 0x7c1   :  { %v7003_v63 = vpop.f32.mrf.mxu0 }
 0x7c2   :  { %v7083_v32 = vmax.f32 %v7009_v51, 0.0  ;;  %v7004_v44 = vadd.f32 %v15184_v29, %v7003_v63 }
 0x7c4   :  { %7147 = vst.msk [vmem:[%s15543_s8 + $0x1e8] sm:$0xff] %vm2194_vm1, %v7083_v32  ;;  %v7082_v23 = vmax.f32 %v7004_v44, 0.0 }
 0x7c6   :  { %7146 = vst.msk [vmem:[%s15543_s8 + $0x1e0] sm:$0xff] %vm2194_vm1, %v7082_v23 }
 0x7c7   :  { %v7903_v36 = vpop.f32.mrf.mxu0 }
 0x7c8   :  { %v7019_v3 = vadd.f32 %v7903_v36, %v15184_v29 }
 0x7c9   :  { %v7013_v55 = vpop.f32.mrf.mxu0 }
 0x7ca   :  { %v7085_v30 = vmax.f32 %v7019_v3, 0.0  ;;  %v7014_v47 = vadd.f32 %v15184_v29, %v7013_v55 }
 0x7cc   :  { %7149 = vst.msk [vmem:[%s15543_s8 + $0x1f8] sm:$0xff] %vm2194_vm1, %v7085_v30  ;;  %v7084_v18 = vmax.f32 %v7014_v47, 0.0 }
 0x7ce   :  { %7148 = vst.msk [vmem:[%s15543_s8 + $0x1f0] sm:$0xff] %vm2194_vm1, %v7084_v18 }

</bundles_post_ra>
